<compile_context>
chip_gen: v6e
topology: v6e:2x2x1
jax: 0.10.0
libtpu: 0.0.40
codegen_flags: <defaults>
</compile_context>

<pallas_src>
import functools
import math

import jax
import jax.numpy as jnp
from jax import lax
from jax.experimental import pallas as pl
from jax.experimental.pallas import tpu as pltpu


# --------------------------------------------------------------------------- #
# Pallas kernel 1: fused GEMM + bias  (ConvTranspose2d(k=2, s=2) as a GEMM)
#   out[m, n] = x[m, :] @ w[:, n] + b[n]
# --------------------------------------------------------------------------- #
def _gemm_bias_kernel(x_ref, w_ref, b_ref, o_ref):
    acc = jnp.dot(x_ref[...], w_ref[...], preferred_element_type=jnp.float32)
    o_ref[...] = (acc + b_ref[...]).astype(o_ref.dtype)


def _pick_tile(dim, cap, align):
    """Largest tile <= cap that divides `dim` and is a multiple of `align`;
    falls back to the full dimension (always a legal block)."""
    t = min(cap, dim)
    t -= t % align
    while t >= align:
        if dim % t == 0:
            return t
        t -= align
    return dim


def conv_transpose2x2(x, wt, bt4):
    """ConvTranspose2d(kernel=2, stride=2) with bias.

    x:   (B, h, w, Cin)  bf16
    wt:  (Cin, 4*Ct)     bf16, columns ordered (kh, kw, ct)
    bt4: (1, 4*Ct)       f32
    returns (B, 2h, 2w, Ct) bf16
    """
    B, h, w, cin = x.shape
    four_ct = wt.shape[1]
    ct = four_ct // 4
    M = B * h * w
    xm = x.reshape(M, cin)
    tm = _pick_tile(M, 256, 8)
    tn = _pick_tile(four_ct, 256, 128)   # >=2 N tiles keeps both v7x TCs busy

    y = pl.pallas_call(
        _gemm_bias_kernel,
        out_shape=jax.ShapeDtypeStruct((M, four_ct), jnp.bfloat16),
        grid_spec=pltpu.PrefetchScalarGridSpec(
            num_scalar_prefetch=0,
            grid=(M // tm, four_ct // tn),
            in_specs=[
                pl.BlockSpec((tm, cin), lambda i, j: (i, 0)),
                pl.BlockSpec((cin, tn), lambda i, j: (0, j)),
                pl.BlockSpec((1, tn), lambda i, j: (0, j)),
            ],
            out_specs=pl.BlockSpec((tm, tn), lambda i, j: (i, j)),
        ),
        compiler_params=pltpu.CompilerParams(
            dimension_semantics=("parallel", "parallel")),
    )(xm, wt, bt4)

    # 2x2 pixel-shuffle of the GEMM output into the upsampled map.
    # TODO(synk): the element-stride interleave is not expressible as a
    # BlockSpec index_map and an in-kernel sublane interleave is a lowering
    # risk; it stays as one small XLA copy fusion (merged with the concat+pad
    # in up_forward), which blocks full single-pallas_call fusion of Up.
    y = y.reshape(B, h, w, 2, 2, ct).transpose(0, 1, 3, 2, 4, 5)
    return y.reshape(B, 2 * h, 2 * w, ct)


# --------------------------------------------------------------------------- #
# Pallas kernel 2: fused DoubleConv over the (already channel-concatenated,
# spatially 1-px padded) input.  conv3x3(BN,ReLU) -> conv3x3(BN,ReLU),
# one grid step per image.
# --------------------------------------------------------------------------- #
def _double_conv_kernel(x_ref, w1_ref, s1_ref, b1_ref, w2_ref, s2_ref, b2_ref,
                        o_ref, mid_ref, *, H, W):
    """x_ref  : (1, H+2, W+2, Cin1) bf16  padded concat([x2, up(x1)])
       w1_ref : (9, Cin1, Cmid)     bf16  first conv (concat folded into K)
       w2_ref : (9, Cmid, Cout)     bf16
       s*/b*  : (1, C)              f32   folded eval-mode BatchNorm
       o_ref  : (1, H, W, Cout)     bf16
       mid_ref: (H+2, W+2, Cmid)    bf16  VMEM-only intermediate w/ zero halo
    """
    cmid = mid_ref.shape[-1]

    # ---- conv1: 9 taps, one full-depth K = Ca+Cb dot per tap ---------------
    acc1 = None
    for dj in range(3):
        x_j = x_ref[0, :, dj:dj + W, :]            # one shifted load per dj
        for di in range(3):
            xw = x_j[di:di + H].reshape(H * W, -1)
            p = jnp.dot(xw, w1_ref[di * 3 + dj],
                        preferred_element_type=jnp.float32)
            acc1 = p if acc1 is None else acc1 + p
    h1 = jnp.maximum(acc1 * s1_ref[...] + b1_ref[...], 0.0)

    # Intermediate activation stays in VMEM (bf16).  Zero only the 1-px halo
    # ring — and do it EVERY grid step: the scratch is per-TensorCore on v7x,
    # so a program_id()==0 one-time init would be unsafe.
    zrow = jnp.zeros((1, W + 2, cmid), jnp.bfloat16)
    zcol = jnp.zeros((H, 1, cmid), jnp.bfloat16)
    mid_ref[pl.ds(0, 1), :, :] = zrow
    mid_ref[pl.ds(H + 1, 1), :, :] = zrow
    mid_ref[pl.ds(1, H), pl.ds(0, 1), :] = zcol
    mid_ref[pl.ds(1, H), pl.ds(W + 1, 1), :] = zcol
    mid_ref[pl.ds(1, H), pl.ds(1, W), :] = (
        h1.reshape(H, W, cmid).astype(jnp.bfloat16))

    # ---- conv2: 9 taps over the bf16 intermediate ---------------------------
    acc2 = None
    for dj in range(3):
        m_j = mid_ref[:, dj:dj + W, :]
        for di in range(3):
            wm = m_j[di:di + H].reshape(H * W, cmid)
            p = jnp.dot(wm, w2_ref[di * 3 + dj],
                        preferred_element_type=jnp.float32)
            acc2 = p if acc2 is None else acc2 + p
    y = jnp.maximum(acc2 * s2_ref[...] + b2_ref[...], 0.0)
    o_ref[...] = y.reshape(1, H, W, -1).astype(o_ref.dtype)


def double_conv(xcat_pad, kp):
    """DoubleConv over a pre-concatenated, 1-px padded NHWC input."""
    B, Hp2, Wp2, Cin1 = xcat_pad.shape
    H, W = Hp2 - 2, Wp2 - 2
    Cmid = kp["w2"].shape[1]
    Cout = kp["w2"].shape[2]

    kernel = functools.partial(_double_conv_kernel, H=H, W=W)
    # TODO(synk): if B == 1 on v7x, add a second parallel grid axis (H-band
    # split with halo) so both TensorCores get work; B >= 2 already does.
    # TODO(synk): at larger U-Net stages (H, W >= 128) the un-tiled per-image
    # block needs an H-band split / vmem_limit_bytes; here the block + bf16
    # scratch is ~1 MB, far under every chip's default scoped VMEM limit.
    return pl.pallas_call(
        kernel,
        out_shape=jax.ShapeDtypeStruct((B, H, W, Cout), jnp.bfloat16),
        grid_spec=pltpu.PrefetchScalarGridSpec(
            num_scalar_prefetch=0,
            grid=(B,),                    # one step per image; batch parallel
            in_specs=[
                pl.BlockSpec((1, H + 2, W + 2, Cin1), lambda n: (n, 0, 0, 0)),
                pl.BlockSpec((9, Cin1, Cmid), lambda n: (0, 0, 0)),
                pl.BlockSpec((1, Cmid), lambda n: (0, 0)),
                pl.BlockSpec((1, Cmid), lambda n: (0, 0)),
                pl.BlockSpec((9, Cmid, Cout), lambda n: (0, 0, 0)),
                pl.BlockSpec((1, Cout), lambda n: (0, 0)),
                pl.BlockSpec((1, Cout), lambda n: (0, 0)),
            ],
            out_specs=pl.BlockSpec((1, H, W, Cout), lambda n: (n, 0, 0, 0)),
            scratch_shapes=[
                pltpu.VMEM((H + 2, W + 2, Cmid), jnp.bfloat16),
            ],
        ),
        compiler_params=pltpu.CompilerParams(
            dimension_semantics=("parallel",)),
    )(xcat_pad, kp["w1"], kp["s1"], kp["b1"], kp["w2"], kp["s2"], kp["b2"])


# --------------------------------------------------------------------------- #
# Deterministic parameter construction (synthetic weights, eval-mode BN fold)
# --------------------------------------------------------------------------- #
def _fold_bn(key, c):
    """Eval-mode BatchNorm folded into per-channel scale/bias (f32)."""
    k1, k2, k3, k4 = jax.random.split(key, 4)
    gamma = 1.0 + 0.1 * jax.random.normal(k1, (c,), jnp.float32)
    beta = 0.1 * jax.random.normal(k2, (c,), jnp.float32)
    mean = 0.1 * jax.random.normal(k3, (c,), jnp.float32)
    var = 1.0 + 0.1 * jnp.abs(jax.random.normal(k4, (c,), jnp.float32))
    scale = gamma / jnp.sqrt(var + 1e-5)
    bias = beta - mean * scale
    return scale.reshape(1, c), bias.reshape(1, c)


def init_up_params(in_channels, out_channels, key):
    """Synthetic weights mirroring `Up(in_channels, out_channels)`.
    Kernel-side weights are built ONCE in their final layout (bf16 GEMM
    operands, f32 folded-BN scale/bias)."""
    # TODO(synk): pretrained decoder weights are not available here;
    # deterministic random weights with matching shapes are used instead.
    if in_channels // out_channels == 4:
        ct = in_channels // 4           # ConvTranspose2d out channels
        dc_in = in_channels // 2        # DoubleConv input channels
    else:
        ct = in_channels // 2
        dc_in = in_channels
    c_skip = dc_in - ct                 # channels of the skip tensor x2
    cmid = out_channels                 # DoubleConv mid == out

    k = jax.random.split(key, 6)
    std_t = math.sqrt(1.0 / (4 * in_channels))
    wt4 = std_t * jax.random.normal(k[0], (in_channels, 2, 2, ct), jnp.float32)
    bt = 0.05 * jax.random.normal(k[1], (ct,), jnp.float32)

    std1 = math.sqrt(2.0 / (9 * dc_in))
    w1 = std1 * jax.random.normal(k[2], (3, 3, dc_in, cmid), jnp.float32)
    s1, b1 = _fold_bn(k[3], cmid)

    std2 = math.sqrt(2.0 / (9 * cmid))
    w2 = std2 * jax.random.normal(k[4], (3, 3, cmid, out_channels), jnp.float32)
    s2, b2 = _fold_bn(k[5], out_channels)

    kparams = {
        "wt": wt4.reshape(in_channels, 4 * ct).astype(jnp.bfloat16),
        "bt4": jnp.tile(bt, 4).reshape(1, 4 * ct),
        # first conv of DoubleConv: concat ([x2, up(x1)]) folded into a single
        # full-depth K contraction -> one merged (9, dc_in, cmid) weight.
        "w1": w1.reshape(9, dc_in, cmid).astype(jnp.bfloat16),
        "s1": s1, "b1": b1,
        "w2": w2.reshape(9, cmid, out_channels).astype(jnp.bfloat16),
        "s2": s2, "b2": b2,
    }
    refparams = {"wt": wt4, "bt": bt, "w1": w1, "w2": w2, "c_skip": c_skip}
    return kparams, refparams


# --------------------------------------------------------------------------- #
# Up.forward  (NCHW boundary, NHWC inside)
# --------------------------------------------------------------------------- #
@jax.jit
def up_forward(kp, x1_nchw, x2_nchw):
    x1 = jnp.transpose(x1_nchw, (0, 2, 3, 1)).astype(jnp.bfloat16)
    x2 = jnp.transpose(x2_nchw, (0, 2, 3, 1)).astype(jnp.bfloat16)
    xu = conv_transpose2x2(x1, kp["wt"], kp["bt4"])
    # Channel-concat + 1-px halo pad in a single XLA copy fusion; the result
    # feeds conv1 as ONE full-depth K = Ca+Ct contraction (K=256 on the MXU).
    xcat = jnp.pad(jnp.concatenate([x2, xu], axis=-1),
                   ((0, 0), (1, 1), (1, 1), (0, 0)))
    y = double_conv(xcat, kp)            # bf16 (B, H, W, Cout)
    return jnp.transpose(y, (0, 3, 1, 2)).astype(jnp.float32)


def up_reference(rp, kp, x1_nchw, x2_nchw):
    """Pure-JAX f32 reference (XLA convs) for numerical validation."""
    x1 = jnp.transpose(x1_nchw, (0, 2, 3, 1))
    x2 = jnp.transpose(x2_nchw, (0, 2, 3, 1))
    n, hh, ww, _ = x1.shape
    ct = rp["wt"].shape[-1]
    y = jnp.einsum("nhwc,cklt->nhkwlt", x1, rp["wt"]).reshape(
        n, 2 * hh, 2 * ww, ct) + rp["bt"]
    xcat = jnp.concatenate([x2, y], axis=-1)

    def cbr(x, wgt, s, b):
        z = lax.conv_general_dilated(
            x, wgt, window_strides=(1, 1), padding="SAME",
            dimension_numbers=("NHWC", "HWIO", "NHWC"))
        return jnp.maximum(z * s + b, 0.0)

    out = cbr(cbr(xcat, rp["w1"], kp["s1"], kp["b1"]),
              rp["w2"], kp["s2"], kp["b2"])
    return jnp.transpose(out, (0, 3, 1, 2))


# --------------------------------------------------------------------------- #
if __name__ == "__main__":
    # Up(in_channels=256, out_channels=128):
    #   conv0 = ConvTranspose2d(256, 128, kernel_size=2, stride=2)
    #   conv1 = DoubleConv(256, 128)      (skip x2 carries 128 channels)
    in_channels, out_channels = 256, 128
    B, h, w = 2, 8, 8

    root = jax.random.PRNGKey(0)
    k_x1, k_x2, k_p = jax.random.split(root, 3)
    kparams, refparams = init_up_params(in_channels, out_channels, k_p)
    c_skip = refparams["c_skip"]

    x1 = jax.random.normal(k_x1, (B, in_channels, h, w), jnp.float32)
    x2 = jax.random.normal(k_x2, (B, c_skip, 2 * h, 2 * w), jnp.float32)

    out = up_forward(kparams, x1, x2)
    out = jax.block_until_ready(out)

    assert out.shape == (B, out_channels, 2 * h, 2 * w), out.shape
    assert bool(jnp.all(jnp.isfinite(out)))

    ref = up_reference(refparams, kparams, x1, x2)
    err = float(jnp.max(jnp.abs(out - ref)) / (jnp.max(jnp.abs(ref)) + 1e-6))
    assert err < 5e-2, f"max rel err {err}"
    print("KERNEL_OK")
</pallas_src>

<mosaic_0001>
module attributes {stable_mosaic.version = 11 : i64} {
  func.func @_gemm_bias_kernel(%arg0: i32, %arg1: i32, %arg2: memref<128x256xbf16, #tpu.memory_space<vmem>>, %arg3: memref<256x256xbf16, #tpu.memory_space<vmem>>, %arg4: memref<1x256xf32, #tpu.memory_space<vmem>>, %arg5: memref<128x256xbf16, #tpu.memory_space<vmem>>) attributes {dimension_semantics = [#tpu.dimension_semantics<parallel>, #tpu.dimension_semantics<parallel>], iteration_bounds = array<i64: 1, 2>, scalar_prefetch = 0 : i64, scratch_operands = 0 : i64, tpu.core_type = #tpu.core_type<tc>, window_params = [{transform_indices = @transform_0, window_bounds = array<i64: 128, 256>}, {transform_indices = @transform_1, window_bounds = array<i64: 256, 256>}, {transform_indices = @transform_2, window_bounds = array<i64: 1, 256>}, {transform_indices = @transform_3, window_bounds = array<i64: 128, 256>}]} {
    %c0 = arith.constant 0 : index
    %c0_0 = arith.constant 0 : index
    %0 = vector.load %arg2[%c0, %c0_0] : memref<128x256xbf16, #tpu.memory_space<vmem>>, vector<128x256xbf16>
    %c0_1 = arith.constant 0 : index
    %c0_2 = arith.constant 0 : index
    %1 = vector.load %arg3[%c0_1, %c0_2] : memref<256x256xbf16, #tpu.memory_space<vmem>>, vector<256x256xbf16>
    %cst = arith.constant dense<0.000000e+00> : vector<128x256xf32>
    %2 = tpu.matmul %0, %1, %cst {dimension_numbers = #tpu.dot_dimension_numbers<[1], [0], [0], [1], [0, 0, 1, 1], [], []>} : vector<128x256xbf16>, vector<256x256xbf16>, vector<128x256xf32> -> vector<128x256xf32>
    %c0_3 = arith.constant 0 : index
    %c0_4 = arith.constant 0 : index
    %3 = vector.load %arg4[%c0_3, %c0_4] : memref<1x256xf32, #tpu.memory_space<vmem>>, vector<1x256xf32>
    %4 = vector.broadcast %3 : vector<1x256xf32> to vector<128x256xf32>
    %5 = arith.addf %2, %4 : vector<128x256xf32>
    %6 = arith.truncf %5 : vector<128x256xf32> to vector<128x256xbf16>
    %c0_5 = arith.constant 0 : index
    %c0_6 = arith.constant 0 : index
    %7 = vector.load %arg5[%c0_5, %c0_6] : memref<128x256xbf16, #tpu.memory_space<vmem>>, vector<128x256xbf16>
    tpu.vector_store %arg5[%c0_5, %c0_6], %6 {strides = array<i32>} : memref<128x256xbf16, #tpu.memory_space<vmem>>, vector<128x256xbf16>,
    return
  }
  func.func @transform_0(%arg0: i32, %arg1: i32) -> (i32, i32) {
    %c0_i32 = arith.constant 0 : i32
    %c0_i32_0 = arith.constant 0 : i32
    return %arg0, %c0_i32 : i32, i32
  }
  func.func @transform_1(%arg0: i32, %arg1: i32) -> (i32, i32) {
    %c0_i32 = arith.constant 0 : i32
    %c0_i32_0 = arith.constant 0 : i32
    return %c0_i32, %arg1 : i32, i32
  }
  func.func @transform_2(%arg0: i32, %arg1: i32) -> (i32, i32) {
    %c0_i32 = arith.constant 0 : i32
    %c0_i32_0 = arith.constant 0 : i32
    return %c0_i32, %arg1 : i32, i32
  }
  func.func @transform_3(%arg0: i32, %arg1: i32) -> (i32, i32) {
    %c0_i32 = arith.constant 0 : i32
    return %arg0, %arg1 : i32, i32
  }
}

module attributes {stable_mosaic.version = 11 : i64} {
  func.func @_double_conv_kernel(%arg0: i32, %arg1: memref<1x18x18x256xbf16, #tpu.memory_space<vmem>>, %arg2: memref<9x256x128xbf16, #tpu.memory_space<vmem>>, %arg3: memref<1x128xf32, #tpu.memory_space<vmem>>, %arg4: memref<1x128xf32, #tpu.memory_space<vmem>>, %arg5: memref<9x128x128xbf16, #tpu.memory_space<vmem>>, %arg6: memref<1x128xf32, #tpu.memory_space<vmem>>, %arg7: memref<1x128xf32, #tpu.memory_space<vmem>>, %arg8: memref<1x16x16x128xbf16, #tpu.memory_space<vmem>>, %arg9: memref<18x18x128xbf16, #tpu.memory_space<vmem>>) attributes {dimension_semantics = [#tpu.dimension_semantics<parallel>], iteration_bounds = array<i64: 2>, scalar_prefetch = 0 : i64, scratch_operands = 1 : i64, tpu.core_type = #tpu.core_type<tc>, window_params = [{transform_indices = @transform_0, window_bounds = array<i64: 1, 18, 18, 256>}, {pipeline_mode = #tpu.pipeline_mode<synchronous>, transform_indices = @transform_1, window_bounds = array<i64: 9, 256, 128>}, {pipeline_mode = #tpu.pipeline_mode<synchronous>, transform_indices = @transform_2, window_bounds = array<i64: 1, 128>}, {pipeline_mode = #tpu.pipeline_mode<synchronous>, transform_indices = @transform_3, window_bounds = array<i64: 1, 128>}, {pipeline_mode = #tpu.pipeline_mode<synchronous>, transform_indices = @transform_4, window_bounds = array<i64: 9, 128, 128>}, {pipeline_mode = #tpu.pipeline_mode<synchronous>, transform_indices = @transform_5, window_bounds = array<i64: 1, 128>}, {pipeline_mode = #tpu.pipeline_mode<synchronous>, transform_indices = @transform_6, window_bounds = array<i64: 1, 128>}, {transform_indices = @transform_7, window_bounds = array<i64: 1, 16, 16, 128>}]} {
    %c0 = arith.constant 0 : index
    %c0_0 = arith.constant 0 : index
    %c0_1 = arith.constant 0 : index
    %c0_2 = arith.constant 0 : index
    %0 = vector.load %arg1[%c0, %c0_0, %c0_1, %c0_2] : memref<1x18x18x256xbf16, #tpu.memory_space<vmem>>, vector<1x18x16x256xbf16>
    %1 = vector.shape_cast %0 : vector<1x18x16x256xbf16> to vector<18x16x256xbf16>
    %2 = vector.extract_strided_slice %1 {offsets = [0, 0, 0], sizes = [16, 16, 256], strides = [1, 1, 1]} : vector<18x16x256xbf16> to vector<16x16x256xbf16>
    %3 = vector.shape_cast %2 : vector<16x16x256xbf16> to vector<256x256xbf16>
    %c0_3 = arith.constant 0 : index
    %c0_4 = arith.constant 0 : index
    %c0_5 = arith.constant 0 : index
    %4 = vector.load %arg2[%c0_3, %c0_4, %c0_5] : memref<9x256x128xbf16, #tpu.memory_space<vmem>>, vector<1x256x128xbf16>
    %5 = vector.shape_cast %4 : vector<1x256x128xbf16> to vector<256x128xbf16>
    %cst = arith.constant dense<0.000000e+00> : vector<256x128xf32>
    %6 = tpu.matmul %3, %5, %cst {dimension_numbers = #tpu.dot_dimension_numbers<[1], [0], [0], [1], [0, 0, 1, 1], [], []>} : vector<256x256xbf16>, vector<256x128xbf16>, vector<256x128xf32> -> vector<256x128xf32>
    %7 = vector.extract_strided_slice %1 {offsets = [1, 0, 0], sizes = [16, 16, 256], strides = [1, 1, 1]} : vector<18x16x256xbf16> to vector<16x16x256xbf16>
    %8 = vector.shape_cast %7 : vector<16x16x256xbf16> to vector<256x256xbf16>
    %c3 = arith.constant 3 : index
    %c0_6 = arith.constant 0 : index
    %c0_7 = arith.constant 0 : index
    %9 = vector.load %arg2[%c3, %c0_6, %c0_7] : memref<9x256x128xbf16, #tpu.memory_space<vmem>>, vector<1x256x128xbf16>
    %10 = vector.shape_cast %9 : vector<1x256x128xbf16> to vector<256x128xbf16>
    %cst_8 = arith.constant dense<0.000000e+00> : vector<256x128xf32>
    %11 = tpu.matmul %8, %10, %cst_8 {dimension_numbers = #tpu.dot_dimension_numbers<[1], [0], [0], [1], [0, 0, 1, 1], [], []>} : vector<256x256xbf16>, vector<256x128xbf16>, vector<256x128xf32> -> vector<256x128xf32>
    %12 = arith.addf %6, %11 : vector<256x128xf32>
    %13 = vector.extract_strided_slice %1 {offsets = [2, 0, 0], sizes = [16, 16, 256], strides = [1, 1, 1]} : vector<18x16x256xbf16> to vector<16x16x256xbf16>
    %14 = vector.shape_cast %13 : vector<16x16x256xbf16> to vector<256x256xbf16>
    %c6 = arith.constant 6 : index
    %c0_9 = arith.constant 0 : index
    %c0_10 = arith.constant 0 : index
    %15 = vector.load %arg2[%c6, %c0_9, %c0_10] : memref<9x256x128xbf16, #tpu.memory_space<vmem>>, vector<1x256x128xbf16>
    %16 = vector.shape_cast %15 : vector<1x256x128xbf16> to vector<256x128xbf16>
    %cst_11 = arith.constant dense<0.000000e+00> : vector<256x128xf32>
    %17 = tpu.matmul %14, %16, %cst_11 {dimension_numbers = #tpu.dot_dimension_numbers<[1], [0], [0], [1], [0, 0, 1, 1], [], []>} : vector<256x256xbf16>, vector<256x128xbf16>, vector<256x128xf32> -> vector<256x128xf32>
    %18 = arith.addf %12, %17 : vector<256x128xf32>
    %c0_12 = arith.constant 0 : index
    %c0_13 = arith.constant 0 : index
    %c1 = arith.constant 1 : index
    %c0_14 = arith.constant 0 : index
    %19 = vector.load %arg1[%c0_12, %c0_13, %c1, %c0_14] : memref<1x18x18x256xbf16, #tpu.memory_space<vmem>>, vector<1x18x16x256xbf16>
    %20 = vector.shape_cast %19 : vector<1x18x16x256xbf16> to vector<18x16x256xbf16>
    %21 = vector.extract_strided_slice %20 {offsets = [0, 0, 0], sizes = [16, 16, 256], strides = [1, 1, 1]} : vector<18x16x256xbf16> to vector<16x16x256xbf16>
    %22 = vector.shape_cast %21 : vector<16x16x256xbf16> to vector<256x256xbf16>
    %c1_15 = arith.constant 1 : index
    %c0_16 = arith.constant 0 : index
    %c0_17 = arith.constant 0 : index
    %23 = vector.load %arg2[%c1_15, %c0_16, %c0_17] : memref<9x256x128xbf16, #tpu.memory_space<vmem>>, vector<1x256x128xbf16>
    %24 = vector.shape_cast %23 : vector<1x256x128xbf16> to vector<256x128xbf16>
    %cst_18 = arith.constant dense<0.000000e+00> : vector<256x128xf32>
    %25 = tpu.matmul %22, %24, %cst_18 {dimension_numbers = #tpu.dot_dimension_numbers<[1], [0], [0], [1], [0, 0, 1, 1], [], []>} : vector<256x256xbf16>, vector<256x128xbf16>, vector<256x128xf32> -> vector<256x128xf32>
    %26 = arith.addf %18, %25 : vector<256x128xf32>
    %27 = vector.extract_strided_slice %20 {offsets = [1, 0, 0], sizes = [16, 16, 256], strides = [1, 1, 1]} : vector<18x16x256xbf16> to vector<16x16x256xbf16>
    %28 = vector.shape_cast %27 : vector<16x16x256xbf16> to vector<256x256xbf16>
    %c4 = arith.constant 4 : index
    %c0_19 = arith.constant 0 : index
    %c0_20 = arith.constant 0 : index
    %29 = vector.load %arg2[%c4, %c0_19, %c0_20] : memref<9x256x128xbf16, #tpu.memory_space<vmem>>, vector<1x256x128xbf16>
    %30 = vector.shape_cast %29 : vector<1x256x128xbf16> to vector<256x128xbf16>
    %cst_21 = arith.constant dense<0.000000e+00> : vector<256x128xf32>
    %31 = tpu.matmul %28, %30, %cst_21 {dimension_numbers = #tpu.dot_dimension_numbers<[1], [0], [0], [1], [0, 0, 1, 1], [], []>} : vector<256x256xbf16>, vector<256x128xbf16>, vector<256x128xf32> -> vector<256x128xf32>
    %32 = arith.addf %26, %31 : vector<256x128xf32>
    %33 = vector.extract_strided_slice %20 {offsets = [2, 0, 0], sizes = [16, 16, 256], strides = [1, 1, 1]} : vector<18x16x256xbf16> to vector<16x16x256xbf16>
    %34 = vector.shape_cast %33 : vector<16x16x256xbf16> to vector<256x256xbf16>
    %c7 = arith.constant 7 : index
    %c0_22 = arith.constant 0 : index
    %c0_23 = arith.constant 0 : index
    %35 = vector.load %arg2[%c7, %c0_22, %c0_23] : memref<9x256x128xbf16, #tpu.memory_space<vmem>>, vector<1x256x128xbf16>
    %36 = vector.shape_cast %35 : vector<1x256x128xbf16> to vector<256x128xbf16>
    %cst_24 = arith.constant dense<0.000000e+00> : vector<256x128xf32>
    %37 = tpu.matmul %34, %36, %cst_24 {dimension_numbers = #tpu.dot_dimension_numbers<[1], [0], [0], [1], [0, 0, 1, 1], [], []>} : vector<256x256xbf16>, vector<256x128xbf16>, vector<256x128xf32> -> vector<256x128xf32>
    %38 = arith.addf %32, %37 : vector<256x128xf32>
    %c0_25 = arith.constant 0 : index
    %c0_26 = arith.constant 0 : index
    %c2 = arith.constant 2 : index
    %c0_27 = arith.constant 0 : index
    %39 = vector.load %arg1[%c0_25, %c0_26, %c2, %c0_27] : memref<1x18x18x256xbf16, #tpu.memory_space<vmem>>, vector<1x18x16x256xbf16>
    %40 = vector.shape_cast %39 : vector<1x18x16x256xbf16> to vector<18x16x256xbf16>
    %41 = vector.extract_strided_slice %40 {offsets = [0, 0, 0], sizes = [16, 16, 256], strides = [1, 1, 1]} : vector<18x16x256xbf16> to vector<16x16x256xbf16>
    %42 = vector.shape_cast %41 : vector<16x16x256xbf16> to vector<256x256xbf16>
    %c2_28 = arith.constant 2 : index
    %c0_29 = arith.constant 0 : index
    %c0_30 = arith.constant 0 : index
    %43 = vector.load %arg2[%c2_28, %c0_29, %c0_30] : memref<9x256x128xbf16, #tpu.memory_space<vmem>>, vector<1x256x128xbf16>
    %44 = vector.shape_cast %43 : vector<1x256x128xbf16> to vector<256x128xbf16>
    %cst_31 = arith.constant dense<0.000000e+00> : vector<256x128xf32>
    %45 = tpu.matmul %42, %44, %cst_31 {dimension_numbers = #tpu.dot_dimension_numbers<[1], [0], [0], [1], [0, 0, 1, 1], [], []>} : vector<256x256xbf16>, vector<256x128xbf16>, vector<256x128xf32> -> vector<256x128xf32>
    %46 = arith.addf %38, %45 : vector<256x128xf32>
    %47 = vector.extract_strided_slice %40 {offsets = [1, 0, 0], sizes = [16, 16, 256], strides = [1, 1, 1]} : vector<18x16x256xbf16> to vector<16x16x256xbf16>
    %48 = vector.shape_cast %47 : vector<16x16x256xbf16> to vector<256x256xbf16>
    %c5 = arith.constant 5 : index
    %c0_32 = arith.constant 0 : index
    %c0_33 = arith.constant 0 : index
    %49 = vector.load %arg2[%c5, %c0_32, %c0_33] : memref<9x256x128xbf16, #tpu.memory_space<vmem>>, vector<1x256x128xbf16>
    %50 = vector.shape_cast %49 : vector<1x256x128xbf16> to vector<256x128xbf16>
    %cst_34 = arith.constant dense<0.000000e+00> : vector<256x128xf32>
    %51 = tpu.matmul %48, %50, %cst_34 {dimension_numbers = #tpu.dot_dimension_numbers<[1], [0], [0], [1], [0, 0, 1, 1], [], []>} : vector<256x256xbf16>, vector<256x128xbf16>, vector<256x128xf32> -> vector<256x128xf32>
    %52 = arith.addf %46, %51 : vector<256x128xf32>
    %53 = vector.extract_strided_slice %40 {offsets = [2, 0, 0], sizes = [16, 16, 256], strides = [1, 1, 1]} : vector<18x16x256xbf16> to vector<16x16x256xbf16>
    %54 = vector.shape_cast %53 : vector<16x16x256xbf16> to vector<256x256xbf16>
    %c8 = arith.constant 8 : index
    %c0_35 = arith.constant 0 : index
    %c0_36 = arith.constant 0 : index
    %55 = vector.load %arg2[%c8, %c0_35, %c0_36] : memref<9x256x128xbf16, #tpu.memory_space<vmem>>, vector<1x256x128xbf16>
    %56 = vector.shape_cast %55 : vector<1x256x128xbf16> to vector<256x128xbf16>
    %cst_37 = arith.constant dense<0.000000e+00> : vector<256x128xf32>
    %57 = tpu.matmul %54, %56, %cst_37 {dimension_numbers = #tpu.dot_dimension_numbers<[1], [0], [0], [1], [0, 0, 1, 1], [], []>} : vector<256x256xbf16>, vector<256x128xbf16>, vector<256x128xf32> -> vector<256x128xf32>
    %58 = arith.addf %52, %57 : vector<256x128xf32>
    %c0_38 = arith.constant 0 : index
    %c0_39 = arith.constant 0 : index
    %59 = vector.load %arg3[%c0_38, %c0_39] : memref<1x128xf32, #tpu.memory_space<vmem>>, vector<1x128xf32>
    %60 = vector.broadcast %59 : vector<1x128xf32> to vector<256x128xf32>
    %61 = arith.mulf %58, %60 : vector<256x128xf32>
    %c0_40 = arith.constant 0 : index
    %c0_41 = arith.constant 0 : index
    %62 = vector.load %arg4[%c0_40, %c0_41] : memref<1x128xf32, #tpu.memory_space<vmem>>, vector<1x128xf32>
    %63 = vector.broadcast %62 : vector<1x128xf32> to vector<256x128xf32>
    %64 = arith.addf %61, %63 : vector<256x128xf32>
    %cst_42 = arith.constant 0.000000e+00 : f32
    %65 = vector.broadcast %cst_42 : f32 to vector<256x128xf32>
    %66 = arith.maximumf %64, %65 : vector<256x128xf32>
    %cst_43 = arith.constant 0.000000e+00 : bf16
    %67 = vector.broadcast %cst_43 : bf16 to vector<1x18x128xbf16>
    %cst_44 = arith.constant 0.000000e+00 : bf16
    %68 = vector.broadcast %cst_44 : bf16 to vector<16x1x128xbf16>
    %c0_45 = arith.constant 0 : index
    %c0_46 = arith.constant 0 : index
    %c0_47 = arith.constant 0 : index
    %69 = vector.load %arg9[%c0_45, %c0_46, %c0_47] : memref<18x18x128xbf16, #tpu.memory_space<vmem>>, vector<1x18x128xbf16>
    tpu.vector_store %arg9[%c0_45, %c0_46, %c0_47], %67 {strides = array<i32>} : memref<18x18x128xbf16, #tpu.memory_space<vmem>>, vector<1x18x128xbf16>,
    %c17 = arith.constant 17 : index
    %c0_48 = arith.constant 0 : index
    %c0_49 = arith.constant 0 : index
    %70 = vector.load %arg9[%c17, %c0_48, %c0_49] : memref<18x18x128xbf16, #tpu.memory_space<vmem>>, vector<1x18x128xbf16>
    tpu.vector_store %arg9[%c17, %c0_48, %c0_49], %67 {strides = array<i32>} : memref<18x18x128xbf16, #tpu.memory_space<vmem>>, vector<1x18x128xbf16>,
    %c1_50 = arith.constant 1 : index
    %c0_51 = arith.constant 0 : index
    %c0_52 = arith.constant 0 : index
    %71 = vector.load %arg9[%c1_50, %c0_51, %c0_52] : memref<18x18x128xbf16, #tpu.memory_space<vmem>>, vector<16x1x128xbf16>
    tpu.vector_store %arg9[%c1_50, %c0_51, %c0_52], %68 {strides = array<i32>} : memref<18x18x128xbf16, #tpu.memory_space<vmem>>, vector<16x1x128xbf16>,
    %c1_53 = arith.constant 1 : index
    %c17_54 = arith.constant 17 : index
    %c0_55 = arith.constant 0 : index
    %72 = vector.load %arg9[%c1_53, %c17_54, %c0_55] : memref<18x18x128xbf16, #tpu.memory_space<vmem>>, vector<16x1x128xbf16>
    tpu.vector_store %arg9[%c1_53, %c17_54, %c0_55], %68 {strides = array<i32>} : memref<18x18x128xbf16, #tpu.memory_space<vmem>>, vector<16x1x128xbf16>,
    %73 = vector.shape_cast %66 : vector<256x128xf32> to vector<16x16x128xf32>
    %74 = arith.truncf %73 : vector<16x16x128xf32> to vector<16x16x128xbf16>
    %c1_56 = arith.constant 1 : index
    %c1_57 = arith.constant 1 : index
    %c0_58 = arith.constant 0 : index
    %75 = vector.load %arg9[%c1_56, %c1_57, %c0_58] : memref<18x18x128xbf16, #tpu.memory_space<vmem>>, vector<16x16x128xbf16>
    tpu.vector_store %arg9[%c1_56, %c1_57, %c0_58], %74 {strides = array<i32>} : memref<18x18x128xbf16, #tpu.memory_space<vmem>>, vector<16x16x128xbf16>,
    %c0_59 = arith.constant 0 : index
    %c0_60 = arith.constant 0 : index
    %c0_61 = arith.constant 0 : index
    %76 = vector.load %arg9[%c0_59, %c0_60, %c0_61] : memref<18x18x128xbf16, #tpu.memory_space<vmem>>, vector<18x16x128xbf16>
    %77 = vector.extract_strided_slice %76 {offsets = [0, 0, 0], sizes = [16, 16, 128], strides = [1, 1, 1]} : vector<18x16x128xbf16> to vector<16x16x128xbf16>
    %78 = vector.shape_cast %77 : vector<16x16x128xbf16> to vector<256x128xbf16>
    %c0_62 = arith.constant 0 : index
    %c0_63 = arith.constant 0 : index
    %c0_64 = arith.constant 0 : index
    %79 = vector.load %arg5[%c0_62, %c0_63, %c0_64] : memref<9x128x128xbf16, #tpu.memory_space<vmem>>, vector<1x128x128xbf16>
    %80 = vector.shape_cast %79 : vector<1x128x128xbf16> to vector<128x128xbf16>
    %cst_65 = arith.constant dense<0.000000e+00> : vector<256x128xf32>
    %81 = tpu.matmul %78, %80, %cst_65 {dimension_numbers = #tpu.dot_dimension_numbers<[1], [0], [0], [1], [0, 0, 1, 1], [], []>} : vector<256x128xbf16>, vector<128x128xbf16>, vector<256x128xf32> -> vector<256x128xf32>
    %82 = vector.extract_strided_slice %76 {offsets = [1, 0, 0], sizes = [16, 16, 128], strides = [1, 1, 1]} : vector<18x16x128xbf16> to vector<16x16x128xbf16>
    %83 = vector.shape_cast %82 : vector<16x16x128xbf16> to vector<256x128xbf16>
    %c3_66 = arith.constant 3 : index
    %c0_67 = arith.constant 0 : index
    %c0_68 = arith.constant 0 : index
    %84 = vector.load %arg5[%c3_66, %c0_67, %c0_68] : memref<9x128x128xbf16, #tpu.memory_space<vmem>>, vector<1x128x128xbf16>
    %85 = vector.shape_cast %84 : vector<1x128x128xbf16> to vector<128x128xbf16>
    %cst_69 = arith.constant dense<0.000000e+00> : vector<256x128xf32>
    %86 = tpu.matmul %83, %85, %cst_69 {dimension_numbers = #tpu.dot_dimension_numbers<[1], [0], [0], [1], [0, 0, 1, 1], [], []>} : vector<256x128xbf16>, vector<128x128xbf16>, vector<256x128xf32> -> vector<256x128xf32>
    %87 = arith.addf %81, %86 : vector<256x128xf32>
    %88 = vector.extract_strided_slice %76 {offsets = [2, 0, 0], sizes = [16, 16, 128], strides = [1, 1, 1]} : vector<18x16x128xbf16> to vector<16x16x128xbf16>
    %89 = vector.shape_cast %88 : vector<16x16x128xbf16> to vector<256x128xbf16>
    %c6_70 = arith.constant 6 : index
    %c0_71 = arith.constant 0 : index
    %c0_72 = arith.constant 0 : index
    %90 = vector.load %arg5[%c6_70, %c0_71, %c0_72] : memref<9x128x128xbf16, #tpu.memory_space<vmem>>, vector<1x128x128xbf16>
    %91 = vector.shape_cast %90 : vector<1x128x128xbf16> to vector<128x128xbf16>
    %cst_73 = arith.constant dense<0.000000e+00> : vector<256x128xf32>
    %92 = tpu.matmul %89, %91, %cst_73 {dimension_numbers = #tpu.dot_dimension_numbers<[1], [0], [0], [1], [0, 0, 1, 1], [], []>} : vector<256x128xbf16>, vector<128x128xbf16>, vector<256x128xf32> -> vector<256x128xf32>
    %93 = arith.addf %87, %92 : vector<256x128xf32>
    %c0_74 = arith.constant 0 : index
    %c1_75 = arith.constant 1 : index
    %c0_76 = arith.constant 0 : index
    %94 = vector.load %arg9[%c0_74, %c1_75, %c0_76] : memref<18x18x128xbf16, #tpu.memory_space<vmem>>, vector<18x16x128xbf16>
    %95 = vector.extract_strided_slice %94 {offsets = [0, 0, 0], sizes = [16, 16, 128], strides = [1, 1, 1]} : vector<18x16x128xbf16> to vector<16x16x128xbf16>
    %96 = vector.shape_cast %95 : vector<16x16x128xbf16> to vector<256x128xbf16>
    %c1_77 = arith.constant 1 : index
    %c0_78 = arith.constant 0 : index
    %c0_79 = arith.constant 0 : index
    %97 = vector.load %arg5[%c1_77, %c0_78, %c0_79] : memref<9x128x128xbf16, #tpu.memory_space<vmem>>, vector<1x128x128xbf16>
    %98 = vector.shape_cast %97 : vector<1x128x128xbf16> to vector<128x128xbf16>
    %cst_80 = arith.constant dense<0.000000e+00> : vector<256x128xf32>
    %99 = tpu.matmul %96, %98, %cst_80 {dimension_numbers = #tpu.dot_dimension_numbers<[1], [0], [0], [1], [0, 0, 1, 1], [], []>} : vector<256x128xbf16>, vector<128x128xbf16>, vector<256x128xf32> -> vector<256x128xf32>
    %100 = arith.addf %93, %99 : vector<256x128xf32>
    %101 = vector.extract_strided_slice %94 {offsets = [1, 0, 0], sizes = [16, 16, 128], strides = [1, 1, 1]} : vector<18x16x128xbf16> to vector<16x16x128xbf16>
    %102 = vector.shape_cast %101 : vector<16x16x128xbf16> to vector<256x128xbf16>
    %c4_81 = arith.constant 4 : index
    %c0_82 = arith.constant 0 : index
    %c0_83 = arith.constant 0 : index
    %103 = vector.load %arg5[%c4_81, %c0_82, %c0_83] : memref<9x128x128xbf16, #tpu.memory_space<vmem>>, vector<1x128x128xbf16>
    %104 = vector.shape_cast %103 : vector<1x128x128xbf16> to vector<128x128xbf16>
    %cst_84 = arith.constant dense<0.000000e+00> : vector<256x128xf32>
    %105 = tpu.matmul %102, %104, %cst_84 {dimension_numbers = #tpu.dot_dimension_numbers<[1], [0], [0], [1], [0, 0, 1, 1], [], []>} : vector<256x128xbf16>, vector<128x128xbf16>, vector<256x128xf32> -> vector<256x128xf32>
    %106 = arith.addf %100, %105 : vector<256x128xf32>
    %107 = vector.extract_strided_slice %94 {offsets = [2, 0, 0], sizes = [16, 16, 128], strides = [1, 1, 1]} : vector<18x16x128xbf16> to vector<16x16x128xbf16>
    %108 = vector.shape_cast %107 : vector<16x16x128xbf16> to vector<256x128xbf16>
    %c7_85 = arith.constant 7 : index
    %c0_86 = arith.constant 0 : index
    %c0_87 = arith.constant 0 : index
    %109 = vector.load %arg5[%c7_85, %c0_86, %c0_87] : memref<9x128x128xbf16, #tpu.memory_space<vmem>>, vector<1x128x128xbf16>
    %110 = vector.shape_cast %109 : vector<1x128x128xbf16> to vector<128x128xbf16>
    %cst_88 = arith.constant dense<0.000000e+00> : vector<256x128xf32>
    %111 = tpu.matmul %108, %110, %cst_88 {dimension_numbers = #tpu.dot_dimension_numbers<[1], [0], [0], [1], [0, 0, 1, 1], [], []>} : vector<256x128xbf16>, vector<128x128xbf16>, vector<256x128xf32> -> vector<256x128xf32>
    %112 = arith.addf %106, %111 : vector<256x128xf32>
    %c0_89 = arith.constant 0 : index
    %c2_90 = arith.constant 2 : index
    %c0_91 = arith.constant 0 : index
    %113 = vector.load %arg9[%c0_89, %c2_90, %c0_91] : memref<18x18x128xbf16, #tpu.memory_space<vmem>>, vector<18x16x128xbf16>
    %114 = vector.extract_strided_slice %113 {offsets = [0, 0, 0], sizes = [16, 16, 128], strides = [1, 1, 1]} : vector<18x16x128xbf16> to vector<16x16x128xbf16>
    %115 = vector.shape_cast %114 : vector<16x16x128xbf16> to vector<256x128xbf16>
    %c2_92 = arith.constant 2 : index
    %c0_93 = arith.constant 0 : index
    %c0_94 = arith.constant 0 : index
    %116 = vector.load %arg5[%c2_92, %c0_93, %c0_94] : memref<9x128x128xbf16, #tpu.memory_space<vmem>>, vector<1x128x128xbf16>
    %117 = vector.shape_cast %116 : vector<1x128x128xbf16> to vector<128x128xbf16>
    %cst_95 = arith.constant dense<0.000000e+00> : vector<256x128xf32>
    %118 = tpu.matmul %115, %117, %cst_95 {dimension_numbers = #tpu.dot_dimension_numbers<[1], [0], [0], [1], [0, 0, 1, 1], [], []>} : vector<256x128xbf16>, vector<128x128xbf16>, vector<256x128xf32> -> vector<256x128xf32>
    %119 = arith.addf %112, %118 : vector<256x128xf32>
    %120 = vector.extract_strided_slice %113 {offsets = [1, 0, 0], sizes = [16, 16, 128], strides = [1, 1, 1]} : vector<18x16x128xbf16> to vector<16x16x128xbf16>
    %121 = vector.shape_cast %120 : vector<16x16x128xbf16> to vector<256x128xbf16>
    %c5_96 = arith.constant 5 : index
    %c0_97 = arith.constant 0 : index
    %c0_98 = arith.constant 0 : index
    %122 = vector.load %arg5[%c5_96, %c0_97, %c0_98] : memref<9x128x128xbf16, #tpu.memory_space<vmem>>, vector<1x128x128xbf16>
    %123 = vector.shape_cast %122 : vector<1x128x128xbf16> to vector<128x128xbf16>
    %cst_99 = arith.constant dense<0.000000e+00> : vector<256x128xf32>
    %124 = tpu.matmul %121, %123, %cst_99 {dimension_numbers = #tpu.dot_dimension_numbers<[1], [0], [0], [1], [0, 0, 1, 1], [], []>} : vector<256x128xbf16>, vector<128x128xbf16>, vector<256x128xf32> -> vector<256x128xf32>
    %125 = arith.addf %119, %124 : vector<256x128xf32>
    %126 = vector.extract_strided_slice %113 {offsets = [2, 0, 0], sizes = [16, 16, 128], strides = [1, 1, 1]} : vector<18x16x128xbf16> to vector<16x16x128xbf16>
    %127 = vector.shape_cast %126 : vector<16x16x128xbf16> to vector<256x128xbf16>
    %c8_100 = arith.constant 8 : index
    %c0_101 = arith.constant 0 : index
    %c0_102 = arith.constant 0 : index
    %128 = vector.load %arg5[%c8_100, %c0_101, %c0_102] : memref<9x128x128xbf16, #tpu.memory_space<vmem>>, vector<1x128x128xbf16>
    %129 = vector.shape_cast %128 : vector<1x128x128xbf16> to vector<128x128xbf16>
    %cst_103 = arith.constant dense<0.000000e+00> : vector<256x128xf32>
    %130 = tpu.matmul %127, %129, %cst_103 {dimension_numbers = #tpu.dot_dimension_numbers<[1], [0], [0], [1], [0, 0, 1, 1], [], []>} : vector<256x128xbf16>, vector<128x128xbf16>, vector<256x128xf32> -> vector<256x128xf32>
    %131 = arith.addf %125, %130 : vector<256x128xf32>
    %c0_104 = arith.constant 0 : index
    %c0_105 = arith.constant 0 : index
    %132 = vector.load %arg6[%c0_104, %c0_105] : memref<1x128xf32, #tpu.memory_space<vmem>>, vector<1x128xf32>
    %133 = vector.broadcast %132 : vector<1x128xf32> to vector<256x128xf32>
    %134 = arith.mulf %131, %133 : vector<256x128xf32>
    %c0_106 = arith.constant 0 : index
    %c0_107 = arith.constant 0 : index
    %135 = vector.load %arg7[%c0_106, %c0_107] : memref<1x128xf32, #tpu.memory_space<vmem>>, vector<1x128xf32>
    %136 = vector.broadcast %135 : vector<1x128xf32> to vector<256x128xf32>
    %137 = arith.addf %134, %136 : vector<256x128xf32>
    %cst_108 = arith.constant 0.000000e+00 : f32
    %138 = vector.broadcast %cst_108 : f32 to vector<256x128xf32>
    %139 = arith.maximumf %137, %138 : vector<256x128xf32>
    %140 = vector.shape_cast %139 : vector<256x128xf32> to vector<1x16x16x128xf32>
    %141 = arith.truncf %140 : vector<1x16x16x128xf32> to vector<1x16x16x128xbf16>
    %c0_109 = arith.constant 0 : index
    %c0_110 = arith.constant 0 : index
    %c0_111 = arith.constant 0 : index
    %c0_112 = arith.constant 0 : index
    %142 = vector.load %arg8[%c0_109, %c0_110, %c0_111, %c0_112] : memref<1x16x16x128xbf16, #tpu.memory_space<vmem>>, vector<1x16x16x128xbf16>
    tpu.vector_store %arg8[%c0_109, %c0_110, %c0_111, %c0_112], %141 {strides = array<i32>} : memref<1x16x16x128xbf16, #tpu.memory_space<vmem>>, vector<1x16x16x128xbf16>,
    return
  }
  func.func @transform_0(%arg0: i32) -> (i32, i32, i32, i32) {
    %c0_i32 = arith.constant 0 : i32
    %c0_i32_0 = arith.constant 0 : i32
    %c0_i32_1 = arith.constant 0 : i32
    %c0_i32_2 = arith.constant 0 : i32
    return %arg0, %c0_i32, %c0_i32_0, %c0_i32_1 : i32, i32, i32, i32
  }
  func.func @transform_1(%arg0: i32) -> (i32, i32, i32) {
    %c0_i32 = arith.constant 0 : i32
    %c0_i32_0 = arith.constant 0 : i32
    %c0_i32_1 = arith.constant 0 : i32
    %c0_i32_2 = arith.constant 0 : i32
    return %c0_i32, %c0_i32_0, %c0_i32_1 : i32, i32, i32
  }
  func.func @transform_2(%arg0: i32) -> (i32, i32) {
    %c0_i32 = arith.constant 0 : i32
    %c0_i32_0 = arith.constant 0 : i32
    %c0_i32_1 = arith.constant 0 : i32
    return %c0_i32, %c0_i32_0 : i32, i32
  }
  func.func @transform_3(%arg0: i32) -> (i32, i32) {
    %c0_i32 = arith.constant 0 : i32
    %c0_i32_0 = arith.constant 0 : i32
    %c0_i32_1 = arith.constant 0 : i32
    return %c0_i32, %c0_i32_0 : i32, i32
  }
  func.func @transform_4(%arg0: i32) -> (i32, i32, i32) {
    %c0_i32 = arith.constant 0 : i32
    %c0_i32_0 = arith.constant 0 : i32
    %c0_i32_1 = arith.constant 0 : i32
    %c0_i32_2 = arith.constant 0 : i32
    return %c0_i32, %c0_i32_0, %c0_i32_1 : i32, i32, i32
  }
  func.func @transform_5(%arg0: i32) -> (i32, i32) {
    %c0_i32 = arith.constant 0 : i32
    %c0_i32_0 = arith.constant 0 : i32
    %c0_i32_1 = arith.constant 0 : i32
    return %c0_i32, %c0_i32_0 : i32, i32
  }
  func.func @transform_6(%arg0: i32) -> (i32, i32) {
    %c0_i32 = arith.constant 0 : i32
    %c0_i32_0 = arith.constant 0 : i32
    %c0_i32_1 = arith.constant 0 : i32
    return %c0_i32, %c0_i32_0 : i32, i32
  }
  func.func @transform_7(%arg0: i32) -> (i32, i32, i32, i32) {
    %c0_i32 = arith.constant 0 : i32
    %c0_i32_0 = arith.constant 0 : i32
    %c0_i32_1 = arith.constant 0 : i32
    %c0_i32_2 = arith.constant 0 : i32
    return %arg0, %c0_i32, %c0_i32_0, %c0_i32_1 : i32, i32, i32, i32
  }
}

</mosaic_0001>

<bundles_post_ra>
// kernel: up_forward.2
= control target key start
LH: loop header
LB: loop body
LE: loop exit
PB: predicated region body
PF: predicated region fallthrough
CT: control target
= control target key end

     0   :  { %8 = vsyncpa [#allocation3], 0  ;;  %s1603_s0 = inlined_call_operand.vmem [shape: bf16[128,256], index: 0, kind: input, shape index: {}]   ;;  %s1604_s1 = inlined_call_operand.hbm [shape: bf16[256,512], index: 1, kind: input, shape index: {}]   ;;  %s1605_s2 = inlined_call_operand.vmem [shape: f32[1,512], index: 2, kind: input, shape index: {}]   ;;  %s1606_s3 = inlined_call_operand.vmem [shape: bf16[128,512], index: 3, kind: output, shape index: {}]  }
   0x1   :  { %10 = vsyncpa [#allocation3 + $0x1], 0  ;;  %s1339_s12 = smov 0   ;;  %s1341_s13 = smov 0  }
   0x2   :  { %s1343_s14 = smov 0   ;;  %s1345_s15 = smov 0  }
   0x3   :  { %s1347_s16 = smov 0   ;;  %s1349_s17 = smov 0  }
   0x4 LB: > { %s974_s18 = sadd.s32 4294967295, %s1313_s17   ;;  %s25_s19 = sadd.s32 1, %s1309_s16  ;;  %s1313_s17 = sphi %s1349_s17, %s16_s17   ;;  %s1309_s16 = sphi %s1347_s16, %s1615_s16   ;;  %s1305_s15 = sphi %s1345_s15, %s1614_s15   ;;  %s1301_s14 = sphi %s1343_s14, %s1613_s14   ;;  %s1297_s13 = sphi %s1341_s13, %s1612_s13   ;;  %s1293_s12 = sphi %s1339_s12, %s1611_s12  }
   0x5   : > { %p26_p0 = scmp.ge.s32.totalorder %s25_s19, 2  ;;  %s61_s20 = sadd.s32 1, %s1301_s14 }
   0x6   : > { %p68_p1 = scmp.ne.s32.totalorder %s1301_s14, %s1297_s13  ;;  %p69_p2 = scmp.eq.s32.totalorder %s1313_s17, 0 }
   0x7   : > { %s1617_s19 = smov (%p26_p0, %s25_s19), 0  ;;  %p74_p4 = scmp.ne.s32.totalorder %s1297_s13, %s1293_s12 }
   0x8   : > { %p1375_p3 = por %p69_p2, %p68_p1  ;;  %s58_s22 = ssub.s32 %s1309_s16, %s1617_s19 }
   0x9   : > { %p75_p5 = scmp.eq.s32.totalorder %s974_s18, 0  ;;  %p59_p6 = scmp.eq.s32.totalorder %s58_s22, 0 }
   0xa   : > { %p126_p7 = scmp.eq.s32.totalorder %s974_s18, 1  ;;  %p1111_p10 = scmp.lt.s32.totalorder %s1313_s17, 2 }
   0xb   : > { %p1382_p8 = por %p75_p5, %p74_p4  ;;  %s162_s26 = sand.u32 1, %s1301_s14  }
   0xc   : > { %s1387_s24 = scalar_select %p59_p6, %s1301_s14, %s61_s20  }
   0xd   : > { %p1389_p9 = por %p126_p7, %p68_p1  ;;  %s1055_s27 = sshll.u32 %s1309_s16, 7 }
   0xe   : > { %s979_s28 = sshll.u32 %s162_s26, 8  ;;  %s172_s4 = scalar_lea.hbm %s1604_s1, %s1055_s27 }
   0xf   : > { %s166_s5 = scalar_lea.vmem [#allocation2], %s979_s28  ;;  %p1401_p11 = pnand %p1111_p10, %p1375_p3 }
  0x10   : > { %s173_s6 = sshll.u32 %s166_s5, 4  ;;  %p982_p12 = scmp.ge.s32.totalorder %s1313_s17, 1  ;;  %s174_s6 = int_to_ptr.vmem [resolvable:$true] %s173_s6 }
  0x11   : > { %s163_s8 = scalar_lea.sflag [#allocation3], %s162_s26  ;;  %p1237_p13 = pneg %p1401_p11 }
  0x12   : > { %s1248_s9 = scalar_lea.vmem %s174_s6, 4096  ;;  %s1315_s10 = smov [#allocation2]  }
  0x13   : > { %p1249_p0 = scmp.ne.s32.totalorder %s174_s6, %s1248_s9  ;;  %s1253_s11 = sshll.u32 %s1315_s10, 4  ;;  %s1254_s11 = int_to_ptr.vmem [resolvable:$false] %s1253_s11 }
  0x14   : > { %s1255_s12 = scalar_lea.vmem %s1254_s11, 8192  ;;  %p1256_p4 = scmp.lt.s32.totalorder %s174_s6, %s1254_s11 }
  0x15   : > { %p1251_p1 = pnand %p1249_p0, %p1237_p13  ;;  %p1257_p5 = scmp.lt.s32.totalorder %s1255_s12, %s1248_s9 }
  0x17   : > { %p1252_p2 = pneg %p1251_p1  ;;  %p1258_p3 = por %p1257_p5, %p1256_p4 }
  0x19   : > { %p1259_p6 = pnand %p1258_p3, %p1252_p2 }
  0x1b   : > { %1262 = shalt.err (!%p1259_p6)
}
  0x1c   : > { %s1316_s18 = smov 256   ;;  %s1317_s20 = smov 128  }
  0x1d   : > { %s1318_s21 = smov 8   ;;  %p189_p7 = scmp.lt.s32.totalorder %s1313_s17, 3 }
  0x1e   : > { %1110 = dma.hbm_to_vmem [thread:$0]  (!%p1401_p11), %s172_s4, 4096, %s174_s6, %s163_s8, %s1316_s18, %s1317_s20, %s1318_s21  }
  0x1f   : > { %p190_p10 = pnand %p982_p12, %p189_p7 }
  0x20   : > { %s1414_s22 = sand.u32 (!%p190_p10), 1, %s1297_s13  }
  0x21   : > { %193 = sbr.rel (%p190_p10) target bundleno = 341 (0x155), region = 32  ;;  %s983_s26 = sshll.u32 (!%p190_p10), %s1414_s22, 8 }
  0x22   : > { %s196_s27 = scalar_lea.sflag (!%p190_p10), [#allocation3], %s1414_s22  ;;  %s1418_s28 = scalar_lea.vmem (!%p190_p10), [#allocation2], %s983_s26 }
  0x26   : > { %1288 = dma.done.wait (%p1382_p8), %s196_s27, 4096  }
  0x27   : > { %1290 = vsyncadd (%p1382_p8), %s196_s27, 4294963200  ;;  %v1163_v0 = vld [vmem:[%s1418_s28 + $0x74] ss:$8 sps:$4 sm:$0xff]   ;;  %v1165_v1 = vld [vmem:[%s1418_s28 + $0x70] ss:$8 sps:$4 sm:$0xff]   ;;  %s985_s21 = sshll.u32 %s1305_s15, 1  ;;  %v296_v48 = vlaneseq }
  0x28   : > { %546 = vmatprep.subr.bf16.mxu0 %v1163_v0  ;;  %1073 = vmatprep.subr.bf16.mxu1 %v1163_v0  ;;  %v1166_v2 = vld [vmem:[%s1418_s28 + $0x64] ss:$8 sps:$4 sm:$0xff]   ;;  %v1168_v3 = vld [vmem:[%s1418_s28 + $0x60] ss:$8 sps:$4 sm:$0xff]   ;;  %v1169_v4 = vld [vmem:[%s1418_s28 + $0x54] ss:$8 sps:$4 sm:$0xff]  }
  0x29   : > { %547 = vmatpush1.bf16.msra.mxu0 %v1165_v1  ;;  %1089 = vmatpush1.bf16.msra.mxu1 %v1165_v1  ;;  %v1171_v5 = vld [vmem:[%s1418_s28 + $0x50] ss:$8 sps:$4 sm:$0xff]   ;;  %v1172_v6 = vld [vmem:[%s1418_s28 + $0x44] ss:$8 sps:$4 sm:$0xff]   ;;  %v1174_v7 = vld [vmem:[%s1418_s28 + $0x40] ss:$8 sps:$4 sm:$0xff]  }
  0x2a   : > { %548 = vmatprep.subr.bf16.mxu0 %v1166_v2  ;;  %1074 = vmatprep.subr.bf16.mxu1 %v1166_v2  ;;  %v1175_v8 = vld [vmem:[%s1418_s28 + $0x34] ss:$8 sps:$4 sm:$0xff]   ;;  %v1177_v9 = vld [vmem:[%s1418_s28 + $0x30] ss:$8 sps:$4 sm:$0xff]   ;;  %v1178_v10 = vld [vmem:[%s1418_s28 + $0x24] ss:$8 sps:$4 sm:$0xff]  }
  0x2b   : > { %v1180_v11 = vld [vmem:[%s1418_s28 + $0x20] ss:$8 sps:$4 sm:$0xff]   ;;  %v1181_v12 = vld [vmem:[%s1418_s28 + $0x14] ss:$8 sps:$4 sm:$0xff]   ;;  %v1213_v13 = vld [vmem:[%s1603_s0 + $0x4] ss:$8 sps:$4 sm:$0xff]  }
  0x2c   : > { %v1183_v14 = vld [vmem:[%s1418_s28 + $0x10] ss:$8 sps:$4 sm:$0xff]   ;;  %v1216_v15 = vld [vmem:[%s1603_s0 + $0x44] ss:$8 sps:$4 sm:$0xff]   ;;  %578 = vmatprep.mubr.bf16.mxu0 %v1213_v13  ;;  %v1186_v17 = vld [vmem:[%s1418_s28] ss:$8 sps:$4 sm:$0xff]  }
  0x2d   : > { %549 = vmatpush1.bf16.msra.mxu0 %v1168_v3  ;;  %1090 = vmatpush1.bf16.msra.mxu1 %v1168_v3  ;;  %v1184_v16 = vld [vmem:[%s1418_s28 + $0x4] ss:$8 sps:$4 sm:$0xff]   ;;  %v1187_v18 = vld [vmem:[%s1418_s28 + $0xf4] ss:$8 sps:$4 sm:$0xff]   ;;  %v1189_v19 = vld [vmem:[%s1418_s28 + $0xf0] ss:$8 sps:$4 sm:$0xff]  }
  0x2e   : > { %550 = vmatprep.subr.bf16.mxu0 %v1169_v4  ;;  %1075 = vmatprep.subr.bf16.mxu1 %v1169_v4  ;;  %v1190_v20 = vld [vmem:[%s1418_s28 + $0xe4] ss:$8 sps:$4 sm:$0xff]   ;;  %v1192_v21 = vld [vmem:[%s1418_s28 + $0xe0] ss:$8 sps:$4 sm:$0xff]   ;;  %v1193_v22 = vld [vmem:[%s1418_s28 + $0xd4] ss:$8 sps:$4 sm:$0xff]  }
  0x2f   : > { %618 = vmatprep.mubr.bf16.mxu1 %v1216_v15  ;;  %v1195_v23 = vld [vmem:[%s1418_s28 + $0xd0] ss:$8 sps:$4 sm:$0xff]   ;;  %v1196_v24 = vld [vmem:[%s1418_s28 + $0xc4] ss:$8 sps:$4 sm:$0xff]   ;;  %v1198_v25 = vld [vmem:[%s1418_s28 + $0xc0] ss:$8 sps:$4 sm:$0xff]  }
  0x30   : > { %v1199_v26 = vld [vmem:[%s1418_s28 + $0xb4] ss:$8 sps:$4 sm:$0xff]   ;;  %v1201_v27 = vld [vmem:[%s1418_s28 + $0xb0] ss:$8 sps:$4 sm:$0xff]   ;;  %v1202_v28 = vld [vmem:[%s1418_s28 + $0xa4] ss:$8 sps:$4 sm:$0xff]  }
  0x31   : > { %551 = vmatpush1.bf16.msra.mxu0 %v1171_v5  ;;  %1091 = vmatpush1.bf16.msra.mxu1 %v1171_v5  ;;  %v1204_v29 = vld [vmem:[%s1418_s28 + $0xa0] ss:$8 sps:$4 sm:$0xff]   ;;  %v1205_v30 = vld [vmem:[%s1418_s28 + $0x94] ss:$8 sps:$4 sm:$0xff]   ;;  %v1207_v31 = vld [vmem:[%s1418_s28 + $0x90] ss:$8 sps:$4 sm:$0xff]  }
  0x32   : > { %552 = vmatprep.subr.bf16.mxu0 %v1172_v6  ;;  %1076 = vmatprep.subr.bf16.mxu1 %v1172_v6  ;;  %v1208_v32 = vld [vmem:[%s1418_s28 + $0x84] ss:$8 sps:$4 sm:$0xff]   ;;  %v1210_v33 = vld [vmem:[%s1418_s28 + $0x80] ss:$8 sps:$4 sm:$0xff]   ;;  %v1217_v36 = vld [vmem:[%s1603_s0 + $0x14] ss:$8 sps:$4 sm:$0xff]  }
  0x33   : > { %v1211_v34 = vld [vmem:[%s1603_s0] ss:$8 sps:$4 sm:$0xff]   ;;  %v1219_v37 = vld [vmem:[%s1603_s0 + $0x54] ss:$8 sps:$4 sm:$0xff]   ;;  %v1221_v38 = vld [vmem:[%s1603_s0 + $0x10] ss:$8 sps:$4 sm:$0xff]  }
  0x34   : > { %v1214_v35 = vld [vmem:[%s1603_s0 + $0x40] ss:$8 sps:$4 sm:$0xff]   ;;  %v1222_v39 = vld [vmem:[%s1603_s0 + $0x50] ss:$8 sps:$4 sm:$0xff]   ;;  %v1223_v40 = vld [vmem:[%s1603_s0 + $0x24] ss:$8 sps:$4 sm:$0xff]  }
  0x35   : > { %553 = vmatpush1.bf16.msra.mxu0 %v1174_v7  ;;  %1092 = vmatpush1.bf16.msra.mxu1 %v1174_v7  ;;  %v1225_v41 = vld [vmem:[%s1603_s0 + $0x64] ss:$8 sps:$4 sm:$0xff]   ;;  %v1227_v42 = vld [vmem:[%s1603_s0 + $0x20] ss:$8 sps:$4 sm:$0xff]   ;;  %v1229_v44 = vld [vmem:[%s1603_s0 + $0x34] ss:$8 sps:$4 sm:$0xff]  }
  0x36   : > { %554 = vmatprep.subr.bf16.mxu0 %v1175_v8  ;;  %1077 = vmatprep.subr.bf16.mxu1 %v1175_v8  ;;  %v1228_v43 = vld [vmem:[%s1603_s0 + $0x60] ss:$8 sps:$4 sm:$0xff]   ;;  %v1231_v45 = vld [vmem:[%s1603_s0 + $0x74] ss:$8 sps:$4 sm:$0xff]   ;;  %v1233_v46 = vld [vmem:[%s1603_s0 + $0x30] ss:$8 sps:$4 sm:$0xff]  }
  0x37   : > { %v1234_v47 = vld [vmem:[%s1603_s0 + $0x70] ss:$8 sps:$4 sm:$0xff]   ;;  %p240_p8 = scmp.lt.s32.totalorder %s985_s21, 3  ;;  %v297_v49 = vshrl.u32 %v296_v48, 7  ;;  %s984_s23 = sshll.u32 %s1414_s22, 7 }
  0x38   : > { %s1517_s29 = scalar_lea.vmem [#allocation4], %s984_s23  ;;  %s1072_s22 = sshll.u32 (%p1389_p9), %s1305_s15, 3 }
  0x39   : > { %555 = vmatpush1.bf16.msra.mxu0 %v1177_v9  ;;  %1093 = vmatpush1.bf16.msra.mxu1 %v1177_v9  ;;  %s1619_s21 = smov (!%p240_p8, %s985_s21), 3  ;;  %v298_v50 = vsub.s32 0, %v297_v49  ;;  %v302_v51 = vsub.s32 1, %v297_v49  ;;  %s783_s5 = scalar_lea.vmem (%p1389_p9), %s1606_s3, %s1072_s22 }
  0x3a   : > { %556 = vmatprep.subr.bf16.mxu0 %v1178_v10  ;;  %1078 = vmatprep.subr.bf16.mxu1 %v1178_v10  ;;  %s242_s28 = scalar_lea.vmem %s1605_s2, %s1619_s21 }
  0x3b   : > { %v294_v52 = vld [vmem:[%s242_s28] sm:$0x3] }
  0x3c   : > { %v1508_v53 = vrot.slane %v294_v52, %v298_v50  ;;  %v1510_v54 = vrot.slane %v294_v52, %v302_v51 }
  0x3d   : > { %557 = vmatpush1.bf16.msra.mxu0 %v1180_v11  ;;  %1094 = vmatpush1.bf16.msra.mxu1 %v1180_v11 }
  0x3e   : > { %558 = vmatprep.subr.bf16.mxu0 %v1181_v12  ;;  %1079 = vmatprep.subr.bf16.mxu1 %v1181_v12 }
  0x41   : > { %559 = vmatpush1.bf16.msra.mxu0 %v1183_v14  ;;  %1095 = vmatpush1.bf16.msra.mxu1 %v1183_v14 }
  0x42   : > { %560 = vmatprep.subr.bf16.mxu0 %v1184_v16  ;;  %1080 = vmatprep.subr.bf16.mxu1 %v1184_v16 }
  0x45   : > { %561 = vmatpush1.bf16.msra.mxu0 %v1186_v17  ;;  %1096 = vmatpush1.bf16.msra.mxu1 %v1186_v17 }
  0x46   : > { %562 = vmatprep.subr.bf16.mxu0 %v1187_v18  ;;  %1081 = vmatprep.subr.bf16.mxu1 %v1187_v18 }
  0x49   : > { %563 = vmatpush2.bf16.msra.mxu0 %v1189_v19  ;;  %1097 = vmatpush2.bf16.msra.mxu1 %v1189_v19 }
  0x4a   : > { %564 = vmatprep.subr.bf16.mxu0 %v1190_v20  ;;  %1082 = vmatprep.subr.bf16.mxu1 %v1190_v20 }
  0x4d   : > { %565 = vmatpush2.bf16.msra.mxu0 %v1192_v21  ;;  %1098 = vmatpush2.bf16.msra.mxu1 %v1192_v21 }
  0x4e   : > { %566 = vmatprep.subr.bf16.mxu0 %v1193_v22  ;;  %1083 = vmatprep.subr.bf16.mxu1 %v1193_v22 }
  0x51   : > { %567 = vmatpush2.bf16.msra.mxu0 %v1195_v23  ;;  %1099 = vmatpush2.bf16.msra.mxu1 %v1195_v23 }
  0x52   : > { %568 = vmatprep.subr.bf16.mxu0 %v1196_v24  ;;  %1084 = vmatprep.subr.bf16.mxu1 %v1196_v24 }
  0x55   : > { %569 = vmatpush2.bf16.msra.mxu0 %v1198_v25  ;;  %1100 = vmatpush2.bf16.msra.mxu1 %v1198_v25 }
  0x56   : > { %570 = vmatprep.subr.bf16.mxu0 %v1199_v26  ;;  %1085 = vmatprep.subr.bf16.mxu1 %v1199_v26 }
  0x59   : > { %571 = vmatpush2.bf16.msra.mxu0 %v1201_v27  ;;  %1101 = vmatpush2.bf16.msra.mxu1 %v1201_v27 }
  0x5a   : > { %572 = vmatprep.subr.bf16.mxu0 %v1202_v28  ;;  %1086 = vmatprep.subr.bf16.mxu1 %v1202_v28 }
  0x5d   : > { %573 = vmatpush2.bf16.msra.mxu0 %v1204_v29  ;;  %1102 = vmatpush2.bf16.msra.mxu1 %v1204_v29 }
  0x5e   : > { %574 = vmatprep.subr.bf16.mxu0 %v1205_v30  ;;  %1087 = vmatprep.subr.bf16.mxu1 %v1205_v30 }
  0x61   : > { %575 = vmatpush2.bf16.msra.mxu0 %v1207_v31  ;;  %1103 = vmatpush2.bf16.msra.mxu1 %v1207_v31 }
  0x62   : > { %576 = vmatprep.subr.bf16.mxu0 %v1208_v32  ;;  %1088 = vmatprep.subr.bf16.mxu1 %v1208_v32 }
  0x65   : > { %577 = vmatpush2.bf16.msra.mxu0 %v1210_v33  ;;  %1104 = vmatpush2.bf16.msra.mxu1 %v1210_v33 }
  0x68   : > { %579 = vmatmul.mubr.bf16.vlgmr.msra.gmra.mxu0 %v1211_v34  ;;  %619 = vmatmul.mubr.bf16.vlgmr.msra.gmra.mxu1 %v1214_v35 }
  0x69   : > { %588 = vmatprep.mubr.bf16.mxu0 %v1217_v36  ;;  %628 = vmatprep.mubr.bf16.mxu1 %v1219_v37 }
  0x70   : > { %589 = vmatmul.mubr.bf16.gmra.mxu0 %v1221_v38  ;;  %629 = vmatmul.mubr.bf16.gmra.mxu1 %v1222_v39 }
  0x71   : > { %598 = vmatprep.mubr.bf16.mxu0 %v1223_v40  ;;  %638 = vmatprep.mubr.bf16.mxu1 %v1225_v41 }
  0x78   : > { %599 = vmatmul.mubr.bf16.gmra.mxu0 %v1227_v42  ;;  %639 = vmatmul.mubr.bf16.gmra.mxu1 %v1228_v43 }
  0x79   : > { %608 = vmatprep.mubr.bf16.mxu0 %v1229_v44  ;;  %648 = vmatprep.mubr.bf16.mxu1 %v1231_v45 }
  0x80   : > { %609 = vmatmul.mubr.bf16.gmra.mxu0 %v1233_v46  ;;  %649 = vmatmul.mubr.bf16.gmra.mxu1 %v1234_v47 }
 0x128   : > { %v580_v55 = vpop.f32.mrf.mxu0  ;;  %v620_v56 = vpop.f32.mrf.mxu1 }
 0x129   : > { %v581_v59 = vadd.f32 %v580_v55, %v1508_v53  ;;  %v621_v60 = vadd.f32 %v620_v56, %v1508_v53 }
 0x12a   : > { %v582_v57 = vpop.f32.mrf.mxu0  ;;  %v622_v58 = vpop.f32.mrf.mxu1 }
 0x12b   : > { %v583_v61 = vadd.f32 %v582_v57, %v1510_v54  ;;  %v623_v62 = vadd.f32 %v622_v58, %v1510_v54 }
 0x12c   : > { %v584_v63 = vpop.f32.mrf.mxu0  ;;  %v624_v0 = vpop.f32.mrf.mxu1 }
 0x12d   : > { %v1056_v1 = vpack.c.bf16 %v583_v61, %v581_v59  ;;  %v1064_v2 = vpack.c.bf16 %v623_v62, %v621_v60  ;;  %v585_v5 = vadd.f32 %v584_v63, %v1508_v53  ;;  %v625_v6 = vadd.f32 %v624_v0, %v1508_v53 }
 0x12e   : > { %v586_v3 = vpop.f32.mrf.mxu0  ;;  %v626_v4 = vpop.f32.mrf.mxu1 }
 0x12f   : > { %755 = vst [vmem:[%s1517_s29] sm:$0xff] %v1056_v1  ;;  %763 = vst [vmem:[%s1517_s29 + $0x40] sm:$0xff] %v1064_v2  ;;  %v587_v7 = vadd.f32 %v586_v3, %v1510_v54  ;;  %v627_v8 = vadd.f32 %v626_v4, %v1510_v54 }
 0x130   : > { %v590_v9 = vpop.f32.mrf.mxu0  ;;  %v630_v10 = vpop.f32.mrf.mxu1 }
 0x131   : > { %v1057_v11 = vpack.c.bf16 %v587_v7, %v585_v5  ;;  %v1065_v12 = vpack.c.bf16 %v627_v8, %v625_v6  ;;  %v591_v15 = vadd.f32 %v590_v9, %v1508_v53  ;;  %v631_v16 = vadd.f32 %v630_v10, %v1508_v53 }
 0x132   : > { %v592_v13 = vpop.f32.mrf.mxu0  ;;  %v632_v14 = vpop.f32.mrf.mxu1 }
 0x133   : > { %756 = vst [vmem:[%s1517_s29 + $0x8] sm:$0xff] %v1057_v11  ;;  %764 = vst [vmem:[%s1517_s29 + $0x48] sm:$0xff] %v1065_v12  ;;  %v593_v17 = vadd.f32 %v592_v13, %v1510_v54  ;;  %v633_v18 = vadd.f32 %v632_v14, %v1510_v54 }
 0x134   : > { %v594_v19 = vpop.f32.mrf.mxu0  ;;  %v634_v20 = vpop.f32.mrf.mxu1 }
 0x135   : > { %v1058_v21 = vpack.c.bf16 %v593_v17, %v591_v15  ;;  %v1066_v22 = vpack.c.bf16 %v633_v18, %v631_v16  ;;  %v595_v25 = vadd.f32 %v594_v19, %v1508_v53  ;;  %v635_v26 = vadd.f32 %v634_v20, %v1508_v53 }
 0x136   : > { %v596_v23 = vpop.f32.mrf.mxu0  ;;  %v636_v24 = vpop.f32.mrf.mxu1  ;;  %v858_v15 = vld [vmem:[%s1517_s29 + $0x40] sm:$0xff] (%p1389_p9) }
 0x137   : > { %757 = vst [vmem:[%s1517_s29 + $0x10] sm:$0xff] %v1058_v21  ;;  %765 = vst [vmem:[%s1517_s29 + $0x50] sm:$0xff] %v1066_v22  ;;  %v597_v27 = vadd.f32 %v596_v23, %v1510_v54  ;;  %v637_v28 = vadd.f32 %v636_v24, %v1510_v54 }
 0x138   : > { %v600_v29 = vpop.f32.mrf.mxu0  ;;  %v640_v30 = vpop.f32.mrf.mxu1  ;;  %859 = vst [vmem:[%s783_s5 + $0x80] sm:$0xff] (%p1389_p9), %v858_v15 }
 0x139   : > { %v1059_v31 = vpack.c.bf16 %v597_v27, %v595_v25  ;;  %v1067_v32 = vpack.c.bf16 %v637_v28, %v635_v26  ;;  %v601_v35 = vadd.f32 %v600_v29, %v1508_v53  ;;  %v641_v36 = vadd.f32 %v640_v30, %v1508_v53 }
 0x13a   : > { %v602_v33 = vpop.f32.mrf.mxu0  ;;  %v642_v34 = vpop.f32.mrf.mxu1  ;;  %v860_v16 = vld [vmem:[%s1517_s29 + $0x48] sm:$0xff] (%p1389_p9) }
 0x13b   : > { %758 = vst [vmem:[%s1517_s29 + $0x18] sm:$0xff] %v1059_v31  ;;  %766 = vst [vmem:[%s1517_s29 + $0x58] sm:$0xff] %v1067_v32  ;;  %v603_v37 = vadd.f32 %v602_v33, %v1510_v54  ;;  %v643_v38 = vadd.f32 %v642_v34, %v1510_v54 }
 0x13c   : > { %v604_v39 = vpop.f32.mrf.mxu0  ;;  %v644_v40 = vpop.f32.mrf.mxu1  ;;  %861 = vst [vmem:[%s783_s5 + $0x90] sm:$0xff] (%p1389_p9), %v860_v16 }
 0x13d   : > { %v1060_v41 = vpack.c.bf16 %v603_v37, %v601_v35  ;;  %v1068_v42 = vpack.c.bf16 %v643_v38, %v641_v36  ;;  %v605_v45 = vadd.f32 %v604_v39, %v1508_v53  ;;  %v645_v46 = vadd.f32 %v644_v40, %v1508_v53 }
 0x13e   : > { %v606_v43 = vpop.f32.mrf.mxu0  ;;  %v646_v44 = vpop.f32.mrf.mxu1  ;;  %v846_v9 = vld [vmem:[%s1517_s29 + $0x10] sm:$0xff] (%p1389_p9) }
 0x13f   : > { %759 = vst [vmem:[%s1517_s29 + $0x20] sm:$0xff] %v1060_v41  ;;  %767 = vst [vmem:[%s1517_s29 + $0x60] sm:$0xff] %v1068_v42  ;;  %v607_v47 = vadd.f32 %v606_v43, %v1510_v54  ;;  %v647_v48 = vadd.f32 %v646_v44, %v1510_v54  ;;  %v862_v17 = vld [vmem:[%s1517_s29 + $0x50] sm:$0xff] (%p1389_p9) }
 0x140   : > { %v610_v49 = vpop.f32.mrf.mxu0  ;;  %v650_v50 = vpop.f32.mrf.mxu1  ;;  %847 = vst [vmem:[%s783_s5 + $0x20] sm:$0xff] (%p1389_p9), %v846_v9  ;;  %863 = vst [vmem:[%s783_s5 + $0xa0] sm:$0xff] (%p1389_p9), %v862_v17 }
 0x141   : > { %v1061_v51 = vpack.c.bf16 %v607_v47, %v605_v45  ;;  %v1069_v52 = vpack.c.bf16 %v647_v48, %v645_v46  ;;  %v611_v57 = vadd.f32 %v610_v49, %v1508_v53  ;;  %v651_v58 = vadd.f32 %v650_v50, %v1508_v53 }
 0x142   : > { %v612_v55 = vpop.f32.mrf.mxu0  ;;  %v652_v56 = vpop.f32.mrf.mxu1  ;;  %v848_v10 = vld [vmem:[%s1517_s29 + $0x18] sm:$0xff] (%p1389_p9) }
 0x143   : > { %760 = vst [vmem:[%s1517_s29 + $0x28] sm:$0xff] %v1061_v51  ;;  %768 = vst [vmem:[%s1517_s29 + $0x68] sm:$0xff] %v1069_v52  ;;  %v613_v59 = vadd.f32 %v612_v55, %v1510_v54  ;;  %v653_v60 = vadd.f32 %v652_v56, %v1510_v54  ;;  %v864_v18 = vld [vmem:[%s1517_s29 + $0x58] sm:$0xff] (%p1389_p9) }
 0x144   : > { %v614_v61 = vpop.f32.mrf.mxu0  ;;  %v654_v62 = vpop.f32.mrf.mxu1  ;;  %849 = vst [vmem:[%s783_s5 + $0x30] sm:$0xff] (%p1389_p9), %v848_v10  ;;  %865 = vst [vmem:[%s783_s5 + $0xb0] sm:$0xff] (%p1389_p9), %v864_v18 }
 0x145   : > { %v1062_v63 = vpack.c.bf16 %v613_v59, %v611_v57  ;;  %v1070_v0 = vpack.c.bf16 %v653_v60, %v651_v58  ;;  %v615_v3 = vadd.f32 %v614_v61, %v1508_v53  ;;  %v655_v4 = vadd.f32 %v654_v62, %v1508_v53  ;;  %v842_v53 = vld [vmem:[%s1517_s29] sm:$0xff] (%p1389_p9) }
 0x146   : > { %v616_v1 = vpop.f32.mrf.mxu0  ;;  %v656_v2 = vpop.f32.mrf.mxu1  ;;  %v850_v11 = vld [vmem:[%s1517_s29 + $0x20] sm:$0xff] (%p1389_p9)  ;;  %843 = vst [vmem:[%s783_s5] sm:$0xff] (%p1389_p9), %v842_v53 }
 0x147   : > { %761 = vst [vmem:[%s1517_s29 + $0x30] sm:$0xff] %v1062_v63  ;;  %769 = vst [vmem:[%s1517_s29 + $0x70] sm:$0xff] %v1070_v0  ;;  %v617_v5 = vadd.f32 %v616_v1, %v1510_v54  ;;  %v657_v6 = vadd.f32 %v656_v2, %v1510_v54  ;;  %777 = sbr.rel (!%p1389_p9) target bundleno = 341 (0x155), region = 40  ;;  %v844_v54 = vld [vmem:[%s1517_s29 + $0x8] sm:$0xff] (%p1389_p9)  ;;  %v866_v19 = vld [vmem:[%s1517_s29 + $0x60] sm:$0xff] (%p1389_p9) }
 0x148   : > { %845 = vst [vmem:[%s783_s5 + $0x10] sm:$0xff] (%p1389_p9), %v844_v54  ;;  %851 = vst [vmem:[%s783_s5 + $0x40] sm:$0xff] (%p1389_p9), %v850_v11 }
 0x149   : > { %v1063_v7 = vpack.c.bf16 %v617_v5, %v615_v3  ;;  %v1071_v8 = vpack.c.bf16 %v657_v6, %v655_v4  ;;  %867 = vst [vmem:[%s783_s5 + $0xc0] sm:$0xff] (%p1389_p9), %v866_v19 }
 0x14a   : > { %v852_v12 = vld [vmem:[%s1517_s29 + $0x28] sm:$0xff] (%p1389_p9) }
 0x14b   : > { %762 = vst [vmem:[%s1517_s29 + $0x38] sm:$0xff] %v1063_v7  ;;  %770 = vst [vmem:[%s1517_s29 + $0x78] sm:$0xff] %v1071_v8  ;;  %v868_v20 = vld [vmem:[%s1517_s29 + $0x68] sm:$0xff] (%p1389_p9) }
 0x14c   : > { %853 = vst [vmem:[%s783_s5 + $0x50] sm:$0xff] %v852_v12  ;;  %869 = vst [vmem:[%s783_s5 + $0xd0] sm:$0xff] %v868_v20 }
 0x14e   : > { %v854_v13 = vld [vmem:[%s1517_s29 + $0x30] sm:$0xff] }
 0x14f   : > { %855 = vst [vmem:[%s783_s5 + $0x60] sm:$0xff] %v854_v13  ;;  %v870_v21 = vld [vmem:[%s1517_s29 + $0x70] sm:$0xff] }
 0x150   : > { %871 = vst [vmem:[%s783_s5 + $0xe0] sm:$0xff] %v870_v21 }
 0x152   : > { %v856_v14 = vld [vmem:[%s1517_s29 + $0x38] sm:$0xff] }
 0x153   : > { %857 = vst [vmem:[%s783_s5 + $0x70] sm:$0xff] %v856_v14  ;;  %v872_v22 = vld [vmem:[%s1517_s29 + $0x78] sm:$0xff] }
 0x154   : > { %873 = vst [vmem:[%s783_s5 + $0xf0] sm:$0xff] %v872_v22 }
 0x155 PF: > { %s16_s17 = sadd.s32 1, %s1313_s17   ;;  %s1611_s12 = smov %s1297_s13 }
 0x156   : > { %p13_p9 = scmp.ge.s32.totalorder %s16_s17, 4   ;;  %s1612_s13 = smov %s1301_s14 }
 0x157   : > { %s1613_s14 = smov %s1387_s24  ;;  %s1614_s15 = smov %s1309_s16 }
 0x158   : > { %s1615_s16 = smov %s1617_s19  ;;  %15 = sbr.rel (!%p13_p9) target bundleno = 4 (0x4), region = 116 }
 0x15d   :  { %889 = vsyncpa [#allocation3], 1 }
 0x15e   :  { %891 = vsyncpa [#allocation3 + $0x1], 1 }

// kernel: up_forward.3
= control target key start
LH: loop header
LB: loop body
LE: loop exit
PB: predicated region body
PF: predicated region fallthrough
CT: control target
= control target key end

     0   :  { %s11722_s24 = smov 0   ;;  %s16099_s0 = inlined_call_operand.vmem [shape: bf16[2,18,18,256], index: 0, kind: input, shape index: {}]   ;;  %s16100_s1 = inlined_call_operand.vmem [shape: bf16[9,256,128], index: 1, kind: input, shape index: {}]   ;;  %s16101_s2 = inlined_call_operand.vmem [shape: f32[1,128], index: 2, kind: input, shape index: {}]   ;;  %s16102_s3 = inlined_call_operand.vmem [shape: f32[1,128], index: 3, kind: input, shape index: {}]   ;;  %s16103_s4 = inlined_call_operand.vmem [shape: bf16[9,128,128], index: 4, kind: input, shape index: {}]   ;;  %s16104_s5 = inlined_call_operand.vmem [shape: f32[1,128], index: 5, kind: input, shape index: {}]   ;;  %s16105_s6 = inlined_call_operand.vmem [shape: f32[1,128], index: 6, kind: input, shape index: {}]   ;;  %s16106_s7 = inlined_call_operand.vmem [shape: bf16[2,16,16,128], index: 7, kind: output, shape index: {}]  }
   0x1 LB: > { %s8612_s25 = sadd.s32 4294967295, %s11679_s24   ;;  %p8616_p0 = scmp.ge.s32.totalorder %s11679_s24, 1  ;;  %s11679_s24 = sphi %s11722_s24, %s17_s24  }
   0x2   : > { %p237_p1 = scmp.lt.s32.totalorder %s11679_s24, 3 }
   0x4   : > { %p238_p2 = pnand %p8616_p0, %p237_p1 }
   0x6   : > { %241 = sbr.rel (%p238_p2) target bundleno = 1339 (0x53b), region = 48 }
   0xb   : > { %v11330_v0 = vld [vmem:[%s16100_s1 + $0x1f8] sm:$0xff]   ;;  %p269_p3 = scmp.lt.s32.totalorder %s8612_s25, 1  ;;  %v11332_v2 = vld [vmem:[%s16100_s1 + $0x1f0] sm:$0xff]   ;;  %v11334_v4 = vld [vmem:[%s16100_s1 + $0x1e8] sm:$0xff]   ;;  %vm1451_vm0 = vsmask.f32 3328 }
   0xc   : > { %v11331_v1 = vld [vmem:[%s16100_s1 + $0x1b8] sm:$0xff]   ;;  %9648 = vmatprep.subr.bf16.mxu0 %v11330_v0  ;;  %11304 = vmatprep.subr.bf16.mxu1 %v11330_v0  ;;  %v11333_v3 = vld [vmem:[%s16100_s1 + $0x1b0] sm:$0xff]   ;;  %v11335_v5 = vld [vmem:[%s16100_s1 + $0x1a8] sm:$0xff]   ;;  %vm1452_vm1 = vsmask.f32 7440  ;;  %vm3062_vm3 = vcmask 1042432  }
   0xd   : > { %9649 = vmatpush3.bf16.msra.mxu0 %v11331_v1  ;;  %11312 = vmatpush3.bf16.msra.mxu1 %v11331_v1  ;;  %s16542_s25 = smov (!%p269_p3, %s8612_s25), 1  ;;  %v11336_v6 = vld [vmem:[%s16100_s1 + $0x1e0] sm:$0xff]   ;;  %v11338_v8 = vld [vmem:[%s16100_s1 + $0x1d8] sm:$0xff]   ;;  %v11340_v10 = vld [vmem:[%s16100_s1 + $0x1d0] sm:$0xff]   ;;  %vm3063_vm4 = vcmask 1046532   ;;  %vm4425_vm6 = vcmask 1040384  }
   0xe   : > { %9650 = vmatprep.subr.bf16.mxu0 %v11332_v2  ;;  %11305 = vmatprep.subr.bf16.mxu1 %v11332_v2  ;;  %s11320_s17 = smul.u32 432, %s16542_s25  ;;  %v11337_v7 = vld [vmem:[%s16100_s1 + $0x1a0] sm:$0xff]   ;;  %v11339_v9 = vld [vmem:[%s16100_s1 + $0x198] sm:$0xff]   ;;  %v11341_v15 = vld [vmem:[%s16100_s1 + $0x190] sm:$0xff]   ;;  %vm4426_vm7 = vsmask.f32 256 }
   0xf   : > { %v11342_v16 = vld [vmem:[%s16100_s1 + $0x1c8] sm:$0xff]   ;;  %v11344_v18 = vld [vmem:[%s16100_s1 + $0x1c0] sm:$0xff]   ;;  %v11351_v20 = vld [vmem:[%s16100_s1 + $0x78] sm:$0xff]   ;;  %vm4476_vm9 = vsmask.f32 7938  ;;  %vm4944_vm11 = vcmask 1043456  }
  0x10   : > { %s11763_s26 = scalar_lea.vmem %s16099_s0, %s11320_s17  ;;  %v11343_v17 = vld [vmem:[%s16100_s1 + $0x188] sm:$0xff]   ;;  %v11345_v19 = vld [vmem:[%s16100_s1 + $0x180] sm:$0xff]   ;;  %v11352_v21 = vld [vmem:[%s16100_s1 + $0x378] sm:$0xff]   ;;  %vm4622_vm13 = vsmask.f32 4368  ;;  %s9488_s30 = sshll.u32 %s16542_s25, 7 }
  0x11   : > { %9651 = vmatpush3.bf16.msra.mxu0 %v11333_v3  ;;  %11313 = vmatpush3.bf16.msra.mxu1 %v11333_v3  ;;  %v11772_v11 = vld [vmem:[%s11763_s26 + $0x18] sm:$0xff]  ;;  %v11775_v12 = vld [vmem:[%s11763_s26 + $0x20] sm:$0xff]  ;;  %v11806_v23 = vld [vmem:[%s11763_s26 + $0x30] sm:$0xff]  ;;  %s15945_s9 = scalar_lea.vmem %s16106_s7, %s9488_s30 }
  0x12   : > { %9652 = vmatprep.subr.bf16.mxu0 %v11334_v4  ;;  %11306 = vmatprep.subr.bf16.mxu1 %v11334_v4  ;;  %v11779_v13 = vcombine.high %v11772_v11, %v11775_v12  ;;  %v11348_v14 = vld [vmem:[%s11763_s26 + $0x13c] ss:$8 sps:$4 sm:$0xff]   ;;  %v11350_v22 = vld [vmem:[%s11763_s26 + $0x138] ss:$8 sps:$4 sm:$0xff]   ;;  %v11813_v25 = vcombine.low %v11772_v11, %v11775_v12  ;;  %v11355_v28 = vld [vmem:[%s16100_s1 + $0x70] sm:$0xff]  }
  0x13   : > { %765 = vmatprep.mubr.bf16.mxu1 %v11348_v14  ;;  %v11809_v24 = vld [vmem:[%s11763_s26 + $0x38] sm:$0xff]  ;;  %v11356_v30 = vld [vmem:[%s16100_s1 + $0x30] sm:$0xff]   ;;  %v11362_v33 = vld [vmem:[%s16100_s1 + $0x68] sm:$0xff]  }
  0x14   : > { %669 = vmatprep.mubr.bf16.mxu0 %v11779_v13  ;;  %v11353_v26 = vld [vmem:[%s16100_s1 + $0x38] sm:$0xff]   ;;  %v11826_v29 = vcombine.high %v11806_v23, %v11809_v24  ;;  %v11365_v32 = vld [vmem:[%s16100_s1 + $0x370] sm:$0xff]   ;;  %v11843_v35 = vld [vmem:[%s11763_s26 + $0x48] sm:$0xff]  ;;  %v11851_v37 = vcombine.low %v11806_v23, %v11809_v24 }
  0x15   : > { %9653 = vmatpush3.bf16.msra.mxu0 %v11335_v5  ;;  %11314 = vmatpush3.bf16.msra.mxu1 %v11335_v5  ;;  %v11354_v27 = vld [vmem:[%s16100_s1 + $0x338] sm:$0xff]   ;;  %v11367_v34 = vld [vmem:[%s16100_s1 + $0x330] sm:$0xff]   ;;  %v11363_v39 = vld [vmem:[%s16100_s1 + $0x28] sm:$0xff]  }
  0x16   : > { %9654 = vmatprep.subr.bf16.mxu0 %v11336_v6  ;;  %11307 = vmatprep.subr.bf16.mxu1 %v11336_v6  ;;  %v11358_v31 = vld [vmem:[%s11763_s26 + $0x154] ss:$8 sps:$4 sm:$0xff]   ;;  %v11361_v38 = vld [vmem:[%s11763_s26 + $0x150] ss:$8 sps:$4 sm:$0xff]   ;;  %v11364_v40 = vld [vmem:[%s16100_s1 + $0x60] sm:$0xff]  }
  0x17   : > { %v11847_v36 = vld [vmem:[%s11763_s26 + $0x50] sm:$0xff]  ;;  %v11366_v43 = vld [vmem:[%s16100_s1 + $0x20] sm:$0xff]   ;;  %v11383_v44 = vld [vmem:[%s16100_s1 + $0x368] sm:$0xff]  }
  0x18   : > { %v11862_v41 = vcombine.high %v11843_v35, %v11847_v36  ;;  %v11369_v42 = vld [vmem:[%s11763_s26 + $0x16c] ss:$8 sps:$4 sm:$0xff]   ;;  %v11373_v45 = vld [vmem:[%s16100_s1 + $0x58] sm:$0xff]   ;;  %v11876_v46 = vld [vmem:[%s11763_s26 + $0x60] sm:$0xff]  ;;  %v11887_v49 = vcombine.low %v11843_v35, %v11847_v36 }
  0x19   : > { %9655 = vmatpush3.bf16.msra.mxu0 %v11337_v7  ;;  %11315 = vmatpush3.bf16.msra.mxu1 %v11337_v7  ;;  %v11385_v47 = vld [vmem:[%s16100_s1 + $0x328] sm:$0xff]   ;;  %v11374_v51 = vld [vmem:[%s16100_s1 + $0x18] sm:$0xff]   ;;  %v11375_v52 = vld [vmem:[%s16100_s1 + $0x50] sm:$0xff]  }
  0x1a   : > { %9656 = vmatprep.subr.bf16.mxu0 %v11338_v8  ;;  %11308 = vmatprep.subr.bf16.mxu1 %v11338_v8  ;;  %v11883_v48 = vld [vmem:[%s11763_s26 + $0x68] sm:$0xff]  ;;  %v11376_v55 = vld [vmem:[%s16100_s1 + $0x10] sm:$0xff]   ;;  %v11392_v56 = vld [vmem:[%s16100_s1 + $0x360] sm:$0xff]  }
  0x1b   : > { %v11372_v50 = vld [vmem:[%s11763_s26 + $0x168] ss:$8 sps:$4 sm:$0xff]   ;;  %v11898_v53 = vcombine.high %v11876_v46, %v11883_v48  ;;  %v11378_v54 = vld [vmem:[%s11763_s26 + $0x184] ss:$8 sps:$4 sm:$0xff]   ;;  %v11912_v58 = vld [vmem:[%s11763_s26 + $0x78] sm:$0xff]  ;;  %v11932_v0 = vcombine.low %v11876_v46, %v11883_v48 }
  0x1c   : > { %v11382_v57 = vld [vmem:[%s16100_s1 + $0x48] sm:$0xff]   ;;  %v11393_v59 = vld [vmem:[%s16100_s1 + $0x320] sm:$0xff]   ;;  %v11398_v60 = vld [vmem:[%s16100_s1 + $0x358] sm:$0xff]  }
  0x1d   : > { %9657 = vmatpush3.bf16.msra.mxu0 %v11339_v9  ;;  %11316 = vmatpush3.bf16.msra.mxu1 %v11339_v9  ;;  %v11922_v61 = vld [vmem:[%s11763_s26 + $0x80] sm:$0xff]  ;;  %v11928_v63 = vld [vmem:[%s11763_s26 + $0x8] sm:$0xff]  ;;  %v11399_v7 = vld [vmem:[%s16100_s1 + $0x318] sm:$0xff]  }
  0x1e   : > { %9658 = vmatprep.subr.bf16.mxu0 %v11340_v10  ;;  %11309 = vmatprep.subr.bf16.mxu1 %v11340_v10  ;;  %v11925_v62 = vld [vmem:[%s11763_s26] sm:$0xff]  ;;  %v11384_v2 = vld [vmem:[%s16100_s1 + $0x8] sm:$0xff]   ;;  %v11940_v3 = vcombine.high %v11912_v58, %v11922_v61  ;;  %v11402_v8 = vld [vmem:[%s16100_s1 + $0x350] sm:$0xff]  }
  0x1f   : > { %v11381_v1 = vld [vmem:[%s11763_s26 + $0x180] ss:$8 sps:$4 sm:$0xff]   ;;  %v8701_v5 = vcombine.high %v11925_v62, %v11928_v63  ;;  %v11959_v9 = vld [vmem:[%s11763_s26 + $0x90] sm:$0xff]  ;;  %v11962_v10 = vld [vmem:[%s11763_s26 + $0x98] sm:$0xff] }
  0x20   : > { %v11386_v4 = vld [vmem:[%s16100_s1 + $0x40] sm:$0xff]   ;;  %v11403_v14 = vld [vmem:[%s16100_s1 + $0x310] sm:$0xff]   ;;  %vm12291_vm2 = vmor %vm1451_vm0, %vm1452_vm1 }
  0x21   : > { %9659 = vmatpush3.bf16.msra.mxu0 %v11341_v15  ;;  %11317 = vmatpush3.bf16.msra.mxu1 %v11341_v15  ;;  %v11387_v6 = vld [vmem:[%s16100_s1] sm:$0xff]   ;;  %v8700_v15 = vcombine.low %v11925_v62, %v11928_v63  ;;  %vm12995_vm5 = vmor %vm3062_vm3, %vm3063_vm4 }
  0x22   : > { %9660 = vmatprep.subr.bf16.mxu0 %v11342_v16  ;;  %11310 = vmatprep.subr.bf16.mxu1 %v11342_v16  ;;  %v11971_v16 = vcombine.low %v11912_v58, %v11922_v61  ;;  %vm13673_vm8 = vmand %vm4425_vm6, %vm4426_vm7 }
  0x23   : > { %vm13686_vm10 = vmand %vm4425_vm6, %vm4476_vm9 }
  0x24   : > { %vm14064_vm12 = vmand %vm4944_vm11, %vm4476_vm9 }
  0x25   : > { %9661 = vmatpush3.bf16.msra.mxu0 %v11343_v17  ;;  %11318 = vmatpush3.bf16.msra.mxu1 %v11343_v17  ;;  %v11975_v17 = vcombine.high %v11959_v9, %v11962_v10  ;;  %vm14080_vm14 = vmor %vm4426_vm7, %vm4622_vm13 }
  0x26   : > { %9662 = vmatprep.subr.bf16.mxu0 %v11344_v18  ;;  %11311 = vmatprep.subr.bf16.mxu1 %v11344_v18  ;;  %v11410_v18 = vld [vmem:[%s16100_s1 + $0x348] sm:$0xff]  }
  0x29   : > { %9663 = vmatpush3.bf16.msra.mxu0 %v11345_v19  ;;  %11319 = vmatpush3.bf16.msra.mxu1 %v11345_v19  ;;  %v11411_v19 = vld [vmem:[%s16100_s1 + $0x308] sm:$0xff]  }
  0x2a   : > { %9760 = vmatprep.subr.bf16.mxu1 %v11351_v20  ;;  %9872 = vmatprep.subr.bf16.mxu0 %v11352_v21  ;;  %v11415_v20 = vld [vmem:[%s16100_s1 + $0x340] sm:$0xff]   ;;  %v11420_v21 = vld [vmem:[%s16100_s1 + $0xf8] sm:$0xff]  }
  0x2c   : > { %670 = vmatmul.mubr.bf16.vlgmr.msra.gmra.mxu0 %v11813_v25  ;;  %766 = vmatmul.mubr.bf16.vlgmr.msra.gmra.mxu1 %v11350_v22  ;;  %v11991_v22 = vld [vmem:[%s11763_s26 + $0xa8] sm:$0xff] }
  0x2d   : > { %9761 = vmatpush3.bf16.msra.mxu1 %v11353_v26  ;;  %9873 = vmatpush3.bf16.msra.mxu0 %v11354_v27  ;;  %v11421_v26 = vld [vmem:[%s16100_s1 + $0xb8] sm:$0xff]   ;;  %v11999_v27 = vld [vmem:[%s11763_s26 + $0xb0] sm:$0xff] }
  0x2e   : > { %9762 = vmatprep.subr.bf16.mxu1 %v11355_v28  ;;  %677 = vmatprep.mubr.bf16.mxu0 %v11826_v29  ;;  %v11416_v28 = vld [vmem:[%s16100_s1 + $0x300] sm:$0xff]  }
  0x2f   : > { %773 = vmatprep.mubr.bf16.mxu1 %v11358_v31  ;;  %9874 = vmatprep.subr.bf16.mxu0 %v11365_v32  ;;  %v12009_v31 = vcombine.low %v11959_v9, %v11962_v10  ;;  %v12016_v32 = vcombine.high %v11991_v22, %v11999_v27 }
  0x31   : > { %9763 = vmatpush3.bf16.msra.mxu1 %v11356_v30  ;;  %9875 = vmatpush3.bf16.msra.mxu0 %v11367_v34  ;;  %v11424_v30 = vld [vmem:[%s16100_s1 + $0xf0] sm:$0xff]   ;;  %v11428_v34 = vld [vmem:[%s16100_s1 + $0xe8] sm:$0xff]  }
  0x32   : > { %9764 = vmatprep.subr.bf16.mxu1 %v11362_v33  ;;  %9876 = vmatprep.subr.bf16.mxu0 %v11383_v44  ;;  %v11422_v33 = vld [vmem:[%s16100_s1 + $0x278] sm:$0xff]  }
  0x34   : > { %678 = vmatmul.mubr.bf16.gmra.mxu0 %v11851_v37  ;;  %774 = vmatmul.mubr.bf16.gmra.mxu1 %v11361_v38  ;;  %v11429_v38 = vld [vmem:[%s16100_s1 + $0xa8] sm:$0xff]  }
  0x35   : > { %9765 = vmatpush3.bf16.msra.mxu1 %v11363_v39  ;;  %685 = vmatprep.mubr.bf16.mxu0 %v11862_v41  ;;  %v12032_v39 = vld [vmem:[%s11763_s26 + $0xc0] sm:$0xff] }
  0x36   : > { %9766 = vmatprep.subr.bf16.mxu1 %v11364_v40  ;;  %781 = vmatprep.mubr.bf16.mxu1 %v11369_v42  ;;  %v12035_v40 = vld [vmem:[%s11763_s26 + $0xc8] sm:$0xff]  ;;  %v11432_v42 = vld [vmem:[%s16100_s1 + $0xe0] sm:$0xff]  }
  0x37   : > { %9877 = vmatpush3.bf16.msra.mxu0 %v11385_v47  ;;  %v12049_v44 = vcombine.high %v12032_v39, %v12035_v40  ;;  %v11436_v47 = vld [vmem:[%s16100_s1 + $0x98] sm:$0xff]  }
  0x38   : > { %9878 = vmatprep.subr.bf16.mxu0 %v11392_v56  ;;  %v11441_v56 = vld [vmem:[%s16100_s1 + $0x88] sm:$0xff]  }
  0x39   : > { %9767 = vmatpush3.bf16.msra.mxu1 %v11366_v43  ;;  %v11433_v43 = vld [vmem:[%s16100_s1 + $0xa0] sm:$0xff]  }
  0x3a   : > { %9768 = vmatprep.subr.bf16.mxu1 %v11373_v45  ;;  %v11434_v45 = vld [vmem:[%s16100_s1 + $0xd8] sm:$0xff]  }
  0x3b   : > { %9879 = vmatpush3.bf16.msra.mxu0 %v11393_v59  ;;  %v11443_v59 = vld [vmem:[%s16100_s1 + $0x80] sm:$0xff]  }
  0x3c   : > { %686 = vmatmul.mubr.bf16.gmra.mxu0 %v11887_v49  ;;  %782 = vmatmul.mubr.bf16.gmra.mxu1 %v11372_v50  ;;  %v11438_v50 = vld [vmem:[%s16100_s1 + $0xd0] sm:$0xff]  }
  0x3d   : > { %9769 = vmatpush3.bf16.msra.mxu1 %v11374_v51  ;;  %693 = vmatprep.mubr.bf16.mxu0 %v11898_v53  ;;  %v11439_v51 = vld [vmem:[%s16100_s1 + $0x90] sm:$0xff]  }
  0x3e   : > { %9770 = vmatprep.subr.bf16.mxu1 %v11375_v52  ;;  %789 = vmatprep.mubr.bf16.mxu1 %v11378_v54  ;;  %v12069_v52 = vcombine.low %v12032_v39, %v12035_v40  ;;  %v12072_v54 = vld [vmem:[%s11763_s26 + $0xdc] ss:$8 sps:$4 sm:$0xff]  }
  0x3f   : > { %9880 = vmatprep.subr.bf16.mxu0 %v11398_v60  ;;  %v12091_v60 = vld [vmem:[%s11763_s26 + $0xd8] ss:$8 sps:$4 sm:$0xff]  }
  0x40   : > { %9881 = vmatpush3.bf16.msra.mxu0 %v11399_v7  ;;  %v12121_v7 = vld [vmem:[%s11763_s26 + $0x120] ss:$8 sps:$4 sm:$0xff]  }
  0x41   : > { %9771 = vmatpush3.bf16.msra.mxu1 %v11376_v55  ;;  %9882 = vmatprep.subr.bf16.mxu0 %v11402_v8  ;;  %v11440_v55 = vld [vmem:[%s16100_s1 + $0xc8] sm:$0xff]   ;;  %v11423_v8 = vld [vmem:[%s16100_s1 + $0x238] sm:$0xff]  }
  0x42   : > { %9772 = vmatprep.subr.bf16.mxu1 %v11382_v57  ;;  %v11442_v57 = vld [vmem:[%s16100_s1 + $0xc0] sm:$0xff]  }
  0x44   : > { %694 = vmatmul.mubr.bf16.gmra.mxu0 %v11932_v0  ;;  %790 = vmatmul.mubr.bf16.gmra.mxu1 %v11381_v1  ;;  %v12094_v1 = vld [vmem:[%s11763_s26 + $0xf4] ss:$8 sps:$4 sm:$0xff]  }
  0x45   : > { %9773 = vmatpush3.bf16.msra.mxu1 %v11384_v2  ;;  %701 = vmatprep.mubr.bf16.mxu0 %v11940_v3  ;;  %v12101_v2 = vld [vmem:[%s11763_s26 + $0xf0] ss:$8 sps:$4 sm:$0xff]  }
  0x46   : > { %9774 = vmatprep.subr.bf16.mxu1 %v11386_v4  ;;  %936 = vmatprep.mubr.bf16.mxu1 %v8701_v5  ;;  %v12104_v4 = vld [vmem:[%s11763_s26 + $0x10c] ss:$8 sps:$4 sm:$0xff]   ;;  %v12111_v5 = vld [vmem:[%s11763_s26 + $0x108] ss:$8 sps:$4 sm:$0xff]  }
  0x47   : > { %9883 = vmatpush3.bf16.msra.mxu0 %v11403_v14  ;;  %v11426_v14 = vld [vmem:[%s16100_s1 + $0x270] sm:$0xff]  }
  0x48   : > { %9884 = vmatprep.subr.bf16.mxu0 %v11410_v18  ;;  %v11430_v18 = vld [vmem:[%s16100_s1 + $0x268] sm:$0xff]  }
  0x49   : > { %9775 = vmatpush3.bf16.msra.mxu1 %v11387_v6  ;;  %v12114_v6 = vld [vmem:[%s11763_s26 + $0x124] ss:$8 sps:$4 sm:$0xff]  }
  0x4a   : > { %9984 = vmatprep.subr.bf16.mxu1 %v11420_v21  ;;  %v11437_v21 = vld [vmem:[%s16100_s1 + $0x220] sm:$0xff]  }
  0x4b   : > { %9885 = vmatpush3.bf16.msra.mxu0 %v11411_v19  ;;  %v11435_v19 = vld [vmem:[%s16100_s1 + $0x260] sm:$0xff]  }
  0x4c   : > { %702 = vmatmul.mubr.bf16.gmra.mxu0 %v11971_v16  ;;  %937 = vmatmul.mubr.bf16.vlgmr.msra.gmra.mxu1 %v8700_v15  ;;  %v11455_v15 = vld [vmem:[%s16100_s1 + $0x3f8] sm:$0xff]  }
  0x4d   : > { %709 = vmatprep.mubr.bf16.mxu0 %v11975_v17  ;;  %944 = vmatprep.mubr.bf16.mxu1 %v11779_v13  ;;  %v11425_v13 = vld [vmem:[%s16100_s1 + $0xb0] sm:$0xff]  }
  0x4e   : > { %9985 = vmatpush3.bf16.msra.mxu1 %v11421_v26  ;;  %9886 = vmatprep.subr.bf16.mxu0 %v11415_v20  ;;  %v1458_v20 = vshll.u32 %v11925_v62, 16  ;;  %v11444_v26 = vld [vmem:[%s16100_s1 + $0x258] sm:$0xff]  }
  0x4f   : > { %9986 = vmatprep.subr.bf16.mxu1 %v11424_v30  ;;  %9887 = vmatpush3.bf16.msra.mxu0 %v11416_v28  ;;  %v1464_v30 = vshll.u32 %v11928_v63, 16 }
  0x50   : > { %10096 = vmatprep.subr.bf16.mxu0 %v11422_v33  ;;  %v11445_v33 = vld [vmem:[%s16100_s1 + $0x218] sm:$0xff]  }
  0x52   : > { %9987 = vmatpush3.bf16.msra.mxu1 %v11425_v13  ;;  %v1479_v13 = vshrl.u32 %v11772_v11, 16 }
  0x53   : > { %9988 = vmatprep.subr.bf16.mxu1 %v11428_v34  ;;  %v1488_v34 = vshll.u32 %v11775_v12, 16 }
  0x54   : > { %710 = vmatmul.mubr.bf16.gmra.mxu0 %v12009_v31  ;;  %945 = vmatmul.mubr.bf16.gmra.mxu1 %v11813_v25  ;;  %v12042_v25 = vcombine.low %v11991_v22, %v11999_v27 }
  0x55   : > { %717 = vmatprep.mubr.bf16.mxu0 %v12016_v32  ;;  %952 = vmatprep.mubr.bf16.mxu1 %v11826_v29 }
  0x56   : > { %9989 = vmatpush3.bf16.msra.mxu1 %v11429_v38  ;;  %v1492_v38 = vshrl.u32 %v11775_v12, 16  ;;  %v12184_v12 = vrot.slane %v1464_v30, 5 }
  0x57   : > { %9990 = vmatprep.subr.bf16.mxu1 %v11432_v42  ;;  %v1503_v42 = vshrl.u32 %v11806_v23, 16 }
  0x5a   : > { %9991 = vmatpush3.bf16.msra.mxu1 %v11433_v43  ;;  %v1506_v43 = vshll.u32 %v11806_v23, 16  ;;  %v1481_v23 = vrot.slane %v1479_v13, 4 }
  0x5b   : > { %9992 = vmatprep.subr.bf16.mxu1 %v11434_v45  ;;  %v1516_v45 = vshrl.u32 %v11809_v24, 16 }
  0x5c   : > { %718 = vmatmul.mubr.bf16.gmra.mxu0 %v12042_v25  ;;  %953 = vmatmul.mubr.bf16.gmra.mxu1 %v11851_v37 }
  0x5d   : > { %725 = vmatprep.mubr.bf16.mxu0 %v12049_v44  ;;  %960 = vmatprep.mubr.bf16.mxu1 %v11862_v41 }
  0x5e   : > { %9993 = vmatpush3.bf16.msra.mxu1 %v11436_v47 }
  0x5f   : > { %9994 = vmatprep.subr.bf16.mxu1 %v11438_v50 }
  0x62   : > { %9995 = vmatpush3.bf16.msra.mxu1 %v11439_v51  ;;  %v12186_v51 = vrot.slane %v1488_v34, 5 }
  0x63   : > { %9996 = vmatprep.subr.bf16.mxu1 %v11440_v55 }
  0x64   : > { %726 = vmatmul.mubr.bf16.gmra.mxu0 %v12069_v52  ;;  %961 = vmatmul.mubr.bf16.gmra.mxu1 %v11887_v49 }
  0x65   : > { %733 = vmatprep.mubr.bf16.mxu0 %v12072_v54  ;;  %968 = vmatprep.mubr.bf16.mxu1 %v11898_v53 }
  0x66   : > { %9997 = vmatpush3.bf16.msra.mxu1 %v11441_v56  ;;  %v1494_v56 = vrot.slane %v1492_v38, 4 }
  0x67   : > { %9998 = vmatprep.subr.bf16.mxu1 %v11442_v57  ;;  %v1508_v57 = vrot.slane %v1506_v43, 5 }
  0x6a   : > { %9999 = vmatpush3.bf16.msra.mxu1 %v11443_v59 }
  0x6b   : > { %10208 = vmatprep.subr.bf16.mxu1 %v11455_v15  ;;  %v1530_v15 = vshll.u32 %v11843_v35, 16 }
  0x6c   : > { %734 = vmatmul.mubr.bf16.gmra.mxu0 %v12091_v60  ;;  %969 = vmatmul.mubr.bf16.gmra.mxu1 %v11932_v0 }
  0x6d   : > { %741 = vmatprep.mubr.bf16.mxu0 %v12094_v1  ;;  %976 = vmatprep.mubr.bf16.mxu1 %v11940_v3 }
  0x74   : > { %742 = vmatmul.mubr.bf16.gmra.mxu0 %v12101_v2  ;;  %977 = vmatmul.mubr.bf16.gmra.mxu1 %v11971_v16 }
  0x75   : > { %749 = vmatprep.mubr.bf16.mxu0 %v12104_v4  ;;  %984 = vmatprep.mubr.bf16.mxu1 %v11975_v17 }
  0x7c   : > { %750 = vmatmul.mubr.bf16.gmra.mxu0 %v12111_v5  ;;  %985 = vmatmul.mubr.bf16.gmra.mxu1 %v12009_v31 }
  0x7d   : > { %757 = vmatprep.mubr.bf16.mxu0 %v12114_v6  ;;  %992 = vmatprep.mubr.bf16.mxu1 %v12016_v32 }
  0x84   : > { %758 = vmatmul.mubr.bf16.gmra.mxu0 %v12121_v7  ;;  %993 = vmatmul.mubr.bf16.gmra.mxu1 %v12042_v25 }
  0x85   : > { %1000 = vmatprep.mubr.bf16.mxu1 %v12049_v44  ;;  %1236 = vmatprep.mubr.bf16.mxu0 %v11826_v29  ;;  %v11427_v29 = vld [vmem:[%s16100_s1 + $0x230] sm:$0xff]  }
  0x8c   : > { %1001 = vmatmul.mubr.bf16.gmra.mxu1 %v12069_v52  ;;  %1237 = vmatmul.mubr.bf16.vlgmr.msra.gmra.mxu0 %v11851_v37  ;;  %v11431_v37 = vld [vmem:[%s16100_s1 + $0x228] sm:$0xff]  }
  0x8d   : > { %10097 = vmatpush3.bf16.msra.mxu0 %v11423_v8  ;;  %1008 = vmatprep.mubr.bf16.mxu1 %v12072_v54  ;;  %v1518_v8 = vrot.slane %v1516_v45, 4 }
  0x8e   : > { %1244 = vmatprep.mubr.bf16.mxu0 %v11862_v41  ;;  %10098 = vmatprep.subr.bf16.mxu0 %v11426_v14  ;;  %v1455_v41 = vshrl.u32 %v11925_v62, 16  ;;  %v1468_v62 = vshrl.u32 %v11928_v63, 16  ;;  %v11446_v63 = vld [vmem:[%s16100_s1 + $0x250] sm:$0xff]   ;;  %v1527_v14 = vshrl.u32 %v11843_v35, 16 }
  0x90   : > { %v1457_v28 = vrot.slane %v1455_v41, 4  ;;  %v1470_v47 = vrot.slane %v1468_v62, 4  ;;  %v11451_v62 = vld [vmem:[%s16100_s1 + $0x200] sm:$0xff]  }
  0x91   : > { %10099 = vmatpush3.bf16.msra.mxu0 %v11427_v29 }
  0x92   : > { %10100 = vmatprep.subr.bf16.mxu0 %v11430_v18  ;;  %v1471_v29 = vor.u32 %v1470_v47, %v12184_v12  ;;  %v11449_v18 = vld [vmem:[%s16100_s1 + $0x208] sm:$0xff]   ;;  %v1408_v47 = vld [vmem:[%s11763_s26 + $0x58] sm:$0x11] }
  0x94   : > { %1009 = vmatmul.mubr.bf16.gmra.mxu1 %v12091_v60  ;;  %1245 = vmatmul.mubr.bf16.gmra.mxu0 %v11887_v49  ;;  %v1460_v49 = vrot.slane %v1458_v20, 5  ;;  %v1495_v20 = vor.u32 %v1494_v56, %v12186_v51  ;;  %v12214_v30 = vrot.slane %v1471_v29, 4  ;;  %v1588_v29 = vshrl.u32 %v11922_v61, 16 }
  0x95   : > { %1016 = vmatprep.mubr.bf16.mxu1 %v12094_v1  ;;  %1252 = vmatprep.mubr.bf16.mxu0 %v11898_v53  ;;  %v1482_v53 = vshll.u32 %v11772_v11, 16  ;;  %v1512_v11 = vshll.u32 %v11809_v24, 16  ;;  %v1505_v24 = vrot.slane %v1503_v42, 4  ;;  %v1405_v42 = vld [vmem:[%s11763_s26 + $0x40] sm:$0x11] }
  0x96   : > { %10101 = vmatpush3.bf16.msra.mxu0 %v11431_v37  ;;  %v1461_v55 = vor.u32 %v1460_v49, %v1457_v28  ;;  %v1399_v37 = vld [vmem:[%s11763_s26 + $0x10] sm:$0x11]  ;;  %v1529_v28 = vrot.slane %v1527_v14, 4  ;;  %v1532_v49 = vrot.slane %v1530_v15, 5  ;;  %v12225_v34 = vrot.slane %v1495_v20, 4 }
  0x97   : > { %10102 = vmatprep.subr.bf16.mxu0 %v11435_v19  ;;  %v1484_v50 = vrot.slane %v1482_v53, 5  ;;  %v12194_v59 = vrot.slane %v1512_v11, 5  ;;  %v1509_v35 = vor.u32 %v1508_v57, %v1505_v24  ;;  %v1474_v13 = vshll.u32 %v1399_v37, 16  ;;  %v11457_v53 = vld [vmem:[%s16100_s1 + $0x178] sm:$0xff]  }
  0x98   : > { %v12203_v19 = vrot.slane %v1461_v55, 4  ;;  %v1533_v43 = vor.u32 %v1532_v49, %v1529_v28  ;;  %v1536_v11 = vshll.u32 %v11847_v36, 16  ;;  %v12242_v55 = vld [vmem:[%s11763_s26 + $0x13c] ss:$8 sps:$4 sm:$0xff]   ;;  %v1522_v56 = vshll.u32 %v1405_v42, 16 }
  0x99   : > { %v1485_v41 = vor.u32 %v1484_v50, %v1481_v23  ;;  %v12233_v45 = vrot.slane %v1474_v13, 5  ;;  %v1540_v23 = vshrl.u32 %v11847_v36, 16  ;;  %v1551_v50 = vshrl.u32 %v11876_v46, 16  ;;  %v12268_v13 = vld [vmem:[%s11763_s26 + $0x138] ss:$8 sps:$4 sm:$0xff]  }
  0x9a   : > { %10103 = vmatpush3.bf16.msra.mxu0 %v11437_v21  ;;  %v11450_v21 = vld [vmem:[%s16100_s1 + $0x240] sm:$0xff]   ;;  %v12246_v24 = vrot.slane %v1533_v43, 4  ;;  %v1560_v36 = vshll.u32 %v11883_v48, 16  ;;  %v1564_v57 = vshrl.u32 %v11883_v48, 16  ;;  %v1584_v15 = vshll.u32 %v11922_v61, 16 }
  0x9b   : > { %10104 = vmatprep.subr.bf16.mxu0 %v11444_v26  ;;  %v1519_v26 = vor.u32 %v1518_v8, %v12194_v59  ;;  %v1578_v8 = vshll.u32 %v11912_v58, 16  ;;  %v1542_v14 = vrot.slane %v1540_v23, 4  ;;  %v1599_v37 = vshrl.u32 %v11959_v9, 16  ;;  %v1414_v42 = vld [vmem:[%s11763_s26 + $0x88] sm:$0x11] }
  0x9c   : > { %1017 = vmatmul.mubr.bf16.gmra.mxu1 %v12101_v2  ;;  %1253 = vmatmul.mubr.bf16.gmra.mxu0 %v11932_v0  ;;  %v11447_v0 = vld [vmem:[%s16100_s1 + $0x210] sm:$0xff]   ;;  %v12260_v20 = vrot.slane %v1560_v36, 5  ;;  %v12263_v28 = vrot.slane %v1584_v15, 5  ;;  %v1590_v49 = vrot.slane %v1588_v29, 4  ;;  %v1612_v61 = vshrl.u32 %v11962_v10, 16 }
  0x9d   : > { %1024 = vmatprep.mubr.bf16.mxu1 %v12104_v4  ;;  %1260 = vmatprep.mubr.bf16.mxu0 %v11940_v3  ;;  %v11448_v3 = vld [vmem:[%s16100_s1 + $0x248] sm:$0xff]   ;;  %v12229_v38 = vrot.slane %v1519_v26, 4  ;;  %v1580_v26 = vrot.slane %v1578_v8, 5  ;;  %v1623_v43 = vshrl.u32 %v11991_v22, 16  ;;  %v12283_v23 = vrot.slane %v1522_v56, 5 }
  0x9e   : > { %10105 = vmatpush3.bf16.msra.mxu0 %v11445_v33  ;;  %v12223_v33 = vrot.slane %v1485_v41, 4  ;;  %v1602_v41 = vshll.u32 %v11959_v9, 16  ;;  %v1601_v9 = vrot.slane %v1599_v37, 4  ;;  %v1594_v8 = vshll.u32 %v1414_v42, 16 }
  0x9f   : > { %10106 = vmatprep.subr.bf16.mxu0 %v11446_v63  ;;  %v1632_v15 = vshll.u32 %v11999_v27, 16  ;;  %v1636_v29 = vshrl.u32 %v11999_v27, 16  ;;  %v1477_v27 = vsel %vm12291_vm2, %v12214_v30, %v12233_v45 }
  0xa1   : > { %v12334_v45 = vrot.slane %v1632_v15, 5  ;;  %v11464_v15 = vld [vmem:[%s16100_s1 + $0x3a8] sm:$0xff]  }
  0xa2   : > { %10107 = vmatpush3.bf16.msra.mxu0 %v11447_v0  ;;  %v1554_v0 = vshll.u32 %v11876_v46, 16  ;;  %v1575_v46 = vshrl.u32 %v11912_v58, 16 }
  0xa3   : > { %10108 = vmatprep.subr.bf16.mxu0 %v11448_v3  ;;  %v12252_v3 = vrot.slane %v1536_v11, 5 }
  0xa4   : > { %1025 = vmatmul.mubr.bf16.gmra.mxu1 %v12111_v5  ;;  %1261 = vmatmul.mubr.bf16.gmra.mxu0 %v11971_v16  ;;  %v1402_v16 = vld [vmem:[%s11763_s26 + $0x28] sm:$0x11]  ;;  %v1556_v48 = vrot.slane %v1554_v0, 5  ;;  %v1577_v58 = vrot.slane %v1575_v46, 4  ;;  %v1591_v46 = vor.u32 %v1590_v49, %v12263_v28 }
  0xa5   : > { %1032 = vmatprep.mubr.bf16.mxu1 %v12114_v6  ;;  %1268 = vmatprep.mubr.bf16.mxu0 %v11975_v17  ;;  %v12227_v17 = vrot.slane %v1509_v35, 4  ;;  %v1498_v63 = vshll.u32 %v1402_v16, 16  ;;  %v1411_v35 = vld [vmem:[%s11763_s26 + $0x70] sm:$0x11]  ;;  %v1604_v16 = vrot.slane %v1602_v41, 5 }
  0xa6   : > { %10109 = vmatpush3.bf16.msra.mxu0 %v11449_v18  ;;  %v1553_v18 = vrot.slane %v1551_v50, 4  ;;  %v1570_v11 = vshll.u32 %v1411_v35, 16  ;;  %v12305_v35 = vld [vmem:[%s11763_s26 + $0x150] ss:$8 sps:$4 sm:$0xff]  }
  0xa7   : > { %10110 = vmatprep.subr.bf16.mxu0 %v11450_v21  ;;  %v1566_v21 = vrot.slane %v1564_v57, 4  ;;  %v1581_v57 = vor.u32 %v1580_v26, %v1577_v58  ;;  %v1605_v56 = vor.u32 %v1604_v16, %v1601_v9  ;;  %v1467_v58 = vsel %vm12291_vm2, %v12203_v19, %v12184_v12 }
  0xa8   : > { %v1557_v0 = vor.u32 %v1556_v48, %v1553_v18  ;;  %v12300_v48 = vrot.slane %v1570_v11, 5  ;;  %v12330_v12 = vrot.slane %v1594_v8, 5  ;;  %v1638_v9 = vrot.slane %v1636_v29, 4 }
  0xa9   : > { %v1567_v36 = vor.u32 %v1566_v21, %v12260_v20  ;;  %v1420_v21 = vld [vmem:[%s11763_s26 + $0xb8] sm:$0x11]  ;;  %v12332_v19 = vrot.slane %v1605_v56, 4 }
  0xaa   : > { %10111 = vmatpush3.bf16.msra.mxu0 %v11451_v62  ;;  %v1608_v62 = vshll.u32 %v11962_v10, 16  ;;  %v1626_v10 = vshll.u32 %v11991_v22, 16  ;;  %v16155_v22 = vmov 0  ;;  %v12317_v26 = vrot.slane %v1557_v0, 4  ;;  %v11456_v56 = vld [vmem:[%s16100_s1 + $0x3b8] sm:$0xff]  }
  0xab   : > { %10320 = vmatprep.subr.bf16.mxu0 %v11457_v53  ;;  %v12273_v53 = vld [vmem:[%s11763_s26 + $0x154] ss:$8 sps:$4 sm:$0xff]   ;;  %v16156_v22 = vsel %vm12291_vm2, 4294967295, %v16155_v22  ;;  %v12319_v49 = vrot.slane %v1567_v36, 4  ;;  %v1642_v16 = vshll.u32 %v1420_v21, 16  ;;  %v1650_v0 = vshll.u32 %v12032_v39, 16 }
  0xac   : > { %1033 = vmatmul.mubr.bf16.gmra.mxu1 %v12121_v7  ;;  %1269 = vmatmul.mubr.bf16.gmra.mxu0 %v12009_v31  ;;  %v12250_v31 = vrot.slane %v1498_v63, 5  ;;  %v1543_v63 = vor.u32 %v1542_v14, %v12252_v3  ;;  %16157 = vst [vmem:[#allocation3_spill] sm:$0xff] %v16156_v22  ;;  %v1625_v14 = vrot.slane %v1623_v43, 4  ;;  %v12348_v36 = vld [vmem:[%s11763_s26 + $0x168] ss:$8 sps:$4 sm:$0xff]  }
  0xad   : > { %1040 = vmatprep.mubr.bf16.mxu1 %v12242_v55  ;;  %1276 = vmatprep.mubr.bf16.mxu0 %v12016_v32  ;;  %v1546_v32 = vshll.u32 %v1408_v47, 16  ;;  %v12281_v47 = vrot.slane %v1608_v62, 5  ;;  %v12322_v62 = vld [vmem:[%s11763_s26 + $0x16c] ss:$8 sps:$4 sm:$0xff]   ;;  %v12343_v11 = vrot.slane %v1642_v16, 5  ;;  %v1424_v16 = vld [vmem:[%s11763_s26 + $0xd8] sm:$0xff] }
  0xae   : > { %v12298_v18 = vrot.slane %v1543_v63, 4  ;;  %v1639_v63 = vor.u32 %v1638_v9, %v12334_v45 }
  0xaf   : > { %v12285_v50 = vrot.slane %v1546_v32, 5  ;;  %v1628_v32 = vrot.slane %v1626_v10, 5  ;;  %v8801_v10 = vcombine.high %v1467_v58, %v1477_v27 }
  0xb1   : > { %v1629_v30 = vor.u32 %v1628_v32, %v1625_v14 }
  0xb4   : > { %1041 = vmatmul.mubr.bf16.gmra.mxu1 %v12268_v13  ;;  %1277 = vmatmul.mubr.bf16.gmra.mxu0 %v12042_v25  ;;  %v1614_v25 = vrot.slane %v1612_v61, 4  ;;  %v12328_v61 = vrot.slane %v1591_v46, 4  ;;  %v1656_v46 = vshll.u32 %v12035_v40, 16 }
  0xb5   : > { %1048 = vmatprep.mubr.bf16.mxu1 %v12273_v53  ;;  %1284 = vmatprep.mubr.bf16.mxu0 %v12049_v44  ;;  %v1417_v44 = vld [vmem:[%s11763_s26 + $0xa0] sm:$0x11] }
  0xb6   : > { %v1615_v37 = vor.u32 %v1614_v25, %v12281_v47  ;;  %v1618_v41 = vshll.u32 %v1417_v44, 16  ;;  %v1647_v25 = vshrl.u32 %v12032_v39, 16  ;;  %v1491_v44 = vsel %vm12291_vm2, %v12223_v33, %v12186_v51  ;;  %v11459_v51 = vld [vmem:[%s16100_s1 + $0x3f0] sm:$0xff]  }
  0xb7   : > { %v12361_v39 = vrot.slane %v1639_v63, 4  ;;  %v12378_v33 = vrot.slane %v1650_v0, 5 }
  0xb8   : > { %v12336_v42 = vrot.slane %v1615_v37, 4  ;;  %v12338_v43 = vrot.slane %v1618_v41, 5  ;;  %v12364_v8 = vrot.slane %v1647_v25, 4  ;;  %v11471_v41 = vld [vmem:[%s16100_s1 + $0x398] sm:$0xff]  }
  0xbc   : > { %1049 = vmatmul.mubr.bf16.gmra.mxu1 %v12305_v35  ;;  %1285 = vmatmul.mubr.bf16.gmra.mxu0 %v12069_v52  ;;  %v12326_v52 = vrot.slane %v1581_v57, 4  ;;  %v1501_v57 = vsel %vm12291_vm2, %v12225_v34, %v12250_v31  ;;  %v11460_v34 = vld [vmem:[%s16100_s1 + $0x3b0] sm:$0xff]   ;;  %v11463_v31 = vld [vmem:[%s16100_s1 + $0x3e8] sm:$0xff]  }
  0xbd   : > { %1056 = vmatprep.mubr.bf16.mxu1 %v12322_v62  ;;  %1292 = vmatprep.mubr.bf16.mxu0 %v12072_v54  ;;  %v12340_v54 = vrot.slane %v1629_v30, 4  ;;  %v12370_v14 = vcombine.high %v1491_v44, %v1501_v57  ;;  %v12396_v32 = vcombine.low %v1491_v44, %v1501_v57  ;;  %v11476_v30 = vld [vmem:[%s16100_s1 + $0x388] sm:$0xff]   ;;  %v1611_v57 = vsel %vm12291_vm2, %v12332_v19, %v12281_v47 }
  0xc4   : > { %1057 = vmatmul.mubr.bf16.gmra.mxu1 %v12348_v36  ;;  %1293 = vmatmul.mubr.bf16.gmra.mxu0 %v12091_v60  ;;  %v1660_v60 = vshrl.u32 %v12035_v40, 16  ;;  %v12380_v40 = vrot.slane %v1656_v46, 5 }
  0xc5   : > { %1300 = vmatprep.mubr.bf16.mxu0 %v12094_v1  ;;  %2127 = vmatprep.mubr.bf16.mxu1 %v8801_v10  ;;  %v8800_v1 = vcombine.low %v1467_v58, %v1477_v27  ;;  %v11475_v58 = vld [vmem:[%s16100_s1 + $0x3c8] sm:$0xff]   ;;  %v1425_v10 = vld [vmem:[%s11763_s26 + $0xe0] sm:$0xff] }
  0xcc   : > { %1301 = vmatmul.mubr.bf16.gmra.mxu0 %v12101_v2  ;;  %2128 = vmatmul.mubr.bf16.vlgmr.msra.gmra.mxu1 %v8800_v1  ;;  %v1515_v2 = vsel %vm12291_vm2, %v12227_v17, %v12194_v59  ;;  %v11467_v59 = vld [vmem:[%s16100_s1 + $0x3e0] sm:$0xff]  }
  0xcd   : > { %1308 = vmatprep.mubr.bf16.mxu0 %v12104_v4  ;;  %2135 = vmatprep.mubr.bf16.mxu1 %v12370_v14  ;;  %v1525_v4 = vsel %vm12291_vm2, %v12229_v38, %v12283_v23  ;;  %v11468_v17 = vld [vmem:[%s16100_s1 + $0x3a0] sm:$0xff]   ;;  %v11469_v38 = vld [vmem:[%s16100_s1 + $0x3d8] sm:$0xff]   ;;  %v1539_v23 = vsel %vm12291_vm2, %v12246_v24, %v12252_v3  ;;  %v11473_v24 = vld [vmem:[%s16100_s1 + $0x3d0] sm:$0xff]   ;;  %v12441_v3 = vrot.slane %v1660_v60, 4 }
  0xce   : > { %10209 = vmatpush3.bf16.msra.mxu1 %v11456_v56  ;;  %v12401_v29 = vcombine.high %v1515_v2, %v1525_v4  ;;  %v12424_v37 = vcombine.low %v1515_v2, %v1525_v4 }
  0xcf   : > { %10210 = vmatprep.subr.bf16.mxu1 %v11459_v51 }
  0xd2   : > { %10211 = vmatpush3.bf16.msra.mxu1 %v11460_v34 }
  0xd3   : > { %10212 = vmatprep.subr.bf16.mxu1 %v11463_v31 }
  0xd4   : > { %1309 = vmatmul.mubr.bf16.gmra.mxu0 %v12111_v5  ;;  %2136 = vmatmul.mubr.bf16.gmra.mxu1 %v12396_v32  ;;  %v1549_v5 = vsel %vm12291_vm2, %v12298_v18, %v12285_v50  ;;  %v11474_v18 = vld [vmem:[%s16100_s1 + $0x390] sm:$0xff]  }
  0xd5   : > { %1316 = vmatprep.mubr.bf16.mxu0 %v12114_v6  ;;  %2143 = vmatprep.mubr.bf16.mxu1 %v12401_v29  ;;  %v12427_v6 = vld [vmem:[%s11763_s26 + $0xd0] sm:$0x11]  ;;  %v12432_v21 = vcombine.high %v1539_v23, %v1549_v5  ;;  %v12458_v27 = vcombine.low %v1539_v23, %v1549_v5 }
  0xd6   : > { %10213 = vmatpush3.bf16.msra.mxu1 %v11464_v15  ;;  %v1666_v50 = vshll.u32 %v12427_v6, 16 }
  0xd7   : > { %10214 = vmatprep.subr.bf16.mxu1 %v11467_v59  ;;  %v1635_v59 = vsel %vm12291_vm2, %v12340_v54, %v12334_v45 }
  0xda   : > { %10215 = vmatpush3.bf16.msra.mxu1 %v11468_v17  ;;  %v1653_v17 = vor.u32 %v12378_v33, %v12364_v8  ;;  %v1426_v8 = vld [vmem:[%s11763_s26 + $0xe8] sm:$0x11]  ;;  %v1427_v33 = vld [vmem:[%s11763_s26 + $0xf0] sm:$0xff] }
  0xdb   : > { %10216 = vmatprep.subr.bf16.mxu1 %v11469_v38  ;;  %v1663_v38 = vor.u32 %v12441_v3, %v12380_v40 }
  0xdc   : > { %1317 = vmatmul.mubr.bf16.gmra.mxu0 %v12121_v7  ;;  %2144 = vmatmul.mubr.bf16.gmra.mxu1 %v12424_v37  ;;  %v1563_v7 = vsel %vm12291_vm2, %v12317_v26, %v12260_v20  ;;  %v11477_v20 = vld [vmem:[%s16100_s1 + $0x3c0] sm:$0xff]   ;;  %v1587_v26 = vsel %vm12291_vm2, %v12326_v52, %v12263_v28  ;;  %v1671_v28 = vshrl.u32 %v1424_v16, 16  ;;  %v1674_v52 = vshll.u32 %v1424_v16, 16 }
  0xdd   : > { %1324 = vmatprep.mubr.bf16.mxu0 %v12242_v55  ;;  %2151 = vmatprep.mubr.bf16.mxu1 %v12432_v21  ;;  %v1573_v55 = vsel %vm12291_vm2, %v12319_v49, %v12300_v48  ;;  %v11478_v48 = vld [vmem:[%s16100_s1 + $0x380] sm:$0xff]  }
  0xde   : > { %10217 = vmatpush3.bf16.msra.mxu1 %v11471_v41  ;;  %v12463_v9 = vcombine.high %v1563_v7, %v1573_v55  ;;  %v12483_v49 = vcombine.low %v1563_v7, %v1573_v55  ;;  %v1673_v41 = vrot.slane %v1671_v28, 4  ;;  %v11616_v28 = vld [vmem:[%s11763_s26 + $0x180] ss:$8 sps:$4 sm:$0xff]  }
  0xdf   : > { %10218 = vmatprep.subr.bf16.mxu1 %v11473_v24  ;;  %v1676_v24 = vrot.slane %v1674_v52, 5 }
  0xe2   : > { %10219 = vmatpush3.bf16.msra.mxu1 %v11474_v18 }
  0xe3   : > { %10220 = vmatprep.subr.bf16.mxu1 %v11475_v58 }
  0xe4   : > { %1325 = vmatmul.mubr.bf16.gmra.mxu0 %v12268_v13  ;;  %2152 = vmatmul.mubr.bf16.gmra.mxu1 %v12458_v27  ;;  %v1597_v13 = vsel %vm12291_vm2, %v12328_v61, %v12330_v12  ;;  %v1680_v61 = vshll.u32 %v1425_v10, 16  ;;  %v1684_v12 = vshrl.u32 %v1425_v10, 16  ;;  %v1677_v10 = vor.u32 %v1676_v24, %v1673_v41 }
  0xe5   : > { %1332 = vmatprep.mubr.bf16.mxu0 %v12273_v53  ;;  %2159 = vmatprep.mubr.bf16.mxu1 %v12463_v9  ;;  %v12487_v63 = vcombine.high %v1587_v26, %v1597_v13  ;;  %v12505_v56 = vcombine.low %v1587_v26, %v1597_v13  ;;  %v1428_v26 = vld [vmem:[%s11763_s26 + $0xf8] sm:$0xff] }
  0xe6   : > { %10221 = vmatpush3.bf16.msra.mxu1 %v11476_v30  ;;  %v1682_v58 = vrot.slane %v1680_v61, 5  ;;  %v1686_v7 = vrot.slane %v1684_v12, 4  ;;  %v1654_v30 = vrot.slane %v1653_v17, 4  ;;  %v1690_v61 = vshll.u32 %v1426_v8, 16  ;;  %v1430_v8 = vld [vmem:[%s11763_s26 + $0x108] sm:$0xff] }
  0xe7   : > { %10222 = vmatprep.subr.bf16.mxu1 %v11477_v20  ;;  %16158 = vst [vmem:[#allocation4_spill] sm:$0xff] %v12487_v63  ;;  %v1664_v20 = vrot.slane %v1663_v38, 4  ;;  %v1695_v12 = vshrl.u32 %v1427_v33, 16  ;;  %v1704_v6 = vshll.u32 %v1428_v26, 16 }
  0xe8   : > { %v1687_v52 = vor.u32 %v1686_v7, %v1682_v58  ;;  %v1692_v17 = vrot.slane %v1690_v61, 5 }
  0xe9   : > { %v1697_v38 = vrot.slane %v1695_v12, 4  ;;  %v1706_v24 = vrot.slane %v1704_v6, 5  ;;  %v1433_v6 = vld [vmem:[%s11763_s26 + $0x120] sm:$0xff] }
  0xea   : > { %10223 = vmatpush3.bf16.msra.mxu1 %v11478_v48  ;;  %v1668_v48 = vrot.slane %v1666_v50, 5  ;;  %v1708_v50 = vshrl.u32 %v1428_v26, 16 }
  0xec   : > { %v9664_v53 = vpop.f32.mrf.mxu0  ;;  %v9736_v25 = vpop.f32.mrf.mxu1  ;;  %1333 = vmatmul.mubr.bf16.gmra.mxu0 %v12305_v35  ;;  %2160 = vmatmul.mubr.bf16.gmra.mxu1 %v12483_v49  ;;  %v1621_v35 = vsel %vm12291_vm2, %v12336_v42, %v12338_v43  ;;  %v11615_v42 = vld [vmem:[%s11763_s26 + $0x184] ss:$8 sps:$4 sm:$0xff]  }
  0xed   : > { %1340 = vmatprep.mubr.bf16.mxu0 %v12322_v62  ;;  %2167 = vmatprep.mubr.bf16.mxu1 %v12487_v63  ;;  %v12507_v51 = vcombine.high %v1611_v57, %v1621_v35  ;;  %v12533_v18 = vcombine.low %v1611_v57, %v1621_v35  ;;  %v1659_v35 = vsel %vm12291_vm2, %v1654_v30, %v12380_v40 }
  0xee   : > { %v9665_v0 = vpop.f32.mrf.mxu0  ;;  %v9737_v44 = vpop.f32.mrf.mxu1 }
  0xef   : > { %v12501_v62 = vadd.f32 %v9665_v0, %v9664_v53  ;;  %v12503_v46 = vadd.f32 %v9737_v44, %v9736_v25  ;;  %v1698_v0 = vshll.u32 %v1427_v33, 16 }
  0xf0   : > { %v9667_v60 = vpop.f32.mrf.mxu0  ;;  %v9739_v1 = vpop.f32.mrf.mxu1 }
  0xf1   : > { %16159 = vst [vmem:[#allocation5_spill] sm:$0xff] %v12503_v46  ;;  %v1700_v40 = vrot.slane %v1698_v0, 5 }
  0xf2   : > { %v9668_v34 = vpop.f32.mrf.mxu0  ;;  %v9740_v31 = vpop.f32.mrf.mxu1 }
  0xf3   : > { %v12509_v2 = vadd.f32 %v9668_v34, %v9667_v60  ;;  %v12511_v47 = vadd.f32 %v9740_v31, %v9739_v1  ;;  %v1669_v60 = vsel %vm12291_vm2, %v1664_v20, %v1668_v48  ;;  %v1701_v48 = vor.u32 %v1700_v40, %v1697_v38 }
  0xf4   : > { %v9670_v19 = vpop.f32.mrf.mxu0  ;;  %v9742_v4 = vpop.f32.mrf.mxu1  ;;  %1341 = vmatmul.mubr.bf16.gmra.mxu0 %v12348_v36  ;;  %2168 = vmatmul.mubr.bf16.gmra.mxu1 %v12505_v56  ;;  %v1645_v36 = vsel %vm12291_vm2, %v12361_v39, %v12343_v11  ;;  %v11452_v11 = vld [vmem:[%s11763_s26 + $0x19c] ss:$8 sps:$4 sm:$0xff]   ;;  %v12562_v41 = vcombine.high %v1659_v35, %v1669_v60 }
  0xf5   : > { %16160 = vst [vmem:[#allocation6_spill] sm:$0xff] %v12511_v47  ;;  %1348 = vmatprep.mubr.bf16.mxu0 %v11615_v42  ;;  %2175 = vmatprep.mubr.bf16.mxu1 %v12507_v51  ;;  %v12536_v39 = vcombine.high %v1635_v59, %v1645_v36  ;;  %v12559_v31 = vcombine.low %v1635_v59, %v1645_v36  ;;  %v1431_v36 = vld [vmem:[%s11763_s26 + $0x110] sm:$0xff] }
  0xf6   : > { %v9671_v43 = vpop.f32.mrf.mxu0  ;;  %v9743_v15 = vpop.f32.mrf.mxu1  ;;  %v1728_v61 = vshll.u32 %v1431_v36, 16  ;;  %v1732_v12 = vshrl.u32 %v1431_v36, 16 }
  0xf7   : > { %v12529_v23 = vadd.f32 %v9671_v43, %v9670_v19  ;;  %v12531_v5 = vadd.f32 %v9743_v15, %v9742_v4  ;;  %v1678_v19 = vrot.slane %v1677_v10, 4  ;;  %v11454_v43 = vld [vmem:[%s11763_s26 + $0x198] ss:$8 sps:$4 sm:$0xff]   ;;  %v1688_v15 = vrot.slane %v1687_v52, 4 }
  0xf8   : > { %v9673_v45 = vpop.f32.mrf.mxu0  ;;  %v9745_v54 = vpop.f32.mrf.mxu1 }
  0xf9   : > { %16161 = vst [vmem:[#allocation7_spill] sm:$0xff] %v12531_v5  ;;  %v12574_v30 = vsel %vm12291_vm2, %v1678_v19, %v1682_v58  ;;  %v12578_v20 = vsel %vm12291_vm2, %v1688_v15, %v1692_v17  ;;  %v1702_v19 = vrot.slane %v1701_v48, 4  ;;  %v11484_v5 = vld [vmem:[%s16100_s1 + $0x108] sm:$0xff]  }
  0xfa   : > { %v9674_v3 = vpop.f32.mrf.mxu0  ;;  %v9746_v55 = vpop.f32.mrf.mxu1 }
  0xfb   : > { %v12543_v13 = vadd.f32 %v9674_v3, %v9673_v45  ;;  %v12545_v16 = vadd.f32 %v9746_v55, %v9745_v54  ;;  %v1710_v45 = vrot.slane %v1708_v50, 4 }
  0xfc   : > { %v9676_v53 = vpop.f32.mrf.mxu0  ;;  %v9748_v25 = vpop.f32.mrf.mxu1  ;;  %1349 = vmatmul.mubr.bf16.gmra.mxu0 %v11616_v28  ;;  %2176 = vmatmul.mubr.bf16.gmra.mxu1 %v12533_v18 }
  0xfd   : > { %16162 = vst [vmem:[#allocation8_spill] sm:$0xff] %v12545_v16  ;;  %1356 = vmatprep.mubr.bf16.mxu0 %v11452_v11  ;;  %2183 = vmatprep.mubr.bf16.mxu1 %v12536_v39  ;;  %v1429_v11 = vld [vmem:[%s11763_s26 + $0x100] sm:$0x11]  ;;  %v1711_v26 = vor.u32 %v1710_v45, %v1706_v24 }
  0xfe   : > { %v9677_v44 = vpop.f32.mrf.mxu0  ;;  %v9749_v57 = vpop.f32.mrf.mxu1  ;;  %v1714_v10 = vshll.u32 %v1429_v11, 16  ;;  %v1746_v11 = vshll.u32 %v1433_v6, 16  ;;  %v1441_v16 = vld [vmem:[%s11763_s26 + $0x160] sm:$0x11] }
  0xff   : > { %v12555_v1 = vadd.f32 %v9677_v44, %v9676_v53  ;;  %v12557_v34 = vadd.f32 %v9749_v57, %v9748_v25  ;;  %v1719_v53 = vshrl.u32 %v1430_v8, 16  ;;  %v1722_v25 = vshll.u32 %v1430_v8, 16 }
 0x100   : > { %v9679_v4 = vpop.f32.mrf.mxu0  ;;  %v9751_v42 = vpop.f32.mrf.mxu1  ;;  %v12587_v57 = vcombine.low %v1659_v35, %v1669_v60  ;;  %v1716_v15 = vrot.slane %v1714_v10, 5  ;;  %v11461_v35 = vld [vmem:[%s16100_s1 + $0x170] sm:$0xff]   ;;  %v12600_v60 = vrot.slane %v1728_v61, 5  ;;  %v11487_v61 = vld [vmem:[%s16100_s1 + $0x2f8] sm:$0xff]  }
 0x101   : > { %16163 = vst [vmem:[#allocation9_spill] sm:$0xff] %v12557_v34  ;;  %v1721_v17 = vrot.slane %v1719_v53, 4  ;;  %v1724_v38 = vrot.slane %v1722_v25, 5  ;;  %v1707_v53 = vsel %vm12291_vm2, %v1702_v19, %v1706_v24  ;;  %v11465_v19 = vld [vmem:[%s16100_s1 + $0x168] sm:$0xff]   ;;  %10432 = vmatprep.subr.bf16.mxu1 %v11487_v61 }
 0x102   : > { %v9680_v54 = vpop.f32.mrf.mxu0  ;;  %v9752_v7 = vpop.f32.mrf.mxu1 }
 0x103   : > { %v12566_v33 = vadd.f32 %v9680_v54, %v9679_v4  ;;  %v12568_v59 = vadd.f32 %v9752_v7, %v9751_v42  ;;  %v1434_v4 = vld [vmem:[%s11763_s26 + $0x128] sm:$0xff]  ;;  %v11458_v42 = vld [vmem:[%s16100_s1 + $0x138] sm:$0xff]   ;;  %v1734_v54 = vrot.slane %v1732_v12, 4  ;;  %v1743_v7 = vshrl.u32 %v1433_v6, 16 }
 0x104   : > { %v9682_v3 = vpop.f32.mrf.mxu0  ;;  %v9754_v55 = vpop.f32.mrf.mxu1  ;;  %1357 = vmatmul.mubr.bf16.gmra.mxu0 %v11454_v43  ;;  %2184 = vmatmul.mubr.bf16.gmra.mxu1 %v12559_v31  ;;  %v1712_v43 = vrot.slane %v1711_v26, 4  ;;  %v1756_v48 = vshrl.u32 %v1434_v4, 16 }
 0x105   : > { %16164 = vst [vmem:[#allocation10_spill] sm:$0xff] %v12568_v59  ;;  %2191 = vmatprep.mubr.bf16.mxu1 %v12562_v41  ;;  %2481 = vmatprep.mubr.bf16.mxu0 %v12370_v14  ;;  %v12591_v14 = vcombine.high %v12574_v30, %v12578_v20  ;;  %v1735_v24 = vor.u32 %v1734_v54, %v12600_v60 }
 0x106   : > { %v9683_v28 = vpop.f32.mrf.mxu0  ;;  %v9755_v52 = vpop.f32.mrf.mxu1  ;;  %v1717_v25 = vsel %vm12291_vm2, %v1712_v43, %v1716_v15  ;;  %v1758_v15 = vrot.slane %v1756_v48, 4 }
 0x107   : > { %v12582_v58 = vadd.f32 %v9683_v28, %v9682_v3  ;;  %v12584_v0 = vadd.f32 %v9755_v52, %v9754_v55  ;;  %v1432_v3 = vld [vmem:[%s11763_s26 + $0x118] sm:$0x11]  ;;  %v1752_v55 = vshll.u32 %v1434_v4, 16  ;;  %v11462_v28 = vld [vmem:[%s16100_s1 + $0x130] sm:$0xff]   ;;  %v1725_v52 = vor.u32 %v1724_v38, %v1721_v17 }
 0x108   : > { %v9685_v50 = vpop.f32.mrf.mxu0  ;;  %v9757_v44 = vpop.f32.mrf.mxu1  ;;  %v1738_v6 = vshll.u32 %v1432_v3, 16  ;;  %v12637_v54 = vcombine.high %v1707_v53, %v1717_v25  ;;  %v1736_v48 = vrot.slane %v1735_v24, 4 }
 0x109   : > { %16165 = vst [vmem:[#allocation11_spill] sm:$0xff] %v12584_v0  ;;  %v12627_v43 = vrot.slane %v1752_v55, 5 }
 0x10a   : > { %v9686_v40 = vpop.f32.mrf.mxu0  ;;  %v9758_v45 = vpop.f32.mrf.mxu1 }
 0x10b   : > { %v12602_v8 = vadd.f32 %v9686_v40, %v9685_v50  ;;  %v12604_v36 = vadd.f32 %v9758_v45, %v9757_v44  ;;  %v1745_v50 = vrot.slane %v1743_v7, 4  ;;  %v1748_v44 = vrot.slane %v1746_v11, 5  ;;  %v1435_v45 = vld [vmem:[%s11763_s26 + $0x130] sm:$0x11]  ;;  %v1436_v7 = vld [vmem:[%s11763_s26 + $0x138] sm:$0xff]  ;;  %v1437_v11 = vld [vmem:[%s11763_s26 + $0x140] sm:$0xff] }
 0x10c   : > { %v9688_v26 = vpop.f32.mrf.mxu0  ;;  %v9776_v10 = vpop.f32.mrf.mxu1  ;;  %2192 = vmatmul.mubr.bf16.gmra.mxu1 %v12587_v57  ;;  %2482 = vmatmul.mubr.bf16.vlgmr.msra.gmra.mxu0 %v12396_v32  ;;  %v12631_v40 = vcombine.low %v12574_v30, %v12578_v20  ;;  %v11466_v30 = vld [vmem:[%s16100_s1 + $0x128] sm:$0xff]   ;;  %v1767_v24 = vshrl.u32 %v1436_v7, 16 }
 0x10d   : > { %16166 = vst [vmem:[#allocation12_spill] sm:$0xff] %v12604_v36  ;;  %10321 = vmatpush3.bf16.msra.mxu0 %v11458_v42  ;;  %2199 = vmatprep.mubr.bf16.mxu1 %v12591_v14  ;;  %v1749_v61 = vor.u32 %v1748_v44, %v1745_v50  ;;  %v1776_v50 = vshll.u32 %v1437_v11, 16  ;;  %v1780_v44 = vshrl.u32 %v1437_v11, 16 }
 0x10e   : > { %v9689_v12 = vpop.f32.mrf.mxu0  ;;  %v9777_v32 = vpop.f32.mrf.mxu1  ;;  %2489 = vmatprep.mubr.bf16.mxu0 %v12401_v29  ;;  %10322 = vmatprep.subr.bf16.mxu0 %v11461_v35 }
 0x10f   : > { %v12625_v4 = vadd.f32 %v9689_v12, %v9688_v26  ;;  %v9778_v42 = vadd.f32 %v9777_v32, %v9776_v10  ;;  %v1726_v26 = vrot.slane %v1725_v52, 4  ;;  %v1740_v10 = vrot.slane %v1738_v6, 5 }
 0x110   : > { %v9691_v17 = vpop.f32.mrf.mxu0  ;;  %v9779_v38 = vpop.f32.mrf.mxu1  ;;  %v1759_v12 = vor.u32 %v1758_v15, %v12627_v43  ;;  %v1762_v32 = vshll.u32 %v1435_v45, 16  ;;  %v1770_v6 = vshll.u32 %v1436_v7, 16 }
 0x111   : > { %v12635_v35 = vadd.f32 %v9778_v42, %v12501_v62  ;;  %10323 = vmatpush3.bf16.msra.mxu0 %v11462_v28  ;;  %v11470_v28 = vld [vmem:[%s16100_s1 + $0x160] sm:$0xff]   ;;  %v1731_v45 = vsel %vm12291_vm2, %v1726_v26, %v12600_v60  ;;  %v1741_v7 = vsel %vm12291_vm2, %v1736_v48, %v1740_v10  ;;  %v11479_v60 = vld [vmem:[%s16100_s1 + $0x158] sm:$0xff]   ;;  %v1769_v10 = vrot.slane %v1767_v24, 4 }
 0x112   : > { %v9692_v3 = vpop.f32.mrf.mxu0  ;;  %v9780_v55 = vpop.f32.mrf.mxu1  ;;  %10324 = vmatprep.subr.bf16.mxu0 %v11465_v19 }
 0x113   : > { %v12644_v20 = vadd.f32 %v9692_v3, %v9691_v17  ;;  %v9781_v62 = vadd.f32 %v9780_v55, %v9779_v38  ;;  %v12657_v38 = vcombine.low %v1707_v53, %v1717_v25  ;;  %v1750_v3 = vrot.slane %v1749_v61, 4 }
 0x114   : > { %v9694_v42 = vpop.f32.mrf.mxu0  ;;  %v9782_v52 = vpop.f32.mrf.mxu1  ;;  %2200 = vmatmul.mubr.bf16.gmra.mxu1 %v12631_v40  ;;  %2490 = vmatmul.mubr.bf16.gmra.mxu0 %v12424_v37  ;;  %v1760_v53 = vrot.slane %v1759_v12, 4  ;;  %v1764_v25 = vrot.slane %v1762_v32, 5  ;;  %v1772_v61 = vrot.slane %v1770_v6, 5  ;;  %v1438_v12 = vld [vmem:[%s11763_s26 + $0x148] sm:$0x11] }
 0x115   : > { %v12653_v19 = vadd.f32 %v9781_v62, %v12509_v2  ;;  %2207 = vmatprep.mubr.bf16.mxu1 %v12637_v54  ;;  %2497 = vmatprep.mubr.bf16.mxu0 %v12432_v21  ;;  %v11472_v2 = vld [vmem:[%s16100_s1 + $0x120] sm:$0xff]   ;;  %v1782_v62 = vrot.slane %v1780_v44, 4  ;;  %v11481_v44 = vld [vmem:[%s16100_s1 + $0x150] sm:$0xff]  }
 0x116   : > { %v9695_v15 = vpop.f32.mrf.mxu0  ;;  %v9783_v17 = vpop.f32.mrf.mxu1  ;;  %10325 = vmatpush3.bf16.msra.mxu0 %v11466_v30  ;;  %v12672_v30 = vrot.slane %v1776_v50, 5  ;;  %v12694_v50 = vsel %vm12291_vm2, %v1760_v53, %v1764_v25 }
 0x117   : > { %v12667_v11 = vadd.f32 %v9695_v15, %v9694_v42  ;;  %v9784_v55 = vadd.f32 %v9783_v17, %v9782_v52  ;;  %10326 = vmatprep.subr.bf16.mxu0 %v11470_v28  ;;  %v12677_v42 = vcombine.high %v1731_v45, %v1741_v7  ;;  %v1439_v52 = vld [vmem:[%s11763_s26 + $0x150] sm:$0xff]  ;;  %v1440_v15 = vld [vmem:[%s11763_s26 + $0x158] sm:$0xff] }
 0x118   : > { %v9697_v26 = vpop.f32.mrf.mxu0  ;;  %v9785_v48 = vpop.f32.mrf.mxu1  ;;  %v11480_v17 = vld [vmem:[%s16100_s1 + $0x118] sm:$0xff]   ;;  %v1794_v53 = vshll.u32 %v1439_v52, 16  ;;  %v1800_v25 = vshll.u32 %v1440_v15, 16 }
 0x119   : > { %v12675_v36 = vadd.f32 %v9784_v55, %v12529_v23  ;;  %v12690_v23 = vsel %vm12291_vm2, %v1750_v3, %v12627_v43  ;;  %v1786_v43 = vshll.u32 %v1438_v12, 16  ;;  %v1791_v3 = vshrl.u32 %v1439_v52, 16  ;;  %v11483_v52 = vld [vmem:[%s16100_s1 + $0x148] sm:$0xff]  }
 0x11a   : > { %v9698_v32 = vpop.f32.mrf.mxu0  ;;  %v9786_v28 = vpop.f32.mrf.mxu1  ;;  %10327 = vmatpush3.bf16.msra.mxu0 %v11472_v2  ;;  %v12712_v12 = vcombine.low %v1731_v45, %v1741_v7  ;;  %v1796_v7 = vrot.slane %v1794_v53, 5 }
 0x11b   : > { %v12685_v24 = vadd.f32 %v9698_v32, %v9697_v26  ;;  %v9787_v6 = vadd.f32 %v9786_v28, %v9785_v48  ;;  %10328 = vmatprep.subr.bf16.mxu0 %v11479_v60  ;;  %v1773_v26 = vor.u32 %v1772_v61, %v1769_v10  ;;  %v1783_v48 = vor.u32 %v1782_v62, %v12672_v30  ;;  %v11482_v10 = vld [vmem:[%s16100_s1 + $0x110] sm:$0xff]  }
 0x11c   : > { %v9700_v2 = vpop.f32.mrf.mxu0  ;;  %v9788_v55 = vpop.f32.mrf.mxu1  ;;  %2208 = vmatmul.mubr.bf16.gmra.mxu1 %v12657_v38  ;;  %2498 = vmatmul.mubr.bf16.gmra.mxu0 %v12458_v27  ;;  %v1804_v60 = vshrl.u32 %v1440_v15, 16 }
 0x11d   : > { %v12703_v32 = vadd.f32 %v9787_v6, %v12543_v13  ;;  %2215 = vmatprep.mubr.bf16.mxu1 %v12677_v42  ;;  %2505 = vmatprep.mubr.bf16.mxu0 %v12463_v9  ;;  %v12716_v13 = vcombine.high %v12690_v23, %v12694_v50  ;;  %v1774_v6 = vrot.slane %v1773_v26, 4 }
 0x11e   : > { %v9701_v28 = vpop.f32.mrf.mxu0  ;;  %v9789_v0 = vpop.f32.mrf.mxu1  ;;  %10329 = vmatpush3.bf16.msra.mxu0 %v11480_v17  ;;  %v1806_v59 = vrot.slane %v1804_v60, 4 }
 0x11f   : > { %16167 = vst [vmem:[#allocation13_spill] sm:$0xff] %v12703_v32  ;;  %v12710_v61 = vadd.f32 %v9701_v28, %v9700_v2  ;;  %v9790_v62 = vadd.f32 %v9789_v0, %v9788_v55  ;;  %16168 = vst [vmem:[#allocation14_spill] sm:$0xff] %v12716_v13  ;;  %10330 = vmatprep.subr.bf16.mxu0 %v11481_v44  ;;  %v1784_v2 = vrot.slane %v1783_v48, 4  ;;  %v1788_v28 = vrot.slane %v1786_v43, 5  ;;  %v1442_v43 = vld [vmem:[%s11763_s26 + $0x168] sm:$0xff] }
 0x120   : > { %v9703_v15 = vpop.f32.mrf.mxu0  ;;  %v9791_v17 = vpop.f32.mrf.mxu1  ;;  %v1793_v0 = vrot.slane %v1791_v3, 4  ;;  %v12724_v55 = vrot.slane %v1800_v25, 5  ;;  %v1443_v3 = vld [vmem:[%s11763_s26 + $0x170] sm:$0xff]  ;;  %v1779_v60 = vsel %vm12291_vm2, %v1774_v6, %v12672_v30  ;;  %v1815_v47 = vshrl.u32 %v1442_v43, 16 }
 0x121   : > { %v12722_v45 = vadd.f32 %v9790_v62, %v12555_v1  ;;  %v11485_v1 = vld [vmem:[%s16100_s1 + $0x140] sm:$0xff]   ;;  %v1818_v46 = vshll.u32 %v1442_v43, 16  ;;  %v1828_v30 = vshrl.u32 %v1443_v3, 16 }
 0x122   : > { %v9704_v44 = vpop.f32.mrf.mxu0  ;;  %v9792_v34 = vpop.f32.mrf.mxu1  ;;  %10331 = vmatpush3.bf16.msra.mxu0 %v11482_v10  ;;  %v1797_v62 = vor.u32 %v1796_v7, %v1793_v0  ;;  %v12760_v0 = vcombine.low %v12690_v23, %v12694_v50  ;;  %v1444_v23 = vld [vmem:[%s11763_s26 + $0x178] sm:$0x11] }
 0x123   : > { %16169 = vst [vmem:[#allocation15_spill] sm:$0xff] %v12722_v45  ;;  %v12730_v26 = vadd.f32 %v9704_v44, %v9703_v15  ;;  %v9793_v48 = vadd.f32 %v9792_v34, %v9791_v17  ;;  %10332 = vmatprep.subr.bf16.mxu0 %v11483_v52  ;;  %v1789_v34 = vsel %vm12291_vm2, %v1784_v2, %v1788_v28  ;;  %v1810_v15 = vshll.u32 %v1441_v16, 16 }
 0x124   : > { %v9706_v53 = vpop.f32.mrf.mxu0  ;;  %v9794_v25 = vpop.f32.mrf.mxu1  ;;  %2216 = vmatmul.mubr.bf16.gmra.mxu1 %v12712_v12  ;;  %2506 = vmatmul.mubr.bf16.gmra.mxu0 %v12483_v49  ;;  %v1807_v52 = vor.u32 %v1806_v59, %v12724_v55  ;;  %v1824_v45 = vshll.u32 %v1443_v3, 16  ;;  %v11489_v59 = vld [vmem:[%s16100_s1 + $0x478] sm:$0xff]  }
 0x125   : > { %v12745_v10 = vadd.f32 %v9793_v48, %v12566_v33  ;;  %2223 = vmatprep.mubr.bf16.mxu1 %v12716_v13  ;;  %2513 = vmatprep.mubr.bf16.mxu0 %v12487_v63  ;;  %v11486_v33 = vld [vmem:[%s16100_s1 + $0x100] sm:$0xff]   ;;  %v1798_v48 = vrot.slane %v1797_v62, 4  ;;  %v1812_v3 = vrot.slane %v1810_v15, 5 }
 0x126   : > { %v9707_v17 = vpop.f32.mrf.mxu0  ;;  %v9795_v44 = vpop.f32.mrf.mxu1  ;;  %10333 = vmatpush3.bf16.msra.mxu0 %v11484_v5  ;;  %v12762_v5 = vcombine.high %v1779_v60, %v1789_v34  ;;  %v1808_v43 = vrot.slane %v1807_v52, 4 }
 0x127   : > { %16170 = vst [vmem:[#allocation16_spill] sm:$0xff] %v12745_v10  ;;  %v12753_v6 = vadd.f32 %v9707_v17, %v9706_v53  ;;  %v9796_v2 = vadd.f32 %v9795_v44, %v9794_v25  ;;  %10334 = vmatprep.subr.bf16.mxu0 %v11485_v1  ;;  %v1817_v25 = vrot.slane %v1815_v47, 4  ;;  %v1820_v17 = vrot.slane %v1818_v46, 5 }
 0x128   : > { %v9709_v16 = vpop.f32.mrf.mxu0  ;;  %v9797_v28 = vpop.f32.mrf.mxu1  ;;  %v1826_v44 = vrot.slane %v1824_v45, 5  ;;  %v1830_v10 = vrot.slane %v1828_v30, 4  ;;  %v1803_v46 = vsel %vm12291_vm2, %v1798_v48, %v12724_v55  ;;  %v1813_v62 = vsel %vm12291_vm2, %v1808_v43, %v1812_v3 }
 0x129   : > { %v12765_v7 = vadd.f32 %v9796_v2, %v12582_v58  ;;  %v1821_v52 = vor.u32 %v1820_v17, %v1817_v25  ;;  %v1834_v30 = vshll.u32 %v1444_v23, 16 }
 0x12a   : > { %v9710_v1 = vpop.f32.mrf.mxu0  ;;  %v9798_v53 = vpop.f32.mrf.mxu1  ;;  %10335 = vmatpush3.bf16.msra.mxu0 %v11486_v33  ;;  %v1831_v15 = vor.u32 %v1830_v10, %v1826_v44 }
 0x12b   : > { %v12767_v63 = vadd.f32 %v9710_v1, %v9709_v16  ;;  %v9799_v13 = vadd.f32 %v9798_v53, %v9797_v28  ;;  %10544 = vmatprep.subr.bf16.mxu0 %v11489_v59  ;;  %v12784_v59 = vcombine.low %v1779_v60, %v1789_v34  ;;  %v12789_v28 = vcombine.high %v1803_v46, %v1813_v62 }
 0x12c   : > { %v9712_v50 = vpop.f32.mrf.mxu0  ;;  %v9800_v32 = vpop.f32.mrf.mxu1  ;;  %2224 = vmatmul.mubr.bf16.gmra.mxu1 %v12760_v0  ;;  %2514 = vmatmul.mubr.bf16.gmra.mxu0 %v12505_v56  ;;  %v1822_v1 = vrot.slane %v1821_v52, 4  ;;  %v1832_v53 = vrot.slane %v1831_v15, 4  ;;  %v1836_v43 = vrot.slane %v1834_v30, 5  ;;  %v12806_v15 = vcombine.low %v1803_v46, %v1813_v62 }
 0x12d   : > { %v12773_v58 = vadd.f32 %v9799_v13, %v12602_v8  ;;  %2231 = vmatprep.mubr.bf16.mxu1 %v12762_v5  ;;  %2521 = vmatprep.mubr.bf16.mxu0 %v12507_v51 }
 0x12e   : > { %v9713_v47 = vpop.f32.mrf.mxu0  ;;  %v9801_v45 = vpop.f32.mrf.mxu1  ;;  %v1827_v34 = vsel %vm12291_vm2, %v1822_v1, %v1826_v44  ;;  %v1837_v23 = vsel %vm12291_vm2, %v1832_v53, %v1836_v43 }
 0x12f   : > { %v12782_v33 = vadd.f32 %v9713_v47, %v9712_v50  ;;  %v9802_v8 = vadd.f32 %v9801_v45, %v9800_v32  ;;  %v12811_v30 = vcombine.high %v1827_v34, %v1837_v23 }
 0x130   : > { %v9715_v13 = vpop.f32.mrf.mxu0  ;;  %v9803_v2 = vpop.f32.mrf.mxu1 }
 0x131   : > { %v12787_v16 = vadd.f32 %v9802_v8, %v12625_v4 }
 0x132   : > { %v9716_v55 = vpop.f32.mrf.mxu0  ;;  %v9804_v48 = vpop.f32.mrf.mxu1 }
 0x133   : > { %v12791_v3 = vadd.f32 %v9716_v55, %v9715_v13  ;;  %v9805_v10 = vadd.f32 %v9804_v48, %v9803_v2 }
 0x134   : > { %v9718_v25 = vpop.f32.mrf.mxu0  ;;  %v9806_v17 = vpop.f32.mrf.mxu1  ;;  %2232 = vmatmul.mubr.bf16.gmra.mxu1 %v12784_v59  ;;  %2522 = vmatmul.mubr.bf16.gmra.mxu0 %v12533_v18 }
 0x135   : > { %v12796_v32 = vadd.f32 %v9805_v10, %v12644_v20  ;;  %2239 = vmatprep.mubr.bf16.mxu1 %v12789_v28  ;;  %2529 = vmatprep.mubr.bf16.mxu0 %v12536_v39 }
 0x136   : > { %v9719_v4 = vpop.f32.mrf.mxu0  ;;  %v9807_v60 = vpop.f32.mrf.mxu1 }
 0x137   : > { %v12804_v50 = vadd.f32 %v9719_v4, %v9718_v25  ;;  %v9808_v47 = vadd.f32 %v9807_v60, %v9806_v17  ;;  %v12824_v25 = vcombine.low %v1827_v34, %v1837_v23 }
 0x138   : > { %v9721_v45 = vpop.f32.mrf.mxu0  ;;  %v9809_v52 = vpop.f32.mrf.mxu1 }
 0x139   : > { %v12809_v20 = vadd.f32 %v9808_v47, %v12667_v11 }
 0x13a   : > { %v9722_v8 = vpop.f32.mrf.mxu0  ;;  %v9810_v13 = vpop.f32.mrf.mxu1 }
 0x13b   : > { %v12813_v2 = vadd.f32 %v9722_v8, %v9721_v45  ;;  %v9811_v44 = vadd.f32 %v9810_v13, %v9809_v52 }
 0x13c   : > { %v9724_v55 = vpop.f32.mrf.mxu0  ;;  %v9812_v48 = vpop.f32.mrf.mxu1  ;;  %2240 = vmatmul.mubr.bf16.gmra.mxu1 %v12806_v15  ;;  %2530 = vmatmul.mubr.bf16.gmra.mxu0 %v12559_v31 }
 0x13d   : > { %v12818_v1 = vadd.f32 %v9811_v44, %v12685_v24  ;;  %2247 = vmatprep.mubr.bf16.mxu1 %v12811_v30  ;;  %2537 = vmatprep.mubr.bf16.mxu0 %v12562_v41 }
 0x13e   : > { %v9725_v11 = vpop.f32.mrf.mxu0  ;;  %v9813_v46 = vpop.f32.mrf.mxu1 }
 0x13f   : > { %v12822_v62 = vadd.f32 %v9725_v11, %v9724_v55  ;;  %v9814_v53 = vadd.f32 %v9813_v46, %v9812_v48 }
 0x140   : > { %v9727_v43 = vpop.f32.mrf.mxu0  ;;  %v9815_v10 = vpop.f32.mrf.mxu1 }
 0x141   : > { %v12827_v17 = vadd.f32 %v9814_v53, %v12710_v61 }
 0x142   : > { %v9728_v4 = vpop.f32.mrf.mxu0  ;;  %v9816_v60 = vpop.f32.mrf.mxu1 }
 0x143   : > { %v12829_v24 = vadd.f32 %v9728_v4, %v9727_v43  ;;  %v9817_v47 = vadd.f32 %v9816_v60, %v9815_v10 }
 0x144   : > { %v9730_v45 = vpop.f32.mrf.mxu0  ;;  %v9818_v52 = vpop.f32.mrf.mxu1  ;;  %2248 = vmatmul.mubr.bf16.gmra.mxu1 %v12824_v25  ;;  %2538 = vmatmul.mubr.bf16.gmra.mxu0 %v12587_v57 }
 0x145   : > { %v12834_v8 = vadd.f32 %v9817_v47, %v12730_v26  ;;  %2545 = vmatprep.mubr.bf16.mxu0 %v12591_v14  ;;  %2835 = vmatprep.mubr.bf16.mxu1 %v12401_v29  ;;  %v11488_v26 = vld [vmem:[%s16100_s1 + $0x2b8] sm:$0xff]   ;;  %v11491_v29 = vld [vmem:[%s16100_s1 + $0x2f0] sm:$0xff]  }
 0x146   : > { %v9731_v61 = vpop.f32.mrf.mxu0  ;;  %v9819_v34 = vpop.f32.mrf.mxu1 }
 0x147   : > { %v12838_v23 = vadd.f32 %v9731_v61, %v9730_v45  ;;  %v9820_v13 = vadd.f32 %v9819_v34, %v9818_v52  ;;  %v11492_v45 = vld [vmem:[%s16100_s1 + $0x2b0] sm:$0xff]  }
 0x148   : > { %v9733_v44 = vpop.f32.mrf.mxu0  ;;  %v9821_v55 = vpop.f32.mrf.mxu1 }
 0x149   : > { %v12841_v48 = vadd.f32 %v9820_v13, %v12753_v6 }
 0x14a   : > { %v9734_v11 = vpop.f32.mrf.mxu0  ;;  %v9822_v46 = vpop.f32.mrf.mxu1 }
 0x14b   : > { %v12846_v53 = vadd.f32 %v9734_v11, %v9733_v44  ;;  %v9823_v43 = vadd.f32 %v9822_v46, %v9821_v55  ;;  %v11496_v11 = vld [vmem:[%s16100_s1 + $0x2a8] sm:$0xff]  }
 0x14c   : > { %v9824_v10 = vpop.f32.mrf.mxu1  ;;  %v9888_v4 = vpop.f32.mrf.mxu0  ;;  %2546 = vmatmul.mubr.bf16.gmra.mxu0 %v12631_v40  ;;  %2836 = vmatmul.mubr.bf16.vlgmr.msra.gmra.mxu1 %v12424_v37  ;;  %v11495_v37 = vld [vmem:[%s16100_s1 + $0x2e8] sm:$0xff]  }
 0x14d   : > { %v12854_v6 = vadd.f32 %v9823_v43, %v12767_v63  ;;  %2553 = vmatprep.mubr.bf16.mxu0 %v12637_v54  ;;  %2843 = vmatprep.mubr.bf16.mxu1 %v12432_v21  ;;  %v11499_v43 = vld [vmem:[%s16100_s1 + $0x2e0] sm:$0xff]  }
 0x14e   : > { %v9825_v60 = vpop.f32.mrf.mxu1  ;;  %v9889_v47 = vpop.f32.mrf.mxu0  ;;  %10433 = vmatpush3.bf16.msra.mxu1 %v11488_v26 }
 0x14f   : > { %v9826_v52 = vadd.f32 %v9825_v60, %v9824_v10  ;;  %v9890_v61 = vadd.f32 %v9889_v47, %v9888_v4  ;;  %10434 = vmatprep.subr.bf16.mxu1 %v11491_v29  ;;  %v11500_v47 = vld [vmem:[%s16100_s1 + $0x2a0] sm:$0xff]  }
 0x150   : > { %v9827_v63 = vpop.f32.mrf.mxu1  ;;  %v9891_v34 = vpop.f32.mrf.mxu0 }
 0x151   : > { %v12865_v13 = vadd.f32 %v9826_v52, %v12782_v33  ;;  %v12868_v21 = vadd.f32 %v9890_v61, %v12635_v35 }
 0x152   : > { %v9828_v44 = vpop.f32.mrf.mxu1  ;;  %v9892_v55 = vpop.f32.mrf.mxu0  ;;  %10435 = vmatpush3.bf16.msra.mxu1 %v11492_v45 }
 0x153   : > { %v9829_v46 = vadd.f32 %v9828_v44, %v9827_v63  ;;  %v9893_v26 = vadd.f32 %v9892_v55, %v9891_v34  ;;  %10436 = vmatprep.subr.bf16.mxu1 %v11495_v37  ;;  %v11503_v34 = vld [vmem:[%s16100_s1 + $0x298] sm:$0xff]  }
 0x154   : > { %v9830_v29 = vpop.f32.mrf.mxu1  ;;  %v9894_v33 = vpop.f32.mrf.mxu0  ;;  %2554 = vmatmul.mubr.bf16.gmra.mxu0 %v12657_v38  ;;  %2844 = vmatmul.mubr.bf16.gmra.mxu1 %v12458_v27  ;;  %v11501_v27 = vld [vmem:[%s16100_s1 + $0x2d8] sm:$0xff]  }
 0x155   : > { %v12879_v35 = vadd.f32 %v9829_v46, %v12791_v3  ;;  %v12882_v10 = vadd.f32 %v9893_v26, %v12653_v19  ;;  %2561 = vmatprep.mubr.bf16.mxu0 %v12677_v42  ;;  %2851 = vmatprep.mubr.bf16.mxu1 %v12463_v9  ;;  %v16171_v26 = vld [vmem:[#allocation13_spill] sm:$0xff] }
 0x156   : > { %v9831_v4 = vpop.f32.mrf.mxu1  ;;  %v9895_v60 = vpop.f32.mrf.mxu0  ;;  %10437 = vmatpush3.bf16.msra.mxu1 %v11496_v11  ;;  %v11505_v11 = vld [vmem:[%s16100_s1 + $0x2d0] sm:$0xff]  }
 0x157   : > { %v9832_v45 = vadd.f32 %v9831_v4, %v9830_v29  ;;  %v9896_v52 = vadd.f32 %v9895_v60, %v9894_v33  ;;  %10438 = vmatprep.subr.bf16.mxu1 %v11499_v43  ;;  %v16172_v29 = vld [vmem:[#allocation14_spill] sm:$0xff]  ;;  %v16173_v33 = vld [vmem:[#allocation4_spill] sm:$0xff] }
 0x158   : > { %v9833_v19 = vpop.f32.mrf.mxu1  ;;  %v9897_v3 = vpop.f32.mrf.mxu0 }
 0x159   : > { %v12893_v61 = vadd.f32 %v9832_v45, %v12804_v50  ;;  %v12896_v9 = vadd.f32 %v9896_v52, %v12675_v36 }
 0x15a   : > { %v9834_v37 = vpop.f32.mrf.mxu1  ;;  %v9898_v63 = vpop.f32.mrf.mxu0  ;;  %10439 = vmatpush3.bf16.msra.mxu1 %v11500_v47  ;;  %v11506_v47 = vld [vmem:[%s16100_s1 + $0x290] sm:$0xff]  }
 0x15b   : > { %v9835_v44 = vadd.f32 %v9834_v37, %v9833_v19  ;;  %v9899_v55 = vadd.f32 %v9898_v63, %v9897_v3  ;;  %10440 = vmatprep.subr.bf16.mxu1 %v11501_v27  ;;  %v16174_v3 = vld [vmem:[#allocation15_spill] sm:$0xff] }
 0x15c   : > { %v9836_v46 = vpop.f32.mrf.mxu1  ;;  %v9900_v50 = vpop.f32.mrf.mxu0  ;;  %2562 = vmatmul.mubr.bf16.gmra.mxu0 %v12712_v12  ;;  %2852 = vmatmul.mubr.bf16.gmra.mxu1 %v12483_v49 }
 0x15d   : > { %v12907_v36 = vadd.f32 %v9835_v44, %v12813_v2  ;;  %v12910_v43 = vadd.f32 %v9899_v55, %v16171_v26  ;;  %2569 = vmatprep.mubr.bf16.mxu0 %v16172_v29  ;;  %2859 = vmatprep.mubr.bf16.mxu1 %v16173_v33  ;;  %v11507_v2 = vld [vmem:[%s16100_s1 + $0x2c8] sm:$0xff]  }
 0x15e   : > { %v9837_v4 = vpop.f32.mrf.mxu1  ;;  %v9901_v60 = vpop.f32.mrf.mxu0  ;;  %10441 = vmatpush3.bf16.msra.mxu1 %v11503_v34  ;;  %v11508_v44 = vld [vmem:[%s16100_s1 + $0x288] sm:$0xff]  }
 0x15f   : > { %v9838_v49 = vadd.f32 %v9837_v4, %v9836_v46  ;;  %v9902_v45 = vadd.f32 %v9901_v60, %v9900_v50  ;;  %10442 = vmatprep.subr.bf16.mxu1 %v11505_v11  ;;  %v1445_v46 = vld [vmem:[%s11763_s26 + $0x180] sm:$0xff]  ;;  %v1446_v50 = vld [vmem:[%s11763_s26 + $0x188] sm:$0xff] }
 0x160   : > { %v9839_v52 = vpop.f32.mrf.mxu1  ;;  %v9903_v27 = vpop.f32.mrf.mxu0  ;;  %v16177_v60 = vld [vmem:[#allocation16_spill] sm:$0xff] }
 0x161   : > { %v12921_v19 = vadd.f32 %v9838_v49, %v12822_v62  ;;  %v12924_v37 = vadd.f32 %v9902_v45, %v16174_v3  ;;  %v11509_v62 = vld [vmem:[%s16100_s1 + $0x2c0] sm:$0xff]   ;;  %v2302_v3 = vshrl.u32 %v1446_v50, 16 }
 0x162   : > { %v9840_v63 = vpop.f32.mrf.mxu1  ;;  %v9904_v34 = vpop.f32.mrf.mxu0  ;;  %10443 = vmatpush3.bf16.msra.mxu1 %v11506_v47 }
 0x163   : > { %16175 = vst [vmem:[#allocation13_spill] sm:$0xff] %v12924_v37  ;;  %v9841_v55 = vadd.f32 %v9840_v63, %v9839_v52  ;;  %v9905_v11 = vadd.f32 %v9904_v34, %v9903_v27  ;;  %10444 = vmatprep.subr.bf16.mxu1 %v11507_v2  ;;  %v2289_v2 = vshrl.u32 %v1445_v46, 16  ;;  %v2292_v52 = vshll.u32 %v1445_v46, 16 }
 0x164   : > { %v9842_v26 = vpop.f32.mrf.mxu1  ;;  %v9906_v33 = vpop.f32.mrf.mxu0  ;;  %2570 = vmatmul.mubr.bf16.gmra.mxu0 %v12760_v0  ;;  %2860 = vmatmul.mubr.bf16.gmra.mxu1 %v12505_v56  ;;  %v2298_v27 = vshll.u32 %v1446_v50, 16  ;;  %v11510_v56 = vld [vmem:[%s16100_s1 + $0x280] sm:$0xff]  }
 0x165   : > { %v12937_v4 = vadd.f32 %v9841_v55, %v12829_v24  ;;  %v12940_v47 = vadd.f32 %v9905_v11, %v16177_v60  ;;  %2577 = vmatprep.mubr.bf16.mxu0 %v12762_v5  ;;  %2867 = vmatprep.mubr.bf16.mxu1 %v12507_v51  ;;  %v2291_v50 = vrot.slane %v2289_v2, 4 }
 0x166   : > { %v9843_v49 = vpop.f32.mrf.mxu1  ;;  %v9907_v45 = vpop.f32.mrf.mxu0  ;;  %10445 = vmatpush3.bf16.msra.mxu1 %v11508_v44  ;;  %v2294_v44 = vrot.slane %v2292_v52, 5 }
 0x167   : > { %16176 = vst [vmem:[#allocation14_spill] sm:$0xff] %v12937_v4  ;;  %16178 = vst [vmem:[#allocation4_spill] sm:$0xff] %v12940_v47  ;;  %v9844_v24 = vadd.f32 %v9843_v49, %v9842_v26  ;;  %v9908_v63 = vadd.f32 %v9907_v45, %v9906_v33  ;;  %10446 = vmatprep.subr.bf16.mxu1 %v11509_v62  ;;  %v2300_v47 = vrot.slane %v2298_v27, 5  ;;  %v2304_v4 = vrot.slane %v2302_v3, 4  ;;  %v1447_v49 = vld [vmem:[%s11763_s26 + $0x190] sm:$0x11] }
 0x168   : > { %v9845_v34 = vpop.f32.mrf.mxu1  ;;  %v9909_v55 = vpop.f32.mrf.mxu0  ;;  %v2295_v52 = vor.u32 %v2294_v44, %v2291_v50  ;;  %v2308_v3 = vshll.u32 %v1447_v49, 16  ;;  %v16180_v49 = vld [vmem:[#allocation6_spill] sm:$0xff] }
 0x169   : > { %v12948_v11 = vadd.f32 %v9844_v24, %v12838_v23  ;;  %v12951_v51 = vadd.f32 %v9908_v63, %v12765_v7  ;;  %v2305_v27 = vor.u32 %v2304_v4, %v2300_v47 }
 0x16a   : > { %v9846_v46 = vpop.f32.mrf.mxu1  ;;  %v9910_v60 = vpop.f32.mrf.mxu0  ;;  %10447 = vmatpush3.bf16.msra.mxu1 %v11510_v56 }
 0x16b   : > { %v9847_v37 = vadd.f32 %v9846_v46, %v9845_v34  ;;  %v9911_v26 = vadd.f32 %v9910_v60, %v9909_v55  ;;  %v2296_v46 = vrot.slane %v2295_v52, 4  ;;  %v2306_v60 = vrot.slane %v2305_v27, 4  ;;  %v11617_v27 = vld [vmem:[%s11763_s26 + $0x8] sm:$0xff] }
 0x16c   : > { %v9848_v33 = vpop.f32.mrf.mxu1  ;;  %v9912_v62 = vpop.f32.mrf.mxu0  ;;  %2578 = vmatmul.mubr.bf16.gmra.mxu0 %v12784_v59  ;;  %2868 = vmatmul.mubr.bf16.gmra.mxu1 %v12533_v18  ;;  %v16179_v18 = vld [vmem:[#allocation5_spill] sm:$0xff] }
 0x16d   : > { %v12957_v23 = vadd.f32 %v9847_v37, %v12846_v53  ;;  %v12960_v7 = vadd.f32 %v9911_v26, %v12773_v58  ;;  %2585 = vmatprep.mubr.bf16.mxu0 %v12789_v28  ;;  %2875 = vmatprep.mubr.bf16.mxu1 %v12536_v39  ;;  %v2310_v39 = vrot.slane %v2308_v3, 5 }
 0x16e   : > { %v9849_v45 = vpop.f32.mrf.mxu1  ;;  %v9913_v2 = vpop.f32.mrf.mxu0 }
 0x16f   : > { %v9850_v56 = vadd.f32 %v9849_v45, %v9848_v33  ;;  %v9914_v24 = vadd.f32 %v9913_v2, %v9912_v62  ;;  %v2301_v2 = vsel %vm12291_vm2, %v2296_v46, %v2300_v47  ;;  %v2311_v52 = vsel %vm12291_vm2, %v2306_v60, %v2310_v39  ;;  %v11618_v39 = vld [vmem:[%s11763_s26 + $0x10] sm:$0x11] }
 0x170   : > { %v9851_v63 = vpop.f32.mrf.mxu1  ;;  %v9915_v34 = vpop.f32.mrf.mxu0  ;;  %v12992_v47 = vcombine.high %v2301_v2, %v2311_v52 }
 0x171   : > { %v12965_v55 = vadd.f32 %v9850_v56, %v16179_v18  ;;  %v12968_v53 = vadd.f32 %v9914_v24, %v12787_v16  ;;  %v2996_v24 = vld [vmem:[%s11763_s26] sm:$0xee] }
 0x172   : > { %v9852_v58 = vpop.f32.mrf.mxu1  ;;  %v9916_v37 = vpop.f32.mrf.mxu0  ;;  %v8948_v46 = vrot.slane %v2996_v24, 9 }
 0x173   : > { %v9853_v26 = vadd.f32 %v9852_v58, %v9851_v63  ;;  %v9917_v50 = vadd.f32 %v9916_v37, %v9915_v34  ;;  %v16181_v34 = vld [vmem:[#allocation7_spill] sm:$0xff] }
 0x174   : > { %v9854_v4 = vpop.f32.mrf.mxu1  ;;  %v9918_v44 = vpop.f32.mrf.mxu0  ;;  %2586 = vmatmul.mubr.bf16.gmra.mxu0 %v12806_v15  ;;  %2876 = vmatmul.mubr.bf16.gmra.mxu1 %v12559_v31  ;;  %v3067_v31 = vrot.slane %v11617_v27, 5 }
 0x175   : > { %v12973_v33 = vadd.f32 %v9853_v26, %v16180_v49  ;;  %v12976_v16 = vadd.f32 %v9917_v50, %v12796_v32  ;;  %2593 = vmatprep.mubr.bf16.mxu0 %v12811_v30  ;;  %2883 = vmatprep.mubr.bf16.mxu1 %v12562_v41  ;;  %v3070_v26 = vrot.slane %v11618_v39, 5  ;;  %v13014_v39 = vcombine.low %v2301_v2, %v2311_v52  ;;  %v16188_v52 = vld [vmem:[#allocation10_spill] sm:$0xff] }
 0x176   : > { %v9855_v62 = vpop.f32.mrf.mxu1  ;;  %v9919_v45 = vpop.f32.mrf.mxu0  ;;  %v3069_v60 = vrot.slane %v3067_v31, 4  ;;  %v3068_v24 = vsel %vm12995_vm5, %v8948_v46, %v3067_v31 }
 0x177   : > { %v9856_v3 = vadd.f32 %v9855_v62, %v9854_v4  ;;  %v9920_v56 = vadd.f32 %v9919_v45, %v9918_v44  ;;  %v16182_v44 = vmov 0 }
 0x178   : > { %v9857_v32 = vpop.f32.mrf.mxu1  ;;  %v9921_v63 = vpop.f32.mrf.mxu0  ;;  %v16183_v44 = vsel %vm12995_vm5, 4294967295, %v16182_v44 }
 0x179   : > { %v12987_v41 = vadd.f32 %v9856_v3, %v16181_v34  ;;  %v12990_v18 = vadd.f32 %v9920_v56, %v12809_v20  ;;  %16184 = vst [vmem:[#allocation15_spill] sm:$0xff] %v16183_v44  ;;  %v16185_v20 = vld [vmem:[#allocation8_spill] sm:$0xff] }
 0x17a   : > { %v9858_v58 = vpop.f32.mrf.mxu1  ;;  %v9922_v37 = vpop.f32.mrf.mxu0 }
 0x17b   : > { %v9859_v50 = vadd.f32 %v9858_v58, %v9857_v32  ;;  %v9923_v4 = vadd.f32 %v9922_v37, %v9921_v63  ;;  %v3071_v32 = vsel %vm12995_vm5, %v3069_v60, %v3070_v26 }
 0x17c   : > { %v9860_v49 = vpop.f32.mrf.mxu1  ;;  %v9924_v62 = vpop.f32.mrf.mxu0  ;;  %2594 = vmatmul.mubr.bf16.gmra.mxu0 %v12824_v25  ;;  %2884 = vmatmul.mubr.bf16.gmra.mxu1 %v12587_v57  ;;  %v11619_v57 = vld [vmem:[%s11763_s26 + $0x20] sm:$0xff]  ;;  %v8997_v31 = vcombine.high %v3068_v24, %v3071_v32 }
 0x17d   : > { %v13002_v45 = vadd.f32 %v9859_v50, %v16185_v20  ;;  %v13005_v27 = vadd.f32 %v9923_v4, %v12818_v1  ;;  %2601 = vmatprep.mubr.bf16.mxu0 %v12992_v47  ;;  %2891 = vmatprep.mubr.bf16.mxu1 %v12591_v14  ;;  %v3074_v63 = vrot.slane %v11619_v57, 5  ;;  %v2997_v50 = vld [vmem:[%s11763_s26 + $0x18] sm:$0xee]  ;;  %v16187_v4 = vld [vmem:[#allocation9_spill] sm:$0xff] }
 0x17e   : > { %v9861_v3 = vpop.f32.mrf.mxu1  ;;  %v9925_v56 = vpop.f32.mrf.mxu0 }
 0x17f   : > { %16186 = vst [vmem:[#allocation16_spill] sm:$0xff] %v13005_v27  ;;  %v9862_v34 = vadd.f32 %v9861_v3, %v9860_v49  ;;  %v9926_v58 = vadd.f32 %v9925_v56, %v9924_v62  ;;  %v3076_v60 = vrot.slane %v3074_v63, 4  ;;  %v8949_v49 = vrot.slane %v2997_v50, 9  ;;  %v11620_v62 = vld [vmem:[%s11763_s26 + $0x28] sm:$0x11] }
 0x180   : > { %v9863_v37 = vpop.f32.mrf.mxu1  ;;  %v9927_v1 = vpop.f32.mrf.mxu0  ;;  %v3077_v3 = vrot.slane %v11620_v62, 5 }
 0x181   : > { %v13018_v14 = vadd.f32 %v9862_v34, %v16187_v4  ;;  %v13021_v20 = vadd.f32 %v9926_v58, %v12827_v17 }
 0x182   : > { %v9864_v46 = vpop.f32.mrf.mxu1  ;;  %v9928_v27 = vpop.f32.mrf.mxu0 }
 0x183   : > { %v9865_v26 = vadd.f32 %v9864_v46, %v9863_v37  ;;  %v9929_v57 = vadd.f32 %v9928_v27, %v9927_v1  ;;  %v11621_v37 = vld [vmem:[%s11763_s26 + $0x38] sm:$0xff]  ;;  %v3075_v46 = vsel %vm12995_vm5, %v8949_v49, %v3074_v63 }
 0x184   : > { %v9866_v56 = vpop.f32.mrf.mxu1  ;;  %v9930_v2 = vpop.f32.mrf.mxu0  ;;  %2602 = vmatmul.mubr.bf16.gmra.mxu0 %v13014_v39  ;;  %2892 = vmatmul.mubr.bf16.gmra.mxu1 %v12631_v40  ;;  %v3081_v1 = vrot.slane %v11621_v37, 5  ;;  %v3078_v40 = vsel %vm12995_vm5, %v3076_v60, %v3077_v3  ;;  %v11622_v3 = vld [vmem:[%s11763_s26 + $0x40] sm:$0x11] }
 0x185   : > { %v13027_v17 = vadd.f32 %v9865_v26, %v16188_v52  ;;  %v13030_v34 = vadd.f32 %v9929_v57, %v12834_v8  ;;  %2899 = vmatprep.mubr.bf16.mxu1 %v12637_v54  ;;  %3466 = vmatprep.mubr.bf16.mxu0 %v8997_v31  ;;  %v2998_v26 = vld [vmem:[%s11763_s26 + $0x30] sm:$0xee]  ;;  %v8996_v57 = vcombine.low %v3068_v24, %v3071_v32  ;;  %v16189_v52 = vld [vmem:[#allocation11_spill] sm:$0xff] }
 0x186   : > { %v9867_v27 = vpop.f32.mrf.mxu1  ;;  %v9931_v58 = vpop.f32.mrf.mxu0  ;;  %v13048_v63 = vcombine.high %v3075_v46, %v3078_v40  ;;  %v8950_v49 = vrot.slane %v2998_v26, 9  ;;  %v3083_v60 = vrot.slane %v3081_v1, 4  ;;  %v11493_v24 = vld [vmem:[%s16100_s1 + $0x470] sm:$0xff]  }
 0x187   : > { %v9868_v50 = vadd.f32 %v9867_v27, %v9866_v56  ;;  %v9932_v4 = vadd.f32 %v9931_v58, %v9930_v2  ;;  %v11490_v56 = vld [vmem:[%s16100_s1 + $0x438] sm:$0xff]   ;;  %v3084_v58 = vrot.slane %v11622_v3, 5 }
 0x188   : > { %v9869_v62 = vpop.f32.mrf.mxu1  ;;  %v9933_v8 = vpop.f32.mrf.mxu0 }
 0x189   : > { %v13040_v54 = vadd.f32 %v9868_v50, %v16189_v52  ;;  %v13043_v31 = vadd.f32 %v9932_v4, %v12841_v48  ;;  %v16190_v4 = vld [vmem:[#allocation12_spill] sm:$0xff] }
 0x18a   : > { %v9870_v2 = vpop.f32.mrf.mxu1  ;;  %v9934_v27 = vpop.f32.mrf.mxu0 }
 0x18b   : > { %v9871_v32 = vadd.f32 %v9870_v2, %v9869_v62  ;;  %v9935_v37 = vadd.f32 %v9934_v27, %v9933_v8  ;;  %v11494_v62 = vld [vmem:[%s16100_s1 + $0x430] sm:$0xff]  }
 0x18c   : > { %v9936_v48 = vpop.f32.mrf.mxu0  ;;  %v10000_v50 = vpop.f32.mrf.mxu1  ;;  %2900 = vmatmul.mubr.bf16.gmra.mxu1 %v12657_v38  ;;  %3467 = vmatmul.mubr.bf16.vlgmr.msra.gmra.mxu0 %v8996_v57  ;;  %v3082_v38 = vsel %vm12995_vm5, %v8950_v49, %v3081_v1  ;;  %v3085_v57 = vsel %vm12995_vm5, %v3083_v60, %v3084_v58 }
 0x18d   : > { %v13056_v52 = vadd.f32 %v9871_v32, %v16190_v4  ;;  %v13059_v26 = vadd.f32 %v9935_v37, %v12854_v6  ;;  %10545 = vmatpush3.bf16.msra.mxu0 %v11490_v56  ;;  %2907 = vmatprep.mubr.bf16.mxu1 %v12677_v42  ;;  %v11623_v6 = vld [vmem:[%s11763_s26 + $0x50] sm:$0xff]  ;;  %v11497_v42 = vld [vmem:[%s16100_s1 + $0x468] sm:$0xff]   ;;  %v13083_v60 = vcombine.high %v3082_v38, %v3085_v57 }
 0x18e   : > { %v9937_v8 = vpop.f32.mrf.mxu0  ;;  %v10001_v2 = vpop.f32.mrf.mxu1  ;;  %3474 = vmatprep.mubr.bf16.mxu0 %v13048_v63  ;;  %10546 = vmatprep.subr.bf16.mxu0 %v11493_v24  ;;  %v3088_v27 = vrot.slane %v11623_v6, 5  ;;  %v2999_v32 = vld [vmem:[%s11763_s26 + $0x48] sm:$0xee] }
 0x18f   : > { %16191 = vst [vmem:[#allocation5_spill] sm:$0xff] %v13056_v52  ;;  %16192 = vst [vmem:[#allocation6_spill] sm:$0xff] %v13059_v26  ;;  %v9938_v56 = vadd.f32 %v9937_v8, %v9936_v48  ;;  %v10002_v3 = vadd.f32 %v10001_v2, %v10000_v50  ;;  %v13075_v26 = vcombine.low %v3075_v46, %v3078_v40  ;;  %v8951_v6 = vrot.slane %v2999_v32, 9  ;;  %v11624_v48 = vld [vmem:[%s11763_s26 + $0x58] sm:$0x11]  ;;  %v11498_v46 = vld [vmem:[%s16100_s1 + $0x428] sm:$0xff]  }
 0x190   : > { %v9939_v37 = vpop.f32.mrf.mxu0  ;;  %v10003_v4 = vpop.f32.mrf.mxu1  ;;  %v3090_v52 = vrot.slane %v3088_v27, 4  ;;  %v3091_v50 = vrot.slane %v11624_v48, 5  ;;  %v13114_v48 = vcombine.low %v3082_v38, %v3085_v57  ;;  %v11512_v38 = vld [vmem:[%s16100_s1 + $0x418] sm:$0xff]  }
 0x191   : > { %v13078_v1 = vadd.f32 %v9938_v56, %v12865_v13  ;;  %v13081_v49 = vadd.f32 %v10002_v3, %v12868_v21  ;;  %10547 = vmatpush3.bf16.msra.mxu0 %v11494_v62  ;;  %v11502_v21 = vld [vmem:[%s16100_s1 + $0x460] sm:$0xff]   ;;  %v3089_v32 = vsel %vm12995_vm5, %v8951_v6, %v3088_v27 }
 0x192   : > { %v9940_v58 = vpop.f32.mrf.mxu0  ;;  %v10004_v24 = vpop.f32.mrf.mxu1  ;;  %10548 = vmatprep.subr.bf16.mxu0 %v11497_v42 }
 0x193   : > { %v9941_v13 = vadd.f32 %v9940_v58, %v9939_v37  ;;  %v10005_v40 = vadd.f32 %v10004_v24, %v10003_v4  ;;  %v11625_v37 = vld [vmem:[%s11763_s26 + $0x68] sm:$0xff]  ;;  %v3000_v58 = vld [vmem:[%s11763_s26 + $0x60] sm:$0xee]  ;;  %v11511_v24 = vld [vmem:[%s16100_s1 + $0x458] sm:$0xff]  }
 0x194   : > { %v9942_v8 = vpop.f32.mrf.mxu0  ;;  %v10006_v62 = vpop.f32.mrf.mxu1  ;;  %2908 = vmatmul.mubr.bf16.gmra.mxu1 %v12712_v12  ;;  %3475 = vmatmul.mubr.bf16.gmra.mxu0 %v13075_v26  ;;  %v3092_v12 = vsel %vm12995_vm5, %v3090_v52, %v3091_v50  ;;  %v3095_v4 = vrot.slane %v11625_v37, 5 }
 0x195   : > { %v13095_v2 = vadd.f32 %v9941_v13, %v12879_v35  ;;  %v13098_v42 = vadd.f32 %v10005_v40, %v12882_v10  ;;  %2915 = vmatprep.mubr.bf16.mxu1 %v16172_v29  ;;  %3482 = vmatprep.mubr.bf16.mxu0 %v13083_v60  ;;  %v11504_v35 = vld [vmem:[%s16100_s1 + $0x420] sm:$0xff]  }
 0x196   : > { %v9943_v56 = vpop.f32.mrf.mxu0  ;;  %v10007_v3 = vpop.f32.mrf.mxu1  ;;  %10549 = vmatpush3.bf16.msra.mxu0 %v11498_v46  ;;  %v13122_v46 = vcombine.high %v3089_v32, %v3092_v12 }
 0x197   : > { %v9944_v10 = vadd.f32 %v9943_v56, %v9942_v8  ;;  %v10008_v29 = vadd.f32 %v10007_v3, %v10006_v62  ;;  %10550 = vmatprep.subr.bf16.mxu0 %v11502_v21  ;;  %v8952_v21 = vrot.slane %v3000_v58, 9  ;;  %v3097_v8 = vrot.slane %v3095_v4, 4  ;;  %v11626_v62 = vld [vmem:[%s11763_s26 + $0x70] sm:$0x11] }
 0x198   : > { %v9945_v27 = vpop.f32.mrf.mxu0  ;;  %v10009_v6 = vpop.f32.mrf.mxu1  ;;  %v3098_v56 = vrot.slane %v11626_v62, 5 }
 0x199   : > { %v13117_v52 = vadd.f32 %v9944_v10, %v12893_v61  ;;  %v13120_v50 = vadd.f32 %v10008_v29, %v12896_v9  ;;  %v11513_v9 = vld [vmem:[%s16100_s1 + $0x450] sm:$0xff]   ;;  %v11627_v10 = vld [vmem:[%s11763_s26 + $0x80] sm:$0xff] }
 0x19a   : > { %v9946_v13 = vpop.f32.mrf.mxu0  ;;  %v10010_v40 = vpop.f32.mrf.mxu1  ;;  %10551 = vmatpush3.bf16.msra.mxu0 %v11504_v35  ;;  %v3102_v35 = vrot.slane %v11627_v10, 5 }
 0x19b   : > { %16193 = vst [vmem:[#allocation7_spill] sm:$0xff] %v13117_v52  ;;  %16194 = vst [vmem:[#allocation8_spill] sm:$0xff] %v13120_v50  ;;  %v9947_v61 = vadd.f32 %v9946_v13, %v9945_v27  ;;  %v10011_v57 = vadd.f32 %v10010_v40, %v10009_v6  ;;  %10552 = vmatprep.subr.bf16.mxu0 %v11511_v24  ;;  %v3001_v24 = vld [vmem:[%s11763_s26 + $0x78] sm:$0xee]  ;;  %v3099_v13 = vsel %vm12995_vm5, %v3097_v8, %v3098_v56  ;;  %v11515_v40 = vld [vmem:[%s16100_s1 + $0x448] sm:$0xff]  }
 0x19c   : > { %v9948_v3 = vpop.f32.mrf.mxu0  ;;  %v10012_v37 = vpop.f32.mrf.mxu1  ;;  %2916 = vmatmul.mubr.bf16.gmra.mxu1 %v12760_v0  ;;  %3483 = vmatmul.mubr.bf16.gmra.mxu0 %v13114_v48  ;;  %v3096_v0 = vsel %vm12995_vm5, %v8952_v21, %v3095_v4  ;;  %v13153_v4 = vcombine.low %v3089_v32, %v3092_v12  ;;  %v8953_v21 = vrot.slane %v3001_v24, 9  ;;  %v3104_v8 = vrot.slane %v3102_v35, 4  ;;  %v11628_v56 = vld [vmem:[%s11763_s26 + $0x88] sm:$0x11] }
 0x19d   : > { %v13135_v29 = vadd.f32 %v9947_v61, %v12907_v36  ;;  %v13138_v58 = vadd.f32 %v10011_v57, %v12910_v43  ;;  %2923 = vmatprep.mubr.bf16.mxu1 %v12762_v5  ;;  %3490 = vmatprep.mubr.bf16.mxu0 %v13122_v46  ;;  %v11514_v36 = vld [vmem:[%s16100_s1 + $0x410] sm:$0xff]   ;;  %v11516_v32 = vld [vmem:[%s16100_s1 + $0x408] sm:$0xff]  }
 0x19e   : > { %v9949_v27 = vpop.f32.mrf.mxu0  ;;  %v10013_v6 = vpop.f32.mrf.mxu1  ;;  %10553 = vmatpush3.bf16.msra.mxu0 %v11512_v38  ;;  %16197 = vst [vmem:[#allocation11_spill] sm:$0xff] %v13153_v4  ;;  %v3105_v38 = vrot.slane %v11628_v56, 5  ;;  %v1449_v56 = vld [vmem:[%s11763_s26 + $0x1a0] sm:$0xff] }
 0x19f   : > { %16195 = vst [vmem:[#allocation9_spill] sm:$0xff] %v13135_v29  ;;  %16196 = vst [vmem:[#allocation10_spill] sm:$0xff] %v13138_v58  ;;  %v9950_v43 = vadd.f32 %v9949_v27, %v9948_v3  ;;  %v10014_v5 = vadd.f32 %v10013_v6, %v10012_v37  ;;  %10554 = vmatprep.subr.bf16.mxu0 %v11513_v9  ;;  %v16199_v3 = vld [vmem:[#allocation13_spill] sm:$0xff]  ;;  %v13162_v9 = vcombine.high %v3096_v0, %v3099_v13  ;;  %v1448_v6 = vld [vmem:[%s11763_s26 + $0x198] sm:$0xff] }
 0x1a0   : > { %v9951_v62 = vpop.f32.mrf.mxu0  ;;  %v10015_v61 = vpop.f32.mrf.mxu1  ;;  %v2646_v58 = vshll.u32 %v1448_v6, 16  ;;  %v2652_v29 = vshll.u32 %v1449_v56, 16 }
 0x1a1   : > { %v13157_v57 = vadd.f32 %v9950_v43, %v12921_v19  ;;  %v13160_v10 = vadd.f32 %v10014_v5, %v16199_v3  ;;  %16201 = vst [vmem:[#allocation17_spill] sm:$0xff] %v13162_v9  ;;  %v11517_v19 = vld [vmem:[%s16100_s1 + $0x440] sm:$0xff]  }
 0x1a2   : > { %v9952_v37 = vpop.f32.mrf.mxu0  ;;  %v10016_v27 = vpop.f32.mrf.mxu1  ;;  %10555 = vmatpush3.bf16.msra.mxu0 %v11514_v36  ;;  %v3103_v36 = vsel %vm12995_vm5, %v8953_v21, %v3102_v35 }
 0x1a3   : > { %16198 = vst [vmem:[#allocation12_spill] sm:$0xff] %v13157_v57  ;;  %16200 = vst [vmem:[#allocation13_spill] sm:$0xff] %v13160_v10  ;;  %v9953_v12 = vadd.f32 %v9952_v37, %v9951_v62  ;;  %v10017_v24 = vadd.f32 %v10016_v27, %v10015_v61  ;;  %10556 = vmatprep.subr.bf16.mxu0 %v11515_v40  ;;  %v3106_v62 = vsel %vm12995_vm5, %v3104_v8, %v3105_v38  ;;  %v11629_v61 = vld [vmem:[%s11763_s26 + $0x98] sm:$0xff]  ;;  %v16202_v37 = vld [vmem:[#allocation14_spill] sm:$0xff] }
 0x1a4   : > { %v9954_v43 = vpop.f32.mrf.mxu0  ;;  %v10018_v5 = vpop.f32.mrf.mxu1  ;;  %2924 = vmatmul.mubr.bf16.gmra.mxu1 %v12784_v59  ;;  %3491 = vmatmul.mubr.bf16.gmra.mxu0 %v13153_v4  ;;  %v3109_v3 = vrot.slane %v11629_v61, 5  ;;  %v16204_v27 = vld [vmem:[#allocation4_spill] sm:$0xff]  ;;  %v3002_v59 = vld [vmem:[%s11763_s26 + $0x90] sm:$0xee]  ;;  %v2643_v57 = vshrl.u32 %v1448_v6, 16  ;;  %v2656_v8 = vshrl.u32 %v1449_v56, 16  ;;  %v13191_v61 = vcombine.low %v3096_v0, %v3099_v13 }
 0x1a5   : > { %v13180_v40 = vadd.f32 %v9953_v12, %v16202_v37  ;;  %v13183_v10 = vadd.f32 %v10017_v24, %v16204_v27  ;;  %2931 = vmatprep.mubr.bf16.mxu1 %v12789_v28  ;;  %3498 = vmatprep.mubr.bf16.mxu0 %v13162_v9  ;;  %v11518_v38 = vld [vmem:[%s16100_s1 + $0x400] sm:$0xff]   ;;  %v13193_v27 = vcombine.high %v3103_v36, %v3106_v62  ;;  %v8954_v6 = vrot.slane %v3002_v59, 9  ;;  %v1450_v13 = vld [vmem:[%s11763_s26 + $0x1a8] sm:$0x11] }
 0x1a6   : > { %v9955_v35 = vpop.f32.mrf.mxu0  ;;  %v10019_v21 = vpop.f32.mrf.mxu1  ;;  %10557 = vmatpush3.bf16.msra.mxu0 %v11516_v32 }
 0x1a7   : > { %16203 = vst [vmem:[#allocation14_spill] sm:$0xff] %v13180_v40  ;;  %16205 = vst [vmem:[#allocation4_spill] sm:$0xff] %v13183_v10  ;;  %v9956_v12 = vadd.f32 %v9955_v35, %v9954_v43  ;;  %v10020_v24 = vadd.f32 %v10019_v21, %v10018_v5  ;;  %10558 = vmatprep.subr.bf16.mxu0 %v11517_v19  ;;  %v3111_v10 = vrot.slane %v3109_v3, 4  ;;  %v11630_v40 = vld [vmem:[%s11763_s26 + $0xa0] sm:$0x11]  ;;  %v2645_v43 = vrot.slane %v2643_v57, 4 }
 0x1a8   : > { %v9957_v28 = vpop.f32.mrf.mxu0  ;;  %v10021_v37 = vpop.f32.mrf.mxu1  ;;  %v3112_v9 = vrot.slane %v11630_v40, 5  ;;  %v2648_v5 = vrot.slane %v2646_v58, 5  ;;  %v2654_v19 = vrot.slane %v2652_v29, 5  ;;  %v2658_v21 = vrot.slane %v2656_v8, 4 }
 0x1a9   : > { %v13197_v32 = vadd.f32 %v9956_v12, %v12948_v11  ;;  %v13200_v56 = vadd.f32 %v10020_v24, %v12951_v51  ;;  %v3110_v11 = vsel %vm12995_vm5, %v8954_v6, %v3109_v3  ;;  %v2662_v57 = vshll.u32 %v1450_v13, 16  ;;  %v11631_v12 = vld [vmem:[%s11763_s26 + $0xb0] sm:$0xff]  ;;  %v11632_v13 = vld [vmem:[%s11763_s26 + $0xb8] sm:$0x11] }
 0x1aa   : > { %v9958_v35 = vpop.f32.mrf.mxu0  ;;  %v10022_v0 = vpop.f32.mrf.mxu1  ;;  %10559 = vmatpush3.bf16.msra.mxu0 %v11518_v38  ;;  %v3113_v51 = vsel %vm12995_vm5, %v3111_v10, %v3112_v9  ;;  %v2659_v38 = vor.u32 %v2658_v21, %v2654_v19  ;;  %v3116_v3 = vrot.slane %v11631_v12, 5  ;;  %v3003_v9 = vld [vmem:[%s11763_s26 + $0xa8] sm:$0xee]  ;;  %v3119_v21 = vrot.slane %v11632_v13, 5 }
 0x1ab   : > { %v9959_v4 = vadd.f32 %v9958_v35, %v9957_v28  ;;  %v10023_v50 = vadd.f32 %v10022_v0, %v10021_v37  ;;  %v13219_v28 = vcombine.low %v3103_v36, %v3106_v62  ;;  %v2664_v6 = vrot.slane %v2662_v57, 5 }
 0x1ac   : > { %v9960_v59 = vpop.f32.mrf.mxu0  ;;  %v10024_v52 = vpop.f32.mrf.mxu1  ;;  %2932 = vmatmul.mubr.bf16.gmra.mxu1 %v12806_v15  ;;  %3499 = vmatmul.mubr.bf16.gmra.mxu0 %v13191_v61  ;;  %v2649_v15 = vor.u32 %v2648_v5, %v2645_v43  ;;  %v2660_v35 = vrot.slane %v2659_v38, 4  ;;  %v8955_v0 = vrot.slane %v3003_v9, 9 }
 0x1ad   : > { %v13210_v29 = vadd.f32 %v9959_v4, %v12957_v23  ;;  %v13213_v58 = vadd.f32 %v10023_v50, %v12960_v7  ;;  %2939 = vmatprep.mubr.bf16.mxu1 %v12811_v30  ;;  %3506 = vmatprep.mubr.bf16.mxu0 %v13193_v27  ;;  %v13221_v7 = vcombine.high %v3110_v11, %v3113_v51 }
 0x1ae   : > { %v9961_v40 = vpop.f32.mrf.mxu0  ;;  %v10025_v8 = vpop.f32.mrf.mxu1  ;;  %v2650_v37 = vrot.slane %v2649_v15, 4  ;;  %v3117_v38 = vsel %vm12995_vm5, %v8955_v0, %v3116_v3 }
 0x1af   : > { %v9962_v24 = vadd.f32 %v9961_v40, %v9960_v59  ;;  %v10026_v10 = vadd.f32 %v10025_v8, %v10024_v52  ;;  %v3118_v52 = vrot.slane %v3116_v3, 4 }
 0x1b0   : > { %v9963_v23 = vpop.f32.mrf.mxu0  ;;  %v10027_v4 = vpop.f32.mrf.mxu1  ;;  %v2655_v15 = vsel %vm12291_vm2, %v2650_v37, %v2654_v19  ;;  %v13250_v19 = vcombine.low %v3110_v11, %v3113_v51 }
 0x1b1   : > { %v13224_v30 = vadd.f32 %v9962_v24, %v12965_v55  ;;  %v13227_v50 = vadd.f32 %v10026_v10, %v12968_v53  ;;  %v3004_v10 = vld [vmem:[%s11763_s26 + $0xc0] sm:$0xee] }
 0x1b2   : > { %v9964_v43 = vpop.f32.mrf.mxu0  ;;  %v10028_v5 = vpop.f32.mrf.mxu1 }
 0x1b3   : > { %v9965_v59 = vadd.f32 %v9964_v43, %v9963_v23  ;;  %v10029_v36 = vadd.f32 %v10028_v5, %v10027_v4 }
 0x1b4   : > { %v9966_v62 = vpop.f32.mrf.mxu0  ;;  %v10030_v40 = vpop.f32.mrf.mxu1  ;;  %2940 = vmatmul.mubr.bf16.gmra.mxu1 %v12824_v25  ;;  %3507 = vmatmul.mubr.bf16.gmra.mxu0 %v13219_v28  ;;  %v2665_v25 = vsel %vm12291_vm2, %v2660_v35, %v2664_v6  ;;  %v8956_v35 = vrot.slane %v3004_v10, 9 }
 0x1b5   : > { %v13233_v55 = vadd.f32 %v9965_v59, %v12973_v33  ;;  %v13236_v53 = vadd.f32 %v10029_v36, %v12976_v16  ;;  %2947 = vmatprep.mubr.bf16.mxu1 %v12992_v47  ;;  %3514 = vmatprep.mubr.bf16.mxu0 %v13221_v7  ;;  %v3120_v33 = vsel %vm12995_vm5, %v3118_v52, %v3119_v21  ;;  %v11633_v16 = vld [vmem:[%s11763_s26 + $0xc8] sm:$0xff]  ;;  %v11634_v52 = vld [vmem:[%s11763_s26 + $0xd0] sm:$0x11] }
 0x1b6   : > { %v9967_v57 = vpop.f32.mrf.mxu0  ;;  %v10031_v8 = vpop.f32.mrf.mxu1  ;;  %v3123_v12 = vrot.slane %v11633_v16, 5  ;;  %v8931_v3 = vcombine.high %v2655_v15, %v2665_v25  ;;  %v13258_v6 = vcombine.high %v3117_v38, %v3120_v33  ;;  %v3126_v13 = vrot.slane %v11634_v52, 5 }
 0x1b7   : > { %v9968_v47 = vadd.f32 %v9967_v57, %v9966_v62  ;;  %v10032_v24 = vadd.f32 %v10031_v8, %v10030_v40 }
 0x1b8   : > { %v9969_v9 = vpop.f32.mrf.mxu0  ;;  %v10033_v23 = vpop.f32.mrf.mxu1  ;;  %v3125_v0 = vrot.slane %v3123_v12, 4  ;;  %v3124_v57 = vsel %vm12995_vm5, %v8956_v35, %v3123_v12 }
 0x1b9   : > { %v13253_v4 = vadd.f32 %v9968_v47, %v12987_v41  ;;  %v13256_v37 = vadd.f32 %v10032_v24, %v12990_v18  ;;  %v16206_v18 = vld [vmem:[#allocation16_spill] sm:$0xff]  ;;  %v3005_v24 = vld [vmem:[%s11763_s26 + $0xd8] sm:$0xee] }
 0x1ba   : > { %v9970_v43 = vpop.f32.mrf.mxu0  ;;  %v10034_v5 = vpop.f32.mrf.mxu1  ;;  %v3127_v8 = vsel %vm12995_vm5, %v3125_v0, %v3126_v13  ;;  %v8957_v52 = vrot.slane %v3005_v24, 9 }
 0x1bb   : > { %v9971_v21 = vadd.f32 %v9970_v43, %v9969_v9  ;;  %v10035_v59 = vadd.f32 %v10034_v5, %v10033_v23  ;;  %v8930_v23 = vcombine.low %v2655_v15, %v2665_v25  ;;  %v13284_v12 = vcombine.high %v3124_v57, %v3127_v8 }
 0x1bc   : > { %v9972_v11 = vpop.f32.mrf.mxu0  ;;  %v10036_v51 = vpop.f32.mrf.mxu1  ;;  %2948 = vmatmul.mubr.bf16.gmra.mxu1 %v13014_v39  ;;  %3515 = vmatmul.mubr.bf16.gmra.mxu0 %v13250_v19  ;;  %v11635_v39 = vld [vmem:[%s11763_s26 + $0xe0] sm:$0xff] }
 0x1bd   : > { %v13264_v41 = vadd.f32 %v9971_v21, %v13002_v45  ;;  %v13267_v36 = vadd.f32 %v10035_v59, %v16206_v18  ;;  %2955 = vmatprep.mubr.bf16.mxu1 %v8931_v3  ;;  %3522 = vmatprep.mubr.bf16.mxu0 %v13258_v6  ;;  %v3130_v16 = vrot.slane %v11635_v39, 5  ;;  %v13276_v3 = vcombine.low %v3117_v38, %v3120_v33  ;;  %v11636_v21 = vld [vmem:[%s11763_s26 + $0xe8] sm:$0x11] }
 0x1be   : > { %v9973_v62 = vpop.f32.mrf.mxu0  ;;  %v10037_v40 = vpop.f32.mrf.mxu1  ;;  %v3133_v59 = vrot.slane %v11636_v21, 5 }
 0x1bf   : > { %v9974_v47 = vadd.f32 %v9973_v62, %v9972_v11  ;;  %v10038_v45 = vadd.f32 %v10037_v40, %v10036_v51  ;;  %v3132_v13 = vrot.slane %v3130_v16, 4  ;;  %v3131_v18 = vsel %vm12995_vm5, %v8957_v52, %v3130_v16  ;;  %v11637_v40 = vld [vmem:[%s11763_s26 + $0xf8] sm:$0xff] }
 0x1c0   : > { %v9975_v10 = vpop.f32.mrf.mxu0  ;;  %v10039_v9 = vpop.f32.mrf.mxu1  ;;  %v3137_v39 = vrot.slane %v11637_v40, 5 }
 0x1c1   : > { %v13279_v43 = vadd.f32 %v9974_v47, %v13018_v14  ;;  %v13282_v5 = vadd.f32 %v10038_v45, %v13021_v20  ;;  %v3134_v62 = vsel %vm12995_vm5, %v3132_v13, %v3133_v59  ;;  %v3006_v45 = vld [vmem:[%s11763_s26 + $0xf0] sm:$0xee]  ;;  %v11638_v13 = vld [vmem:[%s11763_s26 + $0x100] sm:$0x11] }
 0x1c2   : > { %v9976_v35 = vpop.f32.mrf.mxu0  ;;  %v10040_v0 = vpop.f32.mrf.mxu1  ;;  %v13310_v16 = vcombine.high %v3131_v18, %v3134_v62  ;;  %v3139_v52 = vrot.slane %v3137_v39, 4  ;;  %v3140_v21 = vrot.slane %v11638_v13, 5 }
 0x1c3   : > { %v9977_v11 = vadd.f32 %v9976_v35, %v9975_v10  ;;  %v10041_v51 = vadd.f32 %v10040_v0, %v10039_v9  ;;  %v13302_v10 = vcombine.low %v3124_v57, %v3127_v8  ;;  %v8958_v0 = vrot.slane %v3006_v45, 9  ;;  %v16208_v8 = vld [vmem:[#allocation6_spill] sm:$0xff] }
 0x1c4   : > { %v9978_v15 = vpop.f32.mrf.mxu0  ;;  %v10042_v25 = vpop.f32.mrf.mxu1  ;;  %2956 = vmatmul.mubr.bf16.gmra.mxu1 %v8930_v23  ;;  %3523 = vmatmul.mubr.bf16.gmra.mxu0 %v13276_v3  ;;  %v3141_v40 = vsel %vm12995_vm5, %v3139_v52, %v3140_v21 }
 0x1c5   : > { %v13289_v14 = vadd.f32 %v9977_v11, %v13027_v17  ;;  %v13292_v20 = vadd.f32 %v10041_v51, %v13030_v34  ;;  %3530 = vmatprep.mubr.bf16.mxu0 %v13284_v12  ;;  %3806 = vmatprep.mubr.bf16.mxu1 %v13048_v63 }
 0x1c6   : > { %v9979_v38 = vpop.f32.mrf.mxu0  ;;  %v10043_v33 = vpop.f32.mrf.mxu1 }
 0x1c7   : > { %v9980_v17 = vadd.f32 %v9979_v38, %v9978_v15  ;;  %v10044_v47 = vadd.f32 %v10043_v33, %v10042_v25  ;;  %v3138_v33 = vsel %vm12995_vm5, %v8958_v0, %v3137_v39 }
 0x1c8   : > { %v9981_v34 = vpop.f32.mrf.mxu0  ;;  %v10045_v24 = vpop.f32.mrf.mxu1  ;;  %v13337_v39 = vcombine.high %v3138_v33, %v3141_v40 }
 0x1c9   : > { %v13305_v63 = vadd.f32 %v9980_v17, %v13040_v54  ;;  %v13308_v9 = vadd.f32 %v10044_v47, %v13043_v31  ;;  %v16207_v54 = vld [vmem:[#allocation5_spill] sm:$0xff] }
 0x1ca   : > { %v9982_v23 = vpop.f32.mrf.mxu0  ;;  %v10046_v35 = vpop.f32.mrf.mxu1 }
 0x1cb   : > { %v9983_v59 = vadd.f32 %v9982_v23, %v9981_v34  ;;  %v10047_v11 = vadd.f32 %v10046_v35, %v10045_v24  ;;  %v3007_v34 = vld [vmem:[%s11763_s26 + $0x108] sm:$0xee]  ;;  %v13329_v35 = vcombine.low %v3131_v18, %v3134_v62 }
 0x1cc   : > { %v10048_v51 = vpop.f32.mrf.mxu1  ;;  %v10112_v57 = vpop.f32.mrf.mxu0  ;;  %3531 = vmatmul.mubr.bf16.gmra.mxu0 %v13302_v10  ;;  %3807 = vmatmul.mubr.bf16.vlgmr.msra.gmra.mxu1 %v13075_v26  ;;  %v11639_v26 = vld [vmem:[%s11763_s26 + $0x110] sm:$0xff]  ;;  %v8959_v21 = vrot.slane %v3007_v34, 9 }
 0x1cd   : > { %v13316_v31 = vadd.f32 %v9983_v59, %v16207_v54  ;;  %v13319_v15 = vadd.f32 %v10047_v11, %v16208_v8  ;;  %3538 = vmatprep.mubr.bf16.mxu0 %v13310_v16  ;;  %3814 = vmatprep.mubr.bf16.mxu1 %v13083_v60  ;;  %v3144_v17 = vrot.slane %v11639_v26, 5  ;;  %v11640_v54 = vld [vmem:[%s11763_s26 + $0x118] sm:$0x11] }
 0x1ce   : > { %v10049_v25 = vpop.f32.mrf.mxu1  ;;  %v10113_v38 = vpop.f32.mrf.mxu0 }
 0x1cf   : > { %v10050_v47 = vadd.f32 %v10049_v25, %v10048_v51  ;;  %v10114_v45 = vadd.f32 %v10113_v38, %v10112_v57  ;;  %v3146_v11 = vrot.slane %v3144_v17, 4  ;;  %v3147_v51 = vrot.slane %v11640_v54, 5  ;;  %v16211_v54 = vld [vmem:[#allocation7_spill] sm:$0xff] }
 0x1d0   : > { %v10051_v24 = vpop.f32.mrf.mxu1  ;;  %v10115_v23 = vpop.f32.mrf.mxu0  ;;  %v3145_v26 = vsel %vm12995_vm5, %v8959_v21, %v3144_v17 }
 0x1d1   : > { %v13332_v13 = vadd.f32 %v10050_v47, %v13078_v1  ;;  %v13335_v59 = vadd.f32 %v10114_v45, %v13081_v49  ;;  %v3148_v47 = vsel %vm12995_vm5, %v3146_v11, %v3147_v51  ;;  %v11641_v45 = vld [vmem:[%s11763_s26 + $0x128] sm:$0xff] }
 0x1d2   : > { %v10052_v0 = vpop.f32.mrf.mxu1  ;;  %v10116_v52 = vpop.f32.mrf.mxu0  ;;  %v3151_v34 = vrot.slane %v11641_v45, 5  ;;  %v13364_v17 = vcombine.high %v3145_v26, %v3148_v47  ;;  %v11642_v45 = vld [vmem:[%s11763_s26 + $0x130] sm:$0x11] }
 0x1d3   : > { %v10053_v57 = vadd.f32 %v10052_v0, %v10051_v24  ;;  %v10117_v8 = vadd.f32 %v10116_v52, %v10115_v23  ;;  %v3008_v23 = vld [vmem:[%s11763_s26 + $0x120] sm:$0xee]  ;;  %v13356_v52 = vcombine.low %v3138_v33, %v3141_v40  ;;  %v16216_v40 = vld [vmem:[#allocation11_spill] sm:$0xff] }
 0x1d4   : > { %v10054_v25 = vpop.f32.mrf.mxu1  ;;  %v10118_v18 = vpop.f32.mrf.mxu0  ;;  %3539 = vmatmul.mubr.bf16.gmra.mxu0 %v13329_v35  ;;  %3815 = vmatmul.mubr.bf16.gmra.mxu1 %v13114_v48  ;;  %v8960_v51 = vrot.slane %v3008_v23, 9  ;;  %v16221_v23 = vld [vmem:[#allocation17_spill] sm:$0xff] }
 0x1d5   : > { %v13343_v1 = vadd.f32 %v10053_v57, %v13095_v2  ;;  %v13346_v49 = vadd.f32 %v10117_v8, %v13098_v42  ;;  %3546 = vmatprep.mubr.bf16.mxu0 %v13337_v39  ;;  %3822 = vmatprep.mubr.bf16.mxu1 %v13122_v46  ;;  %v16213_v8 = vld [vmem:[#allocation8_spill] sm:$0xff] }
 0x1d6   : > { %v10055_v62 = vpop.f32.mrf.mxu1  ;;  %v10119_v38 = vpop.f32.mrf.mxu0  ;;  %16215 = vst [vmem:[#allocation8_spill] sm:$0xff] %v13364_v17 }
 0x1d7   : > { %16209 = vst [vmem:[#allocation16_spill] sm:$0xff] %v13343_v1  ;;  %16210 = vst [vmem:[#allocation5_spill] sm:$0xff] %v13346_v49  ;;  %v10056_v2 = vadd.f32 %v10055_v62, %v10054_v25  ;;  %v10120_v24 = vadd.f32 %v10119_v38, %v10118_v18  ;;  %v3153_v49 = vrot.slane %v3151_v34, 4  ;;  %v3154_v25 = vrot.slane %v11642_v45, 5 }
 0x1d8   : > { %v10057_v42 = vpop.f32.mrf.mxu1  ;;  %v10121_v0 = vpop.f32.mrf.mxu0 }
 0x1d9   : > { %v13359_v57 = vadd.f32 %v10056_v2, %v16211_v54  ;;  %v13362_v22 = vadd.f32 %v10120_v24, %v16213_v8  ;;  %v16217_v2 = vld [vmem:[#allocation9_spill] sm:$0xff]  ;;  %v16219_v54 = vld [vmem:[#allocation10_spill] sm:$0xff] }
 0x1da   : > { %v10058_v21 = vpop.f32.mrf.mxu1  ;;  %v10122_v11 = vpop.f32.mrf.mxu0 }
 0x1db   : > { %16212 = vst [vmem:[#allocation6_spill] sm:$0xff] %v13359_v57  ;;  %16214 = vst [vmem:[#allocation7_spill] sm:$0xff] %v13362_v22  ;;  %v10059_v18 = vadd.f32 %v10058_v21, %v10057_v42  ;;  %v10123_v62 = vadd.f32 %v10122_v11, %v10121_v0  ;;  %v3152_v0 = vsel %vm12995_vm5, %v8960_v51, %v3151_v34  ;;  %v11643_v11 = vld [vmem:[%s11763_s26 + $0x140] sm:$0xff] }
 0x1dc   : > { %v10060_v38 = vpop.f32.mrf.mxu1  ;;  %v10124_v33 = vpop.f32.mrf.mxu0  ;;  %3547 = vmatmul.mubr.bf16.gmra.mxu0 %v13356_v52  ;;  %3823 = vmatmul.mubr.bf16.gmra.mxu1 %v16216_v40  ;;  %v3155_v21 = vsel %vm12995_vm5, %v3153_v49, %v3154_v25  ;;  %v3158_v22 = vrot.slane %v11643_v11, 5  ;;  %v16222_v57 = vld [vmem:[#allocation12_spill] sm:$0xff]  ;;  %v11644_v11 = vld [vmem:[%s11763_s26 + $0x148] sm:$0x11] }
 0x1dd   : > { %v13370_v24 = vadd.f32 %v10059_v18, %v16217_v2  ;;  %v13373_v8 = vadd.f32 %v10123_v62, %v16219_v54  ;;  %3554 = vmatprep.mubr.bf16.mxu0 %v13364_v17  ;;  %3830 = vmatprep.mubr.bf16.mxu1 %v16221_v23  ;;  %v16224_v17 = vld [vmem:[#allocation13_spill] sm:$0xff]  ;;  %v13391_v34 = vcombine.high %v3152_v0, %v3155_v21 }
 0x1de   : > { %v10061_v45 = vpop.f32.mrf.mxu1  ;;  %v10125_v42 = vpop.f32.mrf.mxu0  ;;  %v3160_v40 = vrot.slane %v3158_v22, 4 }
 0x1df   : > { %16218 = vst [vmem:[#allocation9_spill] sm:$0xff] %v13370_v24  ;;  %16220 = vst [vmem:[#allocation10_spill] sm:$0xff] %v13373_v8  ;;  %v10062_v18 = vadd.f32 %v10061_v45, %v10060_v38  ;;  %v10126_v2 = vadd.f32 %v10125_v42, %v10124_v33  ;;  %v3009_v24 = vld [vmem:[%s11763_s26 + $0x138] sm:$0xee]  ;;  %v13383_v8 = vcombine.low %v3145_v26, %v3148_v47  ;;  %v3161_v38 = vrot.slane %v11644_v11, 5  ;;  %v16226_v47 = vld [vmem:[#allocation14_spill] sm:$0xff] }
 0x1e0   : > { %v10063_v62 = vpop.f32.mrf.mxu1  ;;  %v10127_v54 = vpop.f32.mrf.mxu0  ;;  %v8961_v25 = vrot.slane %v3009_v24, 9 }
 0x1e1   : > { %v13386_v23 = vadd.f32 %v10062_v18, %v16222_v57  ;;  %v13389_v1 = vadd.f32 %v10126_v2, %v16224_v17  ;;  %v16228_v17 = vld [vmem:[#allocation4_spill] sm:$0xff] }
 0x1e2   : > { %v10064_v51 = vpop.f32.mrf.mxu1  ;;  %v10128_v49 = vpop.f32.mrf.mxu0 }
 0x1e3   : > { %16223 = vst [vmem:[#allocation12_spill] sm:$0xff] %v13386_v23  ;;  %16225 = vst [vmem:[#allocation13_spill] sm:$0xff] %v13389_v1  ;;  %v10065_v33 = vadd.f32 %v10064_v51, %v10063_v62  ;;  %v10129_v45 = vadd.f32 %v10128_v49, %v10127_v54  ;;  %v3159_v62 = vsel %vm12995_vm5, %v8961_v25, %v3158_v22  ;;  %v11645_v51 = vld [vmem:[%s11763_s26 + $0x158] sm:$0xff] }
 0x1e4   : > { %v10066_v42 = vpop.f32.mrf.mxu1  ;;  %v10130_v26 = vpop.f32.mrf.mxu0  ;;  %3555 = vmatmul.mubr.bf16.gmra.mxu0 %v13383_v8  ;;  %3831 = vmatmul.mubr.bf16.gmra.mxu1 %v13191_v61  ;;  %v3162_v54 = vsel %vm12995_vm5, %v3160_v40, %v3161_v38  ;;  %v3165_v49 = vrot.slane %v11645_v51, 5  ;;  %v11646_v51 = vld [vmem:[%s11763_s26 + $0x160] sm:$0x11] }
 0x1e5   : > { %v13397_v57 = vadd.f32 %v10065_v33, %v16226_v47  ;;  %v13400_v18 = vadd.f32 %v10129_v45, %v16228_v17  ;;  %3562 = vmatprep.mubr.bf16.mxu0 %v13391_v34  ;;  %3838 = vmatprep.mubr.bf16.mxu1 %v13193_v27  ;;  %v3010_v47 = vld [vmem:[%s11763_s26 + $0x150] sm:$0xee]  ;;  %v13418_v22 = vcombine.high %v3159_v62, %v3162_v54 }
 0x1e6   : > { %v10067_v24 = vpop.f32.mrf.mxu1  ;;  %v10131_v2 = vpop.f32.mrf.mxu0  ;;  %v8962_v38 = vrot.slane %v3010_v47, 9  ;;  %v3167_v23 = vrot.slane %v3165_v49, 4 }
 0x1e7   : > { %16227 = vst [vmem:[#allocation14_spill] sm:$0xff] %v13397_v57  ;;  %16229 = vst [vmem:[#allocation4_spill] sm:$0xff] %v13400_v18  ;;  %v10068_v11 = vadd.f32 %v10067_v24, %v10066_v42  ;;  %v10132_v33 = vadd.f32 %v10131_v2, %v10130_v26  ;;  %v13410_v18 = vcombine.low %v3152_v0, %v3155_v21  ;;  %v3168_v42 = vrot.slane %v11646_v51, 5 }
 0x1e8   : > { %v10069_v45 = vpop.f32.mrf.mxu1  ;;  %v10133_v17 = vpop.f32.mrf.mxu0 }
 0x1e9   : > { %v13413_v57 = vadd.f32 %v10068_v11, %v13197_v32  ;;  %v13416_v1 = vadd.f32 %v10132_v33, %v13200_v56  ;;  %v3166_v33 = vsel %vm12995_vm5, %v8962_v38, %v3165_v49  ;;  %v3169_v47 = vsel %vm12995_vm5, %v3167_v23, %v3168_v42 }
 0x1ea   : > { %v10070_v25 = vpop.f32.mrf.mxu1  ;;  %v10134_v40 = vpop.f32.mrf.mxu0  ;;  %v13445_v49 = vcombine.high %v3166_v33, %v3169_v47 }
 0x1eb   : > { %16230 = vst [vmem:[#allocation18_spill] sm:$0xff] %v13416_v1  ;;  %v10071_v26 = vadd.f32 %v10070_v25, %v10069_v45  ;;  %v10135_v24 = vadd.f32 %v10134_v40, %v10133_v17  ;;  %v11647_v45 = vld [vmem:[%s11763_s26 + $0x170] sm:$0xff]  ;;  %v3011_v40 = vld [vmem:[%s11763_s26 + $0x168] sm:$0xee] }
 0x1ec   : > { %v10072_v2 = vpop.f32.mrf.mxu1  ;;  %v10136_v0 = vpop.f32.mrf.mxu0  ;;  %3563 = vmatmul.mubr.bf16.gmra.mxu0 %v13410_v18  ;;  %3839 = vmatmul.mubr.bf16.gmra.mxu1 %v13219_v28  ;;  %v3172_v17 = vrot.slane %v11647_v45, 5  ;;  %v8963_v42 = vrot.slane %v3011_v40, 9  ;;  %v11648_v45 = vld [vmem:[%s11763_s26 + $0x178] sm:$0x11] }
 0x1ed   : > { %v13424_v32 = vadd.f32 %v10071_v26, %v13210_v29  ;;  %v13427_v56 = vadd.f32 %v10135_v24, %v13213_v58  ;;  %3570 = vmatprep.mubr.bf16.mxu0 %v13418_v22  ;;  %3846 = vmatprep.mubr.bf16.mxu1 %v13221_v7  ;;  %v13437_v26 = vcombine.low %v3159_v62, %v3162_v54 }
 0x1ee   : > { %v10073_v21 = vpop.f32.mrf.mxu1  ;;  %v10137_v11 = vpop.f32.mrf.mxu0 }
 0x1ef   : > { %16231 = vst [vmem:[#allocation19_spill] sm:$0xff] %v13424_v32  ;;  %16232 = vst [vmem:[#allocation20_spill] sm:$0xff] %v13427_v56  ;;  %v10074_v29 = vadd.f32 %v10073_v21, %v10072_v2  ;;  %v10138_v25 = vadd.f32 %v10137_v11, %v10136_v0  ;;  %v3174_v32 = vrot.slane %v3172_v17, 4  ;;  %v3175_v2 = vrot.slane %v11648_v45, 5 }
 0x1f0   : > { %v10075_v58 = vpop.f32.mrf.mxu1  ;;  %v10139_v51 = vpop.f32.mrf.mxu0 }
 0x1f1   : > { %v13440_v24 = vadd.f32 %v10074_v29, %v13224_v30  ;;  %v13443_v56 = vadd.f32 %v10138_v25, %v13227_v50  ;;  %v3173_v29 = vsel %vm12995_vm5, %v8963_v42, %v3172_v17  ;;  %v3176_v25 = vsel %vm12995_vm5, %v3174_v32, %v3175_v2 }
 0x1f2   : > { %v10076_v38 = vpop.f32.mrf.mxu1  ;;  %v10140_v23 = vpop.f32.mrf.mxu0  ;;  %v13470_v45 = vcombine.high %v3173_v29, %v3176_v25 }
 0x1f3   : > { %v10077_v0 = vadd.f32 %v10076_v38, %v10075_v58  ;;  %v10141_v21 = vadd.f32 %v10140_v23, %v10139_v51  ;;  %v13462_v38 = vcombine.low %v3166_v33, %v3169_v47 }
 0x1f4   : > { %v10078_v11 = vpop.f32.mrf.mxu1  ;;  %v10142_v1 = vpop.f32.mrf.mxu0  ;;  %3571 = vmatmul.mubr.bf16.gmra.mxu0 %v13437_v26  ;;  %3847 = vmatmul.mubr.bf16.gmra.mxu1 %v13250_v19 }
 0x1f5   : > { %v13451_v30 = vadd.f32 %v10077_v0, %v13233_v55  ;;  %v13454_v50 = vadd.f32 %v10141_v21, %v13236_v53  ;;  %3578 = vmatprep.mubr.bf16.mxu0 %v13445_v49  ;;  %3854 = vmatprep.mubr.bf16.mxu1 %v13258_v6 }
 0x1f6   : > { %v10079_v62 = vpop.f32.mrf.mxu1  ;;  %v10143_v54 = vpop.f32.mrf.mxu0 }
 0x1f7   : > { %v10080_v40 = vadd.f32 %v10079_v62, %v10078_v11  ;;  %v10144_v58 = vadd.f32 %v10143_v54, %v10142_v1  ;;  %v13482_v54 = vcombine.low %v3173_v29, %v3176_v25 }
 0x1f8   : > { %v10081_v51 = vpop.f32.mrf.mxu1  ;;  %v10145_v55 = vpop.f32.mrf.mxu0 }
 0x1f9   : > { %v13465_v53 = vadd.f32 %v10080_v40, %v13253_v4  ;;  %v13468_v23 = vadd.f32 %v10144_v58, %v13256_v37 }
 0x1fa   : > { %v10082_v0 = vpop.f32.mrf.mxu1  ;;  %v10146_v21 = vpop.f32.mrf.mxu0 }
 0x1fb   : > { %v10083_v17 = vadd.f32 %v10082_v0, %v10081_v51  ;;  %v10147_v42 = vadd.f32 %v10146_v21, %v10145_v55 }
 0x1fc   : > { %v10084_v44 = vpop.f32.mrf.mxu1  ;;  %v10148_v32 = vpop.f32.mrf.mxu0  ;;  %3579 = vmatmul.mubr.bf16.gmra.mxu0 %v13462_v38  ;;  %3855 = vmatmul.mubr.bf16.gmra.mxu1 %v13276_v3 }
 0x1fd   : > { %v13475_v1 = vadd.f32 %v10083_v17, %v13264_v41  ;;  %v13478_v4 = vadd.f32 %v10147_v42, %v13267_v36  ;;  %3586 = vmatprep.mubr.bf16.mxu0 %v13470_v45  ;;  %3862 = vmatprep.mubr.bf16.mxu1 %v13284_v12 }
 0x1fe   : > { %v10085_v37 = vpop.f32.mrf.mxu1  ;;  %v10149_v33 = vpop.f32.mrf.mxu0 }
 0x1ff   : > { %v10086_v47 = vadd.f32 %v10085_v37, %v10084_v44  ;;  %v10150_v2 = vadd.f32 %v10149_v33, %v10148_v32 }
 0x200   : > { %v10087_v11 = vpop.f32.mrf.mxu1  ;;  %v10151_v62 = vpop.f32.mrf.mxu0 }
 0x201   : > { %v13485_v40 = vadd.f32 %v10086_v47, %v13279_v43  ;;  %v13488_v41 = vadd.f32 %v10150_v2, %v13282_v5 }
 0x202   : > { %v10088_v36 = vpop.f32.mrf.mxu1  ;;  %v10152_v58 = vpop.f32.mrf.mxu0 }
 0x203   : > { %v10089_v51 = vadd.f32 %v10088_v36, %v10087_v11  ;;  %v10153_v55 = vadd.f32 %v10152_v58, %v10151_v62 }
 0x204   : > { %v10090_v0 = vpop.f32.mrf.mxu1  ;;  %v10154_v21 = vpop.f32.mrf.mxu0  ;;  %3587 = vmatmul.mubr.bf16.gmra.mxu0 %v13482_v54  ;;  %3863 = vmatmul.mubr.bf16.gmra.mxu1 %v13302_v10 }
 0x205   : > { %v13493_v44 = vadd.f32 %v10089_v51, %v13289_v14  ;;  %v13496_v29 = vadd.f32 %v10153_v55, %v13292_v20  ;;  %3870 = vmatprep.mubr.bf16.mxu1 %v13310_v16  ;;  %4146 = vmatprep.mubr.bf16.mxu0 %v13083_v60 }
 0x206   : > { %v10091_v43 = vpop.f32.mrf.mxu1  ;;  %v10155_v5 = vpop.f32.mrf.mxu0 }
 0x207   : > { %v10092_v25 = vadd.f32 %v10091_v43, %v10090_v0  ;;  %v10156_v17 = vadd.f32 %v10155_v5, %v10154_v21 }
 0x208   : > { %v10093_v42 = vpop.f32.mrf.mxu1  ;;  %v10157_v32 = vpop.f32.mrf.mxu0 }
 0x209   : > { %v13501_v37 = vadd.f32 %v10092_v25, %v13305_v63  ;;  %v13504_v33 = vadd.f32 %v10156_v17, %v13308_v9 }
 0x20a   : > { %v10094_v14 = vpop.f32.mrf.mxu1  ;;  %v10158_v47 = vpop.f32.mrf.mxu0 }
 0x20b   : > { %v10095_v20 = vadd.f32 %v10094_v14, %v10093_v42  ;;  %v10159_v2 = vadd.f32 %v10158_v47, %v10157_v32  ;;  %v16234_v42 = vld [vmem:[#allocation16_spill] sm:$0xff]  ;;  %v16235_v14 = vld [vmem:[#allocation5_spill] sm:$0xff] }
 0x20c   : > { %v10160_v11 = vpop.f32.mrf.mxu0  ;;  %v10224_v62 = vpop.f32.mrf.mxu1  ;;  %3871 = vmatmul.mubr.bf16.gmra.mxu1 %v13329_v35  ;;  %4147 = vmatmul.mubr.bf16.vlgmr.msra.gmra.mxu0 %v13114_v48 }
 0x20d   : > { %v13509_v60 = vadd.f32 %v10095_v20, %v13316_v31  ;;  %v13512_v36 = vadd.f32 %v10159_v2, %v13319_v15  ;;  %3878 = vmatprep.mubr.bf16.mxu1 %v13337_v39  ;;  %4154 = vmatprep.mubr.bf16.mxu0 %v13122_v46  ;;  %v16233_v46 = vld [vmem:[#allocation11_spill] sm:$0xff] }
 0x20e   : > { %v10161_v63 = vpop.f32.mrf.mxu0  ;;  %v10225_v9 = vpop.f32.mrf.mxu1 }
 0x20f   : > { %v10162_v58 = vadd.f32 %v10161_v63, %v10160_v11  ;;  %v10226_v51 = vadd.f32 %v10225_v9, %v10224_v62 }
 0x210   : > { %v10163_v55 = vpop.f32.mrf.mxu0  ;;  %v10227_v0 = vpop.f32.mrf.mxu1 }
 0x211   : > { %v13517_v21 = vadd.f32 %v10162_v58, %v13332_v13  ;;  %v13520_v48 = vadd.f32 %v10226_v51, %v13335_v59  ;;  %v16236_v13 = vld [vmem:[#allocation8_spill] sm:$0xff]  ;;  %v16237_v59 = vld [vmem:[#allocation17_spill] sm:$0xff]  ;;  %v16238_v58 = vld [vmem:[#allocation6_spill] sm:$0xff] }
 0x212   : > { %v10164_v31 = vpop.f32.mrf.mxu0  ;;  %v10228_v43 = vpop.f32.mrf.mxu1 }
 0x213   : > { %v10165_v15 = vadd.f32 %v10164_v31, %v10163_v55  ;;  %v10229_v5 = vadd.f32 %v10228_v43, %v10227_v0  ;;  %v16239_v55 = vld [vmem:[#allocation7_spill] sm:$0xff] }
 0x214   : > { %v10166_v25 = vpop.f32.mrf.mxu0  ;;  %v10230_v17 = vpop.f32.mrf.mxu1  ;;  %3879 = vmatmul.mubr.bf16.gmra.mxu1 %v13356_v52  ;;  %4155 = vmatmul.mubr.bf16.gmra.mxu0 %v16233_v46 }
 0x215   : > { %v13525_v32 = vadd.f32 %v10165_v15, %v16234_v42  ;;  %v13528_v47 = vadd.f32 %v10229_v5, %v16235_v14  ;;  %3886 = vmatprep.mubr.bf16.mxu1 %v16236_v13  ;;  %4162 = vmatprep.mubr.bf16.mxu0 %v16237_v59  ;;  %v16241_v14 = vld [vmem:[#allocation10_spill] sm:$0xff] }
 0x216   : > { %v10167_v20 = vpop.f32.mrf.mxu0  ;;  %v10231_v2 = vpop.f32.mrf.mxu1 }
 0x217   : > { %v10168_v11 = vadd.f32 %v10167_v20, %v10166_v25  ;;  %v10232_v62 = vadd.f32 %v10231_v2, %v10230_v17  ;;  %v16240_v25 = vld [vmem:[#allocation9_spill] sm:$0xff] }
 0x218   : > { %v10169_v63 = vpop.f32.mrf.mxu0  ;;  %v10233_v9 = vpop.f32.mrf.mxu1 }
 0x219   : > { %v13533_v51 = vadd.f32 %v10168_v11, %v16238_v58  ;;  %v13536_v0 = vadd.f32 %v10232_v62, %v16239_v55  ;;  %v16243_v58 = vld [vmem:[#allocation12_spill] sm:$0xff] }
 0x21a   : > { %v10170_v31 = vpop.f32.mrf.mxu0  ;;  %v10234_v43 = vpop.f32.mrf.mxu1 }
 0x21b   : > { %v10171_v15 = vadd.f32 %v10170_v31, %v10169_v63  ;;  %v10235_v5 = vadd.f32 %v10234_v43, %v10233_v9 }
 0x21c   : > { %v10172_v46 = vpop.f32.mrf.mxu0  ;;  %v10236_v42 = vpop.f32.mrf.mxu1  ;;  %3887 = vmatmul.mubr.bf16.gmra.mxu1 %v13383_v8  ;;  %4163 = vmatmul.mubr.bf16.gmra.mxu0 %v13191_v61  ;;  %v16244_v61 = vld [vmem:[#allocation13_spill] sm:$0xff] }
 0x21d   : > { %v13541_v17 = vadd.f32 %v10171_v15, %v16240_v25  ;;  %v13544_v59 = vadd.f32 %v10235_v5, %v16241_v14  ;;  %3894 = vmatprep.mubr.bf16.mxu1 %v13391_v34  ;;  %4170 = vmatprep.mubr.bf16.mxu0 %v13193_v27  ;;  %v16245_v27 = vld [vmem:[#allocation14_spill] sm:$0xff] }
 0x21e   : > { %v10173_v20 = vpop.f32.mrf.mxu0  ;;  %v10237_v2 = vpop.f32.mrf.mxu1 }
 0x21f   : > { %16242 = vst [vmem:[#allocation11_spill] sm:$0xff] %v13544_v59  ;;  %v10174_v11 = vadd.f32 %v10173_v20, %v10172_v46  ;;  %v10238_v62 = vadd.f32 %v10237_v2, %v10236_v42  ;;  %v16246_v42 = vld [vmem:[#allocation4_spill] sm:$0xff] }
 0x220   : > { %v10175_v63 = vpop.f32.mrf.mxu0  ;;  %v10239_v9 = vpop.f32.mrf.mxu1 }
 0x221   : > { %v13549_v55 = vadd.f32 %v10174_v11, %v16243_v58  ;;  %v13552_v31 = vadd.f32 %v10238_v62, %v16244_v61 }
 0x222   : > { %v10176_v43 = vpop.f32.mrf.mxu0  ;;  %v10240_v15 = vpop.f32.mrf.mxu1 }
 0x223   : > { %v10177_v5 = vadd.f32 %v10176_v43, %v10175_v63  ;;  %v10241_v25 = vadd.f32 %v10240_v15, %v10239_v9 }
 0x224   : > { %v10178_v14 = vpop.f32.mrf.mxu0  ;;  %v10242_v59 = vpop.f32.mrf.mxu1  ;;  %3895 = vmatmul.mubr.bf16.gmra.mxu1 %v13410_v18  ;;  %4171 = vmatmul.mubr.bf16.gmra.mxu0 %v13219_v28  ;;  %v16247_v28 = vld [vmem:[#allocation18_spill] sm:$0xff] }
 0x225   : > { %v13557_v46 = vadd.f32 %v10177_v5, %v16245_v27  ;;  %v13560_v20 = vadd.f32 %v10241_v25, %v16246_v42  ;;  %3902 = vmatprep.mubr.bf16.mxu1 %v13418_v22  ;;  %4178 = vmatprep.mubr.bf16.mxu0 %v13221_v7 }
 0x226   : > { %v10179_v2 = vpop.f32.mrf.mxu0  ;;  %v10243_v11 = vpop.f32.mrf.mxu1 }
 0x227   : > { %v10180_v62 = vadd.f32 %v10179_v2, %v10178_v14  ;;  %v10244_v63 = vadd.f32 %v10243_v11, %v10242_v59  ;;  %v16249_v59 = vld [vmem:[#allocation19_spill] sm:$0xff] }
 0x228   : > { %v10181_v9 = vpop.f32.mrf.mxu0  ;;  %v10245_v58 = vpop.f32.mrf.mxu1 }
 0x229   : > { %v13565_v61 = vadd.f32 %v10180_v62, %v13413_v57  ;;  %v13568_v43 = vadd.f32 %v10244_v63, %v16247_v28  ;;  %v16251_v57 = vld [vmem:[#allocation20_spill] sm:$0xff]  ;;  %v11649_v63 = vld [vmem:[%s11763_s26 + $0x188] sm:$0xff] }
 0x22a   : > { %v10182_v15 = vpop.f32.mrf.mxu0  ;;  %v10246_v5 = vpop.f32.mrf.mxu1 }
 0x22b   : > { %16248 = vst [vmem:[#allocation16_spill] sm:$0xff] %v13568_v43  ;;  %v10183_v25 = vadd.f32 %v10182_v15, %v10181_v9  ;;  %v10247_v27 = vadd.f32 %v10246_v5, %v10245_v58  ;;  %v3632_v9 = vrot.slane %v11649_v63, 5  ;;  %v3012_v15 = vld [vmem:[%s11763_s26 + $0x180] sm:$0xee]  ;;  %v11650_v63 = vld [vmem:[%s11763_s26 + $0x190] sm:$0x11] }
 0x22c   : > { %v10184_v42 = vpop.f32.mrf.mxu0  ;;  %v10248_v7 = vpop.f32.mrf.mxu1  ;;  %3903 = vmatmul.mubr.bf16.gmra.mxu1 %v13437_v26  ;;  %4179 = vmatmul.mubr.bf16.gmra.mxu0 %v13250_v19 }
 0x22d   : > { %v13573_v14 = vadd.f32 %v10183_v25, %v16249_v59  ;;  %v13576_v2 = vadd.f32 %v10247_v27, %v16251_v57  ;;  %3910 = vmatprep.mubr.bf16.mxu1 %v13445_v49  ;;  %4186 = vmatprep.mubr.bf16.mxu0 %v13258_v6  ;;  %v11519_v6 = vld [vmem:[%s16103_s4 + $0xf8] sm:$0xff]  }
 0x22e   : > { %v10185_v11 = vpop.f32.mrf.mxu0  ;;  %v10249_v62 = vpop.f32.mrf.mxu1  ;;  %10872 = vmatprep.subr.bf16.mxu1 %v11519_v6 }
 0x22f   : > { %16250 = vst [vmem:[#allocation5_spill] sm:$0xff] %v13573_v14  ;;  %16252 = vst [vmem:[#allocation8_spill] sm:$0xff] %v13576_v2  ;;  %v10186_v58 = vadd.f32 %v10185_v11, %v10184_v42  ;;  %v10250_v28 = vadd.f32 %v10249_v62, %v10248_v7  ;;  %v9044_v2 = vrot.slane %v3012_v15, 9  ;;  %v3634_v14 = vrot.slane %v3632_v9, 4  ;;  %10873 = vmatpush3.bf16.msra.mxu1 %v11519_v6 }
 0x230   : > { %v10187_v5 = vpop.f32.mrf.mxu0  ;;  %v10251_v19 = vpop.f32.mrf.mxu1  ;;  %v3635_v42 = vrot.slane %v11650_v63, 5 }
 0x231   : > { %v13583_v25 = vadd.f32 %v10186_v58, %v13440_v24  ;;  %v13586_v27 = vadd.f32 %v10250_v28, %v13443_v56 }
 0x232   : > { %v10188_v59 = vpop.f32.mrf.mxu0  ;;  %v10252_v57 = vpop.f32.mrf.mxu1 }
 0x233   : > { %v10189_v7 = vadd.f32 %v10188_v59, %v10187_v5  ;;  %v10253_v11 = vadd.f32 %v10252_v57, %v10251_v19  ;;  %v3633_v5 = vsel %vm12995_vm5, %v9044_v2, %v3632_v9  ;;  %v3636_v19 = vsel %vm12995_vm5, %v3634_v14, %v3635_v42 }
 0x234   : > { %v10190_v62 = vpop.f32.mrf.mxu0  ;;  %v10254_v43 = vpop.f32.mrf.mxu1  ;;  %3911 = vmatmul.mubr.bf16.gmra.mxu1 %v13462_v38  ;;  %4187 = vmatmul.mubr.bf16.gmra.mxu0 %v13276_v3 }
 0x235   : > { %v13595_v56 = vadd.f32 %v10189_v7, %v13451_v30  ;;  %v13598_v24 = vadd.f32 %v10253_v11, %v13454_v50  ;;  %3918 = vmatprep.mubr.bf16.mxu1 %v13470_v45  ;;  %4194 = vmatprep.mubr.bf16.mxu0 %v13284_v12  ;;  %v13612_v12 = vcombine.high %v3633_v5, %v3636_v19 }
 0x236   : > { %v10191_v58 = vpop.f32.mrf.mxu0  ;;  %v10255_v28 = vpop.f32.mrf.mxu1 }
 0x237   : > { %16253 = vst [vmem:[#allocation17_spill] sm:$0xff] %v13598_v24  ;;  %v10192_v3 = vadd.f32 %v10191_v58, %v10190_v62  ;;  %v10256_v59 = vadd.f32 %v10255_v28, %v10254_v43  ;;  %v13624_v28 = vcombine.low %v3633_v5, %v3636_v19 }
 0x238   : > { %v10193_v30 = vpop.f32.mrf.mxu0  ;;  %v10257_v57 = vpop.f32.mrf.mxu1 }
 0x239   : > { %v13607_v50 = vadd.f32 %v10192_v3, %v13465_v53  ;;  %v13610_v63 = vadd.f32 %v10256_v59, %v13468_v23 }
 0x23a   : > { %v10194_v7 = vpop.f32.mrf.mxu0  ;;  %v10258_v11 = vpop.f32.mrf.mxu1 }
 0x23b   : > { %v10195_v24 = vadd.f32 %v10194_v7, %v10193_v30  ;;  %v10259_v2 = vadd.f32 %v10258_v11, %v10257_v57 }
 0x23c   : > { %v10196_v9 = vpop.f32.mrf.mxu0  ;;  %v10260_v15 = vpop.f32.mrf.mxu1  ;;  %3919 = vmatmul.mubr.bf16.gmra.mxu1 %v13482_v54  ;;  %4195 = vmatmul.mubr.bf16.gmra.mxu0 %v13302_v10 }
 0x23d   : > { %v13617_v43 = vadd.f32 %v10195_v24, %v13475_v1  ;;  %v13620_v53 = vadd.f32 %v10259_v2, %v13478_v4  ;;  %3926 = vmatprep.mubr.bf16.mxu1 %v13612_v12  ;;  %4202 = vmatprep.mubr.bf16.mxu0 %v13310_v16  ;;  %v11520_v4 = vld [vmem:[%s16103_s4 + $0xf0] sm:$0xff]  }
 0x23e   : > { %v10197_v23 = vpop.f32.mrf.mxu0  ;;  %v10261_v14 = vpop.f32.mrf.mxu1  ;;  %10874 = vmatprep.subr.bf16.mxu1 %v11520_v4 }
 0x23f   : > { %v10198_v6 = vadd.f32 %v10197_v23, %v10196_v9  ;;  %v10262_v42 = vadd.f32 %v10261_v14, %v10260_v15  ;;  %10875 = vmatpush3.bf16.msra.mxu1 %v11520_v4 }
 0x240   : > { %v10199_v62 = vpop.f32.mrf.mxu0  ;;  %v10263_v58 = vpop.f32.mrf.mxu1 }
 0x241   : > { %v13627_v10 = vadd.f32 %v10198_v6, %v13485_v40  ;;  %v13630_v1 = vadd.f32 %v10262_v42, %v13488_v41 }
 0x242   : > { %v10200_v24 = vpop.f32.mrf.mxu0  ;;  %v10264_v16 = vpop.f32.mrf.mxu1 }
 0x243   : > { %v10201_v3 = vadd.f32 %v10200_v24, %v10199_v62  ;;  %v10265_v59 = vadd.f32 %v10264_v16, %v10263_v58 }
 0x244   : > { %v10202_v15 = vpop.f32.mrf.mxu0  ;;  %v10266_v30 = vpop.f32.mrf.mxu1  ;;  %3927 = vmatmul.mubr.bf16.gmra.mxu1 %v13624_v28  ;;  %4203 = vmatmul.mubr.bf16.gmra.mxu0 %v13329_v35 }
 0x245   : > { %v13638_v40 = vadd.f32 %v10201_v3, %v13493_v44  ;;  %v13641_v41 = vadd.f32 %v10265_v59, %v13496_v29  ;;  %4210 = vmatprep.mubr.bf16.mxu0 %v13337_v39 }
 0x246   : > { %v10203_v5 = vpop.f32.mrf.mxu0  ;;  %v10267_v19 = vpop.f32.mrf.mxu1 }
 0x247   : > { %v10204_v57 = vadd.f32 %v10203_v5, %v10202_v15  ;;  %v10268_v7 = vadd.f32 %v10267_v19, %v10266_v30 }
 0x248   : > { %v10205_v11 = vpop.f32.mrf.mxu0  ;;  %v10269_v2 = vpop.f32.mrf.mxu1 }
 0x249   : > { %v13645_v9 = vadd.f32 %v10204_v57, %v13501_v37  ;;  %v13648_v35 = vadd.f32 %v10268_v7, %v13504_v33 }
 0x24a   : > { %v10206_v44 = vpop.f32.mrf.mxu0  ;;  %v10270_v23 = vpop.f32.mrf.mxu1 }
 0x24b   : > { %v10207_v14 = vadd.f32 %v10206_v44, %v10205_v11  ;;  %v10271_v29 = vadd.f32 %v10270_v23, %v10269_v2 }
 0x24c   : > { %v10272_v6 = vpop.f32.mrf.mxu1  ;;  %v10336_v42 = vpop.f32.mrf.mxu0  ;;  %4211 = vmatmul.mubr.bf16.gmra.mxu0 %v13356_v52 }
 0x24d   : > { %v13652_v39 = vadd.f32 %v10207_v14, %v13509_v60  ;;  %v13655_v62 = vadd.f32 %v10271_v29, %v13512_v36  ;;  %4218 = vmatprep.mubr.bf16.mxu0 %v16236_v13 }
 0x24e   : > { %v10273_v37 = vpop.f32.mrf.mxu1  ;;  %v10337_v58 = vpop.f32.mrf.mxu0 }
 0x24f   : > { %v10274_v33 = vadd.f32 %v10273_v37, %v10272_v6  ;;  %v10338_v4 = vadd.f32 %v10337_v58, %v10336_v42  ;;  %v4478_v37 = vld [vmem:[#allocation2 + $0x14] sm:$0x1] }
 0x250   : > { %v10275_v24 = vpop.f32.mrf.mxu1  ;;  %v10339_v16 = vpop.f32.mrf.mxu0 }
 0x251   : > { %v13659_v3 = vadd.f32 %v10274_v33, %v13517_v21  ;;  %v13662_v59 = vadd.f32 %v10338_v4, %v13520_v48  ;;  %v16259_v4 = vld [vmem:[#allocation11_spill] sm:$0xff] }
 0x252   : > { %v10276_v52 = vpop.f32.mrf.mxu1  ;;  %v10340_v60 = vpop.f32.mrf.mxu0 }
 0x253   : > { %v10277_v15 = vadd.f32 %v10276_v52, %v10275_v24  ;;  %v10341_v30 = vadd.f32 %v10340_v60, %v10339_v16  ;;  %v11521_v16 = vld [vmem:[%s16103_s4 + $0xe8] sm:$0xff]  }
 0x254   : > { %v10278_v36 = vpop.f32.mrf.mxu1  ;;  %v10342_v5 = vpop.f32.mrf.mxu0  ;;  %4219 = vmatmul.mubr.bf16.gmra.mxu0 %v13383_v8  ;;  %v4428_v8 = vld [vmem:[#allocation2 + $0xc] sm:$0x1]  ;;  %10876 = vmatprep.subr.bf16.mxu1 %v11521_v16 }
 0x255   : > { %v13666_v13 = vadd.f32 %v10277_v15, %v13525_v32  ;;  %v13669_v19 = vadd.f32 %v10341_v30, %v13528_v47  ;;  %4226 = vmatprep.mubr.bf16.mxu0 %v13391_v34  ;;  %v4429_v47 = vsel %vm13673_vm8, 0, %v4428_v8  ;;  %10877 = vmatpush3.bf16.msra.mxu1 %v11521_v16  ;;  %v16260_v16 = vld [vmem:[#allocation16_spill] sm:$0xff] }
 0x256   : > { %v10279_v21 = vpop.f32.mrf.mxu1  ;;  %v10343_v57 = vpop.f32.mrf.mxu0  ;;  %4430 = vst [vmem:[#allocation2 + $0xc] sm:$0x1] %v4429_v47 }
 0x257   : > { %v10280_v48 = vadd.f32 %v10279_v21, %v10278_v36  ;;  %v10344_v7 = vadd.f32 %v10343_v57, %v10342_v5  ;;  %v4431_v5 = vld [vmem:[#allocation2 + $0x18] sm:$0x1] }
 0x258   : > { %v10281_v32 = vpop.f32.mrf.mxu1  ;;  %v10345_v2 = vpop.f32.mrf.mxu0  ;;  %v4432_v57 = vsel %vm13673_vm8, 0, %v4431_v5  ;;  %v11528_v5 = vld [vmem:[%s16103_s4 + $0x1a0] sm:$0xff]  }
 0x259   : > { %v13680_v34 = vadd.f32 %v10280_v48, %v13533_v51  ;;  %v13683_v44 = vadd.f32 %v10344_v7, %v13536_v0  ;;  %v4479_v51 = vsel %vm13686_vm10, 0, %v4478_v37  ;;  %4433 = vst [vmem:[#allocation2 + $0x18] sm:$0x1] %v4432_v57 }
 0x25a   : > { %v10282_v14 = vpop.f32.mrf.mxu1  ;;  %v10346_v29 = vpop.f32.mrf.mxu0  ;;  %4480 = vst [vmem:[#allocation2 + $0x14] sm:$0x1] %v4479_v51 }
 0x25b   : > { %v10283_v6 = vadd.f32 %v10282_v14, %v10281_v32  ;;  %v10347_v42 = vadd.f32 %v10346_v29, %v10345_v2  ;;  %v11522_v2 = vld [vmem:[%s16103_s4 + $0xe0] sm:$0xff]  }
 0x25c   : > { %v10284_v58 = vpop.f32.mrf.mxu1  ;;  %v10348_v33 = vpop.f32.mrf.mxu0  ;;  %4227 = vmatmul.mubr.bf16.gmra.mxu0 %v13410_v18  ;;  %v4481_v14 = vld [vmem:[#allocation2 + $0x20] sm:$0x1]  ;;  %10878 = vmatprep.subr.bf16.mxu1 %v11522_v2 }
 0x25d   : > { %v13694_v0 = vadd.f32 %v10283_v6, %v13541_v17  ;;  %v13697_v24 = vadd.f32 %v10347_v42, %v16259_v4  ;;  %4234 = vmatprep.mubr.bf16.mxu0 %v13418_v22  ;;  %v11523_v17 = vld [vmem:[%s16103_s4 + $0x1b8] sm:$0xff]   ;;  %v4482_v42 = vsel %vm13686_vm10, 0, %v4481_v14  ;;  %10879 = vmatpush3.bf16.msra.mxu1 %v11522_v2  ;;  %v11651_v14 = vld [vmem:[%s11763_s26 + $0x1a0] sm:$0xff] }
 0x25e   : > { %v10285_v52 = vpop.f32.mrf.mxu1  ;;  %v10349_v60 = vpop.f32.mrf.mxu0  ;;  %10968 = vmatprep.subr.bf16.mxu0 %v11523_v17  ;;  %4483 = vst [vmem:[#allocation2 + $0x20] sm:$0x1] %v4482_v42  ;;  %v3972_v42 = vrot.slane %v11651_v14, 5 }
 0x25f   : > { %v10286_v15 = vadd.f32 %v10285_v52, %v10284_v58  ;;  %v10350_v18 = vadd.f32 %v10349_v60, %v10348_v33  ;;  %10969 = vmatpush3.bf16.msra.mxu0 %v11523_v17  ;;  %v4434_v60 = vld [vmem:[#allocation2 + $0x24] sm:$0x1] }
 0x260   : > { %v10287_v30 = vpop.f32.mrf.mxu1  ;;  %v10351_v36 = vpop.f32.mrf.mxu0  ;;  %v4435_v17 = vsel %vm13673_vm8, 0, %v4434_v60 }
 0x261   : > { %v13707_v22 = vadd.f32 %v10286_v15, %v13549_v55  ;;  %v13710_v21 = vadd.f32 %v10350_v18, %v13552_v31  ;;  %v11524_v55 = vld [vmem:[%s16103_s4 + $0x1b0] sm:$0xff]   ;;  %4436 = vst [vmem:[#allocation2 + $0x24] sm:$0x1] %v4435_v17  ;;  %v3974_v17 = vrot.slane %v3972_v42, 4 }
 0x262   : > { %v10288_v48 = vpop.f32.mrf.mxu1  ;;  %v10352_v7 = vpop.f32.mrf.mxu0  ;;  %10970 = vmatprep.subr.bf16.mxu0 %v11524_v55 }
 0x263   : > { %v10289_v8 = vadd.f32 %v10288_v48, %v10287_v30  ;;  %v10353_v32 = vadd.f32 %v10352_v7, %v10351_v36  ;;  %10971 = vmatpush3.bf16.msra.mxu0 %v11524_v55  ;;  %v16261_v7 = vld [vmem:[#allocation5_spill] sm:$0xff] }
 0x264   : > { %v10290_v31 = vpop.f32.mrf.mxu1  ;;  %v10354_v47 = vpop.f32.mrf.mxu0  ;;  %4235 = vmatmul.mubr.bf16.gmra.mxu0 %v13437_v26  ;;  %v4484_v55 = vld [vmem:[#allocation2 + $0x2c] sm:$0x1] }
 0x265   : > { %v13722_v29 = vadd.f32 %v10289_v8, %v13557_v46  ;;  %v13725_v6 = vadd.f32 %v10353_v32, %v13560_v20  ;;  %4242 = vmatprep.mubr.bf16.mxu0 %v13445_v49  ;;  %v11525_v46 = vld [vmem:[%s16103_s4 + $0xd8] sm:$0xff]   ;;  %v11526_v49 = vld [vmem:[%s16103_s4 + $0x1a8] sm:$0xff]   ;;  %v16262_v32 = vld [vmem:[#allocation8_spill] sm:$0xff] }
 0x266   : > { %v10291_v37 = vpop.f32.mrf.mxu1  ;;  %v10355_v58 = vpop.f32.mrf.mxu0  ;;  %10880 = vmatprep.subr.bf16.mxu1 %v11525_v46  ;;  %10972 = vmatprep.subr.bf16.mxu0 %v11526_v49 }
 0x267   : > { %v10292_v33 = vadd.f32 %v10291_v37, %v10290_v31  ;;  %v10356_v26 = vadd.f32 %v10355_v58, %v10354_v47  ;;  %10881 = vmatpush3.bf16.msra.mxu1 %v11525_v46  ;;  %10973 = vmatpush3.bf16.msra.mxu0 %v11526_v49  ;;  %v4485_v37 = vsel %vm13686_vm10, 0, %v4484_v55  ;;  %v16263_v55 = vld [vmem:[#allocation17_spill] sm:$0xff] }
 0x268   : > { %v10293_v20 = vpop.f32.mrf.mxu1  ;;  %v10357_v51 = vpop.f32.mrf.mxu0  ;;  %10974 = vmatprep.subr.bf16.mxu0 %v11528_v5  ;;  %4486 = vst [vmem:[#allocation2 + $0x2c] sm:$0x1] %v4485_v37 }
 0x269   : > { %v13737_v4 = vadd.f32 %v10292_v33, %v13565_v61  ;;  %v13740_v52 = vadd.f32 %v10356_v26, %v16260_v16  ;;  %v11527_v61 = vld [vmem:[%s16103_s4 + $0xd0] sm:$0xff]   ;;  %v3013_v33 = vld [vmem:[%s11763_s26 + $0x198] sm:$0xee] }
 0x26a   : > { %v10294_v15 = vpop.f32.mrf.mxu1  ;;  %v10358_v18 = vpop.f32.mrf.mxu0  ;;  %10882 = vmatprep.subr.bf16.mxu1 %v11527_v61  ;;  %v11531_v26 = vld [vmem:[%s16103_s4 + $0x198] sm:$0xff]   ;;  %v4437_v16 = vld [vmem:[#allocation2 + $0x30] sm:$0x1] }
 0x26b   : > { %v10295_v30 = vadd.f32 %v10294_v15, %v10293_v20  ;;  %v10359_v36 = vadd.f32 %v10358_v18, %v10357_v51  ;;  %10883 = vmatpush3.bf16.msra.mxu1 %v11527_v61  ;;  %10975 = vmatpush3.bf16.msra.mxu0 %v11528_v5  ;;  %v9095_v18 = vrot.slane %v3013_v33, 9  ;;  %v4438_v61 = vsel %vm13673_vm8, 0, %v4437_v16 }
 0x26c   : > { %v10296_v57 = vpop.f32.mrf.mxu1  ;;  %v10360_v48 = vpop.f32.mrf.mxu0  ;;  %4243 = vmatmul.mubr.bf16.gmra.mxu0 %v13462_v38  ;;  %10976 = vmatprep.subr.bf16.mxu0 %v11531_v26  ;;  %4439 = vst [vmem:[#allocation2 + $0x30] sm:$0x1] %v4438_v61 }
 0x26d   : > { %v13752_v8 = vadd.f32 %v10295_v30, %v16261_v7  ;;  %v13755_v2 = vadd.f32 %v10359_v36, %v16262_v32  ;;  %4250 = vmatprep.mubr.bf16.mxu0 %v13470_v45  ;;  %v11529_v45 = vld [vmem:[%s16103_s4 + $0xc8] sm:$0xff]  }
 0x26e   : > { %v10297_v31 = vpop.f32.mrf.mxu1  ;;  %v10361_v47 = vpop.f32.mrf.mxu0  ;;  %10884 = vmatprep.subr.bf16.mxu1 %v11529_v45  ;;  %v11652_v30 = vld [vmem:[%s11763_s26 + $0x1a8] sm:$0x11] }
 0x26f   : > { %v10298_v38 = vadd.f32 %v10297_v31, %v10296_v57  ;;  %v10362_v58 = vadd.f32 %v10361_v47, %v10360_v48  ;;  %v3975_v36 = vrot.slane %v11652_v30, 5  ;;  %10885 = vmatpush3.bf16.msra.mxu1 %v11529_v45  ;;  %10977 = vmatpush3.bf16.msra.mxu0 %v11531_v26  ;;  %v4487_v47 = vld [vmem:[#allocation2 + $0x38] sm:$0x1] }
 0x270   : > { %v10299_v46 = vpop.f32.mrf.mxu1  ;;  %v10363_v49 = vpop.f32.mrf.mxu0 }
 0x271   : > { %v13769_v20 = vadd.f32 %v10298_v38, %v13583_v25  ;;  %v13772_v51 = vadd.f32 %v10362_v58, %v13586_v27  ;;  %v11532_v25 = vld [vmem:[%s16103_s4 + $0xc0] sm:$0xff]   ;;  %v11533_v27 = vld [vmem:[%s16103_s4 + $0x190] sm:$0xff]   ;;  %v3973_v58 = vsel %vm12995_vm5, %v9095_v18, %v3972_v42  ;;  %v3976_v33 = vsel %vm12995_vm5, %v3974_v17, %v3975_v36 }
 0x272   : > { %v10300_v60 = vpop.f32.mrf.mxu1  ;;  %v10364_v15 = vpop.f32.mrf.mxu0  ;;  %10886 = vmatprep.subr.bf16.mxu1 %v11532_v25  ;;  %10978 = vmatprep.subr.bf16.mxu0 %v11533_v27  ;;  %v9129_v16 = vcombine.high %v3973_v58, %v3976_v33 }
 0x273   : > { %v10301_v5 = vadd.f32 %v10300_v60, %v10299_v46  ;;  %v10365_v57 = vadd.f32 %v10364_v15, %v10363_v49  ;;  %10887 = vmatpush3.bf16.msra.mxu1 %v11532_v25  ;;  %10979 = vmatpush3.bf16.msra.mxu0 %v11533_v27  ;;  %v4440_v60 = vld [vmem:[#allocation2 + $0x3c] sm:$0x1]  ;;  %v4490_v25 = vld [vmem:[#allocation2 + $0x44] sm:$0x1] }
 0x274   : > { %v10302_v48 = vpop.f32.mrf.mxu1  ;;  %v10366_v7 = vpop.f32.mrf.mxu0  ;;  %4251 = vmatmul.mubr.bf16.gmra.mxu0 %v13482_v54  ;;  %v4488_v54 = vsel %vm13686_vm10, 0, %v4487_v47  ;;  %v4441_v17 = vsel %vm13673_vm8, 0, %v4440_v60 }
 0x275   : > { %v13785_v32 = vadd.f32 %v10301_v5, %v13595_v56  ;;  %v13788_v31 = vadd.f32 %v10365_v57, %v16263_v55  ;;  %4258 = vmatprep.mubr.bf16.mxu0 %v13612_v12  ;;  %4489 = vst [vmem:[#allocation2 + $0x38] sm:$0x1] %v4488_v54  ;;  %v11535_v12 = vld [vmem:[%s16103_s4 + $0x188] sm:$0xff]   ;;  %4442 = vst [vmem:[#allocation2 + $0x3c] sm:$0x1] %v4441_v17 }
 0x276   : > { %v10303_v14 = vpop.f32.mrf.mxu1  ;;  %v10367_v37 = vpop.f32.mrf.mxu0  ;;  %10980 = vmatprep.subr.bf16.mxu0 %v11535_v12  ;;  %v4443_v54 = vld [vmem:[#allocation2 + $0x48] sm:$0x1] }
 0x277   : > { %v10304_v56 = vadd.f32 %v10303_v14, %v10302_v48  ;;  %v10368_v45 = vadd.f32 %v10367_v37, %v10366_v7  ;;  %10981 = vmatpush3.bf16.msra.mxu0 %v11535_v12  ;;  %v4491_v7 = vsel %vm13686_vm10, 0, %v4490_v25  ;;  %v9128_v37 = vcombine.low %v3973_v58, %v3976_v33 }
 0x278   : > { %v10305_v26 = vpop.f32.mrf.mxu1  ;;  %v10369_v46 = vpop.f32.mrf.mxu0  ;;  %4492 = vst [vmem:[#allocation2 + $0x44] sm:$0x1] %v4491_v7  ;;  %v4444_v12 = vsel %vm13673_vm8, 0, %v4443_v54 }
 0x279   : > { %v13801_v42 = vadd.f32 %v10304_v56, %v13607_v50  ;;  %v13804_v49 = vadd.f32 %v10368_v45, %v13610_v63  ;;  %v11536_v50 = vld [vmem:[%s16103_s4 + $0x180] sm:$0xff]   ;;  %4445 = vst [vmem:[#allocation2 + $0x48] sm:$0x1] %v4444_v12 }
 0x27a   : > { %v10306_v15 = vpop.f32.mrf.mxu1  ;;  %v10370_v18 = vpop.f32.mrf.mxu0  ;;  %10982 = vmatprep.subr.bf16.mxu0 %v11536_v50 }
 0x27b   : > { %v10307_v30 = vadd.f32 %v10306_v15, %v10305_v26  ;;  %v10371_v36 = vadd.f32 %v10370_v18, %v10369_v46  ;;  %10983 = vmatpush3.bf16.msra.mxu0 %v11536_v50 }
 0x27c   : > { %v10308_v61 = vpop.f32.mrf.mxu1  ;;  %v10372_v5 = vpop.f32.mrf.mxu0  ;;  %4259 = vmatmul.mubr.bf16.gmra.mxu0 %v13624_v28 }
 0x27d   : > { %v13813_v63 = vadd.f32 %v10307_v30, %v13617_v43  ;;  %v13816_v57 = vadd.f32 %v10371_v36, %v13620_v53  ;;  %4266 = vmatprep.mubr.bf16.mxu0 %v9129_v16 }
 0x27e   : > { %v10309_v27 = vpop.f32.mrf.mxu1  ;;  %v10373_v48 = vpop.f32.mrf.mxu0 }
 0x27f   : > { %v10310_v55 = vadd.f32 %v10309_v27, %v10308_v61  ;;  %v10374_v47 = vadd.f32 %v10373_v48, %v10372_v5  ;;  %v4446_v5 = vld [vmem:[#allocation2 + $0x54] sm:$0x1] }
 0x280   : > { %v10311_v14 = vpop.f32.mrf.mxu1  ;;  %v10375_v28 = vpop.f32.mrf.mxu0  ;;  %v4447_v27 = vsel %vm13673_vm8, 0, %v4446_v5 }
 0x281   : > { %v13821_v43 = vadd.f32 %v10310_v55, %v13627_v10  ;;  %v13824_v53 = vadd.f32 %v10374_v47, %v13630_v1  ;;  %v4493_v1 = vld [vmem:[#allocation2 + $0x50] sm:$0x1]  ;;  %4448 = vst [vmem:[#allocation2 + $0x54] sm:$0x1] %v4447_v27 }
 0x282   : > { %v10312_v56 = vpop.f32.mrf.mxu1  ;;  %v10376_v45 = vpop.f32.mrf.mxu0  ;;  %v4494_v18 = vsel %vm13686_vm10, 0, %v4493_v1 }
 0x283   : > { %v10313_v26 = vadd.f32 %v10312_v56, %v10311_v14  ;;  %v10377_v46 = vadd.f32 %v10376_v45, %v10375_v28  ;;  %4495 = vst [vmem:[#allocation2 + $0x50] sm:$0x1] %v4494_v18  ;;  %v4499_v18 = vld [vmem:[#allocation2 + $0x68] sm:$0x1] }
 0x284   : > { %v10314_v16 = vpop.f32.mrf.mxu1  ;;  %v10378_v60 = vpop.f32.mrf.mxu0  ;;  %4267 = vmatmul.mubr.bf16.gmra.mxu0 %v9128_v37 }
 0x285   : > { %v13829_v58 = vadd.f32 %v10313_v26, %v13638_v40  ;;  %v13832_v10 = vadd.f32 %v10377_v46, %v13641_v41 }
 0x286   : > { %v10315_v33 = vpop.f32.mrf.mxu1  ;;  %v10379_v15 = vpop.f32.mrf.mxu0 }
 0x287   : > { %v10316_v17 = vadd.f32 %v10315_v33, %v10314_v16  ;;  %v10380_v30 = vadd.f32 %v10379_v15, %v10378_v60 }
 0x288   : > { %v10317_v36 = vpop.f32.mrf.mxu1  ;;  %v10381_v50 = vpop.f32.mrf.mxu0 }
 0x289   : > { %v13837_v61 = vadd.f32 %v10316_v17, %v13645_v9  ;;  %v13840_v40 = vadd.f32 %v10380_v30, %v13648_v35  ;;  %v4496_v35 = vld [vmem:[#allocation2 + $0x5c] sm:$0x1] }
 0x28a   : > { %v10318_v41 = vpop.f32.mrf.mxu1  ;;  %v10382_v25 = vpop.f32.mrf.mxu0  ;;  %v4497_v54 = vsel %vm13686_vm10, 0, %v4496_v35 }
 0x28b   : > { %v10319_v48 = vadd.f32 %v10318_v41, %v10317_v36  ;;  %v10383_v7 = vadd.f32 %v10382_v25, %v10381_v50  ;;  %4498 = vst [vmem:[#allocation2 + $0x5c] sm:$0x1] %v4497_v54  ;;  %v4452_v25 = vld [vmem:[#allocation2 + $0x6c] sm:$0x1]  ;;  %v4502_v54 = vld [vmem:[#allocation2 + $0x74] sm:$0x1] }
 0x28c   : > { %v10384_v55 = vpop.f32.mrf.mxu0  ;;  %v13844_v47 = vpop.f32.mrf.mxu1 }
 0x28d   : > { %v13847_v14 = vadd.f32 %v10319_v48, %v13652_v39  ;;  %v13850_v9 = vadd.f32 %v10383_v7, %v13655_v62  ;;  %v4449_v39 = vld [vmem:[#allocation2 + $0x60] sm:$0x1] }
 0x28e   : > { %v10385_v28 = vpop.f32.mrf.mxu0  ;;  %v13852_v37 = vpop.f32.mrf.mxu1  ;;  %v4450_v62 = vsel %vm13673_vm8, 0, %v4449_v39 }
 0x28f   : > { %16265 = vst [vmem:[#allocation6_spill] sm:$0xff] %v13850_v9  ;;  %v10386_v56 = vadd.f32 %v10385_v28, %v10384_v55  ;;  %4451 = vst [vmem:[#allocation2 + $0x60] sm:$0x1] %v4450_v62 }
 0x290   : > { %v10387_v45 = vpop.f32.mrf.mxu0  ;;  %v13856_v12 = vpop.f32.mrf.mxu1 }
 0x291   : > { %v13859_v26 = vadd.f32 %v10386_v56, %v13659_v3  ;;  %v4500_v3 = vsel %vm13686_vm10, 0, %v4499_v18 }
 0x292   : > { %v10388_v46 = vpop.f32.mrf.mxu0  ;;  %v13861_v16 = vpop.f32.mrf.mxu1  ;;  %4501 = vst [vmem:[#allocation2 + $0x68] sm:$0x1] %v4500_v3 }
 0x293   : > { %16266 = vst [vmem:[#allocation7_spill] sm:$0xff] %v13859_v26  ;;  %v10389_v60 = vadd.f32 %v10388_v46, %v10387_v45  ;;  %v10450_v26 = vadd.f32 %v13852_v37, %v13844_v47  ;;  %v10453_v47 = vadd.f32 %v13861_v16, %v13856_v12  ;;  %v14026_v12 = vld [vmem:[%s16102_s3] ss:$0 sm:$0xff] }
 0x294   : > { %v10390_v1 = vpop.f32.mrf.mxu0  ;;  %v13865_v33 = vpop.f32.mrf.mxu1 }
 0x295   : > { %v13868_v15 = vadd.f32 %v10389_v60, %v13666_v13  ;;  %v4453_v13 = vsel %vm13673_vm8, 0, %v4452_v25 }
 0x296   : > { %v10391_v17 = vpop.f32.mrf.mxu0  ;;  %v13870_v30 = vpop.f32.mrf.mxu1  ;;  %4454 = vst [vmem:[#allocation2 + $0x6c] sm:$0x1] %v4453_v13 }
 0x297   : > { %16267 = vst [vmem:[#allocation9_spill] sm:$0xff] %v13868_v15  ;;  %v10392_v36 = vadd.f32 %v10391_v17, %v10390_v1  ;;  %v4455_v1 = vld [vmem:[#allocation2 + $0x78] sm:$0x1]  ;;  %v4470_v15 = vld [vmem:[#allocation2 + $0xb4] sm:$0x1] }
 0x298   : > { %v10393_v50 = vpop.f32.mrf.mxu0  ;;  %v13874_v5 = vpop.f32.mrf.mxu1 }
 0x299   : > { %v13877_v41 = vadd.f32 %v10392_v36, %v13680_v34  ;;  %v4503_v34 = vsel %vm13686_vm10, 0, %v4502_v54 }
 0x29a   : > { %v10394_v27 = vpop.f32.mrf.mxu0  ;;  %v13879_v48 = vpop.f32.mrf.mxu1  ;;  %4504 = vst [vmem:[#allocation2 + $0x74] sm:$0x1] %v4503_v34 }
 0x29b   : > { %16268 = vst [vmem:[#allocation10_spill] sm:$0xff] %v13877_v41  ;;  %v10395_v7 = vadd.f32 %v10394_v27, %v10393_v50  ;;  %v4505_v27 = vld [vmem:[#allocation2 + $0x80] sm:$0x1] }
 0x29c   : > { %v10396_v55 = vpop.f32.mrf.mxu0  ;;  %v13883_v35 = vpop.f32.mrf.mxu1 }
 0x29d   : > { %v13886_v28 = vadd.f32 %v10395_v7, %v13694_v0  ;;  %v4456_v0 = vsel %vm13673_vm8, 0, %v4455_v1 }
 0x29e   : > { %v10397_v56 = vpop.f32.mrf.mxu0  ;;  %v13888_v45 = vpop.f32.mrf.mxu1  ;;  %4457 = vst [vmem:[#allocation2 + $0x78] sm:$0x1] %v4456_v0 }
 0x29f   : > { %16269 = vst [vmem:[#allocation12_spill] sm:$0xff] %v13886_v28  ;;  %v10398_v39 = vadd.f32 %v10397_v56, %v10396_v55 }
 0x2a0   : > { %v10399_v46 = vpop.f32.mrf.mxu0  ;;  %v13892_v62 = vpop.f32.mrf.mxu1 }
 0x2a1   : > { %v13895_v60 = vadd.f32 %v10398_v39, %v13707_v22  ;;  %v4506_v22 = vsel %vm13686_vm10, 0, %v4505_v27  ;;  %v4458_v39 = vld [vmem:[#allocation2 + $0x84] sm:$0x1]  ;;  %v4508_v27 = vld [vmem:[#allocation2 + $0x8c] sm:$0x1] }
 0x2a2   : > { %v10400_v18 = vpop.f32.mrf.mxu0  ;;  %v13897_v17 = vpop.f32.mrf.mxu1  ;;  %4507 = vst [vmem:[#allocation2 + $0x80] sm:$0x1] %v4506_v22 }
 0x2a3   : > { %16270 = vst [vmem:[#allocation13_spill] sm:$0xff] %v13895_v60  ;;  %v10401_v3 = vadd.f32 %v10400_v18, %v10399_v46 }
 0x2a4   : > { %v10402_v36 = vpop.f32.mrf.mxu0  ;;  %v13901_v50 = vpop.f32.mrf.mxu1 }
 0x2a5   : > { %v13904_v25 = vadd.f32 %v10401_v3, %v13722_v29  ;;  %v4459_v29 = vsel %vm13673_vm8, 0, %v4458_v39  ;;  %v4461_v39 = vld [vmem:[#allocation2 + $0x90] sm:$0x1] }
 0x2a6   : > { %v10403_v13 = vpop.f32.mrf.mxu0  ;;  %v13906_v7 = vpop.f32.mrf.mxu1  ;;  %4460 = vst [vmem:[#allocation2 + $0x84] sm:$0x1] %v4459_v29 }
 0x2a7   : > { %16271 = vst [vmem:[#allocation14_spill] sm:$0xff] %v13904_v25  ;;  %v10404_v55 = vadd.f32 %v10403_v13, %v10402_v36 }
 0x2a8   : > { %v10405_v54 = vpop.f32.mrf.mxu0  ;;  %v13910_v56 = vpop.f32.mrf.mxu1 }
 0x2a9   : > { %v13913_v34 = vadd.f32 %v10404_v55, %v13737_v4  ;;  %v4509_v4 = vsel %vm13686_vm10, 0, %v4508_v27  ;;  %v4511_v27 = vld [vmem:[#allocation2 + $0x98] sm:$0x1] }
 0x2aa   : > { %v10406_v46 = vpop.f32.mrf.mxu0  ;;  %v13915_v1 = vpop.f32.mrf.mxu1  ;;  %4510 = vst [vmem:[#allocation2 + $0x8c] sm:$0x1] %v4509_v4 }
 0x2ab   : > { %16272 = vst [vmem:[#allocation4_spill] sm:$0xff] %v13913_v34  ;;  %v10407_v18 = vadd.f32 %v10406_v46, %v10405_v54 }
 0x2ac   : > { %v10408_v0 = vpop.f32.mrf.mxu0  ;;  %v13919_v3 = vpop.f32.mrf.mxu1 }
 0x2ad   : > { %v13922_v36 = vadd.f32 %v10407_v18, %v13752_v8  ;;  %v4462_v8 = vsel %vm13673_vm8, 0, %v4461_v39  ;;  %v4464_v39 = vld [vmem:[#allocation2 + $0x9c] sm:$0x1] }
 0x2ae   : > { %v10409_v13 = vpop.f32.mrf.mxu0  ;;  %v13924_v22 = vpop.f32.mrf.mxu1  ;;  %4463 = vst [vmem:[#allocation2 + $0x90] sm:$0x1] %v4462_v8 }
 0x2af   : > { %16273 = vst [vmem:[#allocation18_spill] sm:$0xff] %v13922_v36  ;;  %v10410_v55 = vadd.f32 %v10409_v13, %v10408_v0 }
 0x2b0   : > { %v10411_v38 = vpop.f32.mrf.mxu0  ;;  %v13928_v34 = vpop.f32.mrf.mxu1 }
 0x2b1   : > { %v13931_v54 = vadd.f32 %v10410_v55, %v13769_v20  ;;  %v4512_v20 = vsel %vm13686_vm10, 0, %v4511_v27  ;;  %v4514_v27 = vld [vmem:[#allocation2 + $0xa4] sm:$0x1] }
 0x2b2   : > { %v10412_v46 = vpop.f32.mrf.mxu0  ;;  %v13933_v29 = vpop.f32.mrf.mxu1  ;;  %4513 = vst [vmem:[#allocation2 + $0x98] sm:$0x1] %v4512_v20 }
 0x2b3   : > { %16274 = vst [vmem:[#allocation19_spill] sm:$0xff] %v13931_v54  ;;  %v10413_v18 = vadd.f32 %v10412_v46, %v10411_v38 }
 0x2b4   : > { %v10414_v36 = vpop.f32.mrf.mxu0  ;;  %v13937_v25 = vpop.f32.mrf.mxu1 }
 0x2b5   : > { %v13940_v0 = vadd.f32 %v10413_v18, %v13785_v32  ;;  %v4465_v32 = vsel %vm13673_vm8, 0, %v4464_v39  ;;  %v4467_v39 = vld [vmem:[#allocation2 + $0xa8] sm:$0x1] }
 0x2b6   : > { %v10415_v13 = vpop.f32.mrf.mxu0  ;;  %v13942_v4 = vpop.f32.mrf.mxu1  ;;  %4466 = vst [vmem:[#allocation2 + $0x9c] sm:$0x1] %v4465_v32 }
 0x2b7   : > { %16275 = vst [vmem:[#allocation20_spill] sm:$0xff] %v13940_v0  ;;  %v10416_v55 = vadd.f32 %v10415_v13, %v10414_v36 }
 0x2b8   : > { %v10417_v54 = vpop.f32.mrf.mxu0  ;;  %v13946_v60 = vpop.f32.mrf.mxu1 }
 0x2b9   : > { %v13949_v38 = vadd.f32 %v10416_v55, %v13801_v42  ;;  %v4515_v42 = vsel %vm13686_vm10, 0, %v4514_v27  ;;  %v13976_v27 = vld [vmem:[%s16103_s4 + $0x38] sm:$0xff]  }
 0x2ba   : > { %v10418_v46 = vpop.f32.mrf.mxu0  ;;  %v13951_v8 = vpop.f32.mrf.mxu1  ;;  %4516 = vst [vmem:[#allocation2 + $0xa4] sm:$0x1] %v4515_v42  ;;  %16279 = vst [vmem:[#allocation8_spill] sm:$0xff] %v13976_v27  ;;  %10920 = vmatprep.subr.bf16.mxu1 %v13976_v27  ;;  %v4517_v42 = vld [vmem:[#allocation2 + $0xb0] sm:$0x1] }
 0x2bb   : > { %16276 = vst [vmem:[#allocation11_spill] sm:$0xff] %v13949_v38  ;;  %v10419_v18 = vadd.f32 %v10418_v46, %v10417_v54  ;;  %v4523_v27 = vld [vmem:[#allocation2 + $0xc8] sm:$0x1] }
 0x2bc   : > { %v10420_v0 = vpop.f32.mrf.mxu0  ;;  %v13955_v28 = vpop.f32.mrf.mxu1 }
 0x2bd   : > { %v13958_v36 = vadd.f32 %v10419_v18, %v13813_v63  ;;  %v4468_v63 = vsel %vm13673_vm8, 0, %v4467_v39 }
 0x2be   : > { %v10421_v13 = vpop.f32.mrf.mxu0  ;;  %v13960_v20 = vpop.f32.mrf.mxu1  ;;  %4469 = vst [vmem:[#allocation2 + $0xa8] sm:$0x1] %v4468_v63 }
 0x2bf   : > { %16277 = vst [vmem:[#allocation16_spill] sm:$0xff] %v13958_v36  ;;  %v10422_v55 = vadd.f32 %v10421_v13, %v10420_v0 }
 0x2c0   : > { %v10423_v38 = vpop.f32.mrf.mxu0  ;;  %v13964_v41 = vpop.f32.mrf.mxu1 }
 0x2c1   : > { %v13967_v54 = vadd.f32 %v10422_v55, %v13821_v43 }
 0x2c2   : > { %v10424_v46 = vpop.f32.mrf.mxu0  ;;  %v13969_v32 = vpop.f32.mrf.mxu1 }
 0x2c3   : > { %16278 = vst [vmem:[#allocation5_spill] sm:$0xff] %v13967_v54  ;;  %v10425_v18 = vadd.f32 %v10424_v46, %v10423_v38  ;;  %v4518_v38 = vsel %vm13686_vm10, 0, %v4517_v42 }
 0x2c4   : > { %v10426_v0 = vpop.f32.mrf.mxu0  ;;  %v13978_v13 = vpop.f32.mrf.mxu1  ;;  %4519 = vst [vmem:[#allocation2 + $0xb0] sm:$0x1] %v4518_v38 }
 0x2c5   : > { %v13981_v43 = vadd.f32 %v10425_v18, %v13829_v58 }
 0x2c6   : > { %v10427_v55 = vpop.f32.mrf.mxu0  ;;  %v13984_v54 = vpop.f32.mrf.mxu1 }
 0x2c7   : > { %16280 = vst [vmem:[#allocation17_spill] sm:$0xff] %v13981_v43  ;;  %v10428_v39 = vadd.f32 %v10427_v55, %v10426_v0  ;;  %v4471_v43 = vsel %vm13673_vm8, 0, %v4470_v15  ;;  %v3935_v15 = vadd.f32 %v10450_v26, %v13662_v59  ;;  %v4473_v59 = vld [vmem:[#allocation2 + $0xc0] sm:$0x1] }
 0x2c8   : > { %v10429_v46 = vpop.f32.mrf.mxu0  ;;  %v13988_v36 = vpop.f32.mrf.mxu1  ;;  %4472 = vst [vmem:[#allocation2 + $0xb4] sm:$0x1] %v4471_v43  ;;  %v14014_v43 = vld [vmem:[%s16101_s2] ss:$0 sm:$0xff] }
 0x2c9   : > { %v13991_v63 = vadd.f32 %v10428_v39, %v13837_v61  ;;  %v4520_v61 = vld [vmem:[#allocation2 + $0xbc] sm:$0x1] }
 0x2ca   : > { %v10430_v58 = vpop.f32.mrf.mxu0  ;;  %v13993_v18 = vpop.f32.mrf.mxu1 }
 0x2cb   : > { %16281 = vst [vmem:[#allocation21_spill] sm:$0xff] %v13991_v63  ;;  %v10431_v9 = vadd.f32 %v10430_v58, %v10429_v46  ;;  %v4521_v63 = vsel %vm13686_vm10, 0, %v4520_v61  ;;  %v14021_v46 = vld [vmem:[%s16103_s4 + $0x138] sm:$0xff]   ;;  %v10456_v61 = vadd.f32 %v13870_v30, %v13865_v33 }
 0x2cc   : > { %v13999_v0 = vpop.f32.mrf.mxu1  ;;  %v10560_v42 = vpop.f32.mrf.mxu0  ;;  %4522 = vst [vmem:[#allocation2 + $0xbc] sm:$0x1] %v4521_v63  ;;  %v4474_v63 = vsel %vm13673_vm8, 0, %v4473_v59  ;;  %11064 = vmatprep.subr.bf16.mxu0 %v14021_v46 }
 0x2cd   : > { %v14002_v55 = vadd.f32 %v10431_v9, %v13847_v14  ;;  %4475 = vst [vmem:[#allocation2 + $0xc0] sm:$0x1] %v4474_v63 }
 0x2ce   : > { %v14004_v38 = vpop.f32.mrf.mxu1  ;;  %v10561_v39 = vpop.f32.mrf.mxu0 }
 0x2cf   : > { %16282 = vst [vmem:[#allocation22_spill] sm:$0xff] %v14002_v55  ;;  %16283 = vst [vmem:[#allocation23_spill] sm:$0xff] %v14004_v38  ;;  %v10562_v37 = vadd.f32 %v10561_v39, %v10560_v42  ;;  %v3936_v42 = vadd.f32 %v10453_v47, %v13669_v19  ;;  %v4524_v19 = vsel %vm13686_vm10, 0, %v4523_v27  ;;  %v3937_v47 = vadd.f32 %v10456_v61, %v13683_v44 }
 0x2d0   : > { %v14016_v14 = vpop.f32.mrf.mxu1  ;;  %v10563_v9 = vpop.f32.mrf.mxu0  ;;  %4525 = vst [vmem:[#allocation2 + $0xc8] sm:$0x1] %v4524_v19  ;;  %v10462_v44 = vadd.f32 %v13888_v45, %v13883_v35  ;;  %v4946_v45 = vld [vmem:[#allocation2 + $0xc] sm:$0xf] }
 0x2d1   : > { %16284 = vst [vmem:[#allocation24_spill] sm:$0xff] %v14016_v14  ;;  %v4275_v58 = vadd.f32 %v10562_v37, %v3935_v15 }
 0x2d2   : > { %v14028_v26 = vpop.f32.mrf.mxu1  ;;  %v10564_v16 = vpop.f32.mrf.mxu0 }
 0x2d3   : > { %16285 = vst [vmem:[#allocation25_spill] sm:$0xff] %v14028_v26  ;;  %v4314_v39 = vmul.f32 %v14014_v43, %v4275_v58  ;;  %v10565_v15 = vadd.f32 %v10564_v16, %v10563_v9  ;;  %v10459_v58 = vadd.f32 %v13879_v48, %v13874_v5  ;;  %v10465_v48 = vadd.f32 %v13897_v17, %v13892_v62 }
 0x2d4   : > { %v14037_v37 = vpop.f32.mrf.mxu1  ;;  %v10566_v55 = vpop.f32.mrf.mxu0  ;;  %v3939_v17 = vadd.f32 %v10462_v44, %v13710_v21  ;;  %v10468_v21 = vadd.f32 %v13906_v7, %v13901_v50 }
 0x2d5   : > { %v4353_v26 = vadd.f32 %v14026_v12, %v4314_v39  ;;  %v4276_v14 = vadd.f32 %v10565_v15, %v3936_v42  ;;  %v3938_v5 = vadd.f32 %v10459_v58, %v13697_v24 }
 0x2d6   : > { %v14040_v38 = vpop.f32.mrf.mxu1  ;;  %v10567_v59 = vpop.f32.mrf.mxu0 }
 0x2d7   : > { %v4385_v33 = vmax.f32 %v4353_v26, 0.0  ;;  %v4315_v30 = vmul.f32 %v14014_v43, %v4276_v14  ;;  %v10568_v9 = vadd.f32 %v10567_v59, %v10566_v55 }
 0x2d8   : > { %v14048_v16 = vpop.f32.mrf.mxu1  ;;  %v10569_v63 = vpop.f32.mrf.mxu0 }
 0x2d9   : > { %v9489_v42 = vpack.c.bf16 %v4385_v33, %v4385_v33  ;;  %v4354_v39 = vadd.f32 %v14026_v12, %v4315_v30  ;;  %v4277_v15 = vadd.f32 %v10568_v9, %v3937_v47 }
 0x2da   : > { %v14051_v23 = vpop.f32.mrf.mxu1  ;;  %v10570_v27 = vpop.f32.mrf.mxu0 }
 0x2db   : > { %v4625_v14 = vshrl.u32 %v9489_v42, 16  ;;  %v4386_v55 = vmax.f32 %v4354_v39, 0.0  ;;  %v4316_v26 = vmul.f32 %v14014_v43, %v4277_v15  ;;  %v10571_v61 = vadd.f32 %v10570_v27, %v10569_v63 }
 0x2dc   : > { %v14059_v59 = vpop.f32.mrf.mxu1  ;;  %v10572_v19 = vpop.f32.mrf.mxu0  ;;  %v4628_v33 = vshll.u32 %v9489_v42, 16  ;;  %v3940_v42 = vadd.f32 %v10465_v48, %v13725_v6  ;;  %v4950_v6 = vld [vmem:[#allocation2 + $0x14] sm:$0x1] }
 0x2dd   : > { %v4627_v47 = vrot.slane %v4625_v14, 7  ;;  %v9490_v30 = vpack.c.bf16 %v4386_v55, %v4386_v55  ;;  %v4355_v9 = vadd.f32 %v14026_v12, %v4316_v26  ;;  %v4278_v24 = vadd.f32 %v10571_v61, %v3938_v5 }
 0x2de   : > { %v14068_v58 = vpop.f32.mrf.mxu1  ;;  %v10573_v62 = vpop.f32.mrf.mxu0 }
 0x2df   : > { %16288 = vst [vmem:[#allocation26_spill] sm:$0xff] %v14068_v58  ;;  %v4630_v63 = vor.u32 %v4628_v33, %v4627_v47  ;;  %v4633_v39 = vshrl.u32 %v9490_v30, 16  ;;  %v4387_v15 = vmax.f32 %v4355_v9, 0.0  ;;  %v4317_v27 = vmul.f32 %v14014_v43, %v4278_v24 }
 0x2e0   : > { %v10574_v14 = vadd.f32 %v10573_v62, %v10572_v19  ;;  %v14073_v55 = vpop.f32.mrf.mxu1  ;;  %v10575_v26 = vpop.f32.mrf.mxu0  ;;  %v4636_v58 = vshll.u32 %v9490_v30, 16  ;;  %v4631_v50 = vrot.slane %v4627_v47, 4 }
 0x2e1   : > { %v4947_v5 = vsel %vm14064_vm12, %v4630_v63, %v4946_v45  ;;  %v4635_v61 = vrot.slane %v4633_v39, 7  ;;  %v9491_v48 = vpack.c.bf16 %v4387_v15, %v4387_v15  ;;  %v4356_v19 = vadd.f32 %v14026_v12, %v4317_v27 }
 0x2e2   : > { %4948 = vst [vmem:[#allocation2 + $0xc] sm:$0xf] %v4947_v5  ;;  %v4279_v33 = vadd.f32 %v10574_v14, %v3939_v17  ;;  %v14085_v9 = vpop.f32.mrf.mxu1  ;;  %v10576_v24 = vpop.f32.mrf.mxu0  ;;  %v11681_v45 = vmov 0   ;;  %v10471_v14 = vadd.f32 %v13915_v1, %v13910_v56  ;;  %v10474_v56 = vadd.f32 %v13924_v22, %v13919_v3  ;;  %v4953_v1 = vld [vmem:[#allocation2 + $0x18] sm:$0xf] }
 0x2e3   : > { %4421 = vst [vmem:[#allocation2 + $0xcc] sm:$0xf] %v11681_v45  ;;  %4422 = vst [vmem:[#allocation2 + $0xd0] sm:$0xf] %v11681_v45  ;;  %v4638_v7 = vor.u32 %v4636_v58, %v4635_v61  ;;  %v4640_v30 = vrot.slane %v4635_v61, 4  ;;  %v10577_v62 = vadd.f32 %v10576_v24, %v10575_v26  ;;  %v4642_v63 = vshrl.u32 %v9491_v48, 16 }
 0x2e4   : > { %4417 = vst [vmem:[#allocation2] sm:$0xf] %v11681_v45  ;;  %4418 = vst [vmem:[#allocation2 + $0x4] sm:$0xf] %v11681_v45  ;;  %v4388_v39 = vmax.f32 %v4356_v19, 0.0  ;;  %v4318_v15 = vmul.f32 %v14014_v43, %v4279_v33  ;;  %v14088_v27 = vpop.f32.mrf.mxu1  ;;  %v10578_v17 = vpop.f32.mrf.mxu0  ;;  %v4645_v26 = vshll.u32 %v9491_v48, 16  ;;  %v3941_v24 = vadd.f32 %v10468_v21, %v13740_v52 }
 0x2e5   : > { %4419 = vst [vmem:[#allocation2 + $0x8] sm:$0x1] %v11681_v45  ;;  %4423 = vst [vmem:[#allocation2 + $0xd4] sm:$0x1] %v11681_v45  ;;  %v4639_v5 = vsel %vm14080_vm14, %v4631_v50, %v4638_v7  ;;  %v4951_v45 = vsel %vm13673_vm8, %v4640_v30, %v4950_v6  ;;  %v4280_v47 = vadd.f32 %v10577_v62, %v3940_v42  ;;  %v4644_v58 = vrot.slane %v4642_v63, 7 }
 0x2e6   : > { %4949 = vst [vmem:[#allocation2 + $0x10] sm:$0xf] %v4639_v5  ;;  %4952 = vst [vmem:[#allocation2 + $0x14] sm:$0x1] %v4951_v45  ;;  %v9492_v61 = vpack.c.bf16 %v4388_v39, %v4388_v39  ;;  %v4357_v19 = vadd.f32 %v14026_v12, %v4318_v15  ;;  %v10579_v33 = vpop.f32.mrf.mxu0  ;;  %v14101_v7 = vpop.f32.mrf.mxu1  ;;  %v10477_v48 = vadd.f32 %v13933_v29, %v13928_v34  ;;  %v4957_v5 = vld [vmem:[#allocation2 + $0x20] sm:$0x1] }
 0x2e7   : > { %v4319_v50 = vmul.f32 %v14014_v43, %v4280_v47  ;;  %v10580_v6 = vadd.f32 %v10579_v33, %v10578_v17  ;;  %v4647_v42 = vor.u32 %v4645_v26, %v4644_v58  ;;  %v3942_v52 = vadd.f32 %v10471_v14, %v13755_v2 }
 0x2e8   : > { %v4650_v30 = vshrl.u32 %v9492_v61, 16  ;;  %v10581_v62 = vpop.f32.mrf.mxu0  ;;  %v4389_v63 = vmax.f32 %v4357_v19, 0.0  ;;  %v4653_v21 = vshll.u32 %v9492_v61, 16  ;;  %v3943_v17 = vadd.f32 %v10474_v56, %v13772_v51  ;;  %v14111_v29 = vpop.f32.mrf.mxu1 }
 0x2e9   : > { %v4358_v39 = vadd.f32 %v14026_v12, %v4319_v50  ;;  %v4281_v15 = vadd.f32 %v10580_v6, %v3941_v24  ;;  %v4954_v3 = vsel %vm14064_vm12, %v4647_v42, %v4953_v1  ;;  %v4648_v19 = vrot.slane %v4644_v58, 4 }
 0x2ea   : > { %v4652_v22 = vrot.slane %v4650_v30, 7  ;;  %v10582_v45 = vpop.f32.mrf.mxu0  ;;  %4955 = vst [vmem:[#allocation2 + $0x18] sm:$0xf] %v4954_v3  ;;  %v9493_v47 = vpack.c.bf16 %v4389_v63, %v4389_v63  ;;  %v14114_v1 = vadd.f32 %v10477_v48, %v13788_v31  ;;  %v10480_v56 = vadd.f32 %v13942_v4, %v13937_v25  ;;  %v4960_v3 = vld [vmem:[#allocation2 + $0x24] sm:$0xf] }
 0x2eb   : > { %v4390_v26 = vmax.f32 %v4358_v39, 0.0  ;;  %v4320_v34 = vmul.f32 %v14014_v43, %v4281_v15  ;;  %v10583_v2 = vadd.f32 %v10582_v45, %v10581_v62  ;;  %v14123_v15 = vpop.f32.mrf.mxu1  ;;  %v10483_v25 = vadd.f32 %v13951_v8, %v13946_v60 }
 0x2ec   : > { %v4655_v33 = vor.u32 %v4653_v21, %v4652_v22  ;;  %v4657_v24 = vrot.slane %v4652_v22, 4  ;;  %v10584_v14 = vpop.f32.mrf.mxu0  ;;  %v4659_v61 = vshrl.u32 %v9493_v47, 16  ;;  %v4662_v48 = vshll.u32 %v9493_v47, 16 }
 0x2ed   : > { %v9494_v50 = vpack.c.bf16 %v4390_v26, %v4390_v26  ;;  %v4359_v6 = vadd.f32 %v14026_v12, %v4320_v34  ;;  %v11530_v51 = vld [vmem:[#allocation2 + $0xc] sm:$0xff]   ;;  %v4282_v30 = vadd.f32 %v10583_v2, %v3942_v52  ;;  %v10486_v4 = vadd.f32 %v13960_v20, %v13955_v28 }
 0x2ee   : > { %v4656_v42 = vsel %vm14080_vm14, %v4648_v19, %v4655_v33  ;;  %v4958_v58 = vsel %vm13673_vm8, %v4657_v24, %v4957_v5  ;;  %v10585_v62 = vpop.f32.mrf.mxu0  ;;  %v4661_v31 = vrot.slane %v4659_v61, 7  ;;  %10888 = vmatprep.mubr.bf16.mxu1 %v11530_v51  ;;  %v10489_v34 = vadd.f32 %v13969_v32, %v13964_v41  ;;  %v4964_v33 = vld [vmem:[#allocation2 + $0x2c] sm:$0x1]  ;;  %v14135_v61 = vpop.f32.mrf.mxu1 }
 0x2ef   : > { %4956 = vst [vmem:[#allocation2 + $0x1c] sm:$0xf] %v4656_v42  ;;  %4959 = vst [vmem:[#allocation2 + $0x20] sm:$0x1] %v4958_v58  ;;  %v4667_v63 = vshrl.u32 %v9494_v50, 16  ;;  %v4391_v39 = vmax.f32 %v4359_v6, 0.0  ;;  %v4321_v22 = vmul.f32 %v14014_v43, %v4282_v30  ;;  %v10586_v52 = vadd.f32 %v10585_v62, %v10584_v14 }
 0x2f0   : > { %v10587_v21 = vpop.f32.mrf.mxu0  ;;  %v4664_v5 = vor.u32 %v4662_v48, %v4661_v31  ;;  %v4670_v26 = vshll.u32 %v9494_v50, 16  ;;  %v4665_v19 = vrot.slane %v4661_v31, 4  ;;  %v10492_v50 = vadd.f32 %v13984_v54, %v13978_v13  ;;  %v4967_v30 = vld [vmem:[#allocation2 + $0x30] sm:$0xf] }
 0x2f1   : > { %v4669_v45 = vrot.slane %v4667_v63, 7  ;;  %v9495_v47 = vpack.c.bf16 %v4391_v39, %v4391_v39  ;;  %v4360_v24 = vadd.f32 %v14026_v12, %v4321_v22  ;;  %v4283_v60 = vadd.f32 %v10586_v52, %v3943_v17 }
 0x2f2   : > { %v10588_v8 = vpop.f32.mrf.mxu0  ;;  %v4961_v28 = vsel %vm14064_vm12, %v4664_v5, %v4960_v3  ;;  %v3945_v31 = vadd.f32 %v10480_v56, %v13804_v49  ;;  %v3946_v48 = vadd.f32 %v10483_v25, %v13816_v57  ;;  %v11546_v3 = vld [vmem:[%s16103_s4 + $0x30] sm:$0xff]   ;;  %v14151_v22 = vadd.f32 %v10486_v4, %v13824_v53  ;;  %v14156_v56 = vpop.f32.mrf.mxu1 }
 0x2f3   : > { %v4672_v20 = vor.u32 %v4670_v26, %v4669_v45  ;;  %v4674_v2 = vrot.slane %v4669_v45, 4  ;;  %v4676_v14 = vshrl.u32 %v9495_v47, 16  ;;  %4962 = vst [vmem:[#allocation2 + $0x24] sm:$0xf] %v4961_v28  ;;  %v4679_v6 = vshll.u32 %v9495_v47, 16 }
 0x2f4   : > { %v4392_v41 = vmax.f32 %v4360_v24, 0.0  ;;  %v4322_v32 = vmul.f32 %v14014_v43, %v4283_v60  ;;  %v10590_v51 = vpop.f32.mrf.mxu0  ;;  %v10589_v62 = vadd.f32 %v10588_v8, %v10587_v21  ;;  %v14154_v52 = vadd.f32 %v10489_v34, %v13832_v10  ;;  %v16291_v10 = vld [vmem:[#allocation23_spill] sm:$0xff]  ;;  %v16292_v34 = vld [vmem:[#allocation8_spill] sm:$0xff] }
 0x2f5   : > { %v4673_v17 = vsel %vm14080_vm14, %v4665_v19, %v4672_v20  ;;  %v4965_v42 = vsel %vm13673_vm8, %v4674_v2, %v4964_v33  ;;  %v4678_v58 = vrot.slane %v4676_v14, 7  ;;  %v14160_v25 = vadd.f32 %v10492_v50, %v13840_v40  ;;  %v4971_v20 = vld [vmem:[#allocation2 + $0x38] sm:$0x1]  ;;  %v14177_v2 = vpop.f32.mrf.mxu1 }
 0x2f6   : > { %4963 = vst [vmem:[#allocation2 + $0x28] sm:$0xf] %v4673_v17  ;;  %4966 = vst [vmem:[#allocation2 + $0x2c] sm:$0x1] %v4965_v42  ;;  %v9496_v54 = vpack.c.bf16 %v4392_v41, %v4392_v41  ;;  %v4361_v13 = vadd.f32 %v14026_v12, %v4322_v32  ;;  %v10591_v63 = vpop.f32.mrf.mxu0  ;;  %v11534_v39 = vld [vmem:[#allocation2 + $0x18] sm:$0xff]   ;;  %v4284_v57 = vadd.f32 %v10589_v62, %v14114_v1 }
 0x2f7   : > { %v4681_v49 = vor.u32 %v4679_v6, %v4678_v58  ;;  %v10592_v45 = vadd.f32 %v10591_v63, %v10590_v51  ;;  %10889 = vmatmul.mubr.bf16.vlgmr.msra.gmra.mxu1 %v11534_v39  ;;  %10984 = vmatprep.mubr.bf16.mxu0 %v11534_v39  ;;  %v10495_v53 = vadd.f32 %v13993_v18, %v13988_v36  ;;  %v11548_v36 = vld [vmem:[%s16103_s4 + $0x28] sm:$0xff]   ;;  %v16293_v18 = vld [vmem:[#allocation24_spill] sm:$0xff]  ;;  %v4682_v6 = vrot.slane %v4678_v58, 4 }
 0x2f8   : > { %v4684_v21 = vshrl.u32 %v9496_v54, 16  ;;  %v4393_v5 = vmax.f32 %v4361_v13, 0.0  ;;  %v10593_v26 = vpop.f32.mrf.mxu0  ;;  %v10498_v4 = vadd.f32 %v16291_v10, %v13999_v0  ;;  %v4323_v1 = vmul.f32 %v14014_v43, %v4284_v57  ;;  %10921 = vmatpush3.bf16.msra.mxu1 %v16292_v34  ;;  %v16294_v0 = vld [vmem:[#allocation25_spill] sm:$0xff] }
 0x2f9   : > { %v4968_v47 = vsel %vm14064_vm12, %v4681_v49, %v4967_v30  ;;  %v4687_v19 = vshll.u32 %v9496_v54, 16  ;;  %v4285_v24 = vadd.f32 %v10592_v45, %v3945_v31  ;;  %10922 = vmatprep.subr.bf16.mxu1 %v11546_v3  ;;  %v10501_v8 = vadd.f32 %v16294_v0, %v16293_v18  ;;  %v14198_v49 = vpop.f32.mrf.mxu1  ;;  %v16296_v45 = vld [vmem:[#allocation7_spill] sm:$0xff]  ;;  %v16297_v10 = vld [vmem:[#allocation9_spill] sm:$0xff] }
 0x2fa   : > { %4969 = vst [vmem:[#allocation2 + $0x30] sm:$0xf] %v4968_v47  ;;  %v4686_v40 = vrot.slane %v4684_v21, 7  ;;  %v9497_v33 = vpack.c.bf16 %v4393_v5, %v4393_v5  ;;  %v10594_v60 = vpop.f32.mrf.mxu0  ;;  %v10504_v28 = vadd.f32 %v14040_v38, %v14037_v37  ;;  %v4362_v14 = vadd.f32 %v14026_v12, %v4323_v1 }
 0x2fb   : > { %v10595_v50 = vadd.f32 %v10594_v60, %v10593_v26  ;;  %v10507_v42 = vadd.f32 %v14051_v23, %v14048_v16  ;;  %v4324_v62 = vmul.f32 %v14014_v43, %v4285_v24  ;;  %v11550_v16 = vld [vmem:[%s16103_s4 + $0x20] sm:$0xff]   ;;  %v11554_v23 = vld [vmem:[%s16103_s4 + $0x130] sm:$0xff]   ;;  %v14203_v26 = vadd.f32 %v10498_v4, %v16296_v45 }
 0x2fc   : > { %v4689_v41 = vor.u32 %v4687_v19, %v4686_v40  ;;  %v4691_v32 = vrot.slane %v4686_v40, 4  ;;  %v4693_v51 = vshrl.u32 %v9497_v33, 16  ;;  %v10596_v17 = vpop.f32.mrf.mxu0  ;;  %v4394_v30 = vmax.f32 %v4362_v14, 0.0  ;;  %10923 = vmatpush3.bf16.msra.mxu1 %v11546_v3  ;;  %v4974_v3 = vld [vmem:[#allocation2 + $0x3c] sm:$0xf]  ;;  %v16298_v40 = vld [vmem:[#allocation10_spill] sm:$0xff] }
 0x2fd   : > { %v4286_v31 = vadd.f32 %v10595_v50, %v3946_v48  ;;  %v11537_v54 = vld [vmem:[#allocation2 + $0x24] sm:$0xff]   ;;  %v4696_v13 = vshll.u32 %v9497_v33, 16  ;;  %10924 = vmatprep.subr.bf16.mxu1 %v11548_v36  ;;  %v16295_v48 = vld [vmem:[#allocation6_spill] sm:$0xff]  ;;  %v4363_v21 = vadd.f32 %v14026_v12, %v4324_v62  ;;  %v14206_v47 = vadd.f32 %v10501_v8, %v16297_v10  ;;  %v14223_v50 = vpop.f32.mrf.mxu1 }
 0x2fe   : > { %v4690_v38 = vsel %vm14080_vm14, %v4682_v6, %v4689_v41  ;;  %v4972_v37 = vsel %vm13673_vm8, %v4691_v32, %v4971_v20  ;;  %v14187_v58 = vrot.slane %v4693_v51, 7  ;;  %v10597_v63 = vpop.f32.mrf.mxu0  ;;  %v14196_v39 = vadd.f32 %v10495_v53, %v16295_v48  ;;  %10892 = vmatprep.mubr.bf16.mxu1 %v11537_v54  ;;  %10985 = vmatmul.mubr.bf16.vlgmr.msra.gmra.mxu0 %v11537_v54  ;;  %v16299_v4 = vld [vmem:[#allocation12_spill] sm:$0xff]  ;;  %v11557_v41 = vld [vmem:[%s16103_s4 + $0x128] sm:$0xff]  }
 0x2ff   : > { %4970 = vst [vmem:[#allocation2 + $0x34] sm:$0xf] %v4690_v38  ;;  %4973 = vst [vmem:[#allocation2 + $0x38] sm:$0x1] %v4972_v37  ;;  %v9498_v57 = vpack.c.bf16 %v4394_v30, %v4394_v30  ;;  %v4325_v5 = vmul.f32 %v14014_v43, %v4286_v31  ;;  %v10598_v1 = vadd.f32 %v10597_v63, %v10596_v17  ;;  %v4395_v24 = vmax.f32 %v4363_v21, 0.0  ;;  %v16301_v21 = vld [vmem:[#allocation13_spill] sm:$0xff] }
 0x300   : > { %v4698_v53 = vor.u32 %v4696_v13, %v14187_v58  ;;  %v10599_v34 = vpop.f32.mrf.mxu0  ;;  %v14210_v19 = vadd.f32 %v10504_v28, %v16298_v40  ;;  %10925 = vmatpush3.bf16.msra.mxu1 %v11548_v36  ;;  %11065 = vmatpush3.bf16.msra.mxu0 %v14021_v46  ;;  %v14215_v18 = vadd.f32 %v10507_v42, %v16299_v4  ;;  %v11552_v28 = vld [vmem:[%s16103_s4 + $0x18] sm:$0xff]   ;;  %v4978_v17 = vld [vmem:[#allocation2 + $0x44] sm:$0x1]  ;;  %v4699_v31 = vrot.slane %v14187_v58, 4  ;;  %v11556_v58 = vld [vmem:[%s16103_s4 + $0x10] sm:$0xff]  }
 0x301   : > { %v4701_v33 = vshrl.u32 %v9498_v57, 16  ;;  %v4364_v60 = vadd.f32 %v14026_v12, %v4325_v5  ;;  %v4287_v8 = vadd.f32 %v10598_v1, %v14151_v22  ;;  %10926 = vmatprep.subr.bf16.mxu1 %v11550_v16  ;;  %11066 = vmatprep.subr.bf16.mxu0 %v11554_v23  ;;  %v4704_v36 = vshll.u32 %v9498_v57, 16  ;;  %v16300_v22 = vld [vmem:[#allocation26_spill] sm:$0xff]  ;;  %v11558_v13 = vld [vmem:[%s16103_s4 + $0x120] sm:$0xff]   ;;  %v14248_v57 = vpop.f32.mrf.mxu1  ;;  %v4981_v5 = vld [vmem:[#allocation2 + $0x48] sm:$0xf] }
 0x302   : > { %v4975_v0 = vsel %vm14064_vm12, %v4698_v53, %v4974_v3  ;;  %v10600_v20 = vpop.f32.mrf.mxu0  ;;  %v9499_v46 = vpack.c.bf16 %v4395_v24, %v4395_v24  ;;  %v10510_v32 = vadd.f32 %v16300_v22, %v14059_v59  ;;  %v10513_v51 = vadd.f32 %v14085_v9, %v14073_v55  ;;  %v11561_v4 = vld [vmem:[%s16103_s4 + $0x118] sm:$0xff]  }
 0x303   : > { %4976 = vst [vmem:[#allocation2 + $0x3c] sm:$0xf] %v4975_v0  ;;  %v4703_v14 = vrot.slane %v4701_v33, 7  ;;  %v4396_v6 = vmax.f32 %v4364_v60, 0.0  ;;  %v4326_v42 = vmul.f32 %v14014_v43, %v4287_v8  ;;  %v10601_v30 = vadd.f32 %v10600_v20, %v10599_v34  ;;  %v16302_v34 = vld [vmem:[#allocation14_spill] sm:$0xff]  ;;  %v11560_v60 = vld [vmem:[%s16103_s4 + $0x8] sm:$0xff]   ;;  %v14271_v22 = vpop.f32.mrf.mxu1 }
 0x304   : > { %v10602_v62 = vpop.f32.mrf.mxu0  ;;  %v4710_v37 = vshrl.u32 %v9499_v46, 16  ;;  %10927 = vmatpush3.bf16.msra.mxu1 %v11550_v16  ;;  %11067 = vmatpush3.bf16.msra.mxu0 %v11554_v23  ;;  %v10516_v59 = vadd.f32 %v14101_v7, %v14088_v27  ;;  %v4713_v7 = vshll.u32 %v9499_v46, 16  ;;  %v14255_v40 = vadd.f32 %v10513_v51, %v16302_v34  ;;  %v14264_v46 = vld [vmem:[#allocation2 + $0xc] sm:$0xf] }
 0x305   : > { %v4706_v54 = vor.u32 %v4704_v36, %v4703_v14  ;;  %v4708_v38 = vrot.slane %v4703_v14, 4  ;;  %v9500_v55 = vpack.c.bf16 %v4396_v6, %v4396_v6  ;;  %v4365_v9 = vadd.f32 %v14026_v12, %v4326_v42  ;;  %10928 = vmatprep.subr.bf16.mxu1 %v11552_v28  ;;  %11068 = vmatprep.subr.bf16.mxu0 %v11557_v41 }
 0x306   : > { %v4288_v63 = vadd.f32 %v10601_v30, %v14154_v52  ;;  %v10603_v48 = vpop.f32.mrf.mxu0  ;;  %v11538_v3 = vld [vmem:[#allocation2 + $0x30] sm:$0xff]   ;;  %v4712_v27 = vrot.slane %v4710_v37, 7  ;;  %v14251_v52 = vadd.f32 %v10510_v32, %v16301_v21  ;;  %v5993_v34 = vshll.u32 %v14264_v46, 16 }
 0x307   : > { %v4707_v16 = vsel %vm14080_vm14, %v4699_v31, %v4706_v54  ;;  %v4979_v23 = vsel %vm13673_vm8, %v4708_v38, %v4978_v17  ;;  %v4718_v45 = vshrl.u32 %v9500_v55, 16  ;;  %v4397_v10 = vmax.f32 %v4365_v9, 0.0  ;;  %10893 = vmatmul.mubr.bf16.gmra.mxu1 %v11538_v3  ;;  %10988 = vmatprep.mubr.bf16.mxu0 %v11538_v3  ;;  %v4985_v32 = vld [vmem:[#allocation2 + $0x50] sm:$0x1] }
 0x308   : > { %4977 = vst [vmem:[#allocation2 + $0x40] sm:$0xf] %v4707_v16  ;;  %4980 = vst [vmem:[#allocation2 + $0x44] sm:$0x1] %v4979_v23  ;;  %v4327_v53 = vmul.f32 %v14014_v43, %v4288_v63  ;;  %v10605_v1 = vpop.f32.mrf.mxu0  ;;  %v4715_v33 = vor.u32 %v4713_v7, %v4712_v27  ;;  %v10604_v24 = vadd.f32 %v10603_v48, %v10602_v62  ;;  %10929 = vmatpush3.bf16.msra.mxu1 %v11552_v28  ;;  %v16303_v28 = vld [vmem:[#allocation4_spill] sm:$0xff] }
 0x309   : > { %11069 = vmatpush3.bf16.msra.mxu0 %v11557_v41  ;;  %v4720_v0 = vrot.slane %v4718_v45, 7  ;;  %v4721_v8 = vshll.u32 %v9500_v55, 16  ;;  %v9501_v20 = vpack.c.bf16 %v4397_v10, %v4397_v10  ;;  %10930 = vmatprep.subr.bf16.mxu1 %v11556_v58  ;;  %v14267_v6 = vadd.f32 %v10516_v59, %v16303_v28  ;;  %v14276_v55 = vld [vmem:[#allocation2 + $0x10] sm:$0xf]  ;;  %v4988_v16 = vld [vmem:[#allocation2 + $0x54] sm:$0xf] }
 0x30a   : > { %v4366_v14 = vadd.f32 %v14026_v12, %v4327_v53  ;;  %v10606_v36 = vpop.f32.mrf.mxu0  ;;  %11070 = vmatprep.subr.bf16.mxu0 %v11558_v13  ;;  %v4982_v41 = vsel %vm14064_vm12, %v4715_v33, %v4981_v5  ;;  %v4289_v51 = vadd.f32 %v10604_v24, %v14160_v25  ;;  %v4716_v42 = vrot.slane %v4712_v27, 4  ;;  %v11564_v45 = vld [vmem:[%s16103_s4] sm:$0xff]  }
 0x30b   : > { %v10607_v17 = vadd.f32 %v10606_v36, %v10605_v1  ;;  %4983 = vst [vmem:[#allocation2 + $0x48] sm:$0xf] %v4982_v41  ;;  %v4723_v30 = vor.u32 %v4721_v8, %v4720_v0  ;;  %v4725_v62 = vrot.slane %v4720_v0, 4  ;;  %v4727_v31 = vshrl.u32 %v9501_v20, 16 }
 0x30c   : > { %v10608_v54 = vpop.f32.mrf.mxu0  ;;  %v4398_v38 = vmax.f32 %v4366_v14, 0.0  ;;  %v4328_v37 = vmul.f32 %v14014_v43, %v4289_v51  ;;  %10931 = vmatpush3.bf16.msra.mxu1 %v11556_v58  ;;  %v5990_v9 = vshrl.u32 %v14264_v46, 16  ;;  %v4730_v3 = vshll.u32 %v9501_v20, 16  ;;  %v14306_v46 = vld [vmem:[#allocation2 + $0x14] sm:$0x1] }
 0x30d   : > { %v4290_v59 = vadd.f32 %v10607_v17, %v14196_v39  ;;  %11071 = vmatpush3.bf16.msra.mxu0 %v11558_v13  ;;  %v4724_v25 = vsel %vm14080_vm14, %v4716_v42, %v4723_v30  ;;  %v4986_v63 = vsel %vm13673_vm8, %v4725_v62, %v4985_v32  ;;  %v14283_v48 = vrot.slane %v4727_v31, 7  ;;  %10932 = vmatprep.subr.bf16.mxu1 %v11560_v60  ;;  %v11562_v39 = vld [vmem:[%s16103_s4 + $0x110] sm:$0xff]   ;;  %v14288_v13 = vpop.f32.mrf.mxu1  ;;  %v4992_v17 = vld [vmem:[#allocation2 + $0x5c] sm:$0x1] }
 0x30e   : > { %v10609_v23 = vpop.f32.mrf.mxu0  ;;  %11072 = vmatprep.subr.bf16.mxu0 %v11561_v4  ;;  %4984 = vst [vmem:[#allocation2 + $0x4c] sm:$0xf] %v4724_v25  ;;  %4987 = vst [vmem:[#allocation2 + $0x50] sm:$0x1] %v4986_v63  ;;  %v9502_v58 = vpack.c.bf16 %v4398_v38, %v4398_v38  ;;  %v4367_v27 = vadd.f32 %v14026_v12, %v4328_v37  ;;  %v10519_v10 = vadd.f32 %v14123_v15, %v14111_v29 }
 0x30f   : > { %v4329_v7 = vmul.f32 %v14014_v43, %v4290_v59  ;;  %v10610_v21 = vadd.f32 %v10609_v23, %v10608_v54  ;;  %v11539_v5 = vld [vmem:[#allocation2 + $0x3c] sm:$0xff]   ;;  %v4732_v53 = vor.u32 %v4730_v3, %v14283_v48  ;;  %v16123_v33 = vrot.slane %v14276_v55, 5  ;;  %v14596_v35 = vld [vmem:[#allocation2 + $0x44] sm:$0x1] }
 0x310   : > { %v10611_v1 = vpop.f32.mrf.mxu0  ;;  %v10522_v24 = vadd.f32 %v14156_v56, %v14135_v61  ;;  %v4735_v0 = vshrl.u32 %v9502_v58, 16  ;;  %v4399_v8 = vmax.f32 %v4367_v27, 0.0  ;;  %10896 = vmatprep.mubr.bf16.mxu1 %v11539_v5  ;;  %10989 = vmatmul.mubr.bf16.gmra.mxu0 %v11539_v5  ;;  %v4738_v29 = vshll.u32 %v9502_v58, 16  ;;  %v14310_v61 = vpop.f32.mrf.mxu1  ;;  %v11567_v5 = vld [vmem:[%s16103_s4 + $0x100] sm:$0xff]   ;;  %16318 = vst [vmem:[#allocation25_spill] sm:$0xff] %v14596_v35 }
 0x311   : > { %v4368_v20 = vadd.f32 %v14026_v12, %v4329_v7  ;;  %v4989_v14 = vsel %vm14064_vm12, %v4732_v53, %v4988_v16  ;;  %v4291_v15 = vadd.f32 %v10610_v21, %v14203_v26  ;;  %10933 = vmatpush3.bf16.msra.mxu1 %v11560_v60  ;;  %11073 = vmatpush3.bf16.msra.mxu0 %v11561_v4  ;;  %v14308_v28 = vrot.slane %v5990_v9, 4  ;;  %v11566_v26 = vld [vmem:[%s16103_s4 + $0x108] sm:$0xff]   ;;  %v11569_v60 = vld [vmem:[%s16103_s4 + $0x78] sm:$0xff]  }
 0x312   : > { %v10612_v36 = vpop.f32.mrf.mxu0  ;;  %4990 = vst [vmem:[#allocation2 + $0x54] sm:$0xf] %v4989_v14  ;;  %v4737_v56 = vrot.slane %v4735_v0, 7  ;;  %v9503_v41 = vpack.c.bf16 %v4399_v8, %v4399_v8  ;;  %11074 = vmatprep.subr.bf16.mxu0 %v11562_v39  ;;  %10934 = vmatprep.subr.bf16.mxu1 %v11564_v45  ;;  %v4733_v4 = vrot.slane %v14283_v48, 4  ;;  %v14320_v62 = vrot.slane %v5993_v34, 5  ;;  %v14327_v23 = vpop.f32.mrf.mxu1  ;;  %v16305_v8 = vld [vmem:[#allocation19_spill] sm:$0xff] }
 0x313   : > { %v4400_v32 = vmax.f32 %v4368_v20, 0.0  ;;  %v10613_v51 = vadd.f32 %v10612_v36, %v10611_v1  ;;  %v4330_v42 = vmul.f32 %v14014_v43, %v4291_v15  ;;  %v7320_v31 = vrot.slane %v16123_v33, 4 }
 0x314   : > { %v10614_v30 = vpop.f32.mrf.mxu0  ;;  %v4740_v54 = vor.u32 %v4738_v29, %v4737_v56  ;;  %v4742_v38 = vrot.slane %v4737_v56, 4  ;;  %v4744_v37 = vshrl.u32 %v9503_v41, 16  ;;  %v7321_v59 = vrot.slane %v14306_v46, 5 }
 0x315   : > { %v4747_v9 = vshll.u32 %v9503_v41, 16  ;;  %v9504_v25 = vpack.c.bf16 %v4400_v32, %v4400_v32  ;;  %v4369_v63 = vadd.f32 %v14026_v12, %v4330_v42  ;;  %v4292_v48 = vadd.f32 %v10613_v51, %v14206_v47  ;;  %v11540_v16 = vld [vmem:[#allocation2 + $0x48] sm:$0xff]   ;;  %11075 = vmatpush3.bf16.msra.mxu0 %v11562_v39  ;;  %10935 = vmatpush3.bf16.msra.mxu1 %v11564_v45  ;;  %v16304_v47 = vld [vmem:[#allocation18_spill] sm:$0xff]  ;;  %v4995_v39 = vld [vmem:[#allocation2 + $0x60] sm:$0xf] }
 0x316   : > { %v10615_v3 = vpop.f32.mrf.mxu0  ;;  %v4741_v58 = vsel %vm14080_vm14, %v4733_v4, %v4740_v54  ;;  %v4993_v27 = vsel %vm13673_vm8, %v4742_v38, %v4992_v17  ;;  %v4746_v7 = vrot.slane %v4744_v37, 7  ;;  %11076 = vmatprep.subr.bf16.mxu0 %v11566_v26  ;;  %11016 = vmatprep.subr.bf16.mxu1 %v11569_v60  ;;  %v14337_v53 = vadd.f32 %v10519_v10, %v16304_v47  ;;  %v14349_v60 = vpop.f32.mrf.mxu1  ;;  %v4999_v4 = vld [vmem:[#allocation2 + $0x68] sm:$0x1] }
 0x317   : > { %v10616_v21 = vadd.f32 %v10615_v3, %v10614_v30  ;;  %4991 = vst [vmem:[#allocation2 + $0x58] sm:$0xf] %v4741_v58  ;;  %4994 = vst [vmem:[#allocation2 + $0x5c] sm:$0x1] %v4993_v27  ;;  %v4752_v45 = vshrl.u32 %v9504_v25, 16  ;;  %v4401_v1 = vmax.f32 %v4369_v63, 0.0  ;;  %v4331_v34 = vmul.f32 %v14014_v43, %v4292_v48  ;;  %10897 = vmatmul.mubr.bf16.gmra.mxu1 %v11540_v16 }
 0x318   : > { %v10617_v0 = vpop.f32.mrf.mxu0  ;;  %10992 = vmatprep.mubr.bf16.mxu0 %v11540_v16  ;;  %v14341_v20 = vadd.f32 %v10522_v24, %v16305_v8  ;;  %v4749_v14 = vor.u32 %v4747_v9, %v4746_v7  ;;  %v14346_v10 = vsel %vm12995_vm5, %v7320_v31, %v7321_v59  ;;  %v4755_v56 = vshll.u32 %v9504_v25, 16  ;;  %v11574_v30 = vld [vmem:[%s16103_s4 + $0xb8] sm:$0xff]   ;;  %v14366_v58 = vpop.f32.mrf.mxu1  ;;  %v5002_v27 = vld [vmem:[#allocation2 + $0x6c] sm:$0xf] }
 0x319   : > { %v4293_v29 = vadd.f32 %v10616_v21, %v14210_v19  ;;  %v4754_v36 = vrot.slane %v4752_v45, 7  ;;  %v9505_v41 = vpack.c.bf16 %v4401_v1, %v4401_v1  ;;  %v4370_v32 = vadd.f32 %v14026_v12, %v4331_v34  ;;  %11077 = vmatpush3.bf16.msra.mxu0 %v11566_v26 }
 0x31a   : > { %v10618_v51 = vpop.f32.mrf.mxu0  ;;  %v4996_v24 = vsel %vm14064_vm12, %v4749_v14, %v4995_v39  ;;  %v5996_v42 = vor.u32 %v14320_v62, %v14308_v28  ;;  %11078 = vmatprep.subr.bf16.mxu0 %v11567_v5  ;;  %v4750_v31 = vrot.slane %v4746_v7, 4  ;;  %v5999_v63 = vshll.u32 %v14276_v55, 16 }
 0x31b   : > { %v4332_v17 = vmul.f32 %v14014_v43, %v4293_v29  ;;  %v10619_v19 = vadd.f32 %v10618_v51, %v10617_v0  ;;  %4997 = vst [vmem:[#allocation2 + $0x60] sm:$0xf] %v4996_v24  ;;  %v4757_v26 = vor.u32 %v4755_v56, %v4754_v36  ;;  %v4759_v54 = vrot.slane %v4754_v36, 4  ;;  %v5006_v51 = vld [vmem:[#allocation2 + $0x74] sm:$0x1] }
 0x31c   : > { %v4761_v38 = vshrl.u32 %v9505_v41, 16  ;;  %v10620_v37 = vpop.f32.mrf.mxu0  ;;  %v4402_v59 = vmax.f32 %v4370_v32, 0.0  ;;  %v4764_v3 = vshll.u32 %v9505_v41, 16  ;;  %v10525_v45 = vadd.f32 %v14198_v49, %v14177_v2 }
 0x31d   : > { %v4371_v9 = vadd.f32 %v14026_v12, %v4332_v17  ;;  %v4294_v25 = vadd.f32 %v10619_v19, %v14215_v18  ;;  %v4758_v28 = vsel %vm14080_vm14, %v4750_v31, %v4757_v26  ;;  %v5000_v62 = vsel %vm13673_vm8, %v4759_v54, %v4999_v4  ;;  %11079 = vmatpush3.bf16.msra.mxu0 %v11567_v5  ;;  %v16307_v31 = vld [vmem:[#allocation20_spill] sm:$0xff]  ;;  %v16308_v54 = vld [vmem:[#allocation11_spill] sm:$0xff] }
 0x31e   : > { %v4763_v48 = vrot.slane %v4761_v38, 7  ;;  %v10621_v16 = vpop.f32.mrf.mxu0  ;;  %4998 = vst [vmem:[#allocation2 + $0x64] sm:$0xf] %v4758_v28  ;;  %5001 = vst [vmem:[#allocation2 + $0x68] sm:$0x1] %v5000_v62  ;;  %v9506_v7 = vpack.c.bf16 %v4402_v59, %v4402_v59  ;;  %v11541_v39 = vld [vmem:[#allocation2 + $0x54] sm:$0xff]   ;;  %11160 = vmatprep.subr.bf16.mxu0 %v11574_v30  ;;  %v10528_v1 = vadd.f32 %v14248_v57, %v14223_v50 }
 0x31f   : > { %v4403_v21 = vmax.f32 %v4371_v9, 0.0  ;;  %v4333_v18 = vmul.f32 %v14014_v43, %v4294_v25  ;;  %v10622_v47 = vadd.f32 %v10621_v16, %v10620_v37  ;;  %v10531_v5 = vadd.f32 %v14288_v13, %v14271_v22  ;;  %10900 = vmatprep.mubr.bf16.mxu1 %v11541_v39  ;;  %10993 = vmatmul.mubr.bf16.gmra.mxu0 %v11541_v39  ;;  %v10538_v22 = vpop.f32.mrf.mxu1  ;;  %v5009_v37 = vld [vmem:[#allocation2 + $0x78] sm:$0xf]  ;;  %v14400_v59 = vld [vmem:[%s16102_s3] ss:$0 sm:$0xff] }
 0x320   : > { %v4766_v34 = vor.u32 %v4764_v3, %v4763_v48  ;;  %v10623_v0 = vpop.f32.mrf.mxu0  ;;  %v4769_v8 = vshrl.u32 %v9506_v7, 16  ;;  %v14376_v43 = vrot.slane %v5996_v42, 4  ;;  %v10534_v36 = vadd.f32 %v14327_v23, %v14310_v61  ;;  %v14388_v61 = vld [vmem:[%s16101_s2] ss:$0 sm:$0xff] }
 0x321   : > { %v9507_v14 = vpack.c.bf16 %v4403_v21, %v4403_v21  ;;  %v4372_v29 = vadd.f32 %v14026_v12, %v4333_v18  ;;  %v4295_v49 = vadd.f32 %v10622_v47, %v14251_v52  ;;  %v14383_v57 = vrot.slane %v5999_v63, 5  ;;  %v10539_v62 = vpop.f32.mrf.mxu1 }
 0x322   : > { %v5003_v2 = vsel %vm14064_vm12, %v4766_v34, %v5002_v27  ;;  %v10624_v50 = vpop.f32.mrf.mxu0  ;;  %v4771_v13 = vrot.slane %v4769_v8, 7  ;;  %v4772_v56 = vshll.u32 %v9506_v7, 16  ;;  %v4767_v32 = vrot.slane %v4763_v48, 4  ;;  %v16309_v7 = vld [vmem:[#allocation16_spill] sm:$0xff] }
 0x323   : > { %5004 = vst [vmem:[#allocation2 + $0x6c] sm:$0xf] %v5003_v2  ;;  %v4778_v12 = vshrl.u32 %v9507_v14, 16  ;;  %v4404_v41 = vmax.f32 %v4372_v29, 0.0  ;;  %v4781_v24 = vshll.u32 %v9507_v14, 16  ;;  %v4334_v23 = vmul.f32 %v14388_v61, %v4295_v49 }
 0x324   : > { %v10625_v52 = vadd.f32 %v10624_v50, %v10623_v0  ;;  %v10626_v4 = vpop.f32.mrf.mxu0  ;;  %v4774_v17 = vor.u32 %v4772_v56, %v4771_v13  ;;  %v4776_v19 = vrot.slane %v4771_v13, 4  ;;  %v14392_v26 = vadd.f32 %v10525_v45, %v16307_v31  ;;  %v16310_v45 = vld [vmem:[#allocation5_spill] sm:$0xff]  ;;  %v10541_v13 = vpop.f32.mrf.mxu1  ;;  %v5013_v56 = vld [vmem:[#allocation2 + $0x80] sm:$0x1] }
 0x325   : > { %v4780_v42 = vrot.slane %v4778_v12, 7  ;;  %v9508_v30 = vpack.c.bf16 %v4404_v41, %v4404_v41  ;;  %v14395_v38 = vadd.f32 %v10528_v1, %v16308_v54  ;;  %v4373_v9 = vadd.f32 %v14400_v59, %v4334_v23  ;;  %v11542_v28 = vld [vmem:[#allocation2 + $0x60] sm:$0xff]  }
 0x326   : > { %v4296_v25 = vadd.f32 %v10625_v52, %v14255_v40  ;;  %v10627_v63 = vpop.f32.mrf.mxu0  ;;  %v4775_v48 = vsel %vm14080_vm14, %v4767_v32, %v4774_v17  ;;  %v5007_v3 = vsel %vm13673_vm8, %v4776_v19, %v5006_v51  ;;  %v6003_v27 = vshrl.u32 %v14276_v55, 16  ;;  %10901 = vmatmul.mubr.bf16.gmra.mxu1 %v11542_v28  ;;  %10996 = vmatprep.mubr.bf16.mxu0 %v11542_v28 }
 0x327   : > { %v4783_v16 = vor.u32 %v4781_v24, %v4780_v42  ;;  %v14410_v21 = vadd.f32 %v10531_v5, %v16309_v7  ;;  %5005 = vst [vmem:[#allocation2 + $0x70] sm:$0xf] %v4775_v48  ;;  %5008 = vst [vmem:[#allocation2 + $0x74] sm:$0x1] %v5007_v3  ;;  %v4786_v18 = vshrl.u32 %v9508_v30, 16  ;;  %v4405_v47 = vmax.f32 %v4373_v9, 0.0 }
 0x328   : > { %v4335_v40 = vmul.f32 %v14388_v61, %v4296_v25  ;;  %v10629_v39 = vpop.f32.mrf.mxu0  ;;  %v14414_v1 = vadd.f32 %v10534_v36, %v16310_v45  ;;  %v10628_v0 = vadd.f32 %v10627_v63, %v10626_v4  ;;  %v6002_v8 = vsel %vm12291_vm2, %v14376_v43, %v14383_v57  ;;  %v5016_v9 = vld [vmem:[#allocation2 + $0x84] sm:$0xf] }
 0x329   : > { %v5010_v34 = vsel %vm14064_vm12, %v4783_v16, %v5009_v37  ;;  %v4788_v14 = vrot.slane %v4786_v18, 7  ;;  %v4789_v29 = vshll.u32 %v9508_v30, 16  ;;  %v9509_v2 = vpack.c.bf16 %v4405_v47, %v4405_v47  ;;  %v16313_v18 = vld [vmem:[#allocation21_spill] sm:$0xff] }
 0x32a   : > { %5011 = vst [vmem:[#allocation2 + $0x78] sm:$0xf] %v5010_v34  ;;  %v4374_v49 = vadd.f32 %v14400_v59, %v4335_v40  ;;  %v10630_v50 = vpop.f32.mrf.mxu0  ;;  %v10537_v36 = vadd.f32 %v14366_v58, %v14349_v60  ;;  %v4297_v12 = vadd.f32 %v10628_v0, %v14267_v6  ;;  %v6005_v32 = vrot.slane %v6003_v27, 4  ;;  %v5917_v34 = vld [vmem:[#allocation2 + $0x18] sm:$0xf] }
 0x32b   : > { %v10631_v41 = vadd.f32 %v10630_v50, %v10629_v39  ;;  %v4784_v51 = vrot.slane %v4780_v42, 4  ;;  %v4791_v24 = vor.u32 %v4789_v29, %v4788_v14  ;;  %v4793_v23 = vrot.slane %v4788_v14, 4  ;;  %v10542_v42 = vpop.f32.mrf.mxu1 }
 0x32c   : > { %v4795_v52 = vshrl.u32 %v9509_v2, 16  ;;  %v10632_v4 = vpop.f32.mrf.mxu0  ;;  %v10540_v17 = vadd.f32 %v10539_v62, %v10538_v22  ;;  %v4406_v19 = vmax.f32 %v4374_v49, 0.0  ;;  %v4336_v30 = vmul.f32 %v14388_v61, %v4297_v12  ;;  %v16312_v62 = vld [vmem:[#allocation17_spill] sm:$0xff] }
 0x32d   : > { %v4298_v31 = vadd.f32 %v10631_v41, %v14337_v53  ;;  %v4792_v60 = vsel %vm14080_vm14, %v4784_v51, %v4791_v24  ;;  %v5014_v58 = vsel %vm13673_vm8, %v4793_v23, %v5013_v56  ;;  %v4798_v54 = vshll.u32 %v9509_v2, 16  ;;  %v5020_v12 = vld [vmem:[#allocation2 + $0x8c] sm:$0x1] }
 0x32e   : > { %v4797_v6 = vrot.slane %v4795_v52, 7  ;;  %v10633_v37 = vpop.f32.mrf.mxu0  ;;  %5012 = vst [vmem:[#allocation2 + $0x7c] sm:$0xf] %v4792_v60  ;;  %5015 = vst [vmem:[#allocation2 + $0x80] sm:$0x1] %v5014_v58  ;;  %v9510_v25 = vpack.c.bf16 %v4406_v19, %v4406_v19  ;;  %v4375_v22 = vadd.f32 %v14400_v59, %v4336_v30  ;;  %v11543_v53 = vld [vmem:[#allocation2 + $0x6c] sm:$0xff]   ;;  %v14435_v48 = vadd.f32 %v10537_v36, %v16312_v62 }
 0x32f   : > { %v4337_v63 = vmul.f32 %v14388_v61, %v4298_v31  ;;  %v10634_v28 = vadd.f32 %v10633_v37, %v10632_v4  ;;  %v6006_v27 = vor.u32 %v6005_v32, %v14383_v57  ;;  %v6009_v7 = vshll.u32 %v14306_v46, 16  ;;  %10904 = vmatprep.mubr.bf16.mxu1 %v11543_v53  ;;  %10997 = vmatmul.mubr.bf16.gmra.mxu0 %v11543_v53 }
 0x330   : > { %v4800_v3 = vor.u32 %v4798_v54, %v4797_v6  ;;  %v10635_v16 = vpop.f32.mrf.mxu0  ;;  %v14440_v47 = vadd.f32 %v10540_v17, %v16313_v18  ;;  %v4803_v40 = vshrl.u32 %v9510_v25, 16  ;;  %v4407_v39 = vmax.f32 %v4375_v22, 0.0  ;;  %v14453_v54 = vld [vmem:[#allocation2 + $0x1c] sm:$0xf] }
 0x331   : > { %v4376_v45 = vadd.f32 %v14400_v59, %v4337_v63  ;;  %v14443_v0 = vadd.f32 %v10542_v42, %v10541_v13  ;;  %v4806_v29 = vshll.u32 %v9510_v25, 16  ;;  %v4299_v2 = vadd.f32 %v10634_v28, %v14341_v20  ;;  %v5023_v25 = vld [vmem:[#allocation2 + $0x90] sm:$0xf] }
 0x332   : > { %v5017_v14 = vsel %vm14064_vm12, %v4800_v3, %v5016_v9  ;;  %v10636_v49 = vpop.f32.mrf.mxu0  ;;  %v4805_v46 = vrot.slane %v4803_v40, 7  ;;  %v9511_v50 = vpack.c.bf16 %v4407_v39, %v4407_v39  ;;  %v14449_v51 = vrot.slane %v6006_v27, 4 }
 0x333   : > { %5018 = vst [vmem:[#allocation2 + $0x84] sm:$0xf] %v5017_v14  ;;  %v4408_v36 = vmax.f32 %v4376_v45, 0.0  ;;  %v10637_v56 = vadd.f32 %v10636_v49, %v10635_v16  ;;  %v4338_v41 = vmul.f32 %v14388_v61, %v4299_v2  ;;  %v6014_v13 = vshrl.u32 %v5917_v34, 16 }
 0x334   : > { %v10638_v32 = vpop.f32.mrf.mxu0  ;;  %v6017_v24 = vshll.u32 %v5917_v34, 16  ;;  %v4801_v23 = vrot.slane %v4797_v6, 4  ;;  %v4808_v52 = vor.u32 %v4806_v29, %v4805_v46  ;;  %v4810_v4 = vrot.slane %v4805_v46, 4  ;;  %v5027_v29 = vld [vmem:[#allocation2 + $0x98] sm:$0x1] }
 0x335   : > { %v4812_v17 = vshrl.u32 %v9511_v50, 16  ;;  %v4815_v19 = vshll.u32 %v9511_v50, 16  ;;  %v9512_v20 = vpack.c.bf16 %v4408_v36, %v4408_v36  ;;  %v4377_v30 = vadd.f32 %v14400_v59, %v4338_v41  ;;  %v11545_v58 = vld [vmem:[#allocation2 + $0x78] sm:$0xff]  }
 0x336   : > { %v4300_v31 = vadd.f32 %v10637_v56, %v14392_v26  ;;  %v10639_v60 = vpop.f32.mrf.mxu0  ;;  %v4809_v37 = vsel %vm14080_vm14, %v4801_v23, %v4808_v52  ;;  %v5021_v42 = vsel %vm13673_vm8, %v4810_v4, %v5020_v12  ;;  %10905 = vmatmul.mubr.bf16.gmra.mxu1 %v11545_v58  ;;  %11000 = vmatprep.mubr.bf16.mxu0 %v11545_v58  ;;  %v14460_v53 = vrot.slane %v6009_v7, 5  ;;  %v14480_v58 = vld [vmem:[#allocation2 + $0x24] sm:$0xf] }
 0x337   : > { %v4814_v6 = vrot.slane %v4812_v17, 7  ;;  %v10640_v9 = vadd.f32 %v10639_v60, %v10638_v32  ;;  %5019 = vst [vmem:[#allocation2 + $0x88] sm:$0xf] %v4809_v37  ;;  %5022 = vst [vmem:[#allocation2 + $0x8c] sm:$0x1] %v5021_v42  ;;  %v4820_v22 = vshrl.u32 %v9512_v20, 16 }
 0x338   : > { %v4409_v63 = vmax.f32 %v4377_v30, 0.0  ;;  %v4339_v28 = vmul.f32 %v14388_v61, %v4300_v31  ;;  %v10641_v26 = vpop.f32.mrf.mxu0  ;;  %v14463_v16 = vrot.slane %v6014_v13, 4  ;;  %v6023_v27 = vshll.u32 %v14453_v54, 16  ;;  %v5030_v17 = vld [vmem:[#allocation2 + $0x9c] sm:$0xf] }
 0x339   : > { %v4817_v62 = vor.u32 %v4815_v19, %v4814_v6  ;;  %v4301_v3 = vadd.f32 %v10640_v9, %v14395_v38  ;;  %v4822_v18 = vrot.slane %v4820_v22, 7  ;;  %v4823_v40 = vshll.u32 %v9512_v20, 16 }
 0x33a   : > { %v9513_v39 = vpack.c.bf16 %v4409_v63, %v4409_v63  ;;  %v4378_v45 = vadd.f32 %v14400_v59, %v4339_v28  ;;  %v10642_v34 = vpop.f32.mrf.mxu0  ;;  %v14470_v49 = vrot.slane %v6017_v24, 5  ;;  %v4818_v38 = vrot.slane %v4814_v6, 4 }
 0x33b   : > { %v5024_v14 = vsel %vm14064_vm12, %v4817_v62, %v5023_v25  ;;  %v4340_v7 = vmul.f32 %v14388_v61, %v4301_v3  ;;  %v10643_v2 = vadd.f32 %v10642_v34, %v10641_v26  ;;  %v4825_v46 = vor.u32 %v4823_v40, %v4822_v18  ;;  %v5034_v34 = vld [vmem:[#allocation2 + $0xa4] sm:$0x1] }
 0x33c   : > { %5025 = vst [vmem:[#allocation2 + $0x90] sm:$0xf] %v5024_v14  ;;  %v4827_v50 = vrot.slane %v4822_v18, 4  ;;  %v4829_v36 = vshrl.u32 %v9513_v39, 16  ;;  %v10644_v56 = vpop.f32.mrf.mxu0  ;;  %v4410_v12 = vmax.f32 %v4378_v45, 0.0  ;;  %v6027_v13 = vshrl.u32 %v14453_v54, 16 }
 0x33d   : > { %v4379_v41 = vadd.f32 %v14400_v59, %v4340_v7  ;;  %v4302_v32 = vadd.f32 %v10643_v2, %v14410_v21  ;;  %v4826_v23 = vsel %vm14080_vm14, %v4818_v38, %v4825_v46  ;;  %v4832_v4 = vshll.u32 %v9513_v39, 16  ;;  %v16314_v54 = vld [vmem:[#allocation22_spill] sm:$0xff]  ;;  %v5037_v38 = vld [vmem:[#allocation2 + $0xa8] sm:$0xf] }
 0x33e   : > { %v5028_v24 = vsel %vm13673_vm8, %v4827_v50, %v5027_v29  ;;  %v4831_v52 = vrot.slane %v4829_v36, 7  ;;  %v10645_v19 = vpop.f32.mrf.mxu0  ;;  %5026 = vst [vmem:[#allocation2 + $0x94] sm:$0xf] %v4826_v23  ;;  %v9514_v20 = vpack.c.bf16 %v4410_v12, %v4410_v12  ;;  %v11547_v21 = vld [vmem:[#allocation2 + $0x84] sm:$0xff]   ;;  %v14484_v37 = vadd.f32 %v14443_v0, %v16314_v54 }
 0x33f   : > { %5029 = vst [vmem:[#allocation2 + $0x98] sm:$0x1] %v5028_v24  ;;  %v4411_v30 = vmax.f32 %v4379_v41, 0.0  ;;  %v4341_v31 = vmul.f32 %v14388_v61, %v4302_v32  ;;  %v10646_v60 = vadd.f32 %v10645_v19, %v10644_v56  ;;  %v6012_v9 = vsel %vm12291_vm2, %v14449_v51, %v14460_v53  ;;  %10908 = vmatprep.mubr.bf16.mxu1 %v11547_v21  ;;  %v5919_v32 = vld [vmem:[#allocation2 + $0x20] sm:$0x1] }
 0x340   : > { %v4834_v42 = vor.u32 %v4832_v4, %v4831_v52  ;;  %v10647_v6 = vpop.f32.mrf.mxu0  ;;  %v14490_v25 = vrot.slane %v6023_v27, 5  ;;  %v4837_v22 = vshrl.u32 %v9514_v20, 16  ;;  %11001 = vmatmul.mubr.bf16.gmra.mxu0 %v11547_v21  ;;  %v6020_v26 = vor.u32 %v14470_v49, %v14463_v16  ;;  %v5921_v19 = vld [vmem:[#allocation2 + $0x28] sm:$0xf] }
 0x341   : > { %v9515_v63 = vpack.c.bf16 %v4411_v30, %v4411_v30  ;;  %v4380_v28 = vadd.f32 %v14400_v59, %v4341_v31  ;;  %v4303_v62 = vadd.f32 %v10646_v60, %v14414_v1  ;;  %v14498_v18 = vrot.slane %v6027_v13, 4 }
 0x342   : > { %v5031_v0 = vsel %vm14064_vm12, %v4834_v42, %v5030_v17  ;;  %v10648_v3 = vpop.f32.mrf.mxu0  ;;  %v6038_v51 = vshrl.u32 %v14480_v58, 16  ;;  %v4839_v53 = vrot.slane %v4837_v22, 7  ;;  %v4840_v27 = vshll.u32 %v9514_v20, 16 }
 0x343   : > { %5032 = vst [vmem:[#allocation2 + $0x9c] sm:$0xf] %v5031_v0  ;;  %v4846_v40 = vshrl.u32 %v9515_v63, 16  ;;  %v4412_v39 = vmax.f32 %v4380_v28, 0.0  ;;  %v4835_v45 = vrot.slane %v4831_v52, 4  ;;  %v4849_v14 = vshll.u32 %v9515_v63, 16 }
 0x344   : > { %v4342_v16 = vmul.f32 %v14388_v61, %v4303_v62  ;;  %v10649_v29 = vadd.f32 %v10648_v3, %v10647_v6  ;;  %v10650_v7 = vpop.f32.mrf.mxu0  ;;  %v4842_v2 = vor.u32 %v4840_v27, %v4839_v53  ;;  %v4844_v49 = vrot.slane %v4839_v53, 4 }
 0x345   : > { %v4848_v1 = vrot.slane %v4846_v40, 7  ;;  %v9516_v46 = vpack.c.bf16 %v4412_v39, %v4412_v39  ;;  %v14504_v12 = vld [vmem:[#allocation2 + $0x90] sm:$0xff]   ;;  %v14511_v41 = vcombine.low %v6002_v8, %v6012_v9  ;;  %v14513_v13 = vrot.slane %v6020_v26, 4 }
 0x346   : > { %v4381_v50 = vadd.f32 %v14400_v59, %v4342_v16  ;;  %v4304_v36 = vadd.f32 %v10649_v29, %v14435_v48  ;;  %v10651_v56 = vpop.f32.mrf.mxu0  ;;  %v4843_v23 = vsel %vm14080_vm14, %v4835_v45, %v4842_v2  ;;  %v5035_v24 = vsel %vm13673_vm8, %v4844_v49, %v5034_v34  ;;  %10909 = vmatmul.mubr.bf16.gmra.mxu1 %v14504_v12  ;;  %v5041_v9 = vld [vmem:[#allocation2 + $0xb0] sm:$0x1] }
 0x347   : > { %16315 = vst [vmem:[#allocation23_spill] sm:$0xff] %v14511_v41  ;;  %v4851_v48 = vor.u32 %v4849_v14, %v4848_v1  ;;  %v6041_v52 = vshll.u32 %v14480_v58, 16  ;;  %5033 = vst [vmem:[#allocation2 + $0xa0] sm:$0xf] %v4843_v23  ;;  %v4854_v4 = vshrl.u32 %v9516_v46, 16  ;;  %11004 = vmatprep.mubr.bf16.mxu0 %v14504_v12  ;;  %v6030_v8 = vor.u32 %v14498_v18, %v14490_v25 }
 0x348   : > { %5036 = vst [vmem:[#allocation2 + $0xa4] sm:$0x1] %v5035_v24  ;;  %v4413_v17 = vmax.f32 %v4381_v50, 0.0  ;;  %v4343_v43 = vmul.f32 %v14388_v61, %v4304_v36  ;;  %v10653_v57 = vpop.f32.mrf.mxu0  ;;  %v10652_v30 = vadd.f32 %v10651_v56, %v10650_v7  ;;  %v6033_v31 = vshll.u32 %v5919_v32, 16  ;;  %v5044_v14 = vld [vmem:[#allocation2 + $0xb4] sm:$0xf] }
 0x349   : > { %v5038_v20 = vsel %vm14064_vm12, %v4851_v48, %v5037_v38  ;;  %v14527_v60 = vrot.slane %v6038_v51, 4  ;;  %v4856_v21 = vrot.slane %v4854_v4, 7  ;;  %v4857_v58 = vshll.u32 %v9516_v46, 16  ;;  %v5923_v49 = vld [vmem:[#allocation2 + $0x30] sm:$0xf] }
 0x34a   : > { %5039 = vst [vmem:[#allocation2 + $0xa8] sm:$0xf] %v5038_v20  ;;  %v9517_v54 = vpack.c.bf16 %v4413_v17, %v4413_v17  ;;  %v4382_v42 = vadd.f32 %v14400_v59, %v4343_v43  ;;  %v10654_v6 = vpop.f32.mrf.mxu0  ;;  %v4305_v22 = vadd.f32 %v10652_v30, %v14440_v47  ;;  %v14531_v28 = vrot.slane %v6041_v52, 5  ;;  %v5924_v36 = vld [vmem:[#allocation2 + $0x34] sm:$0xf] }
 0x34b   : > { %v10655_v63 = vadd.f32 %v10654_v6, %v10653_v57  ;;  %v6047_v26 = vshll.u32 %v5921_v19, 16  ;;  %v4852_v0 = vrot.slane %v4848_v1, 4  ;;  %v4859_v62 = vor.u32 %v4857_v58, %v4856_v21  ;;  %v14553_v56 = vld [vmem:[#allocation2 + $0x3c] sm:$0xf]  ;;  %v5927_v43 = vld [vmem:[#allocation2 + $0x40] sm:$0xf] }
 0x34c   : > { %v4861_v3 = vrot.slane %v4856_v21, 4  ;;  %v4863_v18 = vshrl.u32 %v9517_v54, 16  ;;  %v4414_v51 = vmax.f32 %v4382_v42, 0.0  ;;  %v4344_v53 = vmul.f32 %v14388_v61, %v4305_v22  ;;  %v5048_v30 = vld [vmem:[#allocation2 + $0xbc] sm:$0x1] }
 0x34d   : > { %v4306_v27 = vadd.f32 %v10655_v63, %v14484_v37  ;;  %v6051_v40 = vshrl.u32 %v5921_v19, 16  ;;  %v4860_v39 = vsel %vm14080_vm14, %v4852_v0, %v4859_v62  ;;  %v4866_v34 = vshll.u32 %v9517_v54, 16 }
 0x34e   : > { %v5042_v47 = vsel %vm13673_vm8, %v4861_v3, %v5041_v9  ;;  %v4865_v45 = vrot.slane %v4863_v18, 7  ;;  %5040 = vst [vmem:[#allocation2 + $0xac] sm:$0xf] %v4860_v39  ;;  %v9518_v16 = vpack.c.bf16 %v4414_v51, %v4414_v51  ;;  %v4383_v29 = vadd.f32 %v14400_v59, %v4344_v53  ;;  %v14541_v2 = vld [vmem:[#allocation2 + $0x9c] sm:$0xff]  }
 0x34f   : > { %5043 = vst [vmem:[#allocation2 + $0xb0] sm:$0x1] %v5042_v47  ;;  %v4345_v7 = vmul.f32 %v14388_v61, %v4306_v27  ;;  %v6026_v37 = vsel %vm12291_vm2, %v14513_v13, %v14490_v25  ;;  %v14547_v38 = vrot.slane %v6030_v8, 4  ;;  %v14549_v46 = vrot.slane %v6033_v31, 5  ;;  %10912 = vmatprep.mubr.bf16.mxu1 %v14541_v2  ;;  %11005 = vmatmul.mubr.bf16.gmra.mxu0 %v14541_v2  ;;  %v5051_v27 = vld [vmem:[#allocation2 + $0xc0] sm:$0xf] }
 0x350   : > { %v4868_v1 = vor.u32 %v4866_v34, %v4865_v45  ;;  %v6044_v50 = vor.u32 %v14531_v28, %v14527_v60  ;;  %v4871_v61 = vshrl.u32 %v9518_v16, 16  ;;  %v4415_v32 = vmax.f32 %v4383_v29, 0.0  ;;  %v14582_v29 = vld [vmem:[#allocation2 + $0x2c] sm:$0x1]  ;;  %v14608_v60 = vld [vmem:[#allocation2 + $0x58] sm:$0xf] }
 0x351   : > { %v4384_v23 = vadd.f32 %v14400_v59, %v4345_v7  ;;  %v14558_v24 = vrot.slane %v6047_v26, 5  ;;  %v14562_v52 = vrot.slane %v6051_v40, 4  ;;  %v6062_v4 = vshrl.u32 %v5923_v49, 16  ;;  %v14575_v40 = vld [vmem:[#allocation2 + $0x4c] sm:$0xf]  ;;  %16316 = vst [vmem:[#allocation8_spill] sm:$0xff] %v14582_v29 }
 0x352   : > { %v5045_v48 = vsel %vm14064_vm12, %v4868_v1, %v5044_v14  ;;  %v6065_v17 = vshll.u32 %v5923_v49, 16  ;;  %v4873_v57 = vrot.slane %v4871_v61, 7  ;;  %v4874_v8 = vshll.u32 %v9518_v16, 16  ;;  %v5929_v14 = vld [vmem:[#allocation2 + $0x48] sm:$0xf]  ;;  %v11568_v25 = vld [vmem:[#allocation2] sm:$0xff]  }
 0x353   : > { %5046 = vst [vmem:[#allocation2 + $0xb4] sm:$0xf] %v5045_v48  ;;  %v9519_v19 = vpack.c.bf16 %v4415_v32, %v4415_v32  ;;  %v4416_v20 = vmax.f32 %v4384_v23, 0.0  ;;  %v4869_v59 = vrot.slane %v4865_v45, 4  ;;  %v6071_v31 = vshll.u32 %v5924_v36, 16 }
 0x354   : > { %v6075_v21 = vshrl.u32 %v5924_v36, 16  ;;  %v6086_v58 = vshrl.u32 %v14553_v56, 16  ;;  %v4876_v54 = vor.u32 %v4874_v8, %v4873_v57  ;;  %v4878_v42 = vrot.slane %v4873_v57, 4 }
 0x355   : > { %v4880_v6 = vshrl.u32 %v9519_v19, 16  ;;  %v6095_v9 = vshll.u32 %v5927_v43, 16  ;;  %v9520_v22 = vpack.c.bf16 %v4416_v20, %v4416_v20  ;;  %v14565_v63 = vld [vmem:[#allocation2 + $0xa8] sm:$0xff]   ;;  %v6054_v26 = vor.u32 %v14562_v52, %v14558_v24 }
 0x356   : > { %v14569_v0 = vrot.slane %v6062_v4, 4  ;;  %v6099_v62 = vshrl.u32 %v5927_v43, 16  ;;  %v4877_v3 = vsel %vm14080_vm14, %v4869_v59, %v4876_v54  ;;  %v5049_v18 = vsel %vm13673_vm8, %v4878_v42, %v5048_v30  ;;  %10913 = vmatmul.mubr.bf16.gmra.mxu1 %v14565_v63  ;;  %11008 = vmatprep.mubr.bf16.mxu0 %v14565_v63  ;;  %v5055_v52 = vld [vmem:[#allocation2 + $0xc8] sm:$0x1] }
 0x357   : > { %v4882_v51 = vrot.slane %v4880_v6, 7  ;;  %v4883_v53 = vshll.u32 %v9519_v19, 16  ;;  %5047 = vst [vmem:[#allocation2 + $0xb8] sm:$0xf] %v4877_v3  ;;  %5050 = vst [vmem:[#allocation2 + $0xbc] sm:$0x1] %v5049_v18  ;;  %v6036_v44 = vsel %vm12291_vm2, %v14547_v38, %v14549_v46 }
 0x358   : > { %v4888_v39 = vshrl.u32 %v9520_v22, 16  ;;  %v6067_v47 = vrot.slane %v6065_v17, 5  ;;  %v14579_v45 = vrot.slane %v6071_v31, 5  ;;  %v6089_v34 = vshll.u32 %v14553_v56, 16  ;;  %v14590_v19 = vld [vmem:[#allocation2 + $0x38] sm:$0x1] }
 0x359   : > { %v4885_v16 = vor.u32 %v4883_v53, %v4882_v51  ;;  %v6077_v7 = vrot.slane %v6075_v21, 4  ;;  %v6088_v49 = vrot.slane %v6086_v58, 4  ;;  %v14584_v1 = vrot.slane %v6095_v9, 5  ;;  %16317 = vst [vmem:[#allocation24_spill] sm:$0xff] %v14590_v19  ;;  %v14606_v9 = vld [vmem:[#allocation2 + $0x50] sm:$0x1] }
 0x35a   : > { %v4890_v36 = vrot.slane %v4888_v39, 7  ;;  %v4891_v61 = vshll.u32 %v9520_v22, 16  ;;  %v6101_v32 = vrot.slane %v6099_v62, 4  ;;  %v6119_v23 = vshll.u32 %v14575_v40, 16  ;;  %v5932_v53 = vld [vmem:[#allocation2 + $0x54] sm:$0xf] }
 0x35b   : > { %v5052_v48 = vsel %vm14064_vm12, %v4885_v16, %v5051_v27  ;;  %v6110_v4 = vshrl.u32 %v5929_v14, 16  ;;  %v6113_v17 = vshll.u32 %v5929_v14, 16  ;;  %v6123_v56 = vshrl.u32 %v14575_v40, 16  ;;  %v11565_v14 = vld [vmem:[#allocation2 + $0xcc] sm:$0xff]  }
 0x35c   : > { %v4886_v43 = vrot.slane %v4882_v51, 4  ;;  %5053 = vst [vmem:[#allocation2 + $0xc0] sm:$0xf] %v5052_v48  ;;  %v4893_v57 = vor.u32 %v4891_v61, %v4890_v36  ;;  %v4895_v8 = vrot.slane %v4890_v36, 4  ;;  %v6091_v20 = vrot.slane %v6089_v34, 5 }
 0x35d   : > { %v6045_v59 = vrot.slane %v6044_v50, 4  ;;  %v6057_v30 = vshll.u32 %v14582_v29, 16  ;;  %v14598_v31 = vrot.slane %v6119_v23, 5  ;;  %v6125_v21 = vrot.slane %v6123_v56, 4  ;;  %v5935_v56 = vld [vmem:[#allocation2 + $0x60] sm:$0xf] }
 0x35e   : > { %v4894_v58 = vsel %vm14080_vm14, %v4886_v43, %v4893_v57  ;;  %v5056_v54 = vsel %vm13673_vm8, %v4895_v8, %v5055_v52  ;;  %v6078_v42 = vor.u32 %v6077_v7, %v14579_v45  ;;  %v6102_v6 = vor.u32 %v6101_v32, %v14584_v1  ;;  %v14610_v28 = vld [vmem:[#allocation2 + $0xb4] sm:$0xff]   ;;  %v14634_v52 = vld [vmem:[#allocation2 + $0x5c] sm:$0x1] }
 0x35f   : > { %5054 = vst [vmem:[#allocation2 + $0xc4] sm:$0xf] %v4894_v58  ;;  %5057 = vst [vmem:[#allocation2 + $0xc8] sm:$0x1] %v5056_v54  ;;  %v6055_v50 = vrot.slane %v6054_v26, 4  ;;  %v6112_v11 = vrot.slane %v6110_v4, 4  ;;  %v6068_v62 = vor.u32 %v6067_v47, %v14569_v0  ;;  %v6092_v18 = vor.u32 %v6091_v20, %v6088_v49  ;;  %10916 = vmatprep.mubr.bf16.mxu1 %v14610_v28 }
 0x360   : > { %16319 = vst [vmem:[#allocation6_spill] sm:$0xff] %v14610_v28  ;;  %v6115_v22 = vrot.slane %v6113_v17, 5  ;;  %v6081_v3 = vshll.u32 %v14590_v19, 16  ;;  %v6105_v51 = vshll.u32 %v14596_v35, 16  ;;  %11009 = vmatmul.mubr.bf16.gmra.mxu0 %v14610_v28  ;;  %v6059_v27 = vrot.slane %v6057_v30, 5 }
 0x361   : > { %v6126_v39 = vor.u32 %v6125_v21, %v14598_v31  ;;  %v6143_v38 = vshll.u32 %v14608_v60, 16  ;;  %v6147_v46 = vshrl.u32 %v14608_v60, 16  ;;  %v14629_v26 = vcombine.low %v6026_v37, %v6036_v44  ;;  %v14647_v21 = vld [vmem:[#allocation2 + $0x64] sm:$0xf] }
 0x362   : > { %v6079_v0 = vrot.slane %v6078_v42, 4  ;;  %v6103_v47 = vrot.slane %v6102_v6, 4  ;;  %v6129_v34 = vshll.u32 %v14606_v9, 16  ;;  %v6060_v16 = vsel %vm12291_vm2, %v6055_v50, %v6059_v27  ;;  %v14650_v42 = vld [vmem:[#allocation2 + $0x70] sm:$0xf] }
 0x363   : > { %16320 = vst [vmem:[#allocation7_spill] sm:$0xff] %v14629_v26  ;;  %v6116_v7 = vor.u32 %v6115_v22, %v6112_v11  ;;  %v6134_v49 = vshrl.u32 %v5932_v53, 16  ;;  %v6137_v36 = vshll.u32 %v5932_v53, 16  ;;  %v6069_v61 = vrot.slane %v6068_v62, 4 }
 0x364   : > { %v6083_v32 = vrot.slane %v6081_v3, 5  ;;  %v6093_v23 = vrot.slane %v6092_v18, 4  ;;  %v6107_v48 = vrot.slane %v6105_v51, 5  ;;  %v6050_v13 = vsel %vm12291_vm2, %v6045_v59, %v14558_v24  ;;  %v14663_v51 = vld [vmem:[#allocation2 + $0x7c] sm:$0xf] }
 0x365   : > { %v6127_v37 = vrot.slane %v6126_v39, 4  ;;  %v14639_v4 = vrot.slane %v6143_v38, 5  ;;  %v6149_v17 = vrot.slane %v6147_v46, 4  ;;  %v14641_v57 = vcombine.low %v6050_v13, %v6060_v16  ;;  %v14691_v13 = vld [vmem:[#allocation2 + $0x68] sm:$0x1] }
 0x366   : > { %v11563_v43 = vld [vmem:[#allocation2 + $0xc0] sm:$0xff]   ;;  %v6084_v8 = vsel %vm12291_vm2, %v6079_v0, %v6083_v32  ;;  %v6108_v20 = vsel %vm12291_vm2, %v6103_v47, %v6107_v48  ;;  %v6131_v30 = vrot.slane %v6129_v34, 5  ;;  %v6117_v58 = vrot.slane %v6116_v7, 4  ;;  %v5938_v0 = vld [vmem:[#allocation2 + $0x6c] sm:$0xf] }
 0x367   : > { %16321 = vst [vmem:[#allocation9_spill] sm:$0xff] %v14641_v57  ;;  %v6136_v54 = vrot.slane %v6134_v49, 4  ;;  %v6139_v24 = vrot.slane %v6137_v36, 5  ;;  %v6153_v59 = vshll.u32 %v14634_v52, 16  ;;  %10917 = vmatmul.mubr.bf16.gmra.mxu1 %v11563_v43  ;;  %11012 = vmatprep.mubr.bf16.mxu0 %v11563_v43  ;;  %v6074_v6 = vsel %vm12291_vm2, %v6069_v61, %v14579_v45  ;;  %v5941_v34 = vld [vmem:[#allocation2 + $0x78] sm:$0xf] }
 0x368   : > { %v6098_v44 = vsel %vm12291_vm2, %v6093_v23, %v14584_v1  ;;  %v6158_v50 = vshrl.u32 %v5935_v56, 16  ;;  %v6161_v11 = vshll.u32 %v5935_v56, 16  ;;  %11013 = vmatmul.mubr.bf16.gmra.mxu0 %v11565_v14  ;;  %10936 = vmatprep.mubr.bf16.mxu1 %v11568_v25  ;;  %v6132_v22 = vsel %vm12291_vm2, %v6127_v37, %v6131_v30  ;;  %v11570_v14 = vld [vmem:[%s16103_s4 + $0x70] sm:$0xff]   ;;  %v14689_v25 = vld [vmem:[#allocation2 + $0x88] sm:$0xf] }
 0x369   : > { %v6150_v62 = vor.u32 %v6149_v17, %v14639_v4  ;;  %v6167_v3 = vshll.u32 %v14647_v21, 16  ;;  %v6171_v18 = vshrl.u32 %v14647_v21, 16  ;;  %11080 = vmatprep.mubr.bf16.mxu0 %v14511_v41  ;;  %v14666_v45 = vcombine.low %v6074_v6, %v6084_v8  ;;  %v14695_v8 = vld [vmem:[#allocation2 + $0x74] sm:$0x1] }
 0x36a   : > { %v14668_v1 = vcombine.low %v6098_v44, %v6108_v20  ;;  %v6191_v27 = vshll.u32 %v14650_v42, 16  ;;  %v6122_v39 = vsel %vm12291_vm2, %v6117_v58, %v14598_v31  ;;  %v6140_v38 = vor.u32 %v6139_v24, %v6136_v54  ;;  %v5944_v31 = vld [vmem:[#allocation2 + $0x84] sm:$0xf]  ;;  %v11655_v24 = vld [vmem:[#allocation2 + $0xc] sm:$0xff]  }
 0x36b   : > { %16322 = vst [vmem:[#allocation10_spill] sm:$0xff] %v14666_v45  ;;  %v14675_v46 = vrot.slane %v6153_v59, 5  ;;  %v6195_v47 = vshrl.u32 %v14650_v42, 16  ;;  %v14681_v16 = vcombine.low %v6122_v39, %v6132_v22  ;;  %v14683_v7 = vrot.slane %v6158_v50, 4  ;;  %v11656_v22 = vld [vmem:[#allocation2 + $0x18] sm:$0xff]  }
 0x36c   : > { %16323 = vst [vmem:[#allocation12_spill] sm:$0xff] %v14668_v1  ;;  %v6215_v49 = vshll.u32 %v14663_v51, 16  ;;  %v6219_v36 = vshrl.u32 %v14663_v51, 16  ;;  %v6151_v61 = vrot.slane %v6150_v62, 4  ;;  %v6163_v32 = vrot.slane %v6161_v11, 5  ;;  %v11575_v11 = vld [vmem:[%s16103_s4 + $0xb0] sm:$0xff]  }
 0x36d   : > { %16324 = vst [vmem:[#allocation26_spill] sm:$0xff] %v14681_v16  ;;  %v14687_v23 = vrot.slane %v6167_v3, 5  ;;  %v6173_v48 = vrot.slane %v6171_v18, 4  ;;  %v6182_v37 = vshrl.u32 %v5938_v0, 16  ;;  %v6185_v17 = vshll.u32 %v5938_v0, 16  ;;  %v11657_v62 = vld [vmem:[%s16103_s4 + $0x78] sm:$0xff]  }
 0x36e   : > { %v14693_v56 = vrot.slane %v6191_v27, 5  ;;  %v6206_v43 = vshrl.u32 %v5941_v34, 16  ;;  %v6197_v20 = vrot.slane %v6195_v47, 4  ;;  %v6209_v30 = vshll.u32 %v5941_v34, 16  ;;  %v14711_v39 = vld [vmem:[#allocation2 + $0x80] sm:$0x1] }
 0x36f   : > { %v14697_v58 = vrot.slane %v6215_v49, 5  ;;  %v6221_v54 = vrot.slane %v6219_v36, 4  ;;  %10937 = vmatmul.mubr.bf16.vlgmr.msra.gmra.mxu1 %v11655_v24  ;;  %v6141_v59 = vrot.slane %v6140_v38, 4  ;;  %v6230_v6 = vshrl.u32 %v5944_v31, 16  ;;  %v11571_v0 = vld [vmem:[%s16103_s4 + $0x68] sm:$0xff]   ;;  %v11658_v24 = vld [vmem:[%s16103_s4 + $0xb8] sm:$0xff]  }
 0x370   : > { %v6233_v44 = vshll.u32 %v5944_v31, 16  ;;  %v6239_v50 = vshll.u32 %v14689_v25, 16  ;;  %10940 = vmatprep.mubr.bf16.mxu1 %v11656_v22  ;;  %11017 = vmatpush3.bf16.msra.mxu1 %v11657_v62  ;;  %v6156_v3 = vsel %vm12291_vm2, %v6151_v61, %v14675_v46  ;;  %v6164_v18 = vor.u32 %v6163_v32, %v14683_v7  ;;  %v5947_v7 = vld [vmem:[#allocation2 + $0x90] sm:$0xf]  ;;  %v11577_v62 = vld [vmem:[%s16103_s4 + $0xa8] sm:$0xff]  }
 0x371   : > { %v6177_v27 = vshll.u32 %v14691_v13, 16  ;;  %v6243_v38 = vshrl.u32 %v14689_v25, 16  ;;  %11081 = vmatmul.mubr.bf16.vlgmr.msra.gmra.mxu0 %v14629_v26  ;;  %11018 = vmatprep.subr.bf16.mxu1 %v11570_v14  ;;  %v6174_v47 = vor.u32 %v6173_v48, %v14687_v23  ;;  %v6184_v34 = vrot.slane %v6182_v37, 4  ;;  %v14862_v26 = vld [vmem:[#allocation2 + $0x4] sm:$0xf] }
 0x372   : > { %v6187_v49 = vrot.slane %v6185_v17, 5  ;;  %v6201_v46 = vshll.u32 %v14695_v8, 16  ;;  %11084 = vmatprep.mubr.bf16.mxu0 %v14641_v57  ;;  %v6198_v36 = vor.u32 %v6197_v20, %v14693_v56  ;;  %v6208_v31 = vrot.slane %v6206_v43, 4  ;;  %11161 = vmatpush3.bf16.msra.mxu0 %v11658_v24  ;;  %v11659_v57 = vld [vmem:[#allocation2 + $0x24] sm:$0xff]  }
 0x373   : > { %v6211_v61 = vrot.slane %v6209_v30, 5  ;;  %v6222_v32 = vor.u32 %v6221_v54, %v14697_v58  ;;  %v6232_v22 = vrot.slane %v6230_v6, 4  ;;  %v6235_v48 = vrot.slane %v6233_v44, 5  ;;  %11162 = vmatprep.subr.bf16.mxu0 %v11575_v11  ;;  %v14735_v30 = vld [vmem:[#allocation2 + $0x94] sm:$0xf] }
 0x374   : > { %v14726_v37 = vrot.slane %v6239_v50, 5  ;;  %v6245_v17 = vrot.slane %v6243_v38, 4  ;;  %11019 = vmatpush3.bf16.msra.mxu1 %v11570_v14  ;;  %v6146_v43 = vsel %vm12291_vm2, %v6141_v59, %v14639_v4  ;;  %v6225_v20 = vshll.u32 %v14711_v39, 16  ;;  %16325 = vst [vmem:[#allocation13_spill] sm:$0xff] %v14735_v30  ;;  %v11572_v50 = vld [vmem:[%s16103_s4 + $0x60] sm:$0xff]  }
 0x375   : > { %v6254_v54 = vshrl.u32 %v5947_v7, 16  ;;  %v6257_v6 = vshll.u32 %v5947_v7, 16  ;;  %11020 = vmatprep.subr.bf16.mxu1 %v11571_v0  ;;  %v14737_v44 = vcombine.low %v6146_v43, %v6156_v3  ;;  %v6165_v38 = vrot.slane %v6164_v18, 4  ;;  %v14742_v59 = vld [vmem:[#allocation2 + $0x8c] sm:$0x1]  ;;  %v11578_v18 = vld [vmem:[%s16103_s4 + $0xa0] sm:$0xff]  }
 0x376   : > { %v6179_v24 = vrot.slane %v6177_v27, 5  ;;  %v6188_v14 = vor.u32 %v6187_v49, %v6184_v34  ;;  %v6175_v53 = vrot.slane %v6174_v47, 4  ;;  %v6199_v33 = vrot.slane %v6198_v36, 4  ;;  %16327 = vst [vmem:[#allocation4_spill] sm:$0xff] %v14742_v59  ;;  %11163 = vmatpush3.bf16.msra.mxu0 %v11575_v11  ;;  %v11660_v27 = vld [vmem:[#allocation2 + $0x30] sm:$0xff]  }
 0x377   : > { %16326 = vst [vmem:[#allocation14_spill] sm:$0xff] %v14737_v44  ;;  %v6212_v35 = vor.u32 %v6211_v61, %v6208_v31  ;;  %v6223_v4 = vrot.slane %v6222_v32, 4  ;;  %10941 = vmatmul.mubr.bf16.gmra.mxu1 %v11659_v57  ;;  %v6203_v7 = vrot.slane %v6201_v46, 5  ;;  %v6236_v19 = vor.u32 %v6235_v48, %v6232_v22  ;;  %11164 = vmatprep.subr.bf16.mxu0 %v11577_v62  ;;  %v14749_v34 = vld [vmem:[#allocation2 + $0x98] sm:$0x1] }
 0x378   : > { %v6246_v3 = vor.u32 %v6245_v17, %v14726_v37  ;;  %v6263_v43 = vshll.u32 %v14735_v30, 16  ;;  %10944 = vmatprep.mubr.bf16.mxu1 %v11660_v27  ;;  %11021 = vmatpush3.bf16.msra.mxu1 %v11571_v0  ;;  %v6227_v47 = vrot.slane %v6225_v20, 5  ;;  %16328 = vst [vmem:[#allocation18_spill] sm:$0xff] %v14749_v34  ;;  %v6256_v11 = vrot.slane %v6254_v54, 4  ;;  %v11573_v0 = vld [vmem:[%s16103_s4 + $0x58] sm:$0xff]  }
 0x379   : > { %v6259_v49 = vrot.slane %v6257_v6, 5  ;;  %v6267_v57 = vshrl.u32 %v14735_v30, 16  ;;  %11085 = vmatmul.mubr.bf16.gmra.mxu0 %v14666_v45  ;;  %11022 = vmatprep.subr.bf16.mxu1 %v11572_v50  ;;  %v6170_v46 = vsel %vm12291_vm2, %v6165_v38, %v14687_v23  ;;  %v6189_v36 = vrot.slane %v6188_v14, 4  ;;  %v5950_v32 = vld [vmem:[#allocation2 + $0x9c] sm:$0xf] }
 0x37a   : > { %v6249_v61 = vshll.u32 %v14742_v59, 16  ;;  %11088 = vmatprep.mubr.bf16.mxu0 %v14668_v1  ;;  %v6180_v22 = vsel %vm12291_vm2, %v6175_v53, %v6179_v24  ;;  %v6204_v48 = vsel %vm12291_vm2, %v6199_v33, %v6203_v7  ;;  %v6213_v17 = vrot.slane %v6212_v35, 4  ;;  %v14768_v20 = vld [vmem:[#allocation2 + $0xa0] sm:$0xf]  ;;  %11165 = vmatpush3.bf16.msra.mxu0 %v11577_v62  ;;  %v11580_v53 = vld [vmem:[%s16103_s4 + $0x98] sm:$0xff]  }
 0x37b   : > { %v6228_v23 = vsel %vm12291_vm2, %v6223_v4, %v6227_v47  ;;  %16329 = vst [vmem:[#allocation19_spill] sm:$0xff] %v14768_v20  ;;  %v6237_v54 = vrot.slane %v6236_v19, 4  ;;  %v6247_v6 = vrot.slane %v6246_v3, 4  ;;  %v14770_v38 = vrot.slane %v6263_v43, 5  ;;  %11166 = vmatprep.subr.bf16.mxu0 %v11578_v18  ;;  %v11576_v4 = vld [vmem:[%s16103_s4 + $0x50] sm:$0xff]  }
 0x37c   : > { %v6273_v14 = vshll.u32 %v14749_v34, 16  ;;  %11023 = vmatpush3.bf16.msra.mxu1 %v11572_v50  ;;  %v6260_v33 = vor.u32 %v6259_v49, %v6256_v11  ;;  %v6269_v35 = vrot.slane %v6267_v57, 4  ;;  %v6278_v24 = vshrl.u32 %v5950_v32, 16  ;;  %v14792_v11 = vld [vmem:[#allocation2 + $0xa4] sm:$0x1]  ;;  %v11661_v57 = vld [vmem:[#allocation2 + $0x3c] sm:$0xff]  }
 0x37d   : > { %v6281_v7 = vshll.u32 %v5950_v32, 16  ;;  %v6194_v62 = vsel %vm12291_vm2, %v6189_v36, %v14693_v56  ;;  %11024 = vmatprep.subr.bf16.mxu1 %v11573_v0  ;;  %v6251_v19 = vrot.slane %v6249_v61, 5  ;;  %v6287_v3 = vshll.u32 %v14768_v20, 16  ;;  %16332 = vst [vmem:[#allocation11_spill] sm:$0xff] %v14792_v11  ;;  %v5953_v49 = vld [vmem:[#allocation2 + $0xa8] sm:$0xf] }
 0x37e   : > { %v6291_v43 = vshrl.u32 %v14768_v20, 16  ;;  %v14784_v27 = vcombine.low %v6170_v46, %v6180_v22  ;;  %v14786_v50 = vcombine.low %v6194_v62, %v6204_v48  ;;  %v6218_v47 = vsel %vm12291_vm2, %v6213_v17, %v14697_v58  ;;  %11167 = vmatpush3.bf16.msra.mxu0 %v11578_v18  ;;  %v14803_v58 = vld [vmem:[#allocation2 + $0xac] sm:$0xf]  ;;  %v5956_v22 = vld [vmem:[#allocation2 + $0xb4] sm:$0xf] }
 0x37f   : > { %10945 = vmatmul.mubr.bf16.gmra.mxu1 %v11661_v57  ;;  %v14794_v36 = vcombine.low %v6218_v47, %v6228_v23  ;;  %v6242_v46 = vsel %vm12291_vm2, %v6237_v54, %v14726_v37  ;;  %v6252_v61 = vsel %vm12291_vm2, %v6247_v6, %v6251_v19  ;;  %v14801_v32 = vrot.slane %v6273_v14, 5  ;;  %16333 = vst [vmem:[#allocation16_spill] sm:$0xff] %v14803_v58  ;;  %v11581_v18 = vld [vmem:[%s16103_s4 + $0x90] sm:$0xff]   ;;  %v11662_v48 = vld [vmem:[#allocation2 + $0x48] sm:$0xff]   ;;  %v14815_v6 = vld [vmem:[#allocation2 + $0xb8] sm:$0xf] }
 0x380   : > { %16330 = vst [vmem:[#allocation15_spill] sm:$0xff] %v14784_v27  ;;  %16331 = vst [vmem:[#allocation20_spill] sm:$0xff] %v14786_v50  ;;  %11168 = vmatprep.subr.bf16.mxu0 %v11580_v53  ;;  %10948 = vmatprep.mubr.bf16.mxu1 %v11662_v48  ;;  %v14808_v17 = vrot.slane %v6260_v33, 4  ;;  %v6270_v37 = vor.u32 %v6269_v35, %v14770_v38  ;;  %v14811_v23 = vrot.slane %v6278_v24, 4  ;;  %v14813_v54 = vrot.slane %v6281_v7, 5  ;;  %v11582_v57 = vld [vmem:[%s16103_s4 + $0x40] sm:$0xff]  }
 0x381   : > { %11025 = vmatpush3.bf16.msra.mxu1 %v11573_v0  ;;  %16334 = vst [vmem:[#allocation5_spill] sm:$0xff] %v14815_v6  ;;  %11089 = vmatmul.mubr.bf16.gmra.mxu0 %v14681_v16  ;;  %v14818_v14 = vrot.slane %v6287_v3, 5  ;;  %v14820_v62 = vrot.slane %v6291_v43, 4  ;;  %v11579_v0 = vld [vmem:[%s16103_s4 + $0x48] sm:$0xff]   ;;  %v6302_v33 = vshrl.u32 %v5953_v49, 16  ;;  %v6305_v19 = vshll.u32 %v5953_v49, 16 }
 0x382   : > { %11026 = vmatprep.subr.bf16.mxu1 %v11576_v4  ;;  %11092 = vmatprep.mubr.bf16.mxu0 %v14737_v44  ;;  %v14826_v35 = vcombine.low %v6242_v46, %v6252_v61  ;;  %v6297_v24 = vshll.u32 %v14792_v11, 16  ;;  %v6311_v7 = vshll.u32 %v14803_v58, 16  ;;  %v6315_v47 = vshrl.u32 %v14803_v58, 16  ;;  %v14831_v3 = vld [vmem:[#allocation2 + $0xc4] sm:$0xf]  ;;  %v11583_v43 = vld [vmem:[%s16103_s4 + $0x88] sm:$0xff]  }
 0x383   : > { %11169 = vmatpush3.bf16.msra.mxu0 %v11580_v53  ;;  %16335 = vst [vmem:[#allocation3_spill] sm:$0xff] %v14831_v3  ;;  %v6326_v49 = vshrl.u32 %v5956_v22, 16  ;;  %v6335_v48 = vshll.u32 %v14815_v6, 16  ;;  %v6339_v46 = vshrl.u32 %v14815_v6, 16  ;;  %v5959_v61 = vld [vmem:[#allocation2 + $0xc0] sm:$0xf]  ;;  %v6284_v31 = vor.u32 %v14813_v54, %v14811_v23 }
 0x384   : > { %11170 = vmatprep.subr.bf16.mxu0 %v11581_v18  ;;  %v14843_v56 = vrot.slane %v6270_v37, 4  ;;  %v6329_v44 = vshll.u32 %v5956_v22, 16  ;;  %v6294_v16 = vor.u32 %v14820_v62, %v14818_v14  ;;  %v14854_v1 = vrot.slane %v6305_v19, 5  ;;  %v11584_v37 = vld [vmem:[%s16103_s4 + $0x80] sm:$0xff]   ;;  %v11663_v62 = vld [vmem:[#allocation2 + $0x54] sm:$0xff]  }
 0x385   : > { %11027 = vmatpush3.bf16.msra.mxu1 %v11576_v4  ;;  %v14852_v4 = vrot.slane %v6302_v33, 4  ;;  %v6681_v53 = vshll.u32 %v14831_v3, 16  ;;  %v5911_v23 = vld [vmem:[#allocation2] sm:$0xf]  ;;  %v14860_v22 = vrot.slane %v6311_v7, 5  ;;  %v6317_v54 = vrot.slane %v6315_v47, 4 }
 0x386   : > { %11028 = vmatprep.subr.bf16.mxu1 %v11579_v0  ;;  %v6672_v45 = vshrl.u32 %v5959_v61, 16  ;;  %v6675_v29 = vshll.u32 %v5959_v61, 16  ;;  %v14864_v33 = vld [vmem:[#allocation2 + $0xb0] sm:$0x1]  ;;  %v6328_v19 = vrot.slane %v6326_v49, 4  ;;  %v14866_v41 = vrot.slane %v6335_v48, 5 }
 0x387   : > { %11171 = vmatpush3.bf16.msra.mxu0 %v11581_v18  ;;  %10949 = vmatmul.mubr.bf16.gmra.mxu1 %v11663_v62  ;;  %16336 = vst [vmem:[#allocation17_spill] sm:$0xff] %v14864_v33  ;;  %v6341_v28 = vrot.slane %v6339_v46, 4  ;;  %v6685_v6 = vshrl.u32 %v14831_v3, 16  ;;  %v11664_v11 = vld [vmem:[#allocation2 + $0x60] sm:$0xff]   ;;  %v14869_v7 = vld [vmem:[#allocation2 + $0xbc] sm:$0x1]  ;;  %v6276_v49 = vsel %vm12291_vm2, %v14843_v56, %v14801_v32  ;;  %v6308_v32 = vor.u32 %v14854_v1, %v14852_v4 }
 0x388   : > { %11172 = vmatprep.subr.bf16.mxu0 %v11583_v43  ;;  %10952 = vmatprep.mubr.bf16.mxu1 %v11664_v11  ;;  %16337 = vst [vmem:[#allocation21_spill] sm:$0xff] %v14869_v7  ;;  %v6331_v18 = vrot.slane %v6329_v44, 5  ;;  %v14871_v47 = vrot.slane %v6681_v53, 5  ;;  %v5966_v61 = vshrl.u32 %v5911_v23, 16  ;;  %v5969_v58 = vshll.u32 %v5911_v23, 16  ;;  %v14884_v44 = vld [vmem:[%s16103_s4 + $0x1f8] sm:$0xff]  }
 0x389   : > { %11029 = vmatpush3.bf16.msra.mxu1 %v11579_v0  ;;  %11093 = vmatmul.mubr.bf16.gmra.mxu0 %v14784_v27  ;;  %v14878_v48 = vrot.slane %v6297_v24, 5  ;;  %v6687_v46 = vrot.slane %v6685_v6, 4  ;;  %v5975_v11 = vshll.u32 %v14862_v26, 16  ;;  %v6321_v0 = vshll.u32 %v14864_v33, 16  ;;  %v14894_v27 = vld [vmem:[#allocation2 + $0xc8] sm:$0x1] }
 0x38a   : > { %11030 = vmatprep.subr.bf16.mxu1 %v11582_v57  ;;  %11096 = vmatprep.mubr.bf16.mxu0 %v14786_v50  ;;  %v6674_v53 = vrot.slane %v6672_v45, 4  ;;  %v6677_v23 = vrot.slane %v6675_v29, 5  ;;  %v5979_v56 = vshrl.u32 %v14862_v26, 16  ;;  %v6318_v6 = vor.u32 %v6317_v54, %v14860_v22  ;;  %v7244_v50 = vld [vmem:[#allocation2 + $0xc] sm:$0xe]  ;;  %v14899_v29 = vld [vmem:[%s16103_s4 + $0x238] sm:$0xff]  }
 0x38b   : > { %11173 = vmatpush3.bf16.msra.mxu0 %v11583_v43  ;;  %v6342_v24 = vor.u32 %v6341_v28, %v14866_v41  ;;  %v6345_v62 = vshll.u32 %v14869_v7, 16  ;;  %v6332_v45 = vor.u32 %v6331_v18, %v6328_v19  ;;  %v6688_v43 = vor.u32 %v6687_v46, %v14871_v47  ;;  %v5913_v34 = vld [vmem:[#allocation2 + $0x8] sm:$0x1]  ;;  %v11665_v19 = vld [vmem:[#allocation2 + $0x6c] sm:$0xff]  }
 0x38c   : > { %11174 = vmatprep.subr.bf16.mxu0 %v11584_v37  ;;  %v5968_v1 = vrot.slane %v5966_v61, 4  ;;  %v5971_v4 = vrot.slane %v5969_v58, 5  ;;  %v6285_v54 = vrot.slane %v6284_v31, 4  ;;  %v6295_v3 = vrot.slane %v6294_v16, 4  ;;  %v11666_v16 = vld [vmem:[#allocation2 + $0x78] sm:$0xff]  }
 0x38d   : > { %11031 = vmatpush3.bf16.msra.mxu1 %v11582_v57  ;;  %v14902_v28 = vrot.slane %v5975_v11, 5  ;;  %v5981_v7 = vrot.slane %v5979_v56, 4  ;;  %v6323_v33 = vrot.slane %v6321_v0, 5  ;;  %v6678_v59 = vor.u32 %v6677_v23, %v6674_v53  ;;  %v7243_v0 = vld [vmem:[#allocation2] sm:$0xe] }
 0x38e   : > { %11112 = vmatprep.subr.bf16.mxu1 %v14884_v44  ;;  %v6691_v20 = vshll.u32 %v14894_v27, 16  ;;  %v9345_v30 = vrot.slane %v7244_v50, 9  ;;  %v6309_v57 = vrot.slane %v6308_v32, 4  ;;  %v6319_v18 = vrot.slane %v6318_v6, 4 }
 0x38f   : > { %11175 = vmatpush3.bf16.msra.mxu0 %v11584_v37  ;;  %10953 = vmatmul.mubr.bf16.gmra.mxu1 %v11665_v19  ;;  %v6343_v61 = vrot.slane %v6342_v24, 4  ;;  %v6347_v58 = vrot.slane %v6345_v62, 5  ;;  %v6333_v31 = vrot.slane %v6332_v45, 4  ;;  %v6689_v46 = vrot.slane %v6688_v43, 4  ;;  %v7250_v43 = vld [vmem:[#allocation2 + $0x54] sm:$0xe] }
 0x390   : > { %11256 = vmatprep.subr.bf16.mxu0 %v14899_v29  ;;  %10956 = vmatprep.mubr.bf16.mxu1 %v11666_v16  ;;  %v5972_v11 = vor.u32 %v5971_v4, %v5968_v1  ;;  %v16338_v53 = vrot.slane %v14276_v55, 5  ;;  %v5982_v50 = vor.u32 %v5981_v7, %v14902_v28  ;;  %v5985_v23 = vshll.u32 %v5913_v34, 16 }
 0x391   : > { %11097 = vmatmul.mubr.bf16.gmra.mxu0 %v14794_v36  ;;  %v7311_v56 = vrot.slane %v14862_v26, 5  ;;  %v16339_v55 = vsel %vm12291_vm2, %v14808_v17, %v14770_v38  ;;  %v6679_v7 = vrot.slane %v6678_v59, 4  ;;  %v6693_v24 = vrot.slane %v6691_v20, 5 }
 0x392   : > { %v7319_v37 = vsel %vm12995_vm5, %v9345_v30, %v16338_v53  ;;  %11100 = vmatprep.mubr.bf16.mxu0 %v14826_v35  ;;  %v14923_v6 = vcombine.low %v16339_v55, %v6276_v49  ;;  %v6290_v30 = vsel %vm12291_vm2, %v6285_v54, %v14818_v14  ;;  %v6324_v26 = vsel %vm12291_vm2, %v6319_v18, %v6323_v33  ;;  %v7249_v14 = vld [vmem:[#allocation2 + $0x48] sm:$0xe]  ;;  %v7252_v53 = vld [vmem:[#allocation2 + $0x6c] sm:$0xe] }
 0x393   : > { %v14915_v32 = vcombine.low %v7319_v37, %v14346_v10  ;;  %v6300_v10 = vsel %vm12291_vm2, %v6295_v3, %v14878_v48  ;;  %v6348_v62 = vsel %vm12291_vm2, %v6343_v61, %v6347_v58  ;;  %v9344_v45 = vrot.slane %v7243_v0, 9 }
 0x394   : > { %v6314_v38 = vsel %vm12291_vm2, %v6309_v57, %v14860_v22  ;;  %v6338_v59 = vsel %vm12291_vm2, %v6333_v31, %v14866_v41  ;;  %v6694_v20 = vsel %vm12291_vm2, %v6689_v46, %v6693_v24  ;;  %v5973_v17 = vrot.slane %v5972_v11, 4  ;;  %v11667_v22 = vld [vmem:[#allocation2 + $0x84] sm:$0xff]   ;;  %v7251_v46 = vld [vmem:[#allocation2 + $0x60] sm:$0xe] }
 0x395   : > { %v5983_v3 = vrot.slane %v5982_v50, 4  ;;  %v5987_v49 = vrot.slane %v5985_v23, 5  ;;  %v7313_v33 = vrot.slane %v7311_v56, 4  ;;  %v7314_v48 = vrot.slane %v5913_v34, 5  ;;  %v14958_v34 = vld [vmem:[#allocation2 + $0x1c] sm:$0xf] }
 0x396   : > { %v14943_v1 = vcombine.low %v6290_v30, %v6300_v10  ;;  %v14945_v4 = vcombine.low %v6314_v38, %v6324_v26  ;;  %v14947_v54 = vcombine.low %v6338_v59, %v6348_v62  ;;  %v6684_v41 = vsel %vm12291_vm2, %v6679_v7, %v14871_v47  ;;  %v7253_v30 = vld [vmem:[#allocation2 + $0x78] sm:$0xe] }
 0x397   : > { %10957 = vmatmul.mubr.bf16.gmra.mxu1 %v11667_v22  ;;  %v14952_v19 = vcombine.low %v6684_v41, %v6694_v20  ;;  %v14956_v57 = vsel %vm12995_vm5, %v9344_v45, %v7311_v56  ;;  %v7325_v18 = vrot.slane %v14958_v34, 5  ;;  %v7353_v61 = vrot.slane %v14575_v40, 5  ;;  %v7254_v45 = vld [vmem:[#allocation2 + $0x84] sm:$0xe]  ;;  %v11587_v34 = vld [vmem:[%s16103_s4 + $0x1e8] sm:$0xff]  }
 0x398   : > { %10960 = vmatprep.mubr.bf16.mxu1 %v14504_v12  ;;  %v5978_v47 = vsel %vm12291_vm2, %v5973_v17, %v14902_v28  ;;  %v9350_v58 = vrot.slane %v7249_v14, 9  ;;  %v9351_v16 = vrot.slane %v7250_v43, 9  ;;  %v7360_v31 = vrot.slane %v14608_v60, 5  ;;  %v7255_v14 = vld [vmem:[#allocation2 + $0x90] sm:$0xe] }
 0x399   : > { %11101 = vmatmul.mubr.bf16.gmra.mxu0 %v14923_v6  ;;  %v5988_v11 = vsel %vm12291_vm2, %v5983_v3, %v5987_v49  ;;  %v14972_v0 = vsel %vm12995_vm5, %v7313_v33, %v7314_v48  ;;  %v7355_v40 = vrot.slane %v7353_v61, 4  ;;  %v7356_v12 = vrot.slane %v14606_v9, 5 }
 0x39a   : > { %11104 = vmatprep.mubr.bf16.mxu0 %v14943_v1  ;;  %v7354_v28 = vsel %vm12995_vm5, %v9350_v58, %v7353_v61  ;;  %v7361_v60 = vsel %vm12995_vm5, %v9351_v16, %v7360_v31  ;;  %v7362_v37 = vrot.slane %v7360_v31, 4  ;;  %v7367_v50 = vrot.slane %v14647_v21, 5  ;;  %v16342_v61 = vld [vmem:[#allocation13_spill] sm:$0xff] }
 0x39b   : > { %v7357_v23 = vsel %vm12995_vm5, %v7355_v40, %v7356_v12  ;;  %v9352_v56 = vrot.slane %v7251_v46, 9  ;;  %v7370_v55 = vrot.slane %v14691_v13, 5  ;;  %v7374_v9 = vrot.slane %v14650_v42, 5  ;;  %v7257_v12 = vld [vmem:[#allocation2 + $0xa8] sm:$0xe] }
 0x39c   : > { %v14985_v7 = vcombine.low %v7354_v28, %v7357_v23  ;;  %v16340_v24 = vrot.slane %v14634_v52, 5  ;;  %v7369_v26 = vrot.slane %v7367_v50, 4  ;;  %v9353_v62 = vrot.slane %v7252_v53, 9  ;;  %v16345_v28 = vld [vmem:[#allocation4_spill] sm:$0xff] }
 0x39d   : > { %v9270_v21 = vcombine.low %v5978_v47, %v5988_v11  ;;  %v7368_v59 = vsel %vm12995_vm5, %v9352_v56, %v7367_v50  ;;  %v7376_v13 = vrot.slane %v7374_v9, 4  ;;  %v9354_v52 = vrot.slane %v7253_v30, 9  ;;  %v16344_v11 = vld [vmem:[#allocation19_spill] sm:$0xff]  ;;  %v16347_v23 = vld [vmem:[#allocation16_spill] sm:$0xff] }
 0x39e   : > { %v7364_v10 = vsel %vm12995_vm5, %v7362_v37, %v16340_v24  ;;  %v7371_v42 = vsel %vm12995_vm5, %v7369_v26, %v7370_v55  ;;  %v7375_v20 = vsel %vm12995_vm5, %v9353_v62, %v7374_v9  ;;  %v7381_v17 = vrot.slane %v14663_v51, 5 }
 0x39f   : > { %v14991_v38 = vcombine.low %v7361_v60, %v7364_v10  ;;  %10961 = vmatmul.mubr.bf16.gmra.mxu1 %v14541_v2  ;;  %v15001_v3 = vcombine.low %v7368_v59, %v7371_v42  ;;  %v16341_v49 = vrot.slane %v14695_v8, 5  ;;  %v9355_v48 = vrot.slane %v7254_v45, 9  ;;  %v7256_v2 = vld [vmem:[#allocation2 + $0x9c] sm:$0xe]  ;;  %v16348_v45 = vld [vmem:[#allocation17_spill] sm:$0xff] }
 0x3a0   : > { %v7388_v43 = vrot.slane %v14689_v25, 5  ;;  %10964 = vmatprep.mubr.bf16.mxu1 %v14565_v63  ;;  %v7383_v22 = vrot.slane %v7381_v17, 4  ;;  %v7384_v51 = vrot.slane %v14711_v39, 5  ;;  %v7395_v47 = vrot.slane %v16342_v61, 5  ;;  %v16343_v39 = vld [vmem:[#allocation18_spill] sm:$0xff] }
 0x3a1   : > { %v7378_v33 = vsel %vm12995_vm5, %v7376_v13, %v16341_v49  ;;  %11105 = vmatmul.mubr.bf16.gmra.mxu0 %v14945_v4  ;;  %v7382_v8 = vsel %vm12995_vm5, %v9354_v52, %v7381_v17  ;;  %v9356_v25 = vrot.slane %v7255_v14, 9  ;;  %v7398_v46 = vrot.slane %v16343_v39, 5  ;;  %v7258_v13 = vld [vmem:[#allocation2 + $0xb4] sm:$0xe]  ;;  %v16349_v52 = vld [vmem:[#allocation11_spill] sm:$0xff]  ;;  %v16351_v49 = vld [vmem:[#allocation5_spill] sm:$0xff] }
 0x3a2   : > { %v15009_v41 = vcombine.low %v7375_v20, %v7378_v33  ;;  %v7389_v58 = vsel %vm12995_vm5, %v9355_v48, %v7388_v43  ;;  %v7390_v16 = vrot.slane %v7388_v43, 4  ;;  %11108 = vmatprep.mubr.bf16.mxu0 %v14947_v54  ;;  %v7385_v63 = vsel %vm12995_vm5, %v7383_v22, %v7384_v51  ;;  %v7259_v48 = vld [vmem:[#allocation2 + $0xc0] sm:$0xe]  ;;  %v16352_v43 = vld [vmem:[#allocation6_spill] sm:$0xff] }
 0x3a3   : > { %v7397_v31 = vrot.slane %v7395_v47, 4  ;;  %v7402_v40 = vrot.slane %v16344_v11, 5  ;;  %v15023_v53 = vcombine.low %v7382_v8, %v7385_v63  ;;  %v16346_v60 = vrot.slane %v16345_v28, 5 }
 0x3a4   : > { %v9357_v50 = vrot.slane %v7256_v2, 9  ;;  %v7409_v56 = vrot.slane %v16347_v23, 5  ;;  %v7396_v9 = vsel %vm12995_vm5, %v9356_v25, %v7395_v47  ;;  %v9358_v26 = vrot.slane %v7257_v12, 9  ;;  %v16354_v47 = vld [vmem:[#allocation21_spill] sm:$0xff] }
 0x3a5   : > { %v7392_v37 = vsel %vm12995_vm5, %v7390_v16, %v16346_v60  ;;  %v7399_v30 = vsel %vm12995_vm5, %v7397_v31, %v7398_v46  ;;  %v7404_v24 = vrot.slane %v7402_v40, 4  ;;  %v7412_v59 = vrot.slane %v16348_v45, 5  ;;  %v7245_v46 = vld [vmem:[#allocation2 + $0x18] sm:$0xe] }
 0x3a6   : > { %v15030_v55 = vcombine.low %v7389_v58, %v7392_v37  ;;  %v15036_v10 = vcombine.low %v7396_v9, %v7399_v30  ;;  %v7411_v62 = vrot.slane %v7409_v56, 4  ;;  %v9376_v42 = vcombine.low %v14956_v57, %v14972_v0  ;;  %v16353_v0 = vld [vmem:[#allocation3_spill] sm:$0xff]  ;;  %v11586_v30 = vld [vmem:[%s16103_s4 + $0x1f0] sm:$0xff]  }
 0x3a7   : > { %v7403_v20 = vsel %vm12995_vm5, %v9357_v50, %v7402_v40  ;;  %v16350_v17 = vrot.slane %v16349_v52, 5  ;;  %v7416_v33 = vrot.slane %v16351_v49, 5  ;;  %10965 = vmatmul.mubr.bf16.gmra.mxu1 %v16352_v43  ;;  %v7410_v51 = vsel %vm12995_vm5, %v9358_v26, %v7409_v56  ;;  %v11669_v40 = vld [vmem:[#allocation2 + $0x20] sm:$0x1]  ;;  %v11670_v50 = vld [vmem:[#allocation2 + $0x28] sm:$0xf] }
 0x3a8   : > { %v7413_v57 = vsel %vm12995_vm5, %v7411_v62, %v7412_v59  ;;  %v7748_v61 = vrot.slane %v16353_v0, 5  ;;  %v7419_v2 = vrot.slane %v16354_v47, 5  ;;  %11032 = vmatprep.mubr.bf16.mxu1 %v9270_v21  ;;  %v9359_v58 = vrot.slane %v7258_v13, 9  ;;  %v16355_v62 = vld [vmem:[#allocation23_spill] sm:$0xff]  ;;  %v11591_v59 = vld [vmem:[%s16103_s4 + $0x230] sm:$0xff]  }
 0x3a9   : > { %v7406_v14 = vsel %vm12995_vm5, %v7404_v24, %v16350_v17  ;;  %v15057_v8 = vcombine.low %v7410_v51, %v7413_v57  ;;  %v7418_v16 = vrot.slane %v7416_v33, 4  ;;  %11109 = vmatmul.mubr.bf16.gmra.mxu0 %v14952_v19  ;;  %v7327_v25 = vrot.slane %v7325_v18, 4  ;;  %v11671_v24 = vld [vmem:[#allocation2 + $0x34] sm:$0xf]  ;;  %v16356_v13 = vld [vmem:[#allocation7_spill] sm:$0xff] }
 0x3aa   : > { %v15049_v22 = vcombine.low %v7403_v20, %v7406_v14  ;;  %v9400_v63 = vrot.slane %v7259_v48, 9  ;;  %v7750_v31 = vrot.slane %v7748_v61, 4  ;;  %v7751_v39 = vrot.slane %v14894_v27, 5  ;;  %11176 = vmatprep.mubr.bf16.mxu0 %v9376_v42  ;;  %v7246_v52 = vld [vmem:[#allocation2 + $0x24] sm:$0xe]  ;;  %v11593_v48 = vld [vmem:[%s16103_s4 + $0x228] sm:$0xff]  }
 0x3ab   : > { %v7417_v11 = vsel %vm12995_vm5, %v9359_v58, %v7416_v33  ;;  %v7420_v21 = vsel %vm12995_vm5, %v7418_v16, %v7419_v2  ;;  %v7328_v12 = vrot.slane %v11669_v40, 5  ;;  %v7332_v27 = vrot.slane %v11670_v50, 5  ;;  %v7247_v49 = vld [vmem:[#allocation2 + $0x30] sm:$0xe]  ;;  %v11672_v57 = vld [vmem:[#allocation2 + $0x40] sm:$0xf] }
 0x3ac   : > { %v15067_v28 = vcombine.low %v7417_v11, %v7420_v21  ;;  %v7749_v60 = vsel %vm12995_vm5, %v9400_v63, %v7748_v61  ;;  %v7752_v37 = vsel %vm12995_vm5, %v7750_v31, %v7751_v39  ;;  %v9346_v56 = vrot.slane %v7245_v46, 9  ;;  %v16359_v58 = vld [vmem:[#allocation9_spill] sm:$0xff]  ;;  %v11594_v63 = vld [vmem:[%s16103_s4 + $0x220] sm:$0xff]   ;;  %v16360_v31 = vld [vmem:[#allocation10_spill] sm:$0xff] }
 0x3ad   : > { %v15073_v23 = vcombine.low %v7749_v60, %v7752_v37  ;;  %v7329_v9 = vsel %vm12995_vm5, %v7327_v25, %v7328_v12  ;;  %v7339_v26 = vrot.slane %v11671_v24, 5  ;;  %v7334_v20 = vrot.slane %v7332_v27, 4  ;;  %v7248_v11 = vld [vmem:[#allocation2 + $0x3c] sm:$0xe]  ;;  %v16361_v40 = vld [vmem:[#allocation25_spill] sm:$0xff]  ;;  %v11597_v24 = vld [vmem:[%s16103_s4 + $0x210] sm:$0xff]  }
 0x3ae   : > { %v7326_v45 = vsel %vm12995_vm5, %v9346_v56, %v7325_v18  ;;  %v16357_v18 = vld [vmem:[#allocation8_spill] sm:$0xff]  ;;  %v9347_v43 = vrot.slane %v7246_v52, 9  ;;  %v7346_v0 = vrot.slane %v11672_v57, 5  ;;  %v9348_v61 = vrot.slane %v7247_v49, 9  ;;  %v11589_v21 = vld [vmem:[%s16103_s4 + $0x1d8] sm:$0xff]   ;;  %v16364_v52 = vld [vmem:[#allocation14_spill] sm:$0xff] }
 0x3af   : > { %11033 = vmatmul.mubr.bf16.vlgmr.msra.gmra.mxu1 %v16355_v62  ;;  %v15090_v42 = vcombine.low %v7326_v45, %v7329_v9  ;;  %v7341_v17 = vrot.slane %v7339_v26, 4  ;;  %v7335_v14 = vrot.slane %v16357_v18, 5  ;;  %v7349_v12 = vrot.slane %v16361_v40, 5  ;;  %v11596_v60 = vld [vmem:[%s16103_s4 + $0x218] sm:$0xff]   ;;  %v16362_v9 = vld [vmem:[#allocation12_spill] sm:$0xff]  ;;  %v11595_v62 = vld [vmem:[%s16103_s4 + $0x1c8] sm:$0xff]  }
 0x3b0   : > { %11036 = vmatprep.mubr.bf16.mxu1 %v16356_v13  ;;  %11113 = vmatpush3.bf16.msra.mxu1 %v14884_v44  ;;  %v16358_v44 = vld [vmem:[#allocation24_spill] sm:$0xff]  ;;  %v7333_v2 = vsel %vm12995_vm5, %v9347_v43, %v7332_v27  ;;  %v7340_v25 = vsel %vm12995_vm5, %v9348_v61, %v7339_v26  ;;  %v7348_v46 = vrot.slane %v7346_v0, 4  ;;  %v9349_v37 = vrot.slane %v7248_v11, 9  ;;  %v11592_v27 = vld [vmem:[%s16103_s4 + $0x1d0] sm:$0xff]   ;;  %v11599_v45 = vld [vmem:[%s16103_s4 + $0x208] sm:$0xff]  }
 0x3b1   : > { %11177 = vmatmul.mubr.bf16.vlgmr.msra.gmra.mxu0 %v14915_v32  ;;  %11114 = vmatprep.subr.bf16.mxu1 %v11586_v30  ;;  %v7342_v33 = vrot.slane %v16358_v44, 5  ;;  %v7336_v51 = vsel %vm12995_vm5, %v7334_v20, %v7335_v14  ;;  %v16363_v26 = vld [vmem:[#allocation26_spill] sm:$0xff]  ;;  %v11598_v20 = vld [vmem:[%s16103_s4 + $0x1c0] sm:$0xff]   ;;  %v11601_v14 = vld [vmem:[%s16103_s4 + $0x178] sm:$0xff]  }
 0x3b2   : > { %11180 = vmatprep.mubr.bf16.mxu0 %v15090_v42  ;;  %11257 = vmatpush3.bf16.msra.mxu0 %v14899_v29  ;;  %v11588_v29 = vld [vmem:[%s16103_s4 + $0x1e0] sm:$0xff]   ;;  %v15113_v16 = vcombine.low %v7333_v2, %v7336_v51  ;;  %v7350_v50 = vsel %vm12995_vm5, %v7348_v46, %v7349_v12  ;;  %v7347_v56 = vsel %vm12995_vm5, %v9349_v37, %v7346_v0 }
 0x3b3   : > { %11258 = vmatprep.subr.bf16.mxu0 %v11591_v59  ;;  %v7343_v47 = vsel %vm12995_vm5, %v7341_v17, %v7342_v33  ;;  %v11600_v17 = vld [vmem:[%s16103_s4 + $0x200] sm:$0xff]  }
 0x3b4   : > { %11115 = vmatpush3.bf16.msra.mxu1 %v11586_v30  ;;  %v15121_v39 = vcombine.low %v7340_v25, %v7343_v47  ;;  %v15140_v30 = vcombine.low %v7347_v56, %v7350_v50  ;;  %v16366_v33 = vld [vmem:[#allocation20_spill] sm:$0xff]  ;;  %v11602_v50 = vld [vmem:[%s16103_s4 + $0x170] sm:$0xff]  }
 0x3b5   : > { %11116 = vmatprep.subr.bf16.mxu1 %v11587_v34 }
 0x3b6   : > { %11259 = vmatpush3.bf16.msra.mxu0 %v11591_v59 }
 0x3b7   : > { %11037 = vmatmul.mubr.bf16.gmra.mxu1 %v16359_v58  ;;  %11260 = vmatprep.subr.bf16.mxu0 %v11593_v48  ;;  %v15154_v59 = vpop.f32.mrf.mxu1 }
 0x3b8   : > { %11040 = vmatprep.mubr.bf16.mxu1 %v16360_v31  ;;  %11117 = vmatpush3.bf16.msra.mxu1 %v11587_v34  ;;  %v16365_v34 = vld [vmem:[#allocation15_spill] sm:$0xff] }
 0x3b9   : > { %11181 = vmatmul.mubr.bf16.gmra.mxu0 %v15113_v16  ;;  %11118 = vmatprep.subr.bf16.mxu1 %v11588_v29  ;;  %v15164_v18 = vpop.f32.mrf.mxu1 }
 0x3ba   : > { %11184 = vmatprep.mubr.bf16.mxu0 %v15121_v39  ;;  %11261 = vmatpush3.bf16.msra.mxu0 %v11593_v48 }
 0x3bb   : > { %11262 = vmatprep.subr.bf16.mxu0 %v11594_v63  ;;  %v15173_v44 = vpop.f32.mrf.mxu1 }
 0x3bc   : > { %11119 = vmatpush3.bf16.msra.mxu1 %v11588_v29 }
 0x3bd   : > { %11120 = vmatprep.subr.bf16.mxu1 %v11589_v21  ;;  %v15179_v43 = vpop.f32.mrf.mxu1 }
 0x3be   : > { %11263 = vmatpush3.bf16.msra.mxu0 %v11594_v63  ;;  %v15171_v49 = vpop.f32.mrf.mxu0 }
 0x3bf   : > { %11041 = vmatmul.mubr.bf16.gmra.mxu1 %v16362_v9  ;;  %11264 = vmatprep.subr.bf16.mxu0 %v11596_v60 }
 0x3c0   : > { %11044 = vmatprep.mubr.bf16.mxu1 %v16363_v26  ;;  %11121 = vmatpush3.bf16.msra.mxu1 %v11589_v21  ;;  %v15176_v48 = vpop.f32.mrf.mxu0 }
 0x3c1   : > { %11185 = vmatmul.mubr.bf16.gmra.mxu0 %v15140_v30  ;;  %11122 = vmatprep.subr.bf16.mxu1 %v11592_v27 }
 0x3c2   : > { %11188 = vmatprep.mubr.bf16.mxu0 %v14985_v7  ;;  %11265 = vmatpush3.bf16.msra.mxu0 %v11596_v60  ;;  %v15185_v57 = vpop.f32.mrf.mxu0 }
 0x3c3   : > { %11266 = vmatprep.subr.bf16.mxu0 %v11597_v24 }
 0x3c4   : > { %11123 = vmatpush3.bf16.msra.mxu1 %v11592_v27  ;;  %v15190_v61 = vpop.f32.mrf.mxu0 }
 0x3c5   : > { %11124 = vmatprep.subr.bf16.mxu1 %v11595_v62 }
 0x3c6   : > { %11267 = vmatpush3.bf16.msra.mxu0 %v11597_v24 }
 0x3c7   : > { %11045 = vmatmul.mubr.bf16.gmra.mxu1 %v16364_v52  ;;  %11268 = vmatprep.subr.bf16.mxu0 %v11599_v45  ;;  %v15183_v51 = vpop.f32.mrf.mxu1 }
 0x3c8   : > { %11048 = vmatprep.mubr.bf16.mxu1 %v16365_v34  ;;  %11125 = vmatpush3.bf16.msra.mxu1 %v11595_v62 }
 0x3c9   : > { %11189 = vmatmul.mubr.bf16.gmra.mxu0 %v14991_v38  ;;  %11126 = vmatprep.subr.bf16.mxu1 %v11598_v20  ;;  %v15187_v0 = vpop.f32.mrf.mxu1 }
 0x3ca   : > { %11192 = vmatprep.mubr.bf16.mxu0 %v15001_v3  ;;  %11269 = vmatpush3.bf16.msra.mxu0 %v11599_v45 }
 0x3cb   : > { %11270 = vmatprep.subr.bf16.mxu0 %v11600_v17  ;;  %v15197_v29 = vpop.f32.mrf.mxu1 }
 0x3cc   : > { %11127 = vmatpush3.bf16.msra.mxu1 %v11598_v20  ;;  %v11605_v20 = vld [vmem:[%s16103_s4 + $0x158] sm:$0xff]  }
 0x3cd   : > { %11208 = vmatprep.subr.bf16.mxu1 %v11601_v14  ;;  %v15201_v25 = vpop.f32.mrf.mxu1 }
 0x3ce   : > { %11271 = vmatpush3.bf16.msra.mxu0 %v11600_v17 }
 0x3cf   : > { %11049 = vmatmul.mubr.bf16.gmra.mxu1 %v16366_v33 }
 0x3d0   : > { %11052 = vmatprep.mubr.bf16.mxu1 %v14794_v36  ;;  %v15194_v47 = vpop.f32.mrf.mxu0 }
 0x3d1   : > { %11193 = vmatmul.mubr.bf16.gmra.mxu0 %v15009_v41 }
 0x3d2   : > { %11196 = vmatprep.mubr.bf16.mxu0 %v15023_v53  ;;  %v15199_v2 = vpop.f32.mrf.mxu0 }
 0x3d4   : > { %v15208_v46 = vpop.f32.mrf.mxu0 }
 0x3d5   : > { %16368 = vst [vmem:[#allocation13_spill] sm:$0xff] %v15208_v46 }
 0x3d6   : > { %v15213_v21 = vpop.f32.mrf.mxu0 }
 0x3d7   : > { %11053 = vmatmul.mubr.bf16.gmra.mxu1 %v14826_v35  ;;  %v15205_v63 = vpop.f32.mrf.mxu1  ;;  %16370 = vst [vmem:[#allocation19_spill] sm:$0xff] %v15213_v21 }
 0x3d8   : > { %11056 = vmatprep.mubr.bf16.mxu1 %v14923_v6  ;;  %16367 = vst [vmem:[#allocation22_spill] sm:$0xff] %v15205_v63 }
 0x3d9   : > { %11197 = vmatmul.mubr.bf16.gmra.mxu0 %v15030_v55  ;;  %v15211_v11 = vpop.f32.mrf.mxu1 }
 0x3da   : > { %11200 = vmatprep.mubr.bf16.mxu0 %v15036_v10  ;;  %16369 = vst [vmem:[#allocation18_spill] sm:$0xff] %v15211_v11 }
 0x3db   : > { %v15219_v12 = vpop.f32.mrf.mxu1 }
 0x3dc   : > { %16372 = vst [vmem:[#allocation16_spill] sm:$0xff] %v15219_v12 }
 0x3dd   : > { %v15225_v37 = vpop.f32.mrf.mxu1 }
 0x3de   : > { %16374 = vst [vmem:[#allocation11_spill] sm:$0xff] %v15225_v37 }
 0x3df   : > { %11057 = vmatmul.mubr.bf16.gmra.mxu1 %v14943_v1  ;;  %v15216_v40 = vpop.f32.mrf.mxu0 }
 0x3e0   : > { %11060 = vmatprep.mubr.bf16.mxu1 %v14945_v4  ;;  %16371 = vst [vmem:[#allocation4_spill] sm:$0xff] %v15216_v40 }
 0x3e1   : > { %11201 = vmatmul.mubr.bf16.gmra.mxu0 %v15049_v22  ;;  %v15223_v60 = vpop.f32.mrf.mxu0 }
 0x3e2   : > { %11204 = vmatprep.mubr.bf16.mxu0 %v15057_v8  ;;  %16373 = vst [vmem:[#allocation17_spill] sm:$0xff] %v15223_v60 }
 0x3e3   : > { %v15233_v56 = vpop.f32.mrf.mxu0 }
 0x3e4   : > { %16376 = vst [vmem:[#allocation6_spill] sm:$0xff] %v15233_v56 }
 0x3e5   : > { %v15243_v62 = vpop.f32.mrf.mxu0 }
 0x3e6   : > { %v15230_v27 = vpop.f32.mrf.mxu1  ;;  %16378 = vst [vmem:[#allocation21_spill] sm:$0xff] %v15243_v62 }
 0x3e7   : > { %11061 = vmatmul.mubr.bf16.gmra.mxu1 %v14947_v54  ;;  %16375 = vst [vmem:[#allocation5_spill] sm:$0xff] %v15230_v27 }
 0x3e8   : > { %11128 = vmatprep.mubr.bf16.mxu1 %v16356_v13  ;;  %v11603_v13 = vld [vmem:[%s16103_s4 + $0x168] sm:$0xff]   ;;  %v15241_v24 = vpop.f32.mrf.mxu1 }
 0x3e9   : > { %11205 = vmatmul.mubr.bf16.gmra.mxu0 %v15067_v28  ;;  %16377 = vst [vmem:[#allocation3_spill] sm:$0xff] %v15241_v24 }
 0x3ea   : > { %11272 = vmatprep.mubr.bf16.mxu0 %v15090_v42  ;;  %v15250_v45 = vpop.f32.mrf.mxu1 }
 0x3eb   : > { %16380 = vst [vmem:[#allocation7_spill] sm:$0xff] %v15250_v45 }
 0x3ef   : > { %11129 = vmatmul.mubr.bf16.vlgmr.msra.gmra.mxu1 %v16359_v58  ;;  %v11604_v58 = vld [vmem:[%s16103_s4 + $0x160] sm:$0xff]  }
 0x3f0   : > { %11132 = vmatprep.mubr.bf16.mxu1 %v16360_v31  ;;  %11209 = vmatpush3.bf16.msra.mxu1 %v11601_v14  ;;  %v15248_v31 = vpop.f32.mrf.mxu0  ;;  %v15261_v14 = vpop.f32.mrf.mxu1 }
 0x3f1   : > { %11273 = vmatmul.mubr.bf16.vlgmr.msra.gmra.mxu0 %v15113_v16  ;;  %11210 = vmatprep.subr.bf16.mxu1 %v11602_v50  ;;  %16379 = vst [vmem:[#allocation23_spill] sm:$0xff] %v15248_v31  ;;  %16382 = vst [vmem:[#allocation24_spill] sm:$0xff] %v15261_v14  ;;  %v5964_v31 = vld [vmem:[#allocation2 + $0xd4] sm:$0x1] }
 0x3f2   : > { %11276 = vmatprep.mubr.bf16.mxu0 %v15121_v39  ;;  %v15258_v17 = vpop.f32.mrf.mxu0 }
 0x3f3   : > { %16381 = vst [vmem:[#allocation8_spill] sm:$0xff] %v15258_v17 }
 0x3f4   : > { %11211 = vmatpush3.bf16.msra.mxu1 %v11602_v50 }
 0x3f5   : > { %11212 = vmatprep.subr.bf16.mxu1 %v11603_v13 }
 0x3f6   : > { %v15263_v50 = vpop.f32.mrf.mxu1 }
 0x3f7   : > { %11133 = vmatmul.mubr.bf16.gmra.mxu1 %v16362_v9  ;;  %16383 = vst [vmem:[#allocation9_spill] sm:$0xff] %v15263_v50  ;;  %v11606_v9 = vld [vmem:[%s16103_s4 + $0x150] sm:$0xff]  }
 0x3f8   : > { %11136 = vmatprep.mubr.bf16.mxu1 %v16363_v26  ;;  %11213 = vmatpush3.bf16.msra.mxu1 %v11603_v13  ;;  %v15268_v26 = vpop.f32.mrf.mxu0  ;;  %v15272_v13 = vpop.f32.mrf.mxu1 }
 0x3f9   : > { %11277 = vmatmul.mubr.bf16.gmra.mxu0 %v15140_v30  ;;  %11214 = vmatprep.subr.bf16.mxu1 %v11604_v58  ;;  %16384 = vst [vmem:[#allocation10_spill] sm:$0xff] %v15268_v26  ;;  %16385 = vst [vmem:[#allocation25_spill] sm:$0xff] %v15272_v13  ;;  %v5963_v13 = vld [vmem:[#allocation2 + $0xd0] sm:$0xf] }
 0x3fa   : > { %11280 = vmatprep.mubr.bf16.mxu0 %v14985_v7  ;;  %v15278_v50 = vpop.f32.mrf.mxu0  ;;  %v6971_v26 = vshrl.u32 %v5963_v13, 16 }
 0x3fb   : > { %16386 = vst [vmem:[#allocation12_spill] sm:$0xff] %v15278_v50 }
 0x3fc   : > { %11215 = vmatpush3.bf16.msra.mxu1 %v11604_v58  ;;  %v11607_v58 = vld [vmem:[%s16103_s4 + $0x148] sm:$0xff]  }
 0x3fd   : > { %11216 = vmatprep.subr.bf16.mxu1 %v11605_v20 }
 0x3ff   : > { %11137 = vmatmul.mubr.bf16.gmra.mxu1 %v16364_v52  ;;  %v15283_v52 = vpop.f32.mrf.mxu1 }
 0x400   : > { %11140 = vmatprep.mubr.bf16.mxu1 %v16365_v34  ;;  %11217 = vmatpush3.bf16.msra.mxu1 %v11605_v20  ;;  %v15281_v17 = vpop.f32.mrf.mxu0  ;;  %16388 = vst [vmem:[#allocation14_spill] sm:$0xff] %v15283_v52  ;;  %v11608_v34 = vld [vmem:[%s16103_s4 + $0x140] sm:$0xff]   ;;  %v5962_v52 = vld [vmem:[#allocation2 + $0xcc] sm:$0xf] }
 0x401   : > { %11281 = vmatmul.mubr.bf16.gmra.mxu0 %v14991_v38  ;;  %11218 = vmatprep.subr.bf16.mxu1 %v11606_v9  ;;  %16387 = vst [vmem:[#allocation26_spill] sm:$0xff] %v15281_v17  ;;  %v15292_v50 = vpop.f32.mrf.mxu1 }
 0x402   : > { %11284 = vmatprep.mubr.bf16.mxu0 %v15001_v3  ;;  %v15289_v20 = vpop.f32.mrf.mxu0  ;;  %16390 = vst [vmem:[#allocation20_spill] sm:$0xff] %v15292_v50  ;;  %v6967_v50 = vshll.u32 %v5963_v13, 16 }
 0x403   : > { %16389 = vst [vmem:[#allocation15_spill] sm:$0xff] %v15289_v20  ;;  %v6961_v20 = vshll.u32 %v5962_v52, 16 }
 0x404   : > { %11219 = vmatpush3.bf16.msra.mxu1 %v11606_v9  ;;  %v15298_v17 = vpop.f32.mrf.mxu0  ;;  %v6969_v14 = vrot.slane %v6967_v50, 5  ;;  %v8020_v50 = vrot.slane %v5963_v13, 5 }
 0x405   : > { %11220 = vmatprep.subr.bf16.mxu1 %v11607_v58  ;;  %16392 = vst [vmem:[#allocation28_spill] sm:$0xff] %v15298_v17 }
 0x406   : > { %v15296_v9 = vpop.f32.mrf.mxu1 }
 0x407   : > { %11141 = vmatmul.mubr.bf16.gmra.mxu1 %v16366_v33  ;;  %16391 = vst [vmem:[#allocation27_spill] sm:$0xff] %v15296_v9 }
 0x408   : > { %11144 = vmatprep.mubr.bf16.mxu1 %v14794_v36  ;;  %11221 = vmatpush3.bf16.msra.mxu1 %v11607_v58  ;;  %v15300_v33 = vpop.f32.mrf.mxu1  ;;  %v15303_v36 = vpop.f32.mrf.mxu0  ;;  %v6958_v58 = vshrl.u32 %v5962_v52, 16 }
 0x409   : > { %11285 = vmatmul.mubr.bf16.gmra.mxu0 %v15009_v41  ;;  %11222 = vmatprep.subr.bf16.mxu1 %v11608_v34  ;;  %16393 = vst [vmem:[#allocation29_spill] sm:$0xff] %v15300_v33  ;;  %16394 = vst [vmem:[#allocation30_spill] sm:$0xff] %v15303_v36  ;;  %v6963_v33 = vrot.slane %v6961_v20, 5 }
 0x40a   : > { %11288 = vmatprep.mubr.bf16.mxu0 %v15023_v53  ;;  %v6960_v17 = vrot.slane %v6958_v58, 4 }
 0x40c   : > { %11223 = vmatpush3.bf16.msra.mxu1 %v11608_v34  ;;  %v15310_v34 = vpop.f32.mrf.mxu1  ;;  %v6964_v52 = vor.u32 %v6963_v33, %v6960_v17  ;;  %v8022_v17 = vrot.slane %v8020_v50, 4  ;;  %v8023_v33 = vrot.slane %v5964_v31, 5 }
 0x40d   : > { %16396 = vst [vmem:[#allocation32_spill] sm:$0xff] %v15310_v34 }
 0x40e   : > { %v6965_v20 = vrot.slane %v6964_v52, 4 }
 0x40f   : > { %11145 = vmatmul.mubr.bf16.gmra.mxu1 %v14826_v35  ;;  %v15307_v9 = vpop.f32.mrf.mxu0  ;;  %v6973_v35 = vrot.slane %v6971_v26, 4  ;;  %v7260_v26 = vld [vmem:[#allocation2 + $0xcc] sm:$0xe] }
 0x410   : > { %11148 = vmatprep.mubr.bf16.mxu1 %v14923_v6  ;;  %16395 = vst [vmem:[#allocation31_spill] sm:$0xff] %v15307_v9  ;;  %v15314_v6 = vpop.f32.mrf.mxu1  ;;  %v6977_v9 = vshll.u32 %v5964_v31, 16  ;;  %v6970_v13 = vsel %vm12291_vm2, %v6965_v20, %v6969_v14 }
 0x411   : > { %11289 = vmatmul.mubr.bf16.gmra.mxu0 %v15030_v55  ;;  %v15312_v36 = vpop.f32.mrf.mxu0  ;;  %v6974_v45 = vor.u32 %v6973_v35, %v6969_v14 }
 0x412   : > { %11292 = vmatprep.mubr.bf16.mxu0 %v15036_v10  ;;  %16397 = vst [vmem:[#allocation33_spill] sm:$0xff] %v15312_v36  ;;  %v6979_v34 = vrot.slane %v6977_v9, 5 }
 0x413   : > { %v15321_v58 = vpop.f32.mrf.mxu0  ;;  %v6975_v36 = vrot.slane %v6974_v45, 4 }
 0x414   : > { %16398 = vst [vmem:[#allocation34_spill] sm:$0xff] %v15321_v58 }
 0x415   : > { %v6980_v45 = vsel %vm12291_vm2, %v6975_v36, %v6979_v34 }
 0x416   : > { %v15318_v62 = vpop.f32.mrf.mxu1  ;;  %v9335_v31 = vcombine.low %v6970_v13, %v6980_v45 }
 0x417   : > { %11149 = vmatmul.mubr.bf16.gmra.mxu1 %v14943_v1  ;;  %v15326_v1 = vpop.f32.mrf.mxu0 }
 0x418   : > { %11152 = vmatprep.mubr.bf16.mxu1 %v14945_v4  ;;  %v15324_v24 = vpop.f32.mrf.mxu1  ;;  %v9426_v4 = vrot.slane %v7260_v26, 9 }
 0x419   : > { %11293 = vmatmul.mubr.bf16.gmra.mxu0 %v15049_v22 }
 0x41a   : > { %11296 = vmatprep.mubr.bf16.mxu0 %v15057_v8  ;;  %v15336_v9 = vpop.f32.mrf.mxu1 }
 0x41c   : > { %v15348_v14 = vpop.f32.mrf.mxu1 }
 0x41f   : > { %11153 = vmatmul.mubr.bf16.gmra.mxu1 %v14947_v54  ;;  %v8021_v54 = vsel %vm12995_vm5, %v9426_v4, %v8020_v50 }
 0x420   : > { %v15329_v35 = vpop.f32.mrf.mxu0  ;;  %11156 = vmatprep.mubr.bf16.mxu1 %v14952_v19  ;;  %v8024_v19 = vsel %vm12995_vm5, %v8022_v17, %v8023_v33 }
 0x421   : > { %11297 = vmatmul.mubr.bf16.gmra.mxu0 %v15067_v28  ;;  %v9443_v5 = vcombine.low %v8021_v54, %v8024_v19 }
 0x422   : > { %v15339_v52 = vpop.f32.mrf.mxu0  ;;  %11300 = vmatprep.mubr.bf16.mxu0 %v15073_v23 }
 0x424   : > { %v15346_v26 = vpop.f32.mrf.mxu0 }
 0x426   : > { %v15350_v36 = vpop.f32.mrf.mxu0 }
 0x427   : > { %v15352_v34 = vpop.f32.mrf.mxu1  ;;  %11157 = vmatmul.mubr.bf16.gmra.mxu1 %v9335_v31 }
 0x428   : > { %v15354_v20 = vpop.f32.mrf.mxu0  ;;  %11224 = vmatprep.mubr.bf16.mxu1 %v14915_v32 }
 0x429   : > { %v15357_v58 = vpop.f32.mrf.mxu1  ;;  %11301 = vmatmul.mubr.bf16.gmra.mxu0 %v9443_v5 }
 0x42a   : > { %v15359_v15 = vpop.f32.mrf.mxu0 }
 0x42b   : > { %v15361_v50 = vpop.f32.mrf.mxu1 }
 0x42c   : > { %v15363_v4 = vpop.f32.mrf.mxu0 }
 0x42d   : > { %v15365_v17 = vpop.f32.mrf.mxu1 }
 0x42e   : > { %v15367_v33 = vpop.f32.mrf.mxu0 }
 0x42f   : > { %v15369_v13 = vpop.f32.mrf.mxu1  ;;  %11225 = vmatmul.mubr.bf16.vlgmr.msra.gmra.mxu1 %v15090_v42 }
 0x430   : > { %11228 = vmatprep.mubr.bf16.mxu1 %v15113_v16 }
 0x431   : > { %v15373_v32 = vpop.f32.mrf.mxu0  ;;  %v15375_v45 = vpop.f32.mrf.mxu1 }
 0x433   : > { %v15377_v54 = vpop.f32.mrf.mxu0  ;;  %v15379_v19 = vpop.f32.mrf.mxu1 }
 0x435   : > { %v15381_v31 = vpop.f32.mrf.mxu0  ;;  %v15383_v5 = vpop.f32.mrf.mxu1 }
 0x437   : > { %v15385_v56 = vpop.f32.mrf.mxu0  ;;  %v15387_v27 = vpop.f32.mrf.mxu1  ;;  %11229 = vmatmul.mubr.bf16.gmra.mxu1 %v15121_v39 }
 0x438   : > { %11232 = vmatprep.mubr.bf16.mxu1 %v15140_v30 }
 0x439   : > { %v15391_v42 = vpop.f32.mrf.mxu0  ;;  %v15393_v16 = vpop.f32.mrf.mxu1 }
 0x43a   : > { %16399 = vst [vmem:[#allocation35_spill] sm:$0xff] %v15391_v42 }
 0x43b   : > { %v15395_v60 = vpop.f32.mrf.mxu0  ;;  %v15397_v37 = vpop.f32.mrf.mxu1 }
 0x43c   : > { %16400 = vst [vmem:[#allocation36_spill] sm:$0xff] %v15395_v60 }
 0x43d   : > { %v15399_v40 = vpop.f32.mrf.mxu0  ;;  %v15401_v12 = vpop.f32.mrf.mxu1 }
 0x43e   : > { %16401 = vst [vmem:[#allocation37_spill] sm:$0xff] %v15399_v40 }
 0x43f   : > { %v15403_v21 = vpop.f32.mrf.mxu0  ;;  %v15405_v11 = vpop.f32.mrf.mxu1  ;;  %11233 = vmatmul.mubr.bf16.gmra.mxu1 %v14985_v7 }
 0x440   : > { %16402 = vst [vmem:[#allocation38_spill] sm:$0xff] %v15403_v21  ;;  %11236 = vmatprep.mubr.bf16.mxu1 %v14991_v38 }
 0x441   : > { %v15409_v39 = vpop.f32.mrf.mxu0  ;;  %v15411_v30 = vpop.f32.mrf.mxu1 }
 0x442   : > { %16403 = vst [vmem:[#allocation39_spill] sm:$0xff] %v15409_v39 }
 0x443   : > { %v15413_v42 = vpop.f32.mrf.mxu0  ;;  %v15415_v60 = vpop.f32.mrf.mxu1 }
 0x444   : > { %16404 = vst [vmem:[#allocation40_spill] sm:$0xff] %v15413_v42  ;;  %16405 = vst [vmem:[#allocation41_spill] sm:$0xff] %v15415_v60 }
 0x445   : > { %v15417_v46 = vpop.f32.mrf.mxu0  ;;  %v15419_v40 = vpop.f32.mrf.mxu1 }
 0x446   : > { %16406 = vst [vmem:[#allocation42_spill] sm:$0xff] %v15417_v46  ;;  %16407 = vst [vmem:[#allocation43_spill] sm:$0xff] %v15419_v40 }
 0x447   : > { %v15421_v63 = vpop.f32.mrf.mxu0  ;;  %v15423_v21 = vpop.f32.mrf.mxu1  ;;  %11237 = vmatmul.mubr.bf16.gmra.mxu1 %v15001_v3 }
 0x448   : > { %16408 = vst [vmem:[#allocation44_spill] sm:$0xff] %v15421_v63  ;;  %11240 = vmatprep.mubr.bf16.mxu1 %v15009_v41 }
 0x449   : > { %v15427_v7 = vpop.f32.mrf.mxu0  ;;  %v15429_v38 = vpop.f32.mrf.mxu1 }
 0x44a   : > { %16409 = vst [vmem:[#allocation45_spill] sm:$0xff] %v15427_v7 }
 0x44b   : > { %v15431_v39 = vpop.f32.mrf.mxu0  ;;  %v15433_v42 = vpop.f32.mrf.mxu1 }
 0x44c   : > { %16410 = vst [vmem:[#allocation46_spill] sm:$0xff] %v15431_v39  ;;  %16411 = vst [vmem:[#allocation47_spill] sm:$0xff] %v15433_v42 }
 0x44d   : > { %v15435_v60 = vpop.f32.mrf.mxu0  ;;  %v15437_v46 = vpop.f32.mrf.mxu1 }
 0x44e   : > { %16412 = vst [vmem:[#allocation48_spill] sm:$0xff] %v15435_v60  ;;  %16413 = vst [vmem:[#allocation49_spill] sm:$0xff] %v15437_v46 }
 0x44f   : > { %v15439_v40 = vpop.f32.mrf.mxu0  ;;  %v15441_v63 = vpop.f32.mrf.mxu1  ;;  %11241 = vmatmul.mubr.bf16.gmra.mxu1 %v15023_v53 }
 0x450   : > { %16414 = vst [vmem:[#allocation50_spill] sm:$0xff] %v15439_v40  ;;  %11244 = vmatprep.mubr.bf16.mxu1 %v15030_v55 }
 0x451   : > { %v15445_v3 = vpop.f32.mrf.mxu0  ;;  %v15447_v41 = vpop.f32.mrf.mxu1 }
 0x452   : > { %16415 = vst [vmem:[#allocation51_spill] sm:$0xff] %v15445_v3 }
 0x453   : > { %v15449_v7 = vpop.f32.mrf.mxu0  ;;  %v15451_v39 = vpop.f32.mrf.mxu1 }
 0x454   : > { %16416 = vst [vmem:[#allocation52_spill] sm:$0xff] %v15449_v7  ;;  %16417 = vst [vmem:[#allocation53_spill] sm:$0xff] %v15451_v39 }
 0x455   : > { %v15453_v42 = vpop.f32.mrf.mxu0  ;;  %v15455_v60 = vpop.f32.mrf.mxu1 }
 0x456   : > { %16418 = vst [vmem:[#allocation54_spill] sm:$0xff] %v15453_v42  ;;  %16419 = vst [vmem:[#allocation55_spill] sm:$0xff] %v15455_v60 }
 0x457   : > { %v15457_v46 = vpop.f32.mrf.mxu0  ;;  %v15459_v40 = vpop.f32.mrf.mxu1  ;;  %11245 = vmatmul.mubr.bf16.gmra.mxu1 %v15036_v10 }
 0x458   : > { %16420 = vst [vmem:[#allocation56_spill] sm:$0xff] %v15457_v46  ;;  %16421 = vst [vmem:[#allocation57_spill] sm:$0xff] %v15459_v40  ;;  %11248 = vmatprep.mubr.bf16.mxu1 %v15049_v22 }
 0x459   : > { %v15463_v53 = vpop.f32.mrf.mxu0  ;;  %v15465_v55 = vpop.f32.mrf.mxu1 }
 0x45a   : > { %16422 = vst [vmem:[#allocation58_spill] sm:$0xff] %v15463_v53 }
 0x45b   : > { %v15467_v3 = vpop.f32.mrf.mxu0  ;;  %v15469_v7 = vpop.f32.mrf.mxu1 }
 0x45c   : > { %16423 = vst [vmem:[#allocation59_spill] sm:$0xff] %v15467_v3  ;;  %16424 = vst [vmem:[#allocation60_spill] sm:$0xff] %v15469_v7 }
 0x45d   : > { %v15471_v39 = vpop.f32.mrf.mxu0  ;;  %v5603_v42 = vpop.f32.mrf.mxu1 }
 0x45e   : > { %16425 = vst [vmem:[#allocation61_spill] sm:$0xff] %v15471_v39  ;;  %v5604_v60 = vadd.f32 %v5603_v42, %v15314_v6 }
 0x45f   : > { %v15474_v46 = vpop.f32.mrf.mxu0  ;;  %v10962_v40 = vpop.f32.mrf.mxu1  ;;  %11249 = vmatmul.mubr.bf16.gmra.mxu1 %v15057_v8 }
 0x460   : > { %v5625_v10 = vadd.f32 %v10962_v40, %v15318_v62  ;;  %11252 = vmatprep.mubr.bf16.mxu1 %v15067_v28  ;;  %v15480_v22 = vadd.f32 %v15326_v1, %v5604_v60 }
 0x461   : > { %v15482_v3 = vpop.f32.mrf.mxu0  ;;  %v5616_v53 = vpop.f32.mrf.mxu1 }
 0x462   : > { %v5617_v39 = vadd.f32 %v5616_v53, %v15324_v24  ;;  %v15486_v7 = vadd.f32 %v15329_v35, %v5625_v10  ;;  %v5529_v10 = vadd.f32 %v15369_v13, %v15154_v59  ;;  %v5532_v59 = vadd.f32 %v15379_v19, %v15173_v44 }
 0x463   : > { %v15488_v6 = vpop.f32.mrf.mxu0  ;;  %v10963_v42 = vpop.f32.mrf.mxu1 }
 0x464   : > { %v5628_v8 = vadd.f32 %v10963_v42, %v15336_v9  ;;  %v15492_v40 = vadd.f32 %v15339_v52, %v5617_v39  ;;  %v5882_v19 = vadd.f32 %v15185_v57, %v5532_v59  ;;  %v5548_v57 = vadd.f32 %v15397_v37, %v15197_v29  ;;  %v16427_v37 = vld [vmem:[#allocation22_spill] sm:$0xff] }
 0x465   : > { %v15494_v28 = vpop.f32.mrf.mxu0  ;;  %v5619_v60 = vpop.f32.mrf.mxu1 }
 0x466   : > { %v5620_v62 = vadd.f32 %v5619_v60, %v15348_v14  ;;  %v15498_v1 = vadd.f32 %v15346_v26, %v5628_v8 }
 0x467   : > { %v15500_v24 = vpop.f32.mrf.mxu0  ;;  %v10966_v35 = vpop.f32.mrf.mxu1  ;;  %11253 = vmatmul.mubr.bf16.gmra.mxu1 %v15073_v23  ;;  %v5521_v23 = vadd.f32 %v15375_v45, %v15164_v18 }
 0x468   : > { %v5641_v53 = vadd.f32 %v10966_v35, %v15352_v34  ;;  %v15505_v9 = vadd.f32 %v15350_v36, %v5620_v62 }
 0x469   : > { %v15507_v52 = vpop.f32.mrf.mxu0  ;;  %v5632_v39 = vpop.f32.mrf.mxu1  ;;  %v5879_v45 = vadd.f32 %v15176_v48, %v5521_v23  ;;  %v5537_v48 = vadd.f32 %v15393_v16, %v15187_v0 }
 0x46a   : > { %v5633_v14 = vadd.f32 %v5632_v39, %v15357_v58  ;;  %v15513_v26 = vadd.f32 %v15354_v20, %v5641_v53  ;;  %v5881_v20 = vadd.f32 %v15171_v49, %v5529_v10  ;;  %v5545_v49 = vadd.f32 %v15387_v27, %v15183_v51 }
 0x46b   : > { %v15515_v42 = vpop.f32.mrf.mxu0  ;;  %v10967_v8 = vpop.f32.mrf.mxu1  ;;  %v5883_v16 = vadd.f32 %v15199_v2, %v5537_v48  ;;  %v16435_v48 = vld [vmem:[#allocation41_spill] sm:$0xff] }
 0x46c   : > { %v5644_v36 = vadd.f32 %v10967_v8, %v15361_v50  ;;  %v15521_v34 = vadd.f32 %v15359_v15, %v5633_v14  ;;  %v5524_v15 = vadd.f32 %v15383_v5, %v15179_v43 }
 0x46d   : > { %v15523_v60 = vpop.f32.mrf.mxu0  ;;  %v5635_v62 = vpop.f32.mrf.mxu1 }
 0x46e   : > { %v5636_v58 = vadd.f32 %v5635_v62, %v15365_v17  ;;  %v15530_v13 = vadd.f32 %v15363_v4, %v5644_v36  ;;  %v5880_v5 = vadd.f32 %v15190_v61, %v5524_v15  ;;  %v5540_v61 = vadd.f32 %v15401_v12, %v15201_v25  ;;  %v16430_v12 = vld [vmem:[#allocation18_spill] sm:$0xff] }
 0x46f   : > { %v15532_v35 = vpop.f32.mrf.mxu0  ;;  %v11034_v18 = vpop.f32.mrf.mxu1  ;;  %v5553_v2 = vadd.f32 %v15411_v30, %v16430_v12  ;;  %v16445_v12 = vld [vmem:[#allocation5_spill] sm:$0xff] }
 0x470   : > { %v6641_v50 = vadd.f32 %v11034_v18, %v5881_v20  ;;  %v15538_v53 = vadd.f32 %v15367_v33, %v5636_v58  ;;  %v16428_v58 = vld [vmem:[#allocation13_spill] sm:$0xff]  ;;  %v16429_v18 = vld [vmem:[#allocation35_spill] sm:$0xff] }
 0x471   : > { %v15540_v44 = vpop.f32.mrf.mxu0  ;;  %v6512_v17 = vpop.f32.mrf.mxu1  ;;  %v5886_v20 = vadd.f32 %v16428_v58, %v5548_v57  ;;  %v16443_v58 = vld [vmem:[#allocation38_spill] sm:$0xff] }
 0x472   : > { %v6639_v4 = vadd.f32 %v6512_v17, %v5879_v45  ;;  %v15546_v39 = vadd.f32 %v15373_v32, %v6641_v50  ;;  %v5885_v32 = vadd.f32 %v15194_v47, %v5545_v49  ;;  %v5561_v47 = vadd.f32 %v15405_v11, %v16427_v37  ;;  %v16431_v45 = vld [vmem:[#allocation19_spill] sm:$0xff]  ;;  %v16432_v49 = vld [vmem:[#allocation36_spill] sm:$0xff]  ;;  %v16442_v37 = vld [vmem:[#allocation17_spill] sm:$0xff] }
 0x473   : > { %v15548_v10 = vpop.f32.mrf.mxu0  ;;  %v11035_v43 = vpop.f32.mrf.mxu1  ;;  %v5884_v17 = vadd.f32 %v16431_v45, %v5540_v61  ;;  %v16441_v61 = vld [vmem:[#allocation43_spill] sm:$0xff]  ;;  %v16446_v45 = vld [vmem:[#allocation6_spill] sm:$0xff] }
 0x474   : > { %v6642_v33 = vadd.f32 %v11035_v43, %v5882_v19  ;;  %v15554_v14 = vadd.f32 %v15377_v54, %v6639_v4  ;;  %v16434_v43 = vld [vmem:[#allocation16_spill] sm:$0xff] }
 0x475   : > { %v15556_v8 = vpop.f32.mrf.mxu0  ;;  %v6515_v51 = vpop.f32.mrf.mxu1 }
 0x476   : > { %v6640_v27 = vadd.f32 %v6515_v51, %v5880_v5  ;;  %v15562_v23 = vadd.f32 %v15381_v31, %v6642_v33  ;;  %v5564_v33 = vadd.f32 %v16435_v48, %v16434_v43  ;;  %v16436_v51 = vld [vmem:[#allocation4_spill] sm:$0xff] }
 0x477   : > { %v15564_v36 = vpop.f32.mrf.mxu0  ;;  %v11038_v0 = vpop.f32.mrf.mxu1  ;;  %v5889_v57 = vadd.f32 %v16436_v51, %v5561_v47  ;;  %v5577_v47 = vadd.f32 %v15423_v21, %v16445_v12  ;;  %v16448_v51 = vld [vmem:[#allocation3_spill] sm:$0xff]  ;;  %v16455_v12 = vld [vmem:[#allocation42_spill] sm:$0xff] }
 0x478   : > { %16426 = vst [vmem:[#allocation62_spill] sm:$0xff] %v15564_v36  ;;  %v6645_v54 = vadd.f32 %v11038_v0, %v5885_v32  ;;  %v15570_v62 = vadd.f32 %v15385_v56, %v6640_v27  ;;  %v16437_v27 = vld [vmem:[#allocation37_spill] sm:$0xff] }
 0x479   : > { %v15572_v59 = vpop.f32.mrf.mxu0  ;;  %v6528_v29 = vpop.f32.mrf.mxu1 }
 0x47a   : > { %v6643_v31 = vadd.f32 %v6528_v29, %v5883_v16  ;;  %v15578_v15 = vadd.f32 %v16429_v18, %v6645_v54  ;;  %v16440_v54 = vld [vmem:[#allocation11_spill] sm:$0xff] }
 0x47b   : > { %v15580_v50 = vpop.f32.mrf.mxu0  ;;  %v11039_v25 = vpop.f32.mrf.mxu1  ;;  %v5556_v16 = vadd.f32 %v16441_v61, %v16440_v54 }
 0x47c   : > { %v6646_v56 = vadd.f32 %v11039_v25, %v5886_v20  ;;  %v15586_v4 = vadd.f32 %v16432_v49, %v6643_v31  ;;  %v5887_v31 = vadd.f32 %v16442_v37, %v5553_v2  ;;  %v16447_v49 = vld [vmem:[#allocation39_spill] sm:$0xff]  ;;  %v5569_v2 = vadd.f32 %v15429_v38, %v16448_v51  ;;  %v16460_v51 = vld [vmem:[#allocation8_spill] sm:$0xff] }
 0x47d   : > { %v15588_v19 = vpop.f32.mrf.mxu0  ;;  %v6531_v11 = vpop.f32.mrf.mxu1  ;;  %v16452_v37 = vld [vmem:[#allocation7_spill] sm:$0xff] }
 0x47e   : > { %16433 = vst [vmem:[#allocation22_spill] sm:$0xff] %v15588_v19  ;;  %v6644_v5 = vadd.f32 %v6531_v11, %v5884_v17  ;;  %v15594_v32 = vadd.f32 %v16437_v27, %v6646_v56  ;;  %v5890_v17 = vadd.f32 %v16446_v45, %v5564_v33  ;;  %v16453_v33 = vld [vmem:[#allocation47_spill] sm:$0xff] }
 0x47f   : > { %v15596_v0 = vpop.f32.mrf.mxu0  ;;  %v11042_v30 = vpop.f32.mrf.mxu1 }
 0x480   : > { %16438 = vst [vmem:[#allocation13_spill] sm:$0xff] %v15594_v32  ;;  %16439 = vst [vmem:[#allocation35_spill] sm:$0xff] %v15596_v0  ;;  %v6649_v29 = vadd.f32 %v11042_v30, %v5889_v57  ;;  %v15602_v20 = vadd.f32 %v16443_v58, %v6644_v5  ;;  %v16449_v57 = vld [vmem:[#allocation21_spill] sm:$0xff]  ;;  %v16450_v30 = vld [vmem:[#allocation40_spill] sm:$0xff] }
 0x481   : > { %v15604_v18 = vpop.f32.mrf.mxu0  ;;  %v6544_v25 = vpop.f32.mrf.mxu1  ;;  %v5888_v27 = vadd.f32 %v16449_v57, %v5556_v16  ;;  %v16454_v58 = vld [vmem:[#allocation23_spill] sm:$0xff]  ;;  %v16459_v16 = vld [vmem:[#allocation49_spill] sm:$0xff]  ;;  %v5891_v57 = vadd.f32 %v16460_v51, %v5569_v2  ;;  %v16468_v51 = vld [vmem:[#allocation46_spill] sm:$0xff] }
 0x482   : > { %16444 = vst [vmem:[#allocation18_spill] sm:$0xff] %v15602_v20  ;;  %v6647_v56 = vadd.f32 %v6544_v25, %v5887_v31  ;;  %v15610_v11 = vadd.f32 %v16447_v49, %v6649_v29  ;;  %v5580_v31 = vadd.f32 %v16453_v33, %v16452_v37  ;;  %v5893_v25 = vadd.f32 %v16454_v58, %v5577_v47  ;;  %v16464_v37 = vld [vmem:[#allocation10_spill] sm:$0xff]  ;;  %v16465_v58 = vld [vmem:[#allocation45_spill] sm:$0xff] }
 0x483   : > { %v15612_v43 = vpop.f32.mrf.mxu0  ;;  %v11043_v48 = vpop.f32.mrf.mxu1 }
 0x484   : > { %v6650_v5 = vadd.f32 %v11043_v48, %v5890_v17  ;;  %v15618_v54 = vadd.f32 %v16450_v30, %v6647_v56  ;;  %v16458_v17 = vld [vmem:[#allocation24_spill] sm:$0xff]  ;;  %v5894_v33 = vadd.f32 %v16464_v37, %v5580_v31  ;;  %v16471_v31 = vld [vmem:[#allocation53_spill] sm:$0xff] }
 0x485   : > { %v15620_v61 = vpop.f32.mrf.mxu0  ;;  %v6547_v21 = vpop.f32.mrf.mxu1  ;;  %v5572_v48 = vadd.f32 %v16459_v16, %v16458_v17  ;;  %v16461_v30 = vld [vmem:[#allocation44_spill] sm:$0xff] }
 0x486   : > { %16451 = vst [vmem:[#allocation19_spill] sm:$0xff] %v15620_v61  ;;  %v6648_v29 = vadd.f32 %v6547_v21, %v5888_v27  ;;  %v15626_v45 = vadd.f32 %v16455_v12, %v6650_v5  ;;  %v16463_v21 = vld [vmem:[#allocation9_spill] sm:$0xff]  ;;  %v16467_v17 = vld [vmem:[#allocation12_spill] sm:$0xff] }
 0x487   : > { %v15628_v49 = vpop.f32.mrf.mxu0  ;;  %v11046_v38 = vpop.f32.mrf.mxu1  ;;  %v5593_v47 = vadd.f32 %v15441_v63, %v16463_v21  ;;  %v5892_v16 = vadd.f32 %v16467_v17, %v5572_v48  ;;  %v16472_v21 = vld [vmem:[#allocation26_spill] sm:$0xff]  ;;  %v16477_v48 = vld [vmem:[#allocation55_spill] sm:$0xff] }
 0x488   : > { %16456 = vst [vmem:[#allocation36_spill] sm:$0xff] %v15626_v45  ;;  %16457 = vst [vmem:[#allocation16_spill] sm:$0xff] %v15628_v49  ;;  %v6653_v56 = vadd.f32 %v11046_v38, %v5893_v25  ;;  %v15634_v61 = vadd.f32 %v16461_v30, %v6648_v29  ;;  %v16466_v38 = vld [vmem:[#allocation25_spill] sm:$0xff] }
 0x489   : > { %v15636_v0 = vpop.f32.mrf.mxu0  ;;  %v6560_v27 = vpop.f32.mrf.mxu1  ;;  %v5585_v2 = vadd.f32 %v15447_v41, %v16466_v38  ;;  %v5897_v37 = vadd.f32 %v16472_v21, %v5593_v47  ;;  %v16478_v38 = vld [vmem:[#allocation15_spill] sm:$0xff]  ;;  %v16482_v47 = vld [vmem:[#allocation57_spill] sm:$0xff] }
 0x48a   : > { %16462 = vst [vmem:[#allocation41_spill] sm:$0xff] %v15634_v61  ;;  %v6651_v5 = vadd.f32 %v6560_v27, %v5891_v57  ;;  %v15642_v12 = vadd.f32 %v16465_v58, %v6653_v56  ;;  %v16470_v57 = vld [vmem:[#allocation14_spill] sm:$0xff]  ;;  %v16473_v58 = vld [vmem:[#allocation48_spill] sm:$0xff] }
 0x48b   : > { %v15644_v49 = vpop.f32.mrf.mxu0  ;;  %v11047_v25 = vpop.f32.mrf.mxu1  ;;  %v5596_v27 = vadd.f32 %v16471_v31, %v16470_v57  ;;  %v5895_v17 = vadd.f32 %v16478_v38, %v5585_v2  ;;  %v16483_v31 = vld [vmem:[#allocation28_spill] sm:$0xff] }
 0x48c   : > { %v6654_v29 = vadd.f32 %v11047_v25, %v5894_v33  ;;  %v15650_v30 = vadd.f32 %v16468_v51, %v6651_v5  ;;  %v16476_v33 = vld [vmem:[#allocation20_spill] sm:$0xff]  ;;  %v16479_v51 = vld [vmem:[#allocation50_spill] sm:$0xff] }
 0x48d   : > { %v15652_v61 = vpop.f32.mrf.mxu0  ;;  %v6563_v63 = vpop.f32.mrf.mxu1  ;;  %v5588_v25 = vadd.f32 %v16477_v48, %v16476_v33  ;;  %v5898_v21 = vadd.f32 %v16483_v31, %v5596_v27  ;;  %v16486_v33 = vld [vmem:[#allocation30_spill] sm:$0xff]  ;;  %v16487_v38 = vld [vmem:[#allocation52_spill] sm:$0xff] }
 0x48e   : > { %16469 = vst [vmem:[#allocation4_spill] sm:$0xff] %v15652_v61  ;;  %v6652_v56 = vadd.f32 %v6563_v63, %v5892_v16  ;;  %v15658_v45 = vadd.f32 %v16473_v58, %v6654_v29  ;;  %v16481_v63 = vld [vmem:[#allocation27_spill] sm:$0xff]  ;;  %v16490_v27 = vld [vmem:[#allocation60_spill] sm:$0xff] }
 0x48f   : > { %v15660_v19 = vpop.f32.mrf.mxu0  ;;  %v11050_v41 = vpop.f32.mrf.mxu1  ;;  %v5609_v57 = vadd.f32 %v16482_v47, %v16481_v63  ;;  %v16484_v58 = vld [vmem:[#allocation51_spill] sm:$0xff]  ;;  %v5896_v48 = vadd.f32 %v16486_v33, %v5588_v25  ;;  %v16493_v25 = vld [vmem:[#allocation33_spill] sm:$0xff] }
 0x490   : > { %16474 = vst [vmem:[#allocation37_spill] sm:$0xff] %v15658_v45  ;;  %16475 = vst [vmem:[#allocation11_spill] sm:$0xff] %v15660_v19  ;;  %v6657_v5 = vadd.f32 %v11050_v41, %v5897_v37  ;;  %v15666_v61 = vadd.f32 %v16479_v51, %v6652_v56  ;;  %v16485_v41 = vld [vmem:[#allocation29_spill] sm:$0xff]  ;;  %v16491_v47 = vld [vmem:[#allocation31_spill] sm:$0xff] }
 0x491   : > { %v15668_v20 = vpop.f32.mrf.mxu0  ;;  %v6576_v16 = vpop.f32.mrf.mxu1  ;;  %v5601_v2 = vadd.f32 %v15465_v55, %v16485_v41  ;;  %v5901_v31 = vadd.f32 %v16491_v47, %v5609_v57 }
 0x492   : > { %16480 = vst [vmem:[#allocation43_spill] sm:$0xff] %v15666_v61  ;;  %v6655_v29 = vadd.f32 %v6576_v16, %v5895_v17  ;;  %v15674_v19 = vadd.f32 %v16484_v58, %v6657_v5  ;;  %v16489_v16 = vld [vmem:[#allocation32_spill] sm:$0xff]  ;;  %v16492_v58 = vld [vmem:[#allocation54_spill] sm:$0xff] }
 0x493   : > { %v15676_v45 = vpop.f32.mrf.mxu0  ;;  %v11051_v37 = vpop.f32.mrf.mxu1  ;;  %v5612_v63 = vadd.f32 %v16490_v27, %v16489_v16  ;;  %v16495_v16 = vld [vmem:[#allocation34_spill] sm:$0xff] }
 0x494   : > { %v6658_v56 = vadd.f32 %v11051_v37, %v5898_v21  ;;  %v15682_v51 = vadd.f32 %v16487_v38, %v6655_v29  ;;  %v5899_v37 = vadd.f32 %v16493_v25, %v5601_v2  ;;  %v16494_v29 = vld [vmem:[#allocation56_spill] sm:$0xff]  ;;  %v16498_v25 = vld [vmem:[#allocation61_spill] sm:$0xff] }
 0x495   : > { %v15684_v61 = vpop.f32.mrf.mxu0  ;;  %v6579_v17 = vpop.f32.mrf.mxu1 }
 0x496   : > { %16488 = vst [vmem:[#allocation17_spill] sm:$0xff] %v15684_v61  ;;  %v6656_v5 = vadd.f32 %v6579_v17, %v5896_v48  ;;  %v15690_v32 = vadd.f32 %v16492_v58, %v6658_v56  ;;  %v5902_v48 = vadd.f32 %v16495_v16, %v5612_v63  ;;  %v16496_v17 = vld [vmem:[#allocation58_spill] sm:$0xff]  ;;  %v16497_v58 = vld [vmem:[#allocation59_spill] sm:$0xff] }
 0x497   : > { %v15692_v36 = vpop.f32.mrf.mxu0  ;;  %v11054_v55 = vpop.f32.mrf.mxu1 }
 0x498   : > { %v6661_v21 = vadd.f32 %v11054_v55, %v5901_v31  ;;  %v15696_v41 = vadd.f32 %v16494_v29, %v6656_v5 }
 0x499   : > { %v15698_v33 = vpop.f32.mrf.mxu0  ;;  %v6592_v38 = vpop.f32.mrf.mxu1 }
 0x49a   : > { %v6659_v61 = vadd.f32 %v6592_v38, %v5899_v37  ;;  %v15702_v57 = vadd.f32 %v16496_v17, %v6661_v21 }
 0x49b   : > { %v15704_v56 = vpop.f32.mrf.mxu0  ;;  %v11055_v27 = vpop.f32.mrf.mxu1 }
 0x49c   : > { %v6662_v47 = vadd.f32 %v11055_v27, %v5902_v48  ;;  %v15707_v31 = vadd.f32 %v16497_v58, %v6659_v61 }
 0x49d   : > { %v15709_v2 = vpop.f32.mrf.mxu0  ;;  %v6595_v5 = vpop.f32.mrf.mxu1 }
 0x49e   : > { %v6660_v55 = vadd.f32 %v6595_v5, %v15480_v22  ;;  %v15713_v29 = vadd.f32 %v16498_v25, %v6662_v47 }
 0x49f   : > { %v15715_v37 = vpop.f32.mrf.mxu0  ;;  %v11058_v63 = vpop.f32.mrf.mxu1 }
 0x4a0   : > { %16499 = vst [vmem:[#allocation38_spill] sm:$0xff] %v15715_v37  ;;  %v6665_v21 = vadd.f32 %v11058_v63, %v15486_v7  ;;  %v15719_v38 = vadd.f32 %v15474_v46, %v6660_v55 }
 0x4a1   : > { %v15721_v16 = vpop.f32.mrf.mxu0  ;;  %v6608_v61 = vpop.f32.mrf.mxu1 }
 0x4a2   : > { %v6663_v48 = vadd.f32 %v6608_v61, %v15492_v40  ;;  %v15725_v17 = vadd.f32 %v15482_v3, %v6665_v21 }
 0x4a3   : > { %v15727_v22 = vpop.f32.mrf.mxu0  ;;  %v11059_v27 = vpop.f32.mrf.mxu1 }
 0x4a4   : > { %v6666_v47 = vadd.f32 %v11059_v27, %v15498_v1  ;;  %v15731_v58 = vadd.f32 %v15488_v6, %v6663_v48 }
 0x4a5   : > { %v15733_v7 = vpop.f32.mrf.mxu0  ;;  %v6611_v46 = vpop.f32.mrf.mxu1 }
 0x4a6   : > { %16500 = vst [vmem:[#allocation5_spill] sm:$0xff] %v15733_v7  ;;  %v6664_v5 = vadd.f32 %v6611_v46, %v15505_v9  ;;  %v15737_v55 = vadd.f32 %v15494_v28, %v6666_v47 }
 0x4a7   : > { %v15739_v40 = vpop.f32.mrf.mxu0  ;;  %v11062_v3 = vpop.f32.mrf.mxu1 }
 0x4a8   : > { %16501 = vst [vmem:[#allocation6_spill] sm:$0xff] %v15737_v55  ;;  %16502 = vst [vmem:[#allocation39_spill] sm:$0xff] %v15739_v40  ;;  %v6669_v25 = vadd.f32 %v11062_v3, %v15513_v26  ;;  %v15743_v63 = vadd.f32 %v15500_v24, %v6664_v5 }
 0x4a9   : > { %v15745_v1 = vpop.f32.mrf.mxu0  ;;  %v6624_v6 = vpop.f32.mrf.mxu1 }
 0x4aa   : > { %16503 = vst [vmem:[#allocation3_spill] sm:$0xff] %v15743_v63  ;;  %v6667_v21 = vadd.f32 %v6624_v6, %v15521_v34  ;;  %v15749_v61 = vadd.f32 %v15507_v52, %v6669_v25 }
 0x4ab   : > { %v15751_v9 = vpop.f32.mrf.mxu0  ;;  %v11063_v28 = vpop.f32.mrf.mxu1 }
 0x4ac   : > { %v6670_v48 = vadd.f32 %v11063_v28, %v15530_v13  ;;  %v15755_v27 = vadd.f32 %v15515_v42, %v6667_v21 }
 0x4ad   : > { %v6627_v26 = vpop.f32.mrf.mxu1  ;;  %v15757_v47 = vpop.f32.mrf.mxu0 }
 0x4ae   : > { %16504 = vst [vmem:[#allocation21_spill] sm:$0xff] %v15757_v47  ;;  %v6668_v24 = vadd.f32 %v6627_v26, %v15538_v53  ;;  %v15761_v46 = vadd.f32 %v15523_v60, %v6670_v48 }
 0x4af   : > { %v11130_v34 = vpop.f32.mrf.mxu1  ;;  %v15767_v25 = vpop.f32.mrf.mxu0 }
 0x4b0   : > { %16505 = vst [vmem:[#allocation40_spill] sm:$0xff] %v15761_v46  ;;  %v7213_v52 = vadd.f32 %v11130_v34, %v15546_v39  ;;  %v15765_v5 = vadd.f32 %v15532_v35, %v6668_v24  ;;  %16507 = vst [vmem:[#allocation47_spill] sm:$0xff] %v15767_v25 }
 0x4b1   : > { %v7084_v3 = vpop.f32.mrf.mxu1  ;;  %v15780_v21 = vpop.f32.mrf.mxu0 }
 0x4b2   : > { %16506 = vst [vmem:[#allocation7_spill] sm:$0xff] %v15765_v5  ;;  %v7211_v42 = vadd.f32 %v7084_v3, %v15554_v14  ;;  %v15771_v13 = vadd.f32 %v15540_v44, %v7213_v52 }
 0x4b3   : > { %v15773_v6 = vpop.f32.mrf.mxu1  ;;  %v15783_v48 = vpop.f32.mrf.mxu0 }
 0x4b4   : > { %v15776_v53 = vadd.f32 %v15548_v10, %v7211_v42 }
 0x4b5   : > { %v15778_v60 = vpop.f32.mrf.mxu1  ;;  %v15796_v34 = vpop.f32.mrf.mxu0 }
 0x4b7   : > { %v11134_v39 = vpop.f32.mrf.mxu1  ;;  %v15799_v42 = vpop.f32.mrf.mxu0 }
 0x4b8   : > { %v7217_v35 = vadd.f32 %v11134_v39, %v15578_v15 }
 0x4b9   : > { %v7100_v28 = vpop.f32.mrf.mxu1 }
 0x4ba   : > { %v7215_v14 = vadd.f32 %v7100_v28, %v15586_v4  ;;  %v15787_v44 = vadd.f32 %v15572_v59, %v7217_v35  ;;  %v15812_v28 = vpop.f32.mrf.mxu0 }
 0x4bb   : > { %v15789_v26 = vpop.f32.mrf.mxu1 }
 0x4bc   : > { %v15792_v10 = vadd.f32 %v15580_v50, %v7215_v14  ;;  %v15815_v25 = vpop.f32.mrf.mxu0 }
 0x4bd   : > { %v15794_v24 = vpop.f32.mrf.mxu1 }
 0x4bf   : > { %v11138_v52 = vpop.f32.mrf.mxu1 }
 0x4c0   : > { %v7221_v15 = vadd.f32 %v11138_v52, %v15610_v11 }
 0x4c1   : > { %v7116_v3 = vpop.f32.mrf.mxu1 }
 0x4c2   : > { %v7219_v4 = vadd.f32 %v7116_v3, %v15618_v54  ;;  %v15803_v59 = vadd.f32 %v15604_v18, %v7221_v15 }
 0x4c3   : > { %v15805_v39 = vpop.f32.mrf.mxu1 }
 0x4c4   : > { %v15808_v50 = vadd.f32 %v15612_v43, %v7219_v4  ;;  %v15828_v4 = vpop.f32.mrf.mxu0 }
 0x4c5   : > { %v15810_v35 = vpop.f32.mrf.mxu1 }
 0x4c6   : > { %v15831_v5 = vpop.f32.mrf.mxu0 }
 0x4c7   : > { %v11142_v14 = vpop.f32.mrf.mxu1 }
 0x4c8   : > { %v7225_v11 = vadd.f32 %v11142_v14, %v15642_v12 }
 0x4c9   : > { %v7132_v52 = vpop.f32.mrf.mxu1 }
 0x4ca   : > { %v7223_v54 = vadd.f32 %v7132_v52, %v15650_v30  ;;  %v15819_v18 = vadd.f32 %v15636_v0, %v7225_v11 }
 0x4cb   : > { %v15821_v15 = vpop.f32.mrf.mxu1 }
 0x4cc   : > { %v15824_v43 = vadd.f32 %v15644_v49, %v7223_v54  ;;  %v15844_v54 = vpop.f32.mrf.mxu0 }
 0x4cd   : > { %v15826_v3 = vpop.f32.mrf.mxu1 }
 0x4ce   : > { %v15847_v40 = vpop.f32.mrf.mxu0 }
 0x4cf   : > { %v11146_v47 = vpop.f32.mrf.mxu1 }
 0x4d0   : > { %v7229_v12 = vadd.f32 %v11146_v47, %v15674_v19 }
 0x4d1   : > { %v7148_v14 = vpop.f32.mrf.mxu1 }
 0x4d2   : > { %v7227_v30 = vadd.f32 %v7148_v14, %v15682_v51  ;;  %v15835_v0 = vadd.f32 %v15668_v20, %v7229_v12 }
 0x4d3   : > { %v15837_v11 = vpop.f32.mrf.mxu1 }
 0x4d4   : > { %v15840_v49 = vadd.f32 %v15676_v45, %v7227_v30  ;;  %v15860_v30 = vpop.f32.mrf.mxu0 }
 0x4d5   : > { %v15842_v52 = vpop.f32.mrf.mxu1 }
 0x4d6   : > { %v15863_v63 = vpop.f32.mrf.mxu0 }
 0x4d7   : > { %v11150_v46 = vpop.f32.mrf.mxu1 }
 0x4d8   : > { %v7233_v19 = vadd.f32 %v11150_v46, %v15702_v57 }
 0x4d9   : > { %v7164_v47 = vpop.f32.mrf.mxu1 }
 0x4da   : > { %v7231_v51 = vadd.f32 %v7164_v47, %v15707_v31  ;;  %v15851_v20 = vadd.f32 %v15698_v33, %v7233_v19 }
 0x4db   : > { %v15853_v12 = vpop.f32.mrf.mxu1 }
 0x4dc   : > { %v15856_v45 = vadd.f32 %v15704_v56, %v7231_v51  ;;  %v15876_v51 = vpop.f32.mrf.mxu0 }
 0x4dd   : > { %v15858_v14 = vpop.f32.mrf.mxu1 }
 0x4de   : > { %v15879_v55 = vpop.f32.mrf.mxu0 }
 0x4df   : > { %v11154_v7 = vpop.f32.mrf.mxu1 }
 0x4e0   : > { %v7237_v57 = vadd.f32 %v11154_v7, %v15725_v17 }
 0x4e1   : > { %v7180_v46 = vpop.f32.mrf.mxu1 }
 0x4e2   : > { %v7235_v31 = vadd.f32 %v7180_v46, %v15731_v58  ;;  %v15867_v33 = vadd.f32 %v15721_v16, %v7237_v57 }
 0x4e3   : > { %v15869_v19 = vpop.f32.mrf.mxu1 }
 0x4e4   : > { %v15872_v56 = vadd.f32 %v15727_v22, %v7235_v31  ;;  %v7214_v31 = vadd.f32 %v15773_v6, %v15562_v23 }
 0x4e5   : > { %v15874_v47 = vpop.f32.mrf.mxu1 }
 0x4e6   : > { %16508 = vst [vmem:[#allocation23_spill] sm:$0xff] %v15872_v56  ;;  %v15894_v56 = vpop.f32.mrf.mxu0  ;;  %v7714_v6 = vadd.f32 %v15556_v8, %v7214_v31 }
 0x4e7   : > { %v11158_v37 = vpop.f32.mrf.mxu1 }
 0x4e8   : > { %v7241_v17 = vadd.f32 %v11158_v37, %v15749_v61  ;;  %v7212_v61 = vadd.f32 %v15778_v60, %v15570_v62  ;;  %v15913_v62 = vld [vmem:[%s16105_s6] ss:$0 sm:$0xff] }
 0x4e9   : > { %v7196_v7 = vpop.f32.mrf.mxu1 }
 0x4ea   : > { %v7239_v58 = vadd.f32 %v7196_v7, %v15755_v27  ;;  %v15883_v16 = vadd.f32 %v15745_v1, %v7241_v17  ;;  %v15902_v1 = vld [vmem:[%s16104_s5] ss:$0 sm:$0xff]  ;;  %v15904_v17 = vpop.f32.mrf.mxu0 }
 0x4eb   : > { %v15885_v57 = vpop.f32.mrf.mxu1 }
 0x4ec   : > { %16509 = vst [vmem:[#allocation42_spill] sm:$0xff] %v15883_v16  ;;  %16510 = vst [vmem:[#allocation24_spill] sm:$0xff] %v15885_v57  ;;  %v15888_v22 = vadd.f32 %v15751_v9, %v7239_v58 }
 0x4ed   : > { %v15890_v46 = vpop.f32.mrf.mxu1 }
 0x4ee   : > { %16511 = vst [vmem:[#allocation49_spill] sm:$0xff] %v15888_v22  ;;  %16512 = vst [vmem:[#allocation8_spill] sm:$0xff] %v15890_v46 }
 0x4ef   : > { %v11226_v37 = vpop.f32.mrf.mxu1 }
 0x4f0   : > { %v7985_v27 = vadd.f32 %v11226_v37, %v15771_v13  ;;  %v16513_v37 = vld [vmem:[#allocation62_spill] sm:$0xff] }
 0x4f1   : > { %v7856_v9 = vpop.f32.mrf.mxu1  ;;  %v7712_v46 = vadd.f32 %v16513_v37, %v7212_v61  ;;  %v16515_v61 = vld [vmem:[#allocation18_spill] sm:$0xff] }
 0x4f2   : > { %v8257_v7 = vadd.f32 %v15780_v21, %v7985_v27  ;;  %v7983_v23 = vadd.f32 %v7856_v9, %v15776_v53  ;;  %v16514_v21 = vld [vmem:[#allocation13_spill] sm:$0xff]  ;;  %v15919_v27 = vpop.f32.mrf.mxu0 }
 0x4f3   : > { %v11227_v58 = vpop.f32.mrf.mxu1  ;;  %v7218_v53 = vadd.f32 %v15789_v26, %v16514_v21 }
 0x4f4   : > { %v8296_v22 = vmul.f32 %v15902_v1, %v8257_v7  ;;  %v8255_v13 = vadd.f32 %v15783_v48, %v7983_v23  ;;  %v7986_v60 = vadd.f32 %v11227_v58, %v7714_v6  ;;  %v7216_v6 = vadd.f32 %v15794_v24, %v16515_v61  ;;  %v15930_v21 = vpop.f32.mrf.mxu0 }
 0x4f5   : > { %v7859_v16 = vpop.f32.mrf.mxu1 }
 0x4f6   : > { %v8294_v8 = vmul.f32 %v15902_v1, %v8255_v13  ;;  %v8258_v31 = vadd.f32 %v15796_v34, %v7986_v60  ;;  %v7984_v9 = vadd.f32 %v7859_v16, %v7712_v46  ;;  %v8335_v7 = vadd.f32 %v15913_v62, %v8296_v22  ;;  %v16516_v46 = vld [vmem:[#allocation22_spill] sm:$0xff] }
 0x4f7   : > { %v11230_v57 = vpop.f32.mrf.mxu1  ;;  %v7718_v13 = vadd.f32 %v16516_v46, %v7218_v53 }
 0x4f8   : > { %v8297_v48 = vmul.f32 %v15902_v1, %v8258_v31  ;;  %v8256_v23 = vadd.f32 %v15799_v42, %v7984_v9  ;;  %v8333_v58 = vadd.f32 %v15913_v62, %v8294_v8  ;;  %v7989_v26 = vadd.f32 %v11230_v57, %v15787_v44  ;;  %v16517_v9 = vld [vmem:[#allocation36_spill] sm:$0xff] }
 0x4f9   : > { %v7872_v37 = vpop.f32.mrf.mxu1  ;;  %v8367_v42 = vmax.f32 %v8335_v7, 0.0  ;;  %v7222_v61 = vadd.f32 %v15805_v39, %v16517_v9 }
 0x4fa   : > { %v8336_v34 = vadd.f32 %v15913_v62, %v8297_v48  ;;  %v8295_v16 = vmul.f32 %v15902_v1, %v8256_v23  ;;  %v7987_v22 = vadd.f32 %v7872_v37, %v15792_v10  ;;  %v8261_v60 = vadd.f32 %v15812_v28, %v7989_v26  ;;  %v16518_v28 = vld [vmem:[#allocation35_spill] sm:$0xff]  ;;  %v15949_v23 = vpop.f32.mrf.mxu0 }
 0x4fb   : > { %v11231_v24 = vpop.f32.mrf.mxu1  ;;  %v8365_v48 = vmax.f32 %v8333_v58, 0.0  ;;  %v7716_v53 = vadd.f32 %v16518_v28, %v7216_v6 }
 0x4fc   : > { %v8368_v31 = vmax.f32 %v8336_v34, 0.0  ;;  %v8334_v8 = vadd.f32 %v15913_v62, %v8295_v16  ;;  %v8259_v44 = vadd.f32 %v15815_v25, %v7987_v22  ;;  %v7990_v57 = vadd.f32 %v11231_v24, %v7718_v13  ;;  %v16519_v13 = vld [vmem:[#allocation41_spill] sm:$0xff] }
 0x4fd   : > { %v8300_v10 = vmul.f32 %v15902_v1, %v8261_v60  ;;  %v7875_v7 = vpop.f32.mrf.mxu1  ;;  %v7220_v60 = vadd.f32 %v15810_v35, %v16519_v13 }
 0x4fe   : > { %v9561_v26 = vpack.c.bf16 %v8368_v31, %v8367_v42  ;;  %v8366_v25 = vmax.f32 %v8334_v8, 0.0  ;;  %v8298_v37 = vmul.f32 %v15902_v1, %v8259_v44  ;;  %v8262_v39 = vadd.f32 %v15828_v4, %v7990_v57  ;;  %v16520_v31 = vld [vmem:[#allocation19_spill] sm:$0xff]  ;;  %v15961_v44 = vpop.f32.mrf.mxu0 }
 0x4ff   : > { %v8339_v58 = vadd.f32 %v15913_v62, %v8300_v10  ;;  %v7988_v34 = vadd.f32 %v7875_v7, %v7716_v53  ;;  %v11234_v16 = vpop.f32.mrf.mxu1  ;;  %v7722_v8 = vadd.f32 %v16520_v31, %v7222_v61 }
 0x500   : > { %9633 = vst [vmem:[%s15945_s9 + $0x8] sm:$0xff] %v9561_v26   ;;  %v9556_v22 = vpack.c.bf16 %v8366_v25, %v8365_v48  ;;  %v8301_v46 = vmul.f32 %v15902_v1, %v8262_v39  ;;  %v7993_v6 = vadd.f32 %v11234_v16, %v15803_v59  ;;  %v8337_v4 = vadd.f32 %v15913_v62, %v8298_v37  ;;  %v16521_v26 = vld [vmem:[#allocation16_spill] sm:$0xff]  ;;  %v16522_v39 = vld [vmem:[#allocation37_spill] sm:$0xff] }
 0x501   : > { %v8260_v42 = vadd.f32 %v15831_v5, %v7988_v34  ;;  %v7888_v24 = vpop.f32.mrf.mxu1  ;;  %v8371_v59 = vmax.f32 %v8339_v58, 0.0  ;;  %v7720_v25 = vadd.f32 %v16521_v26, %v7220_v60 }
 0x502   : > { %9557 = vst [vmem:[%s15945_s9] sm:$0xff] %v9556_v22   ;;  %v8340_v57 = vadd.f32 %v15913_v62, %v8301_v46  ;;  %v8265_v9 = vadd.f32 %v15844_v54, %v7993_v6  ;;  %v7991_v48 = vadd.f32 %v7888_v24, %v15808_v50  ;;  %v7226_v54 = vadd.f32 %v15821_v15, %v16522_v39  ;;  %v15975_v50 = vpop.f32.mrf.mxu0  ;;  %v16523_v15 = vld [vmem:[#allocation43_spill] sm:$0xff] }
 0x503   : > { %v8299_v10 = vmul.f32 %v15902_v1, %v8260_v42  ;;  %v11235_v35 = vpop.f32.mrf.mxu1  ;;  %v8369_v58 = vmax.f32 %v8337_v4, 0.0  ;;  %v7224_v24 = vadd.f32 %v15826_v3, %v16523_v15 }
 0x504   : > { %v8372_v28 = vmax.f32 %v8340_v57, 0.0  ;;  %v8304_v5 = vmul.f32 %v15902_v1, %v8265_v9  ;;  %v8263_v61 = vadd.f32 %v15847_v40, %v7991_v48  ;;  %v7994_v53 = vadd.f32 %v11235_v35, %v7722_v8  ;;  %v15986_v4 = vpop.f32.mrf.mxu0 }
 0x505   : > { %v8338_v7 = vadd.f32 %v15913_v62, %v8299_v10  ;;  %v7891_v37 = vpop.f32.mrf.mxu1 }
 0x506   : > { %v9571_v34 = vpack.c.bf16 %v8372_v28, %v8371_v59  ;;  %v8266_v16 = vadd.f32 %v15860_v30, %v7994_v53  ;;  %v8343_v46 = vadd.f32 %v15913_v62, %v8304_v5  ;;  %v8302_v40 = vmul.f32 %v15902_v1, %v8263_v61  ;;  %v16524_v59 = vld [vmem:[#allocation4_spill] sm:$0xff] }
 0x507   : > { %v8370_v22 = vmax.f32 %v8338_v7, 0.0  ;;  %v7992_v6 = vadd.f32 %v7891_v37, %v7720_v25  ;;  %v11238_v13 = vpop.f32.mrf.mxu1  ;;  %v7726_v10 = vadd.f32 %v16524_v59, %v7226_v54  ;;  %v16525_v7 = vld [vmem:[#allocation11_spill] sm:$0xff]  ;;  %v16001_v37 = vpop.f32.mrf.mxu0 }
 0x508   : > { %9635 = vst [vmem:[%s15945_s9 + $0x18] sm:$0xff] %v9571_v34   ;;  %v8305_v60 = vmul.f32 %v15902_v1, %v8266_v16  ;;  %v7997_v42 = vadd.f32 %v11238_v13, %v15819_v18  ;;  %v8375_v35 = vmax.f32 %v8343_v46, 0.0  ;;  %v8341_v18 = vadd.f32 %v15913_v62, %v8302_v40 }
 0x509   : > { %v9566_v31 = vpack.c.bf16 %v8370_v22, %v8369_v58  ;;  %v8264_v8 = vadd.f32 %v15863_v63, %v7992_v6  ;;  %v7904_v30 = vpop.f32.mrf.mxu1  ;;  %v7724_v26 = vadd.f32 %v16525_v7, %v7224_v24  ;;  %v7228_v40 = vadd.f32 %v15842_v52, %v15696_v41  ;;  %v16013_v15 = vpop.f32.mrf.mxu0 }
 0x50a   : > { %v8344_v57 = vadd.f32 %v15913_v62, %v8305_v60  ;;  %v8269_v9 = vadd.f32 %v15876_v51, %v7997_v42  ;;  %v7995_v48 = vadd.f32 %v7904_v30, %v15824_v43  ;;  %v7230_v51 = vadd.f32 %v15837_v11, %v15690_v32 }
 0x50b   : > { %9634 = vst [vmem:[%s15945_s9 + $0x10] sm:$0xff] %v9566_v31   ;;  %v8303_v3 = vmul.f32 %v15902_v1, %v8264_v8  ;;  %v11239_v28 = vpop.f32.mrf.mxu1  ;;  %v8373_v34 = vmax.f32 %v8341_v18, 0.0 }
 0x50c   : > { %v8376_v5 = vmax.f32 %v8344_v57, 0.0  ;;  %v8308_v63 = vmul.f32 %v15902_v1, %v8269_v9  ;;  %v8267_v61 = vadd.f32 %v15879_v55, %v7995_v48  ;;  %v7998_v53 = vadd.f32 %v11239_v28, %v7726_v10 }
 0x50d   : > { %v8342_v43 = vadd.f32 %v15913_v62, %v8303_v3  ;;  %v7907_v25 = vpop.f32.mrf.mxu1  ;;  %v7728_v10 = vadd.f32 %v15692_v36, %v7228_v40 }
 0x50e   : > { %v9581_v39 = vpack.c.bf16 %v8376_v5, %v8375_v35  ;;  %v8306_v54 = vmul.f32 %v15902_v1, %v8267_v61  ;;  %v8270_v58 = vadd.f32 %v15894_v56, %v7998_v53  ;;  %v8347_v55 = vadd.f32 %v15913_v62, %v8308_v63  ;;  %v16526_v56 = vld [vmem:[#allocation17_spill] sm:$0xff] }
 0x50f   : > { %v8374_v16 = vmax.f32 %v8342_v43, 0.0  ;;  %v7996_v22 = vadd.f32 %v7907_v25, %v7724_v26  ;;  %v11242_v46 = vpop.f32.mrf.mxu1  ;;  %v7730_v42 = vadd.f32 %v16526_v56, %v7230_v51 }
 0x510   : > { %9637 = vst [vmem:[%s15945_s9 + $0x28] sm:$0xff] %v9581_v39   ;;  %v8309_v32 = vmul.f32 %v15902_v1, %v8270_v58  ;;  %v8001_v11 = vadd.f32 %v11242_v46, %v15835_v0  ;;  %v8345_v24 = vadd.f32 %v15913_v62, %v8306_v54  ;;  %v8379_v0 = vmax.f32 %v8347_v55, 0.0 }
 0x511   : > { %v9576_v6 = vpack.c.bf16 %v8374_v16, %v8373_v34  ;;  %v8268_v13 = vadd.f32 %v15904_v17, %v7996_v22  ;;  %v7920_v60 = vpop.f32.mrf.mxu1  ;;  %v16527_v22 = vld [vmem:[#allocation6_spill] sm:$0xff] }
 0x512   : > { %v8348_v31 = vadd.f32 %v15913_v62, %v8309_v32  ;;  %v8273_v8 = vadd.f32 %v15919_v27, %v8001_v11  ;;  %v7999_v30 = vadd.f32 %v7920_v60, %v15840_v49  ;;  %v7234_v49 = vadd.f32 %v15853_v12, %v15713_v29  ;;  %v11298_v27 = vpop.f32.mrf.mxu0 }
 0x513   : > { %9636 = vst [vmem:[%s15945_s9 + $0x20] sm:$0xff] %v9576_v6   ;;  %v8307_v41 = vmul.f32 %v15902_v1, %v8268_v13  ;;  %v11243_v52 = vpop.f32.mrf.mxu1  ;;  %v8377_v18 = vmax.f32 %v8345_v24, 0.0  ;;  %v7232_v29 = vadd.f32 %v15858_v14, %v15719_v38 }
 0x514   : > { %v8380_v57 = vmax.f32 %v8348_v31, 0.0  ;;  %v8312_v17 = vmul.f32 %v15902_v1, %v8273_v8  ;;  %v8271_v9 = vadd.f32 %v15930_v21, %v7999_v30  ;;  %v8002_v48 = vadd.f32 %v11243_v52, %v7730_v42  ;;  %v8224_v7 = vpop.f32.mrf.mxu0  ;;  %v16529_v8 = vld [vmem:[#allocation3_spill] sm:$0xff] }
 0x515   : > { %v8346_v59 = vadd.f32 %v15913_v62, %v8307_v41  ;;  %v7923_v35 = vpop.f32.mrf.mxu1  ;;  %v7734_v54 = vadd.f32 %v15709_v2, %v7234_v49  ;;  %v16528_v2 = vld [vmem:[#allocation38_spill] sm:$0xff]  ;;  %v7236_v30 = vadd.f32 %v15874_v47, %v16529_v8  ;;  %v16540_v8 = vld [vmem:[#allocation47_spill] sm:$0xff] }
 0x516   : > { %v9591_v3 = vpack.c.bf16 %v8380_v57, %v8379_v0  ;;  %v8274_v28 = vadd.f32 %v15949_v23, %v8002_v48  ;;  %v8351_v63 = vadd.f32 %v15913_v62, %v8312_v17  ;;  %v8310_v21 = vmul.f32 %v15902_v1, %v8271_v9  ;;  %v11299_v11 = vpop.f32.mrf.mxu0 }
 0x517   : > { %v8378_v5 = vmax.f32 %v8346_v59, 0.0  ;;  %v8000_v61 = vadd.f32 %v7923_v35, %v7728_v10  ;;  %v11246_v53 = vpop.f32.mrf.mxu1  ;;  %v7732_v46 = vadd.f32 %v16528_v2, %v7232_v29  ;;  %v16531_v10 = vld [vmem:[#allocation23_spill] sm:$0xff]  ;;  %v16538_v2 = vld [vmem:[#allocation49_spill] sm:$0xff] }
 0x518   : > { %9639 = vst [vmem:[%s15945_s9 + $0x38] sm:$0xff] %v9591_v3   ;;  %v8313_v36 = vmul.f32 %v15902_v1, %v8274_v28  ;;  %v8005_v51 = vadd.f32 %v11246_v53, %v15851_v20  ;;  %v8383_v58 = vmax.f32 %v8351_v63, 0.0  ;;  %v8349_v20 = vadd.f32 %v15913_v62, %v8310_v21  ;;  %v8227_v17 = vpop.f32.mrf.mxu0  ;;  %v16532_v21 = vld [vmem:[#allocation39_spill] sm:$0xff] }
 0x519   : > { %v9586_v12 = vpack.c.bf16 %v8378_v5, %v8377_v18  ;;  %v8272_v43 = vadd.f32 %v15961_v44, %v8000_v61  ;;  %v7936_v23 = vpop.f32.mrf.mxu1  ;;  %v7736_v61 = vadd.f32 %v16532_v21, %v7236_v30 }
 0x51a   : > { %v8352_v26 = vadd.f32 %v15913_v62, %v8313_v36  ;;  %v8277_v25 = vadd.f32 %v15975_v50, %v8005_v51  ;;  %v8003_v39 = vadd.f32 %v7936_v23, %v15856_v45  ;;  %v7238_v50 = vadd.f32 %v15869_v19, %v16527_v22  ;;  %v11302_v5 = vpop.f32.mrf.mxu0  ;;  %v16534_v36 = vld [vmem:[#allocation24_spill] sm:$0xff] }
 0x51b   : > { %9638 = vst [vmem:[%s15945_s9 + $0x30] sm:$0xff] %v9586_v12   ;;  %v8311_v34 = vmul.f32 %v15902_v1, %v8272_v43  ;;  %v11247_v38 = vpop.f32.mrf.mxu1  ;;  %v8381_v60 = vmax.f32 %v8349_v20, 0.0  ;;  %v16535_v20 = vld [vmem:[#allocation42_spill] sm:$0xff] }
 0x51c   : > { %v8384_v14 = vmax.f32 %v8352_v26, 0.0  ;;  %v8316_v44 = vmul.f32 %v15902_v1, %v8277_v25  ;;  %v8275_v16 = vadd.f32 %v15986_v4, %v8003_v39  ;;  %v8006_v55 = vadd.f32 %v11247_v38, %v7734_v54  ;;  %v16536_v38 = vld [vmem:[#allocation7_spill] sm:$0xff] }
 0x51d   : > { %v8350_v45 = vadd.f32 %v15913_v62, %v8311_v34  ;;  %v7939_v32 = vpop.f32.mrf.mxu1 }
 0x51e   : > { %v9601_v40 = vpack.c.bf16 %v8384_v14, %v8383_v58  ;;  %v8314_v6 = vmul.f32 %v15902_v1, %v8275_v16  ;;  %v8278_v13 = vadd.f32 %v16001_v37, %v8006_v55  ;;  %v8355_v42 = vadd.f32 %v15913_v62, %v8316_v44  ;;  %v16530_v37 = vld [vmem:[#allocation5_spill] sm:$0xff]  ;;  %v8240_v58 = vpop.f32.mrf.mxu0  ;;  %v16537_v14 = vld [vmem:[#allocation8_spill] sm:$0xff] }
 0x51f   : > { %v8382_v56 = vmax.f32 %v8350_v45, 0.0  ;;  %v8004_v4 = vadd.f32 %v7939_v32, %v7732_v46  ;;  %v11250_v24 = vpop.f32.mrf.mxu1  ;;  %v7738_v57 = vadd.f32 %v16530_v37, %v7238_v50  ;;  %v7240_v44 = vadd.f32 %v16537_v14, %v16536_v38  ;;  %v16539_v32 = vld [vmem:[#allocation21_spill] sm:$0xff] }
 0x520   : > { %9641 = vst [vmem:[%s15945_s9 + $0x48] sm:$0xff] %v9601_v40   ;;  %v8317_v19 = vmul.f32 %v15902_v1, %v8278_v13  ;;  %v8009_v31 = vadd.f32 %v11250_v24, %v15867_v33  ;;  %v8353_v9 = vadd.f32 %v15913_v62, %v8314_v6  ;;  %v8387_v49 = vmax.f32 %v8355_v42, 0.0 }
 0x521   : > { %v9596_v0 = vpack.c.bf16 %v8382_v56, %v8381_v60  ;;  %v8276_v41 = vadd.f32 %v16013_v15, %v8004_v4  ;;  %v7952_v52 = vpop.f32.mrf.mxu1  ;;  %v11303_v4 = vpop.f32.mrf.mxu0  ;;  %v7740_v30 = vadd.f32 %v16540_v8, %v7240_v44 }
 0x522   : > { %v8356_v48 = vadd.f32 %v15913_v62, %v8317_v19  ;;  %v8281_v59 = vadd.f32 %v11298_v27, %v8009_v31  ;;  %v8007_v35 = vadd.f32 %v7952_v52, %v16531_v10  ;;  %v16533_v27 = vld [vmem:[#allocation40_spill] sm:$0xff]  ;;  %v8385_v29 = vmax.f32 %v8353_v9, 0.0 }
 0x523   : > { %9640 = vst [vmem:[%s15945_s9 + $0x40] sm:$0xff] %v9596_v0   ;;  %v8315_v33 = vmul.f32 %v15902_v1, %v8276_v41  ;;  %v11251_v18 = vpop.f32.mrf.mxu1  ;;  %v7242_v51 = vadd.f32 %v16534_v36, %v16533_v27 }
 0x524   : > { %v8388_v47 = vmax.f32 %v8356_v48, 0.0  ;;  %v8320_v3 = vmul.f32 %v15902_v1, %v8281_v59  ;;  %v8279_v15 = vadd.f32 %v8224_v7, %v8007_v35  ;;  %v8010_v28 = vadd.f32 %v11251_v18, %v7738_v57  ;;  %v8243_v59 = vpop.f32.mrf.mxu0 }
 0x525   : > { %v8354_v63 = vadd.f32 %v15913_v62, %v8315_v33  ;;  %v7955_v53 = vpop.f32.mrf.mxu1 }
 0x526   : > { %v9611_v12 = vpack.c.bf16 %v8388_v47, %v8387_v49  ;;  %v8282_v43 = vadd.f32 %v11299_v11, %v8010_v28  ;;  %v8359_v26 = vadd.f32 %v15913_v62, %v8320_v3  ;;  %v8318_v25 = vmul.f32 %v15902_v1, %v8279_v15 }
 0x527   : > { %v8386_v23 = vmax.f32 %v8354_v63, 0.0  ;;  %v8008_v7 = vadd.f32 %v7955_v53, %v7736_v61  ;;  %v11254_v39 = vpop.f32.mrf.mxu1  ;;  %v7742_v11 = vadd.f32 %v16539_v32, %v7242_v51 }
 0x528   : > { %9643 = vst [vmem:[%s15945_s9 + $0x58] sm:$0xff] %v9611_v12   ;;  %v8321_v54 = vmul.f32 %v15902_v1, %v8282_v43  ;;  %v8013_v34 = vadd.f32 %v11254_v39, %v16535_v20  ;;  %v8391_v40 = vmax.f32 %v8359_v26, 0.0  ;;  %v8357_v6 = vadd.f32 %v15913_v62, %v8318_v25 }
 0x529   : > { %v9606_v16 = vpack.c.bf16 %v8386_v23, %v8385_v29  ;;  %v8280_v55 = vadd.f32 %v8227_v17, %v8008_v7  ;;  %v7968_v22 = vpop.f32.mrf.mxu1 }
 0x52a   : > { %v8360_v50 = vadd.f32 %v15913_v62, %v8321_v54  ;;  %v8285_v45 = vadd.f32 %v11302_v5, %v8013_v34  ;;  %v8011_v46 = vadd.f32 %v7968_v22, %v16538_v2  ;;  %v8389_v37 = vmax.f32 %v8357_v6, 0.0 }
 0x52b   : > { %9642 = vst [vmem:[%s15945_s9 + $0x50] sm:$0xff] %v9606_v16   ;;  %v8319_v13 = vmul.f32 %v15902_v1, %v8280_v55  ;;  %v11255_v60 = vpop.f32.mrf.mxu1 }
 0x52c   : > { %v8392_v56 = vmax.f32 %v8360_v50, 0.0  ;;  %v8324_v42 = vmul.f32 %v15902_v1, %v8285_v45  ;;  %v8283_v24 = vadd.f32 %v8240_v58, %v8011_v46  ;;  %v8014_v19 = vadd.f32 %v11255_v60, %v7742_v11 }
 0x52d   : > { %v8358_v31 = vadd.f32 %v15913_v62, %v8319_v13  ;;  %v7971_v0 = vpop.f32.mrf.mxu1 }
 0x52e   : > { %v9621_v41 = vpack.c.bf16 %v8392_v56, %v8391_v40  ;;  %v8286_v52 = vadd.f32 %v11303_v4, %v8014_v19  ;;  %v8322_v17 = vmul.f32 %v15902_v1, %v8283_v24  ;;  %v8012_v9 = vadd.f32 %v7971_v0, %v7740_v30 }
 0x52f   : > { %v8390_v57 = vmax.f32 %v8358_v31, 0.0  ;;  %v8363_v48 = vadd.f32 %v15913_v62, %v8324_v42 }
 0x530   : > { %9645 = vst [vmem:[%s15945_s9 + $0x68] sm:$0xff] %v9621_v41   ;;  %v8325_v10 = vmul.f32 %v15902_v1, %v8286_v52  ;;  %v8284_v49 = vadd.f32 %v8243_v59, %v8012_v9  ;;  %v8361_v18 = vadd.f32 %v15913_v62, %v8322_v17 }
 0x531   : > { %v9616_v35 = vpack.c.bf16 %v8390_v57, %v8389_v37  ;;  %v8395_v3 = vmax.f32 %v8363_v48, 0.0 }
 0x532   : > { %v8364_v33 = vadd.f32 %v15913_v62, %v8325_v10  ;;  %v8323_v47 = vmul.f32 %v15902_v1, %v8284_v49  ;;  %v8393_v63 = vmax.f32 %v8361_v18, 0.0 }
 0x533   : > { %9644 = vst [vmem:[%s15945_s9 + $0x60] sm:$0xff] %v9616_v35  }
 0x534   : > { %v8396_v15 = vmax.f32 %v8364_v33, 0.0  ;;  %v8362_v28 = vadd.f32 %v15913_v62, %v8323_v47 }
 0x536   : > { %v9631_v5 = vpack.c.bf16 %v8396_v15, %v8395_v3  ;;  %v8394_v21 = vmax.f32 %v8362_v28, 0.0 }
 0x538   : > { %9647 = vst [vmem:[%s15945_s9 + $0x78] sm:$0xff] %v9631_v5   ;;  %v9626_v61 = vpack.c.bf16 %v8394_v21, %v8393_v63 }
 0x53a   : > { %9646 = vst [vmem:[%s15945_s9 + $0x70] sm:$0xff] %v9626_v61  }
 0x53b PF: > { %s17_s24 = sadd.s32 1, %s11679_s24  }
 0x53c   : > { %p14_p4 = scmp.ge.s32.totalorder %s17_s24, 4  }
 0x53e   :  { %16 = sbr.rel (!%p14_p4) target bundleno = 1 (0x1), region = 96 }

</bundles_post_ra>
